<compile_context>
chip_gen: v6e
topology: v6e:2x2x1
jax: 0.10.0
libtpu: 0.0.40
codegen_flags: <defaults>
</compile_context>

<pallas_src>
import jax
import jax.numpy as jnp
from jax.experimental import pallas as pl
from jax.experimental.pallas import tpu as pltpu

EPS = 1e-5


def bn_relu_conv1x1_kernel(x_ref, gamma_ref, beta_ref, w_ref, o_ref, xn_ref):
    # x_ref:     (Cin, M)  f32   activations, channels on sublanes, spatial on lanes
    # gamma_ref: (Cin, 1)  f32   BN scale
    # beta_ref:  (Cin, 1)  f32   BN shift
    # w_ref:     (TC, Cin) bf16  weight tile for this Cout grid step
    # o_ref:     (TC, M)   f32   output tile
    # xn_ref:    (Cin, M)  bf16  scratch: BN + ReLU normalized activations

    @pl.when(pl.program_id(0) == 0)
    def _():
        x = x_ref[...]
        m = x.shape[1]
        inv_m = 1.0 / m
        # Single sweep: sum and sum-of-squares (biased variance, training mode).
        mean = jnp.sum(x, axis=1, keepdims=True) * inv_m          # (Cin, 1)
        ex2 = jnp.sum(x * x, axis=1, keepdims=True) * inv_m       # (Cin, 1)
        var = ex2 - mean * mean
        inv_std = jax.lax.rsqrt(var + EPS)
        # Fold BN into a single per-channel FMA: xn = x*scale + shift
        scale = gamma_ref[...] * inv_std                          # (Cin, 1)
        shift = beta_ref[...] - mean * scale                      # (Cin, 1)
        xn = jnp.maximum(x * scale + shift, 0.0)                  # ReLU
        xn_ref[...] = xn.astype(jnp.bfloat16)

    # 1x1 conv tile on the MXU: (TC, Cin) @ (Cin, M) -> (TC, M), f32 accumulate.
    o_ref[...] = jnp.dot(w_ref[...], xn_ref[...],
                         preferred_element_type=jnp.float32)


def bn_relu_conv1x1(x_nchw, gamma, beta, w_oc_ic, *, tile_cout=256):
    """x_nchw: (N, Cin, H, W); gamma/beta: (Cin,); w_oc_ic: (Cout, Cin) (1x1 kernel squeezed)."""
    n, cin, h, wdim = x_nchw.shape
    cout = w_oc_ic.shape[0]
    m = n * h * wdim

    # NCHW -> (Cin, M): pure reshape when N == 1 (no HBM transpose round trip).
    if n == 1:
        x2d = x_nchw.reshape(cin, m)
    else:
        x2d = jnp.transpose(x_nchw, (1, 0, 2, 3)).reshape(cin, m)

    gamma2d = gamma.reshape(cin, 1)
    beta2d = beta.reshape(cin, 1)
    w_bf16 = w_oc_ic.astype(jnp.bfloat16)        # bf16 into the MXU, f32 accumulation

    assert cout % tile_cout == 0
    grid = (cout // tile_cout,)

    out2d = pl.pallas_call(
        bn_relu_conv1x1_kernel,
        out_shape=jax.ShapeDtypeStruct((cout, m), jnp.float32),
        grid_spec=pltpu.PrefetchScalarGridSpec(
            num_scalar_prefetch=0,
            grid=grid,
            in_specs=[
                pl.BlockSpec((cin, m), lambda i: (0, 0)),        # X: DMA'd once (block idx constant)
                pl.BlockSpec((cin, 1), lambda i: (0, 0)),        # gamma
                pl.BlockSpec((cin, 1), lambda i: (0, 0)),        # beta
                pl.BlockSpec((tile_cout, cin), lambda i: (i, 0)),  # W tile (double-buffered)
            ],
            out_specs=pl.BlockSpec((tile_cout, m), lambda i: (i, 0)),
            scratch_shapes=[pltpu.VMEM((cin, m), jnp.bfloat16)],   # normalized-X, reused per tile
        ),
        compiler_params=pltpu.CompilerParams(
            # "arbitrary": the normalized-X scratch is written at step 0 and
            # carried across the Cout axis, so the axis must run sequentially.
            dimension_semantics=("arbitrary",),
            vmem_limit_bytes=32 * 1024 * 1024,
        ),
    )(x2d, gamma2d, beta2d, w_bf16)

    # (Cout, M) -> NCHW: pure reshape when N == 1.
    if n == 1:
        return out2d.reshape(1, cout, h, wdim)
    return jnp.transpose(out2d.reshape(cout, n, h, wdim), (1, 0, 2, 3))


def _reference(x_nchw, gamma, beta, w_oc_ic):
    # Pure-JAX f32 reference mirroring torch training-mode BN + ReLU + 1x1 conv.
    mean = jnp.mean(x_nchw, axis=(0, 2, 3), keepdims=True)
    var = jnp.mean((x_nchw - mean) ** 2, axis=(0, 2, 3), keepdims=True)
    xn = (x_nchw - mean) / jnp.sqrt(var + EPS)
    xn = xn * gamma.reshape(1, -1, 1, 1) + beta.reshape(1, -1, 1, 1)
    xr = jnp.maximum(xn, 0.0)
    return jnp.einsum("nchw,oc->nohw", xr, w_oc_ic)


if __name__ == "__main__":
    key = jax.random.PRNGKey(0)
    k_x, k_g, k_b, k_w = jax.random.split(key, 4)

    # Module-implied shapes: input (1, 256, 28, 28), conv 256 -> 1024, 1x1, no bias.
    N, CIN, H, W = 1, 256, 28, 28
    COUT = 1024

    x = jax.random.normal(k_x, (N, CIN, H, W), dtype=jnp.float32)
    gamma = 1.0 + 0.1 * jax.random.normal(k_g, (CIN,), dtype=jnp.float32)
    beta = 0.1 * jax.random.normal(k_b, (CIN,), dtype=jnp.float32)
    w = 0.05 * jax.random.normal(k_w, (COUT, CIN), dtype=jnp.float32)  # (Cout, Cin, 1, 1) squeezed

    out = bn_relu_conv1x1(x, gamma, beta, w)
    jax.block_until_ready(out)

    assert out.shape == (N, COUT, H, W), out.shape

    ref = _reference(x, gamma, beta, w)
    err = jnp.max(jnp.abs(out - ref))
    # bf16 MXU inputs with f32 accumulation over K=256: expect ~1e-3..1e-2 max
    # abs error vs the pure-f32 reference (output magnitudes ~O(1)).
    assert err < 2e-2, f"max abs error {err}"

    # TODO(synk): running_mean / running_var (momentum=0.1) buffer updates of
    # BatchNorm2d are not computed; only the training-mode forward output is.
    print("KERNEL_OK")
</pallas_src>

<mosaic_0001>
module attributes {stable_mosaic.version = 11 : i64} {
  func.func @bn_relu_conv1x1_kernel(%arg0: i32, %arg1: memref<256x784xf32, #tpu.memory_space<vmem>>, %arg2: memref<256x1xf32, #tpu.memory_space<vmem>>, %arg3: memref<256x1xf32, #tpu.memory_space<vmem>>, %arg4: memref<256x256xbf16, #tpu.memory_space<vmem>>, %arg5: memref<256x784xf32, #tpu.memory_space<vmem>>, %arg6: memref<256x784xbf16, #tpu.memory_space<vmem>>) attributes {dimension_semantics = [#tpu.dimension_semantics<arbitrary>], iteration_bounds = array<i64: 4>, scalar_prefetch = 0 : i64, scratch_operands = 1 : i64, tpu.core_type = #tpu.core_type<tc>, window_params = [{pipeline_mode = #tpu.pipeline_mode<synchronous>, transform_indices = @transform_0, window_bounds = array<i64: 256, 784>}, {pipeline_mode = #tpu.pipeline_mode<synchronous>, transform_indices = @transform_1, window_bounds = array<i64: 256, 1>}, {pipeline_mode = #tpu.pipeline_mode<synchronous>, transform_indices = @transform_2, window_bounds = array<i64: 256, 1>}, {transform_indices = @transform_3, window_bounds = array<i64: 256, 256>}, {transform_indices = @transform_4, window_bounds = array<i64: 256, 784>}]} {
    %c0_i32 = arith.constant 0 : i32
    %0 = arith.cmpi eq, %arg0, %c0_i32 : i32
    %1 = arith.extui %0 : i1 to i32
    %c0_i32_0 = arith.constant 0 : i32
    %2 = arith.cmpi ne, %1, %c0_i32_0 : i32
    scf.if %2 {
      %c0_6 = arith.constant 0 : index
      %c0_7 = arith.constant 0 : index
      %7 = vector.load %arg1[%c0_6, %c0_7] : memref<256x784xf32, #tpu.memory_space<vmem>>, vector<256x784xf32>
      %cst_8 = arith.constant dense<0.000000e+00> : vector<256xf32>
      %8 = vector.multi_reduction <add>, %7, %cst_8 [1] : vector<256x784xf32> to vector<256xf32>
      %9 = vector.shape_cast %8 : vector<256xf32> to vector<256x1xf32>
      %cst_9 = arith.constant 0.00127551018 : f32
      %10 = vector.broadcast %cst_9 : f32 to vector<256x1xf32>
      %11 = arith.mulf %9, %10 : vector<256x1xf32>
      %12 = arith.mulf %7, %7 : vector<256x784xf32>
      %cst_10 = arith.constant dense<0.000000e+00> : vector<256xf32>
      %13 = vector.multi_reduction <add>, %12, %cst_10 [1] : vector<256x784xf32> to vector<256xf32>
      %14 = vector.shape_cast %13 : vector<256xf32> to vector<256x1xf32>
      %cst_11 = arith.constant 0.00127551018 : f32
      %15 = vector.broadcast %cst_11 : f32 to vector<256x1xf32>
      %16 = arith.mulf %14, %15 : vector<256x1xf32>
      %17 = arith.mulf %11, %11 : vector<256x1xf32>
      %18 = arith.subf %16, %17 : vector<256x1xf32>
      %cst_12 = arith.constant 9.99999974E-6 : f32
      %19 = vector.broadcast %cst_12 : f32 to vector<256x1xf32>
      %20 = arith.addf %18, %19 : vector<256x1xf32>
      %21 = math.rsqrt %20 : vector<256x1xf32>
      %c0_13 = arith.constant 0 : index
      %c0_14 = arith.constant 0 : index
      %22 = vector.load %arg2[%c0_13, %c0_14] : memref<256x1xf32, #tpu.memory_space<vmem>>, vector<256x1xf32>
      %23 = arith.mulf %22, %21 : vector<256x1xf32>
      %c0_15 = arith.constant 0 : index
      %c0_16 = arith.constant 0 : index
      %24 = vector.load %arg3[%c0_15, %c0_16] : memref<256x1xf32, #tpu.memory_space<vmem>>, vector<256x1xf32>
      %25 = arith.mulf %11, %23 : vector<256x1xf32>
      %26 = arith.subf %24, %25 : vector<256x1xf32>
      %27 = vector.broadcast %23 : vector<256x1xf32> to vector<256x784xf32>
      %28 = arith.mulf %7, %27 : vector<256x784xf32>
      %29 = vector.broadcast %26 : vector<256x1xf32> to vector<256x784xf32>
      %30 = arith.addf %28, %29 : vector<256x784xf32>
      %cst_17 = arith.constant 0.000000e+00 : f32
      %31 = vector.broadcast %cst_17 : f32 to vector<256x784xf32>
      %32 = arith.maximumf %30, %31 : vector<256x784xf32>
      %33 = arith.truncf %32 : vector<256x784xf32> to vector<256x784xbf16>
      %c0_18 = arith.constant 0 : index
      %c0_19 = arith.constant 0 : index
      %34 = vector.load %arg6[%c0_18, %c0_19] : memref<256x784xbf16, #tpu.memory_space<vmem>>, vector<256x784xbf16>
      tpu.vector_store %arg6[%c0_18, %c0_19], %33 {strides = array<i32>} : memref<256x784xbf16, #tpu.memory_space<vmem>>, vector<256x784xbf16>,
    } else {
    }
    %c0 = arith.constant 0 : index
    %c0_1 = arith.constant 0 : index
    %3 = vector.load %arg4[%c0, %c0_1] : memref<256x256xbf16, #tpu.memory_space<vmem>>, vector<256x256xbf16>
    %c0_2 = arith.constant 0 : index
    %c0_3 = arith.constant 0 : index
    %4 = vector.load %arg6[%c0_2, %c0_3] : memref<256x784xbf16, #tpu.memory_space<vmem>>, vector<256x784xbf16>
    %cst = arith.constant dense<0.000000e+00> : vector<256x784xf32>
    %5 = tpu.matmul %3, %4, %cst {dimension_numbers = #tpu.dot_dimension_numbers<[1], [0], [0], [1], [0, 0, 1, 1], [], []>} : vector<256x256xbf16>, vector<256x784xbf16>, vector<256x784xf32> -> vector<256x784xf32>
    %c0_4 = arith.constant 0 : index
    %c0_5 = arith.constant 0 : index
    %6 = vector.load %arg5[%c0_4, %c0_5] : memref<256x784xf32, #tpu.memory_space<vmem>>, vector<256x784xf32>
    tpu.vector_store %arg5[%c0_4, %c0_5], %5 {strides = array<i32>} : memref<256x784xf32, #tpu.memory_space<vmem>>, vector<256x784xf32>,
    return
  }
  func.func @transform_0(%arg0: i32) -> (i32, i32) {
    %c0_i32 = arith.constant 0 : i32
    %c0_i32_0 = arith.constant 0 : i32
    %c0_i32_1 = arith.constant 0 : i32
    return %c0_i32, %c0_i32_0 : i32, i32
  }
  func.func @transform_1(%arg0: i32) -> (i32, i32) {
    %c0_i32 = arith.constant 0 : i32
    %c0_i32_0 = arith.constant 0 : i32
    %c0_i32_1 = arith.constant 0 : i32
    return %c0_i32, %c0_i32_0 : i32, i32
  }
  func.func @transform_2(%arg0: i32) -> (i32, i32) {
    %c0_i32 = arith.constant 0 : i32
    %c0_i32_0 = arith.constant 0 : i32
    %c0_i32_1 = arith.constant 0 : i32
    return %c0_i32, %c0_i32_0 : i32, i32
  }
  func.func @transform_3(%arg0: i32) -> (i32, i32) {
    %c0_i32 = arith.constant 0 : i32
    %c0_i32_0 = arith.constant 0 : i32
    return %arg0, %c0_i32 : i32, i32
  }
  func.func @transform_4(%arg0: i32) -> (i32, i32) {
    %c0_i32 = arith.constant 0 : i32
    %c0_i32_0 = arith.constant 0 : i32
    return %arg0, %c0_i32 : i32, i32
  }
}

</mosaic_0001>

<bundles_post_ra>
// kernel: tpu_custom_call.1
= control target key start
LH: loop header
LB: loop body
LE: loop exit
PB: predicated region body
PF: predicated region fallthrough
CT: control target
= control target key end

     0   :  { %9 = vsyncpa [#allocation4], 0  ;;  %s11102_s0 = inlined_call_operand.vmem [shape: f32[256,784], index: 0, kind: input, shape index: {}]   ;;  %s11103_s1 = inlined_call_operand.vmem [shape: f32[256,1], index: 1, kind: input, shape index: {}]   ;;  %s11104_s2 = inlined_call_operand.vmem [shape: f32[256,1], index: 2, kind: input, shape index: {}]   ;;  %s11105_s3 = inlined_call_operand.hbm [shape: bf16[1024,256], index: 3, kind: input, shape index: {}]   ;;  %s11106_s4 = inlined_call_operand.vmem [shape: f32[1024,784], index: 4, kind: output, shape index: {}]  }
   0x1   :  { %11 = vsyncpa [#allocation4 + $0x1], 0  ;;  %s6523_s15 = smov 0   ;;  %s6525_s16 = smov 0  }
   0x2   :  { %s6527_s17 = smov 0   ;;  %s6529_s18 = smov 0  }
   0x3 LB: > { %s6542_s19 = sadd.s32 4294967295, %s6492_s18   ;;  %s6545_s20 = sadd.s32 1, %s6492_s18   ;;  %s6492_s18 = sphi %s6529_s18, %s11907_s18   ;;  %s6488_s17 = sphi %s6527_s17, %s11906_s17   ;;  %s6484_s16 = sphi %s6525_s16, %s11905_s16   ;;  %s6480_s15 = sphi %s6523_s15, %s11904_s15  }
   0x4   : > { %s84_s21 = ssub.s32 %s6492_s18, %s6545_s20  ;;  %s87_s22 = sadd.s32 1, %s6488_s17 }
   0x5   : > { %p85_p0 = scmp.eq.s32.totalorder %s84_s21, 0  ;;  %p94_p1 = scmp.ne.s32.totalorder %s6488_s17, %s6484_s16 }
   0x6   : > { %p95_p2 = scmp.eq.s32.totalorder %s6492_s18, 0  ;;  %p100_p3 = scmp.ne.s32.totalorder %s6484_s16, %s6480_s15 }
   0x7   : > { %s6555_s23 = scalar_select %p85_p0, %s6488_s17, %s87_s22  }
   0x8   : > { %p96_p4 = por %p95_p2, %p94_p1  ;;  %p101_p5 = scmp.eq.s32.totalorder %s6542_s19, 0 }
   0x9   : > { %p5896_p6 = scmp.lt.s32.totalorder %s6492_s18, 4  ;;  %s159_s25 = sand.u32 1, %s6488_s17  }
   0xa   : > { %p6559_p7 = por %p101_p5, %p100_p3  ;;  %s5364_s26 = sshll.u32 %s159_s25, 8 }
   0xb   : > { %s5648_s27 = sshll.u32 %s6492_s18, 12  ;;  %s163_s5 = scalar_lea.vmem [#allocation3], %s5364_s26 }
   0xc   : > { %s11260_s24 = scalar_select %p6559_p7, 1, 0 }
   0xd   : > { %s6568_s30 = scalar_lea.hbm %s11105_s3, %s5648_s27  ;;  %s171_s6 = sshll.u32 %s163_s5, 4  ;;  %s6570_s6 = int_to_ptr.vmem [resolvable:$true] %s171_s6 }
   0xe   : > { %p6572_p8 = pnand %p5896_p6, %p96_p4  ;;  %s6577_s8 = scalar_lea.sflag [#allocation4], %s159_s25 }
   0xf   : > { %s6430_s9 = scalar_lea.hbm %s6568_s30, 4096  ;;  %s6435_s12 = scalar_lea.hbm %s11105_s3, 16384 }
  0x10   : > { %p6431_p10 = scmp.ne.s32.totalorder %s6568_s30, %s6430_s9  ;;  %p6432_p11 = pneg %p6572_p8 }
  0x11   : > { %p6436_p0 = scmp.lt.s32.totalorder %s6568_s30, %s11105_s3  ;;  %p6437_p1 = scmp.lt.s32.totalorder %s6435_s12, %s6430_s9 }
  0x12   : > { %p6433_p12 = pnand %p6432_p11, %p6431_p10 }
  0x13   : > { %p6438_p2 = por %p6437_p1, %p6436_p0 }
  0x14   : > { %p6434_p13 = pneg %p6433_p12 }
  0x16   : > { %p6439_p3 = pnand %p6438_p2, %p6434_p13 }
  0x18   : > { %6442 = shalt.err (!%p6439_p3)
}
  0x19   : > { %s6443_s15 = scalar_lea.vmem %s6570_s6, 4096  ;;  %s6494_s21 = smov [#allocation3]  }
  0x1a   : > { %p6444_p4 = scmp.ne.s32.totalorder %s6570_s6, %s6443_s15  ;;  %s6448_s22 = sshll.u32 %s6494_s21, 4  ;;  %s6449_s22 = int_to_ptr.vmem [resolvable:$false] %s6448_s22 }
  0x1b   : > { %s6450_s25 = scalar_lea.vmem %s6449_s22, 8192  ;;  %p6451_p10 = scmp.lt.s32.totalorder %s6570_s6, %s6449_s22 }
  0x1c   : > { %p6446_p5 = pnand %p6444_p4, %p6432_p11  ;;  %p6452_p12 = scmp.lt.s32.totalorder %s6450_s25, %s6443_s15 }
  0x1e   : > { %p6447_p6 = pneg %p6446_p5  ;;  %p6453_p9 = por %p6452_p12, %p6451_p10 }
  0x20   : > { %p6454_p7 = pnand %p6453_p9, %p6447_p6 }
  0x22   : > { %6457 = shalt.err (!%p6454_p7)
}
  0x23   : > { %s6495_s26 = smov 128   ;;  %s6496_s27 = smov 8  }
  0x24   : > { %5895 = dma.hbm_to_vmem [thread:$0]  (!%p6572_p8), %s6568_s30, 4096, %s6570_s6, %s6577_s8, %s6495_s26, %s6495_s26, %s6496_s27  }
  0x25   : > { %p179_p11 = scmp.lt.s32.totalorder %s6492_s18, 5  ;;  %p11262_p13 = scmp.ge.s32.totalorder %s6492_s18, 1 }
  0x27   : > { %p180_p0 = pnand %p11262_p13, %p179_p11 }
  0x28   : > { %s185_s28 = sand.u32 (!%p180_p0), 1, %s6484_s16   ;;  %p11263_p7 = scmp.ne.s32.totalorder (!%p180_p0), %s11260_s24, 0 }
  0x29   : > { %183 = sbr.rel (%p180_p0) target bundleno = 1249 (0x4e1), region = 36  ;;  %s5369_s29 = sshll.u32 (!%p180_p0), %s185_s28, 8 }
  0x2a   : > { %s186_s5 = scalar_lea.sflag (!%p180_p0), [#allocation4], %s185_s28  ;;  %s6602_s9 = scalar_lea.vmem (!%p180_p0), [#allocation3], %s5369_s29 }
  0x2e   : > { %6475 = dma.done.wait (%p11263_p7), %s186_s5, 4096  }
  0x2f   : > { %6477 = vsyncadd (%p11263_p7), %s186_s5, 4294963200  ;;  %s5370_s10 = sshll.u32 %s6542_s19, 5  ;;  %p5372_p8 = scmp.ne.s32.totalorder %s6542_s19, 0 }
  0x30   : > { %p217_p9 = scmp.lt.s32.totalorder %s5370_s10, 127 }
  0x31   : > { %227 = sbr.rel (%p5372_p8) target bundleno = 734 (0x2de), region = 44 }
  0x32   : > { %s11909_s10 = smov (!%p217_p9, %s5370_s10), 127 }
  0x33   : > { %s5889_s30 = smul.u32 56, %s11909_s10 }
  0x35   : > { %s6612_s7 = scalar_lea.vmem %s11106_s4, %s5889_s30 }
  0x36   : > { %v242_v0 = vld [vmem:[%s11102_s0 + $0x70] sm:$0xff]  ;;  %v243_v1 = vld [vmem:[%s11102_s0 + $0x78] sm:$0xff]  ;;  %v244_v2 = vld [vmem:[%s11102_s0 + $0x80] sm:$0xff]  ;;  %vm457_vm0 = vcmask 130048   ;;  %vm3304_vm1 = vcmask 125952  }
  0x37   : > { %v245_v3 = vld [vmem:[%s11102_s0 + $0x88] sm:$0xff]  ;;  %v471_v4 = vadd.f32 %v243_v1, %v242_v0  ;;  %v6630_v5 = vld [vmem:[%s11102_s0 + $0xa0] sm:$0xff]  ;;  %v6638_v8 = vmul.f32 %v242_v0, %v242_v0  ;;  %v6640_v9 = vmul.f32 %v243_v1, %v243_v1  ;;  %v246_v10 = vld [vmem:[%s11102_s0 + $0x90] sm:$0xff]  ;;  %v6651_v15 = vmul.f32 %v244_v2, %v244_v2 }
  0x38   : > { %v228_v6 = vld [vmem:[%s11102_s0] sm:$0xff]  ;;  %v229_v7 = vld [vmem:[%s11102_s0 + $0x8] sm:$0xff]  ;;  %v247_v11 = vld [vmem:[%s11102_s0 + $0x98] sm:$0xff]  ;;  %v6653_v16 = vmul.f32 %v245_v3, %v245_v3  ;;  %v6664_v22 = vmul.f32 %v246_v10, %v246_v10  ;;  %v476_v25 = vsel %vm457_vm0, %v6630_v5, 0.0 }
  0x39   : > { %v472_v12 = vadd.f32 %v471_v4, %v244_v2  ;;  %v230_v13 = vld [vmem:[%s11102_s0 + $0x10] sm:$0xff]  ;;  %v452_v14 = vadd.f32 %v229_v7, %v228_v6  ;;  %v231_v17 = vld [vmem:[%s11102_s0 + $0x18] sm:$0xff]  ;;  %v249_v19 = vld [vmem:[%s11102_s0 + $0xa8] sm:$0xff]  ;;  %v773_v20 = vmul.f32 %v228_v6, %v228_v6  ;;  %v774_v21 = vmul.f32 %v229_v7, %v229_v7 }
  0x3a   : > { %v234_v18 = vld [vmem:[%s11102_s0 + $0x30] sm:$0xff]  ;;  %v6666_v23 = vmul.f32 %v247_v11, %v247_v11  ;;  %v232_v26 = vld [vmem:[%s11102_s0 + $0x20] sm:$0xff]  ;;  %v6681_v29 = vld [vmem:[%s11102_s0 + $0xb8] sm:$0xff]  ;;  %v6683_v30 = vmul.f32 %v230_v13, %v230_v13  ;;  %v6700_v36 = vmul.f32 %v231_v17, %v231_v17  ;;  %v6726_v50 = vmul.f32 %v249_v19, %v249_v19 }
  0x3b   : > { %v473_v24 = vadd.f32 %v472_v12, %v245_v3  ;;  %v453_v27 = vadd.f32 %v452_v14, %v230_v13  ;;  %v6676_v28 = vld [vmem:[%s11102_s0 + $0xb0] sm:$0xff]  ;;  %v233_v31 = vld [vmem:[%s11102_s0 + $0x28] sm:$0xff]  ;;  %v458_v32 = vsel %vm457_vm0, %v234_v18, 0.0  ;;  %v6692_v33 = vld [vmem:[%s11102_s0 + $0xc0] sm:$0xff]  ;;  %v6702_v37 = vmul.f32 %v232_v26, %v232_v26 }
  0x3c   : > { %v6697_v34 = vld [vmem:[%s11102_s0 + $0xd8] sm:$0xff]  ;;  %v480_v35 = vadd.f32 %v6676_v28, %v249_v19  ;;  %v236_v41 = vld [vmem:[%s11102_s0 + $0x40] sm:$0xff]  ;;  %v237_v42 = vld [vmem:[%s11102_s0 + $0x48] sm:$0xff]  ;;  %v6713_v43 = vmul.f32 %v233_v31, %v233_v31  ;;  %v6715_v44 = vmul.f32 %v234_v18, %v234_v18  ;;  %v997_v49 = vadd.f32 %v774_v21, %v773_v20 }
  0x3d   : > { %v474_v38 = vadd.f32 %v473_v24, %v246_v10  ;;  %v454_v39 = vadd.f32 %v453_v27, %v231_v17  ;;  %v235_v40 = vld [vmem:[%s11102_s0 + $0x38] sm:$0xff]  ;;  %v6720_v45 = vld [vmem:[%s11102_s0 + $0xc8] sm:$0xff]  ;;  %v238_v47 = vld [vmem:[%s11102_s0 + $0x50] sm:$0xff]  ;;  %v781_v57 = vmul.f32 %v236_v41, %v236_v41  ;;  %v485_v60 = vsel %vm457_vm0, %v6697_v34, 0.0 }
  0x3e   : > { %v481_v46 = vadd.f32 %v480_v35, %v6681_v29  ;;  %v462_v48 = vadd.f32 %v236_v41, %v235_v40  ;;  %v241_v53 = vld [vmem:[%s11102_s0 + $0x68] sm:$0xff]  ;;  %v6734_v54 = vld [vmem:[%s11102_s0 + $0x118] sm:$0xff]  ;;  %v6739_v55 = vld [vmem:[%s11102_s0 + $0x120] sm:$0xff]  ;;  %v780_v56 = vmul.f32 %v235_v40, %v235_v40  ;;  %v782_v6 = vmul.f32 %v237_v42, %v237_v42 }
  0x3f   : > { %v475_v51 = vadd.f32 %v474_v38, %v247_v11  ;;  %v455_v52 = vadd.f32 %v454_v39, %v232_v26  ;;  %v6744_v58 = vld [vmem:[%s11102_s0 + $0xd0] sm:$0xff]  ;;  %v6752_v62 = vld [vmem:[%s11102_s0 + $0x128] sm:$0xff]  ;;  %v498_v63 = vadd.f32 %v6739_v55, %v6734_v54  ;;  %v239_v2 = vld [vmem:[%s11102_s0 + $0x58] sm:$0xff]  ;;  %v783_v7 = vmul.f32 %v238_v47, %v238_v47 }
  0x40   : > { %v482_v59 = vadd.f32 %v481_v46, %v6692_v33  ;;  %v463_v61 = vadd.f32 %v462_v48, %v237_v42  ;;  %v6762_v3 = vld [vmem:[%s11102_s0 + $0x130] sm:$0xff]  ;;  %v6767_v4 = vld [vmem:[%s11102_s0 + $0xe0] sm:$0xff]  ;;  %v467_v12 = vsel %vm457_vm0, %v241_v53, 0.0  ;;  %v6774_v13 = vld [vmem:[%s11102_s0 + $0x148] sm:$0xff]  ;;  %v784_v26 = vmul.f32 %v239_v2, %v239_v2 }
  0x41   : > { %v477_v0 = vadd.f32 %v476_v25, %v475_v51  ;;  %v456_v1 = vadd.f32 %v455_v52, %v233_v31  ;;  %v499_v14 = vadd.f32 %v498_v63, %v6752_v62  ;;  %v6780_v17 = vld [vmem:[%s11102_s0 + $0xe8] sm:$0xff]  ;;  %v6785_v18 = vld [vmem:[%s11102_s0 + $0xf0] sm:$0xff]  ;;  %v240_v20 = vld [vmem:[%s11102_s0 + $0x60] sm:$0xff]  ;;  %v1006_v27 = vadd.f32 %v781_v57, %v780_v56 }
  0x42   : > { %v483_v10 = vadd.f32 %v482_v59, %v6720_v45  ;;  %v464_v11 = vadd.f32 %v463_v61, %v238_v47  ;;  %v6793_v21 = vld [vmem:[%s11102_s0 + $0x138] sm:$0xff]  ;;  %v489_v25 = vadd.f32 %v6780_v17, %v6767_v4  ;;  %v6807_v38 = vld [vmem:[%s11102_s0 + $0x188] sm:$0xff]  ;;  %v6812_v39 = vld [vmem:[%s11102_s0 + $0x190] sm:$0xff]  ;;  %v6819_v41 = vmul.f32 %v240_v20, %v240_v20 }
  0x43   : > { %478 = vadd.xlane.f32.xlu1 %v477_v0  ;;  %v459_v19 = vadd.f32 %v458_v32, %v456_v1  ;;  %v6798_v24 = vld [vmem:[%s11102_s0 + $0xf8] sm:$0xff]  ;;  %v500_v35 = vadd.f32 %v499_v14, %v6762_v3  ;;  %v6824_v42 = vld [vmem:[%s11102_s0 + $0x140] sm:$0xff]  ;;  %v503_v46 = vsel %vm457_vm0, %v6774_v13, 0.0  ;;  %v6836_v48 = vld [vmem:[%s11102_s0 + $0x110] sm:$0xff]  ;;  %v516_v52 = vadd.f32 %v6812_v39, %v6807_v38 }
  0x44   : > { %v484_v31 = vadd.f32 %v483_v10, %v6744_v58  ;;  %v465_v32 = vadd.f32 %v464_v11, %v239_v2  ;;  %v6817_v40 = vld [vmem:[%s11102_s0 + $0x198] sm:$0xff]  ;;  %v6831_v47 = vld [vmem:[%s11102_s0 + $0x100] sm:$0xff]  ;;  %v490_v51 = vadd.f32 %v489_v25, %v6785_v18  ;;  %v1007_v56 = vadd.f32 %v1006_v27, %v782_v6  ;;  %v6850_v0 = vld [vmem:[%s11102_s0 + $0x150] sm:$0xff] }
  0x45   : > { %460 = vadd.xlane.f32.xlu0 %v459_v19  ;;  %v501_v61 = vadd.f32 %v500_v35, %v6793_v21  ;;  %v6845_v63 = vld [vmem:[%s11102_s0 + $0x1a0] sm:$0xff]  ;;  %v6855_v1 = vld [vmem:[%s11102_s0 + $0x158] sm:$0xff]  ;;  %v6861_v2 = vld [vmem:[%s11102_s0 + $0x108] sm:$0xff]  ;;  %v517_v11 = vadd.f32 %v516_v52, %v6817_v40  ;;  %v494_v35 = vsel %vm457_vm0, %v6836_v48, 0.0 }
  0x46   : > { %v486_v57 = vadd.f32 %v485_v60, %v484_v31  ;;  %v466_v59 = vadd.f32 %v465_v32, %v240_v20  ;;  %11264 = vst [vmem:[#allocation6_spill] sm:$0xff] %v6855_v1  ;;  %v998_v60 = vadd.f32 %v997_v49, %v6683_v30  ;;  %v491_v6 = vadd.f32 %v490_v51, %v6798_v24  ;;  %v6867_v10 = vld [vmem:[%s11102_s0 + $0x1a8] sm:$0xff]  ;;  %v6873_v14 = vld [vmem:[%s11102_s0 + $0x160] sm:$0xff]  ;;  %v6881_v25 = vld [vmem:[%s11102_s0 + $0x1b8] sm:$0xff] }
  0x47   : > { %11265 = vst [vmem:[#allocation7_spill] sm:$0xff] %v6873_v14  ;;  %v507_v30 = vadd.f32 %v6855_v1, %v6850_v0  ;;  %v786_v49 = vmul.f32 %v241_v53, %v241_v53  ;;  %v502_v20 = vadd.f32 %v501_v61, %v6824_v42  ;;  %11266 = vst [vmem:[#allocation8_spill] sm:$0xff] %v6881_v25  ;;  %v6886_v27 = vld [vmem:[%s11102_s0 + $0x168] sm:$0xff]  ;;  %v6891_v31 = vld [vmem:[%s11102_s0 + $0x1f8] sm:$0xff] }
  0x48   : > { %487 = vadd.xlane.f32.xlu1 %v486_v57  ;;  %v468_v19 = vadd.f32 %v467_v12, %v466_v59  ;;  %11267 = vst [vmem:[#allocation9_spill] sm:$0xff] %v6886_v27  ;;  %11268 = vst [vmem:[#allocation10_spill] sm:$0xff] %v6891_v31  ;;  %v1008_v53 = vadd.f32 %v1007_v56, %v783_v7  ;;  %v999_v12 = vadd.f32 %v998_v60, %v6700_v36  ;;  %v6901_v52 = vld [vmem:[%s11102_s0 + $0x180] sm:$0xff]  ;;  %v6912_v36 = vld [vmem:[%s11102_s0 + $0x208] sm:$0xff] }
  0x49   : > { %v492_v32 = vadd.f32 %v491_v6, %v6831_v47  ;;  %v518_v51 = vadd.f32 %v517_v11, %v6845_v63  ;;  %11269 = vst [vmem:[#allocation11_spill] sm:$0xff] %v6901_v52  ;;  %v508_v57 = vadd.f32 %v507_v30, %v6873_v14  ;;  %v6907_v7 = vld [vmem:[%s11102_s0 + $0x200] sm:$0xff]  ;;  %11271 = vst [vmem:[#allocation13_spill] sm:$0xff] %v6912_v36  ;;  %v6917_v59 = vld [vmem:[%s11102_s0 + $0x1b0] sm:$0xff] }
  0x4a   : > { %11270 = vst [vmem:[#allocation12_spill] sm:$0xff] %v6907_v7  ;;  %469 = vadd.xlane.f32.xlu0 %v468_v19  ;;  %v504_v56 = vadd.f32 %v503_v46, %v502_v20  ;;  %v6922_v61 = vld [vmem:[%s11102_s0 + $0x170] sm:$0xff]  ;;  %v534_v6 = vadd.f32 %v6907_v7, %v6891_v31  ;;  %v1009_v11 = vadd.f32 %v1008_v53, %v784_v26  ;;  %v6938_v14 = vld [vmem:[%s11102_s0 + $0x1c0] sm:$0xff]  ;;  %v6943_v1 = vld [vmem:[%s11102_s0 + $0x1c8] sm:$0xff]  ;;  %v1011_v26 = vsel %vm457_vm0, %v786_v49, 0.0 }
  0x4b   : > { %11272 = vst [vmem:[#allocation14_spill] sm:$0xff] %v6922_v61  ;;  %v6927_v60 = vld [vmem:[%s11102_s0 + $0x210] sm:$0xff]  ;;  %v1000_v46 = vadd.f32 %v999_v12, %v6702_v37  ;;  %v493_v30 = vadd.f32 %v492_v32, %v6861_v2  ;;  %v519_v19 = vadd.f32 %v518_v51, %v6867_v10  ;;  %v509_v20 = vadd.f32 %v508_v57, %v6886_v27  ;;  %v6956_v12 = vld [vmem:[%s11102_s0 + $0x178] sm:$0xff]  ;;  %v6968_v49 = vld [vmem:[%s11102_s0 + $0x228] sm:$0xff] }
  0x4c   : > { %11273 = vst [vmem:[#allocation15_spill] sm:$0xff] %v6927_v60  ;;  %11274 = vst [vmem:[#allocation16_spill] sm:$0xff] %v6938_v14  ;;  %v6948_v37 = vld [vmem:[%s11102_s0 + $0x1d0] sm:$0xff]  ;;  %505 = vadd.xlane.f32.xlu1 %v504_v56  ;;  %v521_v53 = vsel %vm457_vm0, %v6881_v25, 0.0  ;;  %v512_v32 = vsel %vm457_vm0, %v6901_v52, 0.0  ;;  %v6963_v51 = vld [vmem:[%s11102_s0 + $0x218] sm:$0xff]  ;;  %v535_v57 = vadd.f32 %v534_v6, %v6912_v36  ;;  %v525_v56 = vadd.f32 %v6943_v1, %v6938_v14 }
  0x4d   : > { %11275 = vst [vmem:[#allocation17_spill] sm:$0xff] %v6943_v1  ;;  %11276 = vst [vmem:[#allocation18_spill] sm:$0xff] %v6948_v37  ;;  %v495_v7 = vadd.f32 %v494_v35, %v493_v30  ;;  %v520_v31 = vadd.f32 %v519_v19, %v6917_v59  ;;  %v510_v52 = vadd.f32 %v509_v20, %v6922_v61  ;;  %v6978_v27 = vld [vmem:[%s11102_s0 + $0x220] sm:$0xff]  ;;  %v6983_v25 = vld [vmem:[%s11102_s0 + $0x1d8] sm:$0xff] }
  0x4e   : > { %11277 = vst [vmem:[#allocation19_spill] sm:$0xff] %v6963_v51  ;;  %11278 = vst [vmem:[#allocation20_spill] sm:$0xff] %v6968_v49  ;;  %v6988_v6 = vld [vmem:[%s11102_s0 + $0x268] sm:$0xff]  ;;  %v6993_v35 = vld [vmem:[%s11102_s0 + $0x270] sm:$0xff]  ;;  %v1010_v30 = vadd.f32 %v1009_v11, %v6819_v41  ;;  %v536_v19 = vadd.f32 %v535_v57, %v6927_v60  ;;  %v526_v14 = vadd.f32 %v525_v56, %v6948_v37 }
  0x4f   : > { %11279 = vst [vmem:[#allocation21_spill] sm:$0xff] %v6983_v25  ;;  %11280 = vst [vmem:[#allocation22_spill] sm:$0xff] %v6988_v6  ;;  %v7000_v20 = vld [vmem:[%s11102_s0 + $0x1e0] sm:$0xff]  ;;  %v7005_v1 = vld [vmem:[%s11102_s0 + $0x1f0] sm:$0xff]  ;;  %v552_v41 = vadd.f32 %v6993_v35, %v6988_v6  ;;  %v1001_v11 = vadd.f32 %v1000_v46, %v6713_v43  ;;  %496 = vadd.xlane.f32.xlu0 %v495_v7  ;;  %v522_v57 = vadd.f32 %v521_v53, %v520_v31 }
  0x50   : > { %11281 = vst [vmem:[#allocation23_spill] sm:$0xff] %v6993_v35  ;;  %11282 = vst [vmem:[#allocation24_spill] sm:$0xff] %v7005_v1  ;;  %v7011_v61 = vld [vmem:[%s11102_s0 + $0x278] sm:$0xff]  ;;  %v511_v60 = vadd.f32 %v510_v52, %v6956_v12  ;;  %v7020_v36 = vld [vmem:[%s11102_s0 + $0x1e8] sm:$0xff]  ;;  %v1002_v43 = vsel %vm457_vm0, %v6715_v44, 0.0  ;;  %v795_v31 = vmul.f32 %v6676_v28, %v6676_v28  ;;  %v537_v52 = vadd.f32 %v536_v19, %v6963_v51 }
  0x51   : > { %11283 = vst [vmem:[#allocation25_spill] sm:$0xff] %v7011_v61  ;;  %v7025_v56 = vld [vmem:[%s11102_s0 + $0x280] sm:$0xff]  ;;  %v7030_v35 = vld [vmem:[%s11102_s0 + $0x230] sm:$0xff]  ;;  %v539_v7 = vsel %vm457_vm0, %v6968_v49, 0.0  ;;  %v527_v46 = vadd.f32 %v526_v14, %v6983_v25  ;;  %v7043_v53 = vld [vmem:[%s11102_s0 + $0x298] sm:$0xff]  ;;  %v553_v6 = vadd.f32 %v552_v41, %v7011_v61  ;;  %523 = vadd.xlane.f32.xlu1 %v522_v57  ;;  %v530_v14 = vsel %vm457_vm0, %v7005_v1, 0.0 }
  0x52   : > { %11284 = vst [vmem:[#allocation26_spill] sm:$0xff] %v7025_v56  ;;  %11285 = vst [vmem:[#allocation27_spill] sm:$0xff] %v7030_v35  ;;  %v7049_v44 = vld [vmem:[%s11102_s0 + $0x238] sm:$0xff]  ;;  %v7054_v28 = vld [vmem:[%s11102_s0 + $0x240] sm:$0xff]  ;;  %v513_v19 = vadd.f32 %v512_v32, %v511_v60  ;;  %v7075_v32 = vadd.f32 %v1011_v26, %v1010_v30  ;;  %v538_v57 = vadd.f32 %v537_v52, %v6978_v27  ;;  %v557_v52 = vsel %vm457_vm0, %v7043_v53, 0.0 }
  0x53   : > { %11286 = vst [vmem:[#allocation28_spill] sm:$0xff] %v7043_v53  ;;  %11287 = vst [vmem:[#allocation29_spill] sm:$0xff] %v7049_v44  ;;  %v7061_v25 = vld [vmem:[%s11102_s0 + $0x288] sm:$0xff]  ;;  %v7071_v61 = vld [vmem:[%s11102_s0 + $0x260] sm:$0xff]  ;;  %v543_v60 = vadd.f32 %v7049_v44, %v7030_v35  ;;  %v528_v1 = vadd.f32 %v527_v46, %v7000_v20  ;;  %v554_v37 = vadd.f32 %v553_v6, %v7025_v56 }
  0x54   : > { %11288 = vst [vmem:[#allocation30_spill] sm:$0xff] %v7054_v28  ;;  %11289 = vst [vmem:[#allocation31_spill] sm:$0xff] %v7061_v25  ;;  %v7066_v41 = vld [vmem:[%s11102_s0 + $0x248] sm:$0xff]  ;;  %v7083_v51 = vld [vmem:[%s11102_s0 + $0x2d8] sm:$0xff]  ;;  %v7095_v30 = vadd.f32 %v1002_v43, %v1001_v11  ;;  %514 = vadd.xlane.f32.xlu0 %v513_v19  ;;  %v796_v43 = vmul.f32 %v6681_v29, %v6681_v29  ;;  %v540_v19 = vadd.f32 %v539_v7, %v538_v57 }
  0x55   : > { %11290 = vst [vmem:[#allocation32_spill] sm:$0xff] %v7066_v41  ;;  %11291 = vst [vmem:[#allocation33_spill] sm:$0xff] %v7071_v61  ;;  %v7088_v49 = vld [vmem:[%s11102_s0 + $0x2e0] sm:$0xff]  ;;  %v7093_v26 = vld [vmem:[%s11102_s0 + $0x2e8] sm:$0xff]  ;;  %v544_v44 = vadd.f32 %v543_v60, %v7054_v28  ;;  %v529_v35 = vadd.f32 %v528_v1, %v7020_v36  ;;  %v555_v56 = vadd.f32 %v554_v37, %v7061_v25  ;;  %v548_v7 = vsel %vm457_vm0, %v7071_v61, 0.0 }
  0x56   : > { %11292 = vst [vmem:[#allocation34_spill] sm:$0xff] %v7083_v51  ;;  %11293 = vst [vmem:[#allocation35_spill] sm:$0xff] %v7088_v49  ;;  %v7100_v6 = vld [vmem:[%s11102_s0 + $0x290] sm:$0xff]  ;;  %v570_v11 = vadd.f32 %v7088_v49, %v7083_v51  ;;  %v7124_v60 = vld [vmem:[%s11102_s0 + $0x2a0] sm:$0xff]  ;;  %v797_v29 = vmul.f32 %v6692_v33, %v6692_v33  ;;  %541 = vadd.xlane.f32.xlu1 %v540_v19 }
  0x57   : > { %11294 = vst [vmem:[#allocation36_spill] sm:$0xff] %v7093_v26  ;;  %11295 = vst [vmem:[#allocation37_spill] sm:$0xff] %v7100_v6  ;;  %v7107_v46 = vld [vmem:[%s11102_s0 + $0x250] sm:$0xff]  ;;  %v7129_v49 = vld [vmem:[%s11102_s0 + $0x2a8] sm:$0xff]  ;;  %v545_v37 = vadd.f32 %v544_v44, %v7066_v41  ;;  %v531_v44 = vadd.f32 %v530_v14, %v529_v35  ;;  %v556_v41 = vadd.f32 %v555_v56, %v7100_v6 }
  0x58   : > { %11296 = vst [vmem:[#allocation38_spill] sm:$0xff] %v7107_v46  ;;  %v7119_v53 = vld [vmem:[%s11102_s0 + $0x2f0] sm:$0xff]  ;;  %11298 = vst [vmem:[#allocation40_spill] sm:$0xff] %v7124_v60  ;;  %v7136_v1 = vld [vmem:[%s11102_s0 + $0x258] sm:$0xff]  ;;  %v571_v51 = vadd.f32 %v570_v11, %v7093_v26  ;;  %v561_v28 = vadd.f32 %v7129_v49, %v7124_v60  ;;  %v798_v35 = vmul.f32 %v6720_v45, %v6720_v45 }
  0x59   : > { %11297 = vst [vmem:[#allocation39_spill] sm:$0xff] %v7119_v53  ;;  %11299 = vst [vmem:[#allocation41_spill] sm:$0xff] %v7129_v49  ;;  %v7144_v57 = vld [vmem:[%s11102_s0 + $0x2f8] sm:$0xff]  ;;  %v7150_v33 = vld [vmem:[%s11102_s0 + $0x2b0] sm:$0xff]  ;;  %v1024_v56 = vadd.f32 %v795_v31, %v6726_v50  ;;  %v546_v14 = vadd.f32 %v545_v37, %v7107_v46  ;;  %v800_v50 = vmul.f32 %v6697_v34, %v6697_v34  ;;  %532 = vadd.xlane.f32.xlu0 %v531_v44 }
  0x5a   : > { %11300 = vst [vmem:[#allocation42_spill] sm:$0xff] %v7144_v57  ;;  %11301 = vst [vmem:[#allocation43_spill] sm:$0xff] %v7150_v33  ;;  %v7158_v61 = vld [vmem:[%s11102_s0 + $0x308] sm:$0xff]  ;;  %v7163_v11 = vld [vmem:[%s11102_s0 + $0x2b8] sm:$0xff]  ;;  %v572_v49 = vadd.f32 %v571_v51, %v7119_v53  ;;  %v562_v60 = vadd.f32 %v561_v28, %v7150_v33  ;;  %v558_v31 = vadd.f32 %v557_v52, %v556_v41 }
  0x5b   : > { %11302 = vst [vmem:[#allocation44_spill] sm:$0xff] %v7158_v61  ;;  %11303 = vst [vmem:[#allocation45_spill] sm:$0xff] %v7163_v11  ;;  %v7168_v26 = vld [vmem:[%s11102_s0 + $0x348] sm:$0xff]  ;;  %v7177_v19 = vld [vmem:[%s11102_s0 + $0x300] sm:$0xff]  ;;  %v7212_v41 = vmul.f32 %v6744_v58, %v6744_v58  ;;  %v1025_v52 = vadd.f32 %v1024_v56, %v796_v43  ;;  %v547_v44 = vadd.f32 %v546_v14, %v7136_v1  ;;  %v575_v53 = vsel %vm457_vm0, %v7158_v61, 0.0 }
  0x5c   : > { %11304 = vst [vmem:[#allocation46_spill] sm:$0xff] %v7168_v26  ;;  %v7184_v6 = vld [vmem:[%s11102_s0 + $0x350] sm:$0xff]  ;;  %v7189_v45 = vld [vmem:[%s11102_s0 + $0x358] sm:$0xff]  ;;  %v7196_v51 = vld [vmem:[%s11102_s0 + $0x2c0] sm:$0xff]  ;;  %v573_v33 = vadd.f32 %v572_v49, %v7144_v57  ;;  %v563_v46 = vadd.f32 %v562_v60, %v7163_v11  ;;  %559 = vadd.xlane.f32.xlu1 %v558_v31 }
  0x5d   : > { %11305 = vst [vmem:[#allocation47_spill] sm:$0xff] %v7184_v6  ;;  %11306 = vst [vmem:[#allocation48_spill] sm:$0xff] %v7196_v51  ;;  %v7201_v28 = vld [vmem:[%s11102_s0 + $0x2d0] sm:$0xff]  ;;  %v7206_v37 = vld [vmem:[%s11102_s0 + $0x360] sm:$0xff]  ;;  %v588_v34 = vadd.f32 %v7184_v6, %v7168_v26  ;;  %v1026_v6 = vadd.f32 %v1025_v52, %v797_v29  ;;  %v1015_v26 = vadd.f32 %v6640_v9, %v6638_v8  ;;  %v7272_v9 = vsel %vm457_vm0, %v800_v50, 0.0 }
  0x5e   : > { %11307 = vst [vmem:[#allocation49_spill] sm:$0xff] %v7206_v37  ;;  %v7222_v25 = vld [vmem:[%s11102_s0 + $0x310] sm:$0xff]  ;;  %v7227_v58 = vld [vmem:[%s11102_s0 + $0x318] sm:$0xff]  ;;  %v7232_v43 = vld [vmem:[%s11102_s0 + $0x320] sm:$0xff]  ;;  %v549_v31 = vadd.f32 %v548_v7, %v547_v44  ;;  %v574_v11 = vadd.f32 %v573_v33, %v7177_v19  ;;  %v564_v57 = vadd.f32 %v563_v46, %v7196_v51  ;;  %v566_v46 = vsel %vm457_vm0, %v7201_v28, 0.0 }
  0x5f   : > { %11308 = vst [vmem:[#allocation50_spill] sm:$0xff] %v7222_v25  ;;  %11309 = vst [vmem:[#allocation51_spill] sm:$0xff] %v7227_v58  ;;  %v7237_v49 = vld [vmem:[%s11102_s0 + $0x2c8] sm:$0xff]  ;;  %v589_v56 = vadd.f32 %v588_v34, %v7189_v45  ;;  %v579_v14 = vadd.f32 %v7227_v58, %v7222_v25  ;;  %v7254_v61 = vld [vmem:[%s11102_s0 + $0x370] sm:$0xff] }
  0x60   : > { %11310 = vst [vmem:[#allocation52_spill] sm:$0xff] %v7232_v43  ;;  %v7242_v60 = vld [vmem:[%s11102_s0 + $0x368] sm:$0xff]  ;;  %11312 = vst [vmem:[#allocation54_spill] sm:$0xff] %v7254_v61  ;;  %v7264_v29 = vld [vmem:[%s11102_s0 + $0x3b8] sm:$0xff]  ;;  %550 = vadd.xlane.f32.xlu0 %v549_v31  ;;  %v576_v25 = vadd.f32 %v575_v53, %v574_v11  ;;  %v565_v51 = vadd.f32 %v564_v57, %v7237_v49  ;;  %v1016_v53 = vadd.f32 %v1015_v26, %v6651_v15 }
  0x61   : > { %11311 = vst [vmem:[#allocation53_spill] sm:$0xff] %v7242_v60  ;;  %v7259_v34 = vld [vmem:[%s11102_s0 + $0x328] sm:$0xff]  ;;  %11314 = vst [vmem:[#allocation56_spill] sm:$0xff] %v7264_v29  ;;  %v7269_v8 = vld [vmem:[%s11102_s0 + $0x3c0] sm:$0xff]  ;;  %v590_v33 = vadd.f32 %v589_v56, %v7206_v37  ;;  %v580_v44 = vadd.f32 %v579_v14, %v7232_v43  ;;  %v793_v26 = vmul.f32 %v6630_v5, %v6630_v5 }
  0x62   : > { %11313 = vst [vmem:[#allocation55_spill] sm:$0xff] %v7259_v34  ;;  %11315 = vst [vmem:[#allocation57_spill] sm:$0xff] %v7269_v8  ;;  %v7279_v7 = vld [vmem:[%s11102_s0 + $0x378] sm:$0xff]  ;;  %v7285_v52 = vld [vmem:[%s11102_s0 + $0x330] sm:$0xff]  ;;  %v606_v58 = vadd.f32 %v7269_v8, %v7264_v29  ;;  %v1027_v8 = vadd.f32 %v1026_v6, %v798_v35  ;;  %577 = vadd.xlane.f32.xlu1 %v576_v25  ;;  %v567_v6 = vadd.f32 %v566_v46, %v565_v51 }
  0x63   : > { %11316 = vst [vmem:[#allocation58_spill] sm:$0xff] %v7279_v7  ;;  %11317 = vst [vmem:[#allocation59_spill] sm:$0xff] %v7285_v52  ;;  %v7291_v50 = vld [vmem:[%s11102_s0 + $0x3c8] sm:$0xff]  ;;  %v7299_v56 = vld [vmem:[%s11102_s0 + $0x340] sm:$0xff]  ;;  %v591_v57 = vadd.f32 %v590_v33, %v7242_v60  ;;  %v581_v31 = vadd.f32 %v580_v44, %v7259_v34  ;;  %v593_v35 = vsel %vm457_vm0, %v7279_v7, 0.0  ;;  %v1017_v25 = vadd.f32 %v1016_v53, %v6653_v16 }
  0x64   : > { %11318 = vst [vmem:[#allocation60_spill] sm:$0xff] %v7291_v50  ;;  %11319 = vst [vmem:[#allocation61_spill] sm:$0xff] %v7299_v56  ;;  %v7304_v14 = vld [vmem:[%s11102_s0 + $0x3d0] sm:$0xff]  ;;  %v7309_v43 = vld [vmem:[%s11102_s0 + $0x380] sm:$0xff]  ;;  %v607_v29 = vadd.f32 %v606_v58, %v7291_v50  ;;  %v584_v50 = vsel %vm457_vm0, %v7299_v56, 0.0  ;;  %568 = vadd.xlane.f32.xlu0 %v567_v6 }
  0x65   : > { %11320 = vst [vmem:[#allocation62_spill] sm:$0xff] %v7304_v14  ;;  %11321 = vst [vmem:[#allocation63_spill] sm:$0xff] %v7309_v43  ;;  %v7316_v11 = vld [vmem:[%s11102_s0 + $0x338] sm:$0xff]  ;;  %v7323_v37 = vld [vmem:[%s11102_s0 + $0x388] sm:$0xff]  ;;  %v592_v51 = vadd.f32 %v591_v57, %v7254_v61  ;;  %v582_v46 = vadd.f32 %v581_v31, %v7285_v52 }
  0x66   : > { %11322 = vst [vmem:[#allocation64_spill] sm:$0xff] %v7323_v37  ;;  %v7328_v15 = vld [vmem:[%s11102_s0 + $0x390] sm:$0xff]  ;;  %v7337_v58 = vld [vmem:[%s11102_s0 + $0x3d8] sm:$0xff]  ;;  %v7342_v33 = vld [vmem:[%s11102_s0 + $0x3e8] sm:$0xff]  ;;  %v597_v5 = vadd.f32 %v7323_v37, %v7309_v43  ;;  %v608_v34 = vadd.f32 %v607_v29, %v7304_v14  ;;  %v1028_v43 = vadd.f32 %v1027_v8, %v7212_v41  ;;  %v1018_v14 = vadd.f32 %v1017_v25, %v6664_v22 }
  0x67   : > { %11323 = vst [vmem:[#allocation65_spill] sm:$0xff] %v7328_v15  ;;  %v7347_v44 = vld [vmem:[%s11102_s0 + $0x398] sm:$0xff]  ;;  %v7360_v60 = vld [vmem:[%s11102_s0 + $0x428] sm:$0xff]  ;;  %v7365_v37 = vld [vmem:[%s11102_s0 + $0x430] sm:$0xff]  ;;  %v594_v52 = vadd.f32 %v593_v35, %v592_v51  ;;  %v583_v56 = vadd.f32 %v582_v46, %v7316_v11  ;;  %v611_v8 = vsel %vm457_vm0, %v7342_v33, 0.0 }
  0x68   : > { %11324 = vst [vmem:[#allocation66_spill] sm:$0xff] %v7347_v44  ;;  %11325 = vst [vmem:[#allocation67_spill] sm:$0xff] %v7360_v60  ;;  %v7370_v16 = vld [vmem:[%s11102_s0 + $0x438] sm:$0xff]  ;;  %v7375_v29 = vld [vmem:[%s11102_s0 + $0x3e0] sm:$0xff]  ;;  %v598_v31 = vadd.f32 %v597_v5, %v7328_v15  ;;  %v624_v6 = vadd.f32 %v7365_v37, %v7360_v60  ;;  %v609_v61 = vadd.f32 %v608_v34, %v7337_v58  ;;  %v1020_v34 = vsel %vm457_vm0, %v793_v26, 0.0 }
  0x69   : > { %11326 = vst [vmem:[#allocation68_spill] sm:$0xff] %v7365_v37  ;;  %11327 = vst [vmem:[#allocation69_spill] sm:$0xff] %v7370_v16  ;;  %v7380_v53 = vld [vmem:[%s11102_s0 + $0x3a0] sm:$0xff]  ;;  %v7385_v57 = vld [vmem:[%s11102_s0 + $0x3b0] sm:$0xff]  ;;  %595 = vadd.xlane.f32.xlu1 %v594_v52  ;;  %v585_v37 = vadd.f32 %v584_v50, %v583_v56 }
  0x6a   : > { %11328 = vst [vmem:[#allocation70_spill] sm:$0xff] %v7380_v53  ;;  %11329 = vst [vmem:[#allocation71_spill] sm:$0xff] %v7385_v57  ;;  %v7397_v7 = vld [vmem:[%s11102_s0 + $0x3a8] sm:$0xff]  ;;  %v7402_v5 = vld [vmem:[%s11102_s0 + $0x440] sm:$0xff]  ;;  %v599_v35 = vadd.f32 %v598_v31, %v7347_v44  ;;  %v625_v46 = vadd.f32 %v624_v6, %v7370_v16  ;;  %v610_v60 = vadd.f32 %v609_v61, %v7375_v29  ;;  %v602_v44 = vsel %vm457_vm0, %v7385_v57, 0.0 }
  0x6b   : > { %11330 = vst [vmem:[#allocation72_spill] sm:$0xff] %v7397_v7  ;;  %11331 = vst [vmem:[#allocation73_spill] sm:$0xff] %v7402_v5  ;;  %v7407_v41 = vld [vmem:[%s11102_s0 + $0x3f0] sm:$0xff]  ;;  %v7412_v22 = vld [vmem:[%s11102_s0 + $0x3f8] sm:$0xff]  ;;  %v1019_v61 = vadd.f32 %v1018_v14, %v6666_v23  ;;  %v7474_v14 = vadd.f32 %v7272_v9, %v1028_v43  ;;  %586 = vadd.xlane.f32.xlu0 %v585_v37 }
  0x6c   : > { %11332 = vst [vmem:[#allocation74_spill] sm:$0xff] %v7407_v41  ;;  %11333 = vst [vmem:[#allocation75_spill] sm:$0xff] %v7412_v22  ;;  %v7421_v25 = vld [vmem:[%s11102_s0 + $0x448] sm:$0xff]  ;;  %v7426_v51 = vld [vmem:[%s11102_s0 + $0x458] sm:$0xff]  ;;  %v615_v31 = vadd.f32 %v7412_v22, %v7407_v41  ;;  %v600_v50 = vadd.f32 %v599_v35, %v7380_v53  ;;  %v626_v56 = vadd.f32 %v625_v46, %v7402_v5 }
  0x6d   : > { %11334 = vst [vmem:[#allocation76_spill] sm:$0xff] %v7421_v25  ;;  %11335 = vst [vmem:[#allocation77_spill] sm:$0xff] %v7426_v51  ;;  %v7432_v26 = vld [vmem:[%s11102_s0 + $0x400] sm:$0xff]  ;;  %v7442_v15 = vld [vmem:[%s11102_s0 + $0x450] sm:$0xff]  ;;  %v612_v35 = vadd.f32 %v611_v8, %v610_v60  ;;  %v629_v46 = vsel %vm457_vm0, %v7426_v51, 0.0  ;;  %v808_v60 = vmul.f32 %v6734_v54, %v6734_v54 }
  0x6e   : > { %11336 = vst [vmem:[#allocation78_spill] sm:$0xff] %v7432_v26  ;;  %v7447_v6 = vld [vmem:[%s11102_s0 + $0x408] sm:$0xff]  ;;  %v7452_v52 = vld [vmem:[%s11102_s0 + $0x498] sm:$0xff]  ;;  %v7460_v22 = vld [vmem:[%s11102_s0 + $0x420] sm:$0xff]  ;;  %v616_v41 = vadd.f32 %v615_v31, %v7432_v26  ;;  %v601_v9 = vadd.f32 %v600_v50, %v7397_v7  ;;  %v627_v8 = vadd.f32 %v626_v56, %v7421_v25  ;;  %v809_v50 = vmul.f32 %v6739_v55, %v6739_v55 }
  0x6f   : > { %11337 = vst [vmem:[#allocation79_spill] sm:$0xff] %v7447_v6  ;;  %11338 = vst [vmem:[#allocation80_spill] sm:$0xff] %v7452_v52  ;;  %v7466_v16 = vld [vmem:[%s11102_s0 + $0x4a0] sm:$0xff]  ;;  %v7471_v23 = vld [vmem:[%s11102_s0 + $0x4a8] sm:$0xff]  ;;  %613 = vadd.xlane.f32.xlu1 %v612_v35  ;;  %v620_v56 = vsel %vm457_vm0, %v7460_v22, 0.0  ;;  %v7532_v55 = vadd.f32 %v1020_v34, %v1019_v61 }
  0x70   : > { %11339 = vst [vmem:[#allocation81_spill] sm:$0xff] %v7460_v22  ;;  %11340 = vst [vmem:[#allocation82_spill] sm:$0xff] %v7466_v16  ;;  %v7481_v31 = vld [vmem:[%s11102_s0 + $0x410] sm:$0xff]  ;;  %v7491_v43 = vld [vmem:[%s11102_s0 + $0x4c8] sm:$0xff]  ;;  %v642_v37 = vadd.f32 %v7466_v16, %v7452_v52  ;;  %v617_v51 = vadd.f32 %v616_v41, %v7447_v6  ;;  %v603_v35 = vadd.f32 %v602_v44, %v601_v9 }
  0x71   : > { %v7486_v26 = vld [vmem:[%s11102_s0 + $0x4b0] sm:$0xff]  ;;  %11342 = vst [vmem:[#allocation84_spill] sm:$0xff] %v7491_v43  ;;  %v7503_v5 = vld [vmem:[%s11102_s0 + $0x460] sm:$0xff]  ;;  %v7508_v53 = vld [vmem:[%s11102_s0 + $0x468] sm:$0xff]  ;;  %v628_v25 = vadd.f32 %v627_v8, %v7442_v15  ;;  %v810_v44 = vmul.f32 %v6752_v62, %v6752_v62 }
  0x72   : > { %11341 = vst [vmem:[#allocation83_spill] sm:$0xff] %v7486_v26  ;;  %11343 = vst [vmem:[#allocation85_spill] sm:$0xff] %v7503_v5  ;;  %v7513_v54 = vld [vmem:[%s11102_s0 + $0x470] sm:$0xff]  ;;  %v7520_v41 = vld [vmem:[%s11102_s0 + $0x418] sm:$0xff]  ;;  %v643_v52 = vadd.f32 %v642_v37, %v7471_v23  ;;  %v633_v6 = vadd.f32 %v7508_v53, %v7503_v5  ;;  %v618_v7 = vadd.f32 %v617_v51, %v7481_v31  ;;  %v647_v37 = vsel %vm457_vm0, %v7491_v43, 0.0 }
  0x73   : > { %11344 = vst [vmem:[#allocation86_spill] sm:$0xff] %v7508_v53  ;;  %11345 = vst [vmem:[#allocation87_spill] sm:$0xff] %v7513_v54  ;;  %v7527_v16 = vld [vmem:[%s11102_s0 + $0x4b8] sm:$0xff]  ;;  %v7544_v57 = vld [vmem:[%s11102_s0 + $0x508] sm:$0xff]  ;;  %604 = vadd.xlane.f32.xlu0 %v603_v35 }
  0x74   : > { %11346 = vst [vmem:[#allocation88_spill] sm:$0xff] %v7520_v41  ;;  %11347 = vst [vmem:[#allocation89_spill] sm:$0xff] %v7527_v16  ;;  %v7539_v22 = vld [vmem:[%s11102_s0 + $0x478] sm:$0xff]  ;;  %v7549_v34 = vld [vmem:[%s11102_s0 + $0x510] sm:$0xff]  ;;  %v644_v61 = vadd.f32 %v643_v52, %v7486_v26  ;;  %v634_v8 = vadd.f32 %v633_v6, %v7513_v54  ;;  %v630_v52 = vadd.f32 %v629_v46, %v628_v25 }
  0x75   : > { %11348 = vst [vmem:[#allocation90_spill] sm:$0xff] %v7539_v22  ;;  %11349 = vst [vmem:[#allocation91_spill] sm:$0xff] %v7544_v57  ;;  %v7556_v51 = vld [vmem:[%s11102_s0 + $0x4c0] sm:$0xff]  ;;  %v7570_v62 = vld [vmem:[%s11102_s0 + $0x518] sm:$0xff]  ;;  %v660_v53 = vadd.f32 %v7549_v34, %v7544_v57  ;;  %v619_v5 = vadd.f32 %v618_v7, %v7520_v41  ;;  %v811_v25 = vmul.f32 %v6762_v3, %v6762_v3 }
  0x76   : > { %11350 = vst [vmem:[#allocation92_spill] sm:$0xff] %v7549_v34  ;;  %11351 = vst [vmem:[#allocation93_spill] sm:$0xff] %v7556_v51  ;;  %v7564_v9 = vld [vmem:[%s11102_s0 + $0x480] sm:$0xff]  ;;  %v7578_v43 = vld [vmem:[%s11102_s0 + $0x488] sm:$0xff]  ;;  %v1042_v46 = vadd.f32 %v809_v50, %v808_v60  ;;  %v645_v7 = vadd.f32 %v644_v61, %v7527_v16  ;;  %v635_v34 = vadd.f32 %v634_v8, %v7539_v22  ;;  %631 = vadd.xlane.f32.xlu1 %v630_v52 }
  0x77   : > { %11352 = vst [vmem:[#allocation94_spill] sm:$0xff] %v7564_v9  ;;  %11353 = vst [vmem:[#allocation95_spill] sm:$0xff] %v7570_v62  ;;  %v7583_v6 = vld [vmem:[%s11102_s0 + $0x520] sm:$0xff]  ;;  %v7588_v54 = vld [vmem:[%s11102_s0 + $0x4d0] sm:$0xff]  ;;  %v661_v57 = vadd.f32 %v660_v53, %v7570_v62  ;;  %v812_v60 = vmul.f32 %v6793_v21, %v6793_v21  ;;  %v621_v50 = vadd.f32 %v620_v56, %v619_v5 }
  0x78   : > { %11354 = vst [vmem:[#allocation96_spill] sm:$0xff] %v7583_v6  ;;  %11355 = vst [vmem:[#allocation97_spill] sm:$0xff] %v7588_v54  ;;  %v7596_v35 = vld [vmem:[%s11102_s0 + $0x490] sm:$0xff]  ;;  %v7603_v26 = vld [vmem:[%s11102_s0 + $0x4d8] sm:$0xff]  ;;  %v814_v5 = vmul.f32 %v6774_v13, %v6774_v13  ;;  %v1043_v56 = vadd.f32 %v1042_v46, %v810_v44  ;;  %v646_v52 = vadd.f32 %v645_v7, %v7556_v51 }
  0x79   : > { %11356 = vst [vmem:[#allocation98_spill] sm:$0xff] %v7596_v35  ;;  %11357 = vst [vmem:[#allocation99_spill] sm:$0xff] %v7603_v26  ;;  %v7608_v3 = vld [vmem:[%s11102_s0 + $0x4e0] sm:$0xff]  ;;  %v7615_v61 = vld [vmem:[%s11102_s0 + $0x528] sm:$0xff]  ;;  %v651_v21 = vadd.f32 %v7603_v26, %v7588_v54  ;;  %v636_v62 = vadd.f32 %v635_v34, %v7564_v9  ;;  %v662_v22 = vadd.f32 %v661_v57, %v7583_v6  ;;  %622 = vadd.xlane.f32.xlu0 %v621_v50 }
  0x7a   : > { %11358 = vst [vmem:[#allocation100_spill] sm:$0xff] %v7608_v3  ;;  %11359 = vst [vmem:[#allocation101_spill] sm:$0xff] %v7615_v61  ;;  %v7620_v53 = vld [vmem:[%s11102_s0 + $0x538] sm:$0xff]  ;;  %v7625_v8 = vld [vmem:[%s11102_s0 + $0x4e8] sm:$0xff]  ;;  %v813_v34 = vmul.f32 %v6824_v42, %v6824_v42  ;;  %v638_v57 = vsel %vm457_vm0, %v7596_v35, 0.0  ;;  %v1044_v26 = vadd.f32 %v1043_v56, %v811_v25  ;;  %v648_v54 = vadd.f32 %v647_v37, %v646_v52 }
  0x7b   : > { %11360 = vst [vmem:[#allocation102_spill] sm:$0xff] %v7625_v8  ;;  %v7637_v16 = vld [vmem:[%s11102_s0 + $0x578] sm:$0xff]  ;;  %v7642_v41 = vld [vmem:[%s11102_s0 + $0x580] sm:$0xff]  ;;  %v7647_v13 = vld [vmem:[%s11102_s0 + $0x588] sm:$0xff]  ;;  %v652_v42 = vadd.f32 %v651_v21, %v7608_v3  ;;  %v637_v6 = vadd.f32 %v636_v62, %v7578_v43  ;;  %v663_v9 = vadd.f32 %v662_v22, %v7615_v61  ;;  %v665_v35 = vsel %vm457_vm0, %v7620_v53, 0.0 }
  0x7c   : > { %11361 = vst [vmem:[#allocation103_spill] sm:$0xff] %v7637_v16  ;;  %11362 = vst [vmem:[#allocation104_spill] sm:$0xff] %v7642_v41  ;;  %v7656_v44 = vld [vmem:[%s11102_s0 + $0x530] sm:$0xff]  ;;  %v7666_v7 = vld [vmem:[%s11102_s0 + $0x500] sm:$0xff]  ;;  %v678_v50 = vadd.f32 %v7642_v41, %v7637_v16  ;;  %v1047_v16 = vsel %vm457_vm0, %v814_v5, 0.0  ;;  %649 = vadd.xlane.f32.xlu1 %v648_v54 }
  0x7d   : > { %11363 = vst [vmem:[#allocation105_spill] sm:$0xff] %v7647_v13  ;;  %v7661_v46 = vld [vmem:[%s11102_s0 + $0x4f0] sm:$0xff]  ;;  %11365 = vst [vmem:[#allocation107_spill] sm:$0xff] %v7666_v7  ;;  %v7678_v51 = vld [vmem:[%s11102_s0 + $0x4f8] sm:$0xff]  ;;  %v653_v62 = vadd.f32 %v652_v42, %v7625_v8  ;;  %v639_v8 = vadd.f32 %v638_v57, %v637_v6  ;;  %v664_v3 = vadd.f32 %v663_v9, %v7656_v44  ;;  %v656_v61 = vsel %vm457_vm0, %v7666_v7, 0.0 }
  0x7e   : > { %11364 = vst [vmem:[#allocation106_spill] sm:$0xff] %v7661_v46  ;;  %v7683_v21 = vld [vmem:[%s11102_s0 + $0x590] sm:$0xff]  ;;  %v7688_v37 = vld [vmem:[%s11102_s0 + $0x540] sm:$0xff]  ;;  %v7693_v22 = vld [vmem:[%s11102_s0 + $0x548] sm:$0xff]  ;;  %v679_v52 = vadd.f32 %v678_v50, %v7647_v13  ;;  %v1045_v6 = vadd.f32 %v1044_v26, %v812_v60  ;;  %v801_v60 = vmul.f32 %v6767_v4, %v6767_v4 }
  0x7f   : > { %11366 = vst [vmem:[#allocation108_spill] sm:$0xff] %v7683_v21  ;;  %11367 = vst [vmem:[#allocation109_spill] sm:$0xff] %v7688_v37  ;;  %v7699_v25 = vld [vmem:[%s11102_s0 + $0x598] sm:$0xff]  ;;  %v7704_v56 = vld [vmem:[%s11102_s0 + $0x5a8] sm:$0xff]  ;;  %v669_v42 = vadd.f32 %v7693_v22, %v7688_v37  ;;  %v654_v9 = vadd.f32 %v653_v62, %v7661_v46  ;;  %640 = vadd.xlane.f32.xlu0 %v639_v8  ;;  %v666_v62 = vadd.f32 %v665_v35, %v664_v3 }
  0x80   : > { %11368 = vst [vmem:[#allocation110_spill] sm:$0xff] %v7693_v22  ;;  %11369 = vst [vmem:[#allocation111_spill] sm:$0xff] %v7699_v25  ;;  %v7710_v41 = vld [vmem:[%s11102_s0 + $0x550] sm:$0xff]  ;;  %v7721_v50 = vld [vmem:[%s11102_s0 + $0x5a0] sm:$0xff]  ;;  %v680_v5 = vadd.f32 %v679_v52, %v7683_v21  ;;  %v683_v52 = vsel %vm457_vm0, %v7704_v56, 0.0  ;;  %v802_v35 = vmul.f32 %v6780_v17, %v6780_v17 }
  0x81   : > { %11370 = vst [vmem:[#allocation112_spill] sm:$0xff] %v7704_v56  ;;  %11371 = vst [vmem:[#allocation113_spill] sm:$0xff] %v7710_v41  ;;  %v7726_v13 = vld [vmem:[%s11102_s0 + $0x558] sm:$0xff]  ;;  %v7731_v54 = vld [vmem:[%s11102_s0 + $0x5e8] sm:$0xff]  ;;  %v670_v22 = vadd.f32 %v669_v42, %v7710_v41  ;;  %v655_v3 = vadd.f32 %v654_v9, %v7678_v51  ;;  %v1046_v9 = vadd.f32 %v1045_v6, %v813_v34  ;;  %667 = vadd.xlane.f32.xlu1 %v666_v62 }
  0x82   : > { %11372 = vst [vmem:[#allocation114_spill] sm:$0xff] %v7726_v13  ;;  %11373 = vst [vmem:[#allocation115_spill] sm:$0xff] %v7731_v54  ;;  %v7738_v57 = vld [vmem:[%s11102_s0 + $0x570] sm:$0xff]  ;;  %v7749_v26 = vld [vmem:[%s11102_s0 + $0x5f8] sm:$0xff]  ;;  %v681_v8 = vadd.f32 %v680_v5, %v7699_v25  ;;  %v803_v34 = vmul.f32 %v6785_v18, %v6785_v18  ;;  %v804_v18 = vmul.f32 %v6798_v24, %v6798_v24 }
  0x83   : > { %11374 = vst [vmem:[#allocation116_spill] sm:$0xff] %v7738_v57  ;;  %v7744_v37 = vld [vmem:[%s11102_s0 + $0x5f0] sm:$0xff]  ;;  %v7758_v42 = vld [vmem:[%s11102_s0 + $0x560] sm:$0xff]  ;;  %v7768_v21 = vld [vmem:[%s11102_s0 + $0x618] sm:$0xff]  ;;  %v671_v56 = vadd.f32 %v670_v22, %v7726_v13  ;;  %v674_v5 = vsel %vm457_vm0, %v7738_v57, 0.0  ;;  %v657_v6 = vadd.f32 %v656_v61, %v655_v3 }
  0x84   : > { %11375 = vst [vmem:[#allocation117_spill] sm:$0xff] %v7744_v37  ;;  %11376 = vst [vmem:[#allocation118_spill] sm:$0xff] %v7758_v42  ;;  %v7763_v41 = vld [vmem:[%s11102_s0 + $0x600] sm:$0xff]  ;;  %v696_v4 = vadd.f32 %v7744_v37, %v7731_v54  ;;  %v7780_v46 = vld [vmem:[%s11102_s0 + $0x5b0] sm:$0xff]  ;;  %v682_v62 = vadd.f32 %v681_v8, %v7721_v50  ;;  %v701_v3 = vsel %vm457_vm0, %v7768_v21, 0.0 }
  0x85   : > { %11377 = vst [vmem:[#allocation119_spill] sm:$0xff] %v7763_v41  ;;  %11378 = vst [vmem:[#allocation120_spill] sm:$0xff] %v7768_v21  ;;  %v7785_v7 = vld [vmem:[%s11102_s0 + $0x5b8] sm:$0xff]  ;;  %v7790_v17 = vld [vmem:[%s11102_s0 + $0x5c0] sm:$0xff]  ;;  %v672_v25 = vadd.f32 %v671_v56, %v7758_v42  ;;  %658 = vadd.xlane.f32.xlu0 %v657_v6 }
  0x86   : > { %11379 = vst [vmem:[#allocation121_spill] sm:$0xff] %v7780_v46  ;;  %11380 = vst [vmem:[#allocation122_spill] sm:$0xff] %v7785_v7  ;;  %v7795_v22 = vld [vmem:[%s11102_s0 + $0x568] sm:$0xff]  ;;  %v697_v54 = vadd.f32 %v696_v4, %v7749_v26  ;;  %v687_v13 = vadd.f32 %v7785_v7, %v7780_v46  ;;  %v7819_v4 = vld [vmem:[%s11102_s0 + $0x658] sm:$0xff] }
  0x87   : > { %11381 = vst [vmem:[#allocation123_spill] sm:$0xff] %v7790_v17  ;;  %11382 = vst [vmem:[#allocation124_spill] sm:$0xff] %v7795_v22  ;;  %v7802_v37 = vld [vmem:[%s11102_s0 + $0x608] sm:$0xff]  ;;  %v7824_v7 = vld [vmem:[%s11102_s0 + $0x660] sm:$0xff] }
  0x88   : > { %11383 = vst [vmem:[#allocation125_spill] sm:$0xff] %v7802_v37  ;;  %v7814_v57 = vld [vmem:[%s11102_s0 + $0x5c8] sm:$0xff]  ;;  %11385 = vst [vmem:[#allocation127_spill] sm:$0xff] %v7819_v4  ;;  %v7831_v61 = vld [vmem:[%s11102_s0 + $0x610] sm:$0xff]  ;;  %v698_v56 = vadd.f32 %v697_v54, %v7763_v41  ;;  %v688_v46 = vadd.f32 %v687_v13, %v7790_v17  ;;  %v714_v42 = vadd.f32 %v7824_v7, %v7819_v4 }
  0x89   : > { %11384 = vst [vmem:[#allocation126_spill] sm:$0xff] %v7814_v57  ;;  %11386 = vst [vmem:[#allocation128_spill] sm:$0xff] %v7824_v7  ;;  %v7839_v8 = vld [vmem:[%s11102_s0 + $0x5d0] sm:$0xff]  ;;  %v7845_v24 = vld [vmem:[%s11102_s0 + $0x668] sm:$0xff]  ;;  %v684_v54 = vadd.f32 %v683_v52, %v682_v62  ;;  %v673_v41 = vadd.f32 %v672_v25, %v7795_v22  ;;  %v7865_v7 = vadd.f32 %v1047_v16, %v1046_v9 }
  0x8a   : > { %11387 = vst [vmem:[#allocation129_spill] sm:$0xff] %v7831_v61  ;;  %11388 = vst [vmem:[#allocation130_spill] sm:$0xff] %v7839_v8  ;;  %v7853_v21 = vld [vmem:[%s11102_s0 + $0x5e0] sm:$0xff]  ;;  %v7858_v13 = vld [vmem:[%s11102_s0 + $0x670] sm:$0xff]  ;;  %v1033_v52 = vadd.f32 %v802_v35, %v801_v60  ;;  %v699_v25 = vadd.f32 %v698_v56, %v7802_v37  ;;  %v689_v62 = vadd.f32 %v688_v46, %v7814_v57 }
  0x8b   : > { %11389 = vst [vmem:[#allocation131_spill] sm:$0xff] %v7845_v24  ;;  %11390 = vst [vmem:[#allocation132_spill] sm:$0xff] %v7853_v21  ;;  %v7863_v17 = vld [vmem:[%s11102_s0 + $0x620] sm:$0xff]  ;;  %v7871_v6 = vld [vmem:[%s11102_s0 + $0x5d8] sm:$0xff]  ;;  %v715_v4 = vadd.f32 %v714_v42, %v7845_v24  ;;  %v805_v60 = vmul.f32 %v6831_v47, %v6831_v47  ;;  %685 = vadd.xlane.f32.xlu1 %v684_v54  ;;  %v675_v35 = vadd.f32 %v674_v5, %v673_v41 }
  0x8c   : > { %11391 = vst [vmem:[#allocation133_spill] sm:$0xff] %v7858_v13  ;;  %11392 = vst [vmem:[#allocation134_spill] sm:$0xff] %v7863_v17  ;;  %v7878_v22 = vld [vmem:[%s11102_s0 + $0x628] sm:$0xff]  ;;  %v7883_v16 = vld [vmem:[%s11102_s0 + $0x630] sm:$0xff]  ;;  %v806_v41 = vmul.f32 %v6861_v2, %v6861_v2  ;;  %v1034_v5 = vadd.f32 %v1033_v52, %v803_v34  ;;  %v700_v56 = vadd.f32 %v699_v25, %v7831_v61  ;;  %v692_v24 = vsel %vm457_vm0, %v7853_v21, 0.0 }
  0x8d   : > { %11393 = vst [vmem:[#allocation135_spill] sm:$0xff] %v7878_v22  ;;  %v7890_v46 = vld [vmem:[%s11102_s0 + $0x678] sm:$0xff]  ;;  %v7895_v42 = vld [vmem:[%s11102_s0 + $0x688] sm:$0xff]  ;;  %v705_v47 = vadd.f32 %v7878_v22, %v7863_v17  ;;  %v690_v54 = vadd.f32 %v689_v62, %v7839_v8  ;;  %v716_v57 = vadd.f32 %v715_v4, %v7858_v13  ;;  %v7919_v22 = vld [vmem:[%s11102_s0 + $0x6d0] sm:$0xff]  ;;  %676 = vadd.xlane.f32.xlu0 %v675_v35 }
  0x8e   : > { %v7900_v9 = vld [vmem:[%s11102_s0 + $0x638] sm:$0xff]  ;;  %v7914_v37 = vld [vmem:[%s11102_s0 + $0x6c8] sm:$0xff]  ;;  %11396 = vst [vmem:[#allocation138_spill] sm:$0xff] %v7919_v22  ;;  %v7929_v34 = vld [vmem:[%s11102_s0 + $0x680] sm:$0xff]  ;;  %v807_v62 = vmul.f32 %v6836_v48, %v6836_v48  ;;  %v1035_v17 = vadd.f32 %v1034_v5, %v804_v18  ;;  %v702_v35 = vadd.f32 %v701_v3, %v700_v56  ;;  %v719_v21 = vsel %vm457_vm0, %v7895_v42, 0.0 }
  0x8f   : > { %11394 = vst [vmem:[#allocation136_spill] sm:$0xff] %v7900_v9  ;;  %11395 = vst [vmem:[#allocation137_spill] sm:$0xff] %v7914_v37  ;;  %v7924_v2 = vld [vmem:[%s11102_s0 + $0x6d8] sm:$0xff]  ;;  %v7934_v4 = vld [vmem:[%s11102_s0 + $0x640] sm:$0xff]  ;;  %v706_v52 = vadd.f32 %v705_v47, %v7883_v16  ;;  %v732_v25 = vadd.f32 %v7919_v22, %v7914_v37  ;;  %v691_v13 = vadd.f32 %v690_v54, %v7871_v6 }
  0x90   : > { %11397 = vst [vmem:[#allocation139_spill] sm:$0xff] %v7924_v2  ;;  %11398 = vst [vmem:[#allocation140_spill] sm:$0xff] %v7929_v34  ;;  %v717_v8 = vadd.f32 %v716_v57, %v7890_v46  ;;  %v7948_v61 = vld [vmem:[%s11102_s0 + $0x6e0] sm:$0xff]  ;;  %v7953_v47 = vld [vmem:[%s11102_s0 + $0x690] sm:$0xff]  ;;  %v822_v22 = vmul.f32 %v6807_v38, %v6807_v38  ;;  %703 = vadd.xlane.f32.xlu1 %v702_v35  ;;  %v1036_v38 = vadd.f32 %v1035_v17, %v805_v60 }
  0x91   : > { %11399 = vst [vmem:[#allocation141_spill] sm:$0xff] %v7953_v47  ;;  %v7958_v48 = vld [vmem:[%s11102_s0 + $0x698] sm:$0xff]  ;;  %v7963_v57 = vld [vmem:[%s11102_s0 + $0x650] sm:$0xff]  ;;  %v707_v18 = vadd.f32 %v706_v52, %v7900_v9  ;;  %v733_v5 = vadd.f32 %v732_v25, %v7924_v2  ;;  %v7975_v56 = vld [vmem:[%s11102_s0 + $0x6a0] sm:$0xff]  ;;  %v693_v52 = vadd.f32 %v692_v24, %v691_v13  ;;  %v823_v24 = vmul.f32 %v6812_v39, %v6812_v39 }
  0x92   : > { %11400 = vst [vmem:[#allocation142_spill] sm:$0xff] %v7958_v48  ;;  %v7969_v3 = vld [vmem:[%s11102_s0 + $0x6f8] sm:$0xff]  ;;  %11402 = vst [vmem:[#allocation144_spill] sm:$0xff] %v7975_v56  ;;  %v723_v54 = vadd.f32 %v7958_v48, %v7953_v47  ;;  %v718_v37 = vadd.f32 %v717_v8, %v7929_v34  ;;  %v7985_v9 = vld [vmem:[%s11102_s0 + $0x648] sm:$0xff]  ;;  %v1038_v2 = vsel %vm457_vm0, %v807_v62, 0.0  ;;  %v710_v17 = vsel %vm457_vm0, %v7963_v57, 0.0 }
  0x93   : > { %11401 = vst [vmem:[#allocation143_spill] sm:$0xff] %v7969_v3  ;;  %11403 = vst [vmem:[#allocation145_spill] sm:$0xff] %v7985_v9  ;;  %v7990_v25 = vld [vmem:[%s11102_s0 + $0x6e8] sm:$0xff]  ;;  %v708_v8 = vadd.f32 %v707_v18, %v7934_v4  ;;  %v734_v13 = vadd.f32 %v733_v5, %v7948_v61  ;;  %v8004_v35 = vld [vmem:[%s11102_s0 + $0x6c0] sm:$0xff]  ;;  %694 = vadd.xlane.f32.xlu0 %v693_v52  ;;  %v737_v60 = vsel %vm457_vm0, %v7969_v3, 0.0 }
  0x94   : > { %11404 = vst [vmem:[#allocation146_spill] sm:$0xff] %v7990_v25  ;;  %v7995_v48 = vld [vmem:[%s11102_s0 + $0x6a8] sm:$0xff]  ;;  %11406 = vst [vmem:[#allocation148_spill] sm:$0xff] %v8004_v35  ;;  %v724_v47 = vadd.f32 %v723_v54, %v7975_v56  ;;  %v720_v34 = vadd.f32 %v719_v21, %v718_v37  ;;  %v8013_v39 = vld [vmem:[%s11102_s0 + $0x6f0] sm:$0xff]  ;;  %v824_v62 = vmul.f32 %v6817_v40, %v6817_v40  ;;  %v728_v3 = vsel %vm457_vm0, %v8004_v35, 0.0 }
  0x95   : > { %11405 = vst [vmem:[#allocation147_spill] sm:$0xff] %v7995_v48  ;;  %v8020_v18 = vld [vmem:[%s11102_s0 + $0x6b0] sm:$0xff]  ;;  %v709_v21 = vadd.f32 %v708_v8, %v7985_v9  ;;  %v735_v37 = vadd.f32 %v734_v13, %v7990_v25  ;;  %v1037_v54 = vadd.f32 %v1036_v38, %v806_v41  ;;  %v8030_v52 = vld [vmem:[%s11102_s0 + $0x6b8] sm:$0xff]  ;;  %v825_v56 = vmul.f32 %v6845_v63, %v6845_v63  ;;  %v11410_v63 = vld [vmem:[#allocation7_spill] sm:$0xff] }
  0x96   : > { %11407 = vst [vmem:[#allocation149_spill] sm:$0xff] %v8020_v18  ;;  %v725_v5 = vadd.f32 %v724_v47, %v7995_v48  ;;  %721 = vadd.xlane.f32.xlu1 %v720_v34  ;;  %v1060_v40 = vadd.f32 %v823_v24, %v822_v22  ;;  %v815_v8 = vmul.f32 %v6850_v0, %v6850_v0  ;;  %v11408_v34 = vld [vmem:[#allocation6_spill] sm:$0xff]  ;;  %v11409_v25 = vld [vmem:[#allocation8_spill] sm:$0xff] }
  0x97   : > { %v711_v13 = vadd.f32 %v710_v17, %v709_v21  ;;  %v736_v47 = vadd.f32 %v735_v37, %v8013_v39  ;;  %v816_v38 = vmul.f32 %v11408_v34, %v11408_v34  ;;  %v826_v48 = vmul.f32 %v6867_v10, %v6867_v10 }
  0x98   : > { %v726_v41 = vadd.f32 %v725_v5, %v8020_v18  ;;  %v828_v35 = vmul.f32 %v11409_v25, %v11409_v25  ;;  %v1061_v9 = vadd.f32 %v1060_v40, %v824_v62  ;;  %v817_v22 = vmul.f32 %v11410_v63, %v11410_v63  ;;  %v11411_v5 = vld [vmem:[#allocation9_spill] sm:$0xff]  ;;  %v11412_v18 = vld [vmem:[#allocation10_spill] sm:$0xff]  ;;  %v11413_v40 = vld [vmem:[#allocation11_spill] sm:$0xff] }
  0x99   : > { %712 = vadd.xlane.f32.xlu0 %v711_v13  ;;  %v738_v0 = vadd.f32 %v737_v60, %v736_v47  ;;  %v8049_v17 = vadd.f32 %v1038_v2, %v1037_v54  ;;  %v827_v21 = vmul.f32 %v6917_v59, %v6917_v59  ;;  %v818_v10 = vmul.f32 %v11411_v5, %v11411_v5  ;;  %v11414_v13 = vld [vmem:[#allocation12_spill] sm:$0xff]  ;;  %v11415_v54 = vld [vmem:[#allocation13_spill] sm:$0xff] }
  0x9a   : > { %v727_v24 = vadd.f32 %v726_v41, %v8030_v52  ;;  %v1062_v37 = vadd.f32 %v1061_v9, %v825_v56  ;;  %v1051_v34 = vadd.f32 %v816_v38, %v815_v8  ;;  %v836_v25 = vmul.f32 %v11412_v18, %v11412_v18  ;;  %v11416_v56 = vld [vmem:[#allocation14_spill] sm:$0xff]  ;;  %v11417_v18 = vld [vmem:[#allocation15_spill] sm:$0xff] }
  0x9b   : > { %739 = vadd.xlane.f32.xlu1 %v738_v0  ;;  %v821_v60 = vmul.f32 %v11413_v40, %v11413_v40  ;;  %v837_v2 = vmul.f32 %v11414_v13, %v11414_v13  ;;  %v838_v47 = vmul.f32 %v11415_v54, %v11415_v54  ;;  %v1065_v9 = vsel %vm457_vm0, %v828_v35, 0.0  ;;  %v11418_v0 = vld [vmem:[#allocation16_spill] sm:$0xff] }
  0x9c   : > { %v729_v62 = vadd.f32 %v728_v3, %v727_v24  ;;  %v1063_v59 = vadd.f32 %v1062_v37, %v826_v48  ;;  %v819_v8 = vmul.f32 %v11416_v56, %v11416_v56  ;;  %v1052_v41 = vadd.f32 %v1051_v34, %v817_v22  ;;  %v11419_v48 = vld [vmem:[#allocation20_spill] sm:$0xff]  ;;  %v11420_v37 = vld [vmem:[#allocation17_spill] sm:$0xff] }
  0x9d   : > { %v820_v3 = vmul.f32 %v6956_v12, %v6956_v12  ;;  %v839_v38 = vmul.f32 %v11417_v18, %v11417_v18  ;;  %v1078_v63 = vadd.f32 %v837_v2, %v836_v25  ;;  %v829_v24 = vmul.f32 %v11418_v0, %v11418_v0  ;;  %v11421_v12 = vld [vmem:[#allocation19_spill] sm:$0xff]  ;;  %v11422_v25 = vld [vmem:[#allocation18_spill] sm:$0xff]  ;;  %v11424_v56 = vld [vmem:[#allocation24_spill] sm:$0xff] }
  0x9e   : > { %730 = vadd.xlane.f32.xlu0 %v729_v62  ;;  %v1064_v5 = vadd.f32 %v1063_v59, %v827_v21  ;;  %v1053_v40 = vadd.f32 %v1052_v41, %v818_v10  ;;  %v842_v35 = vmul.f32 %v11419_v48, %v11419_v48  ;;  %v830_v13 = vmul.f32 %v11420_v37, %v11420_v37  ;;  %v11423_v10 = vld [vmem:[#allocation21_spill] sm:$0xff]  ;;  %v11425_v18 = vld [vmem:[#allocation22_spill] sm:$0xff] }
  0x9f   : > { %1013 = vadd.xlane.f32.xlu1 %v7075_v32  ;;  %v1056_v22 = vsel %vm457_vm0, %v821_v60, 0.0  ;;  %v840_v34 = vmul.f32 %v11421_v12, %v11421_v12  ;;  %v1079_v62 = vadd.f32 %v1078_v63, %v838_v47  ;;  %v831_v2 = vmul.f32 %v11422_v25, %v11422_v25  ;;  %v11426_v63 = vld [vmem:[#allocation23_spill] sm:$0xff]  ;;  %v11427_v48 = vld [vmem:[#allocation25_spill] sm:$0xff] }
  0xa0   : > { %v1054_v54 = vadd.f32 %v1053_v40, %v819_v8  ;;  %v841_v21 = vmul.f32 %v6978_v27, %v6978_v27  ;;  %v832_v59 = vmul.f32 %v11423_v10, %v11423_v10  ;;  %v835_v41 = vmul.f32 %v11424_v56, %v11424_v56  ;;  %v11430_v10 = vld [vmem:[#allocation31_spill] sm:$0xff]  ;;  %v11433_v56 = vld [vmem:[#allocation37_spill] sm:$0xff] }
  0xa1   : > { %v1080_v32 = vadd.f32 %v1079_v62, %v839_v38  ;;  %v1069_v60 = vadd.f32 %v830_v13, %v829_v24  ;;  %v850_v47 = vmul.f32 %v11425_v18, %v11425_v18  ;;  %v851_v0 = vmul.f32 %v11426_v63, %v11426_v63  ;;  %v11428_v62 = vld [vmem:[#allocation26_spill] sm:$0xff] }
  0xa2   : > { %1004 = vadd.xlane.f32.xlu0 %v7095_v30  ;;  %v1066_v8 = vadd.f32 %v1065_v9, %v1064_v5  ;;  %v1083_v40 = vsel %vm457_vm0, %v842_v35, 0.0  ;;  %v833_v27 = vmul.f32 %v7000_v20, %v7000_v20  ;;  %v852_v37 = vmul.f32 %v11427_v48, %v11427_v48  ;;  %v11429_v35 = vld [vmem:[#allocation27_spill] sm:$0xff] }
  0xa3   : > { %1031 = vadd.xlane.f32.xlu1 %v7474_v14  ;;  %v1055_v30 = vadd.f32 %v1054_v54, %v820_v3  ;;  %v1081_v38 = vadd.f32 %v1080_v32, %v840_v34  ;;  %v834_v24 = vmul.f32 %v7020_v36, %v7020_v36  ;;  %v1070_v13 = vadd.f32 %v1069_v60, %v831_v2  ;;  %v11431_v3 = vld [vmem:[#allocation28_spill] sm:$0xff]  ;;  %v11432_v36 = vld [vmem:[#allocation29_spill] sm:$0xff]  ;;  %v11434_v60 = vld [vmem:[#allocation30_spill] sm:$0xff] }
  0xa4   : > { %v1074_v12 = vsel %vm457_vm0, %v835_v41, 0.0  ;;  %v853_v9 = vmul.f32 %v11428_v62, %v11428_v62  ;;  %v1096_v5 = vadd.f32 %v851_v0, %v850_v47  ;;  %v843_v20 = vmul.f32 %v11429_v35, %v11429_v35  ;;  %v11435_v47 = vld [vmem:[#allocation32_spill] sm:$0xff]  ;;  %v11436_v0 = vld [vmem:[#allocation33_spill] sm:$0xff]  ;;  %v11438_v35 = vld [vmem:[#allocation35_spill] sm:$0xff] }
  0xa5   : > { %v1071_v25 = vadd.f32 %v1070_v13, %v832_v59  ;;  %v854_v14 = vmul.f32 %v11430_v10, %v11430_v10  ;;  %v856_v34 = vmul.f32 %v11431_v3, %v11431_v3  ;;  %v844_v2 = vmul.f32 %v11432_v36, %v11432_v36 }
  0xa6   : > { %1022 = vadd.xlane.f32.xlu0 %v7532_v55  ;;  %v1082_v54 = vadd.f32 %v1081_v38, %v841_v21  ;;  %v855_v41 = vmul.f32 %v11433_v56, %v11433_v56  ;;  %v1097_v32 = vadd.f32 %v1096_v5, %v852_v37  ;;  %v845_v18 = vmul.f32 %v11434_v60, %v11434_v60  ;;  %v11437_v21 = vld [vmem:[#allocation34_spill] sm:$0xff] }
  0xa7   : > { %1049 = vadd.xlane.f32.xlu1 %v7865_v7  ;;  %v1057_v55 = vadd.f32 %v1056_v22, %v1055_v30  ;;  %v1072_v59 = vadd.f32 %v1071_v25, %v833_v27  ;;  %v846_v63 = vmul.f32 %v11435_v47, %v11435_v47  ;;  %v849_v48 = vmul.f32 %v11436_v0, %v11436_v0  ;;  %v11439_v22 = vld [vmem:[#allocation38_spill] sm:$0xff]  ;;  %v11440_v30 = vld [vmem:[#allocation36_spill] sm:$0xff]  ;;  %v11446_v0 = vld [vmem:[#allocation43_spill] sm:$0xff] }
  0xa8   : > { %v1098_v13 = vadd.f32 %v1097_v32, %v853_v9  ;;  %v1087_v62 = vadd.f32 %v844_v2, %v843_v20  ;;  %v864_v38 = vmul.f32 %v11437_v21, %v11437_v21  ;;  %v865_v37 = vmul.f32 %v11438_v35, %v11438_v35  ;;  %v11441_v2 = vld [vmem:[#allocation39_spill] sm:$0xff] }
  0xa9   : > { %v1073_v5 = vadd.f32 %v1072_v59, %v834_v24  ;;  %v1101_v7 = vsel %vm457_vm0, %v856_v34, 0.0  ;;  %v847_v27 = vmul.f32 %v11439_v22, %v11439_v22  ;;  %v866_v25 = vmul.f32 %v11440_v30, %v11440_v30  ;;  %v11442_v34 = vld [vmem:[#allocation40_spill] sm:$0xff] }
  0xaa   : > { %1040 = vadd.xlane.f32.xlu0 %v8049_v17  ;;  %v1084_v10 = vadd.f32 %v1083_v40, %v1082_v54  ;;  %v1099_v9 = vadd.f32 %v1098_v13, %v854_v14  ;;  %v848_v20 = vmul.f32 %v7136_v1, %v7136_v1  ;;  %v1088_v3 = vadd.f32 %v1087_v62, %v845_v18  ;;  %v11443_v59 = vld [vmem:[#allocation44_spill] sm:$0xff]  ;;  %v11444_v14 = vld [vmem:[#allocation41_spill] sm:$0xff] }
  0xab   : > { %1067 = vadd.xlane.f32.xlu1 %v1066_v8  ;;  %v1092_v36 = vsel %vm457_vm0, %v849_v48, 0.0  ;;  %v867_v17 = vmul.f32 %v11441_v2, %v11441_v2  ;;  %v1114_v24 = vadd.f32 %v865_v37, %v864_v38  ;;  %v857_v56 = vmul.f32 %v11442_v34, %v11442_v34  ;;  %v11445_v8 = vld [vmem:[#allocation42_spill] sm:$0xff]  ;;  %v11449_v37 = vld [vmem:[#allocation47_spill] sm:$0xff] }
  0xac   : > { %v1100_v32 = vadd.f32 %v1099_v9, %v855_v41  ;;  %v1089_v60 = vadd.f32 %v1088_v3, %v846_v63  ;;  %v870_v40 = vmul.f32 %v11443_v59, %v11443_v59  ;;  %v858_v54 = vmul.f32 %v11444_v14, %v11444_v14  ;;  %v11447_v63 = vld [vmem:[#allocation45_spill] sm:$0xff]  ;;  %v11452_v34 = vld [vmem:[#allocation50_spill] sm:$0xff]  ;;  %v11454_v59 = vld [vmem:[#allocation51_spill] sm:$0xff] }
  0xad   : > { %v1075_v1 = vadd.f32 %v1074_v12, %v1073_v5  ;;  %v868_v18 = vmul.f32 %v11445_v8, %v11445_v8  ;;  %v1115_v47 = vadd.f32 %v1114_v24, %v866_v25  ;;  %v859_v48 = vmul.f32 %v11446_v0, %v11446_v0  ;;  %v11450_v25 = vld [vmem:[#allocation48_spill] sm:$0xff]  ;;  %v11455_v14 = vld [vmem:[#allocation53_spill] sm:$0xff]  ;;  %v11457_v0 = vld [vmem:[#allocation54_spill] sm:$0xff] }
  0xae   : > { %1058 = vadd.xlane.f32.xlu0 %v1057_v55  ;;  %v1102_v13 = vadd.f32 %v1101_v7, %v1100_v32  ;;  %v1090_v62 = vadd.f32 %v1089_v60, %v847_v27  ;;  %v869_v41 = vmul.f32 %v7177_v19, %v7177_v19  ;;  %v860_v21 = vmul.f32 %v11447_v63, %v11447_v63  ;;  %v11448_v55 = vld [vmem:[#allocation46_spill] sm:$0xff] }
  0xaf   : > { %1085 = vadd.xlane.f32.xlu1 %v1084_v10  ;;  %v1116_v38 = vadd.f32 %v1115_v47, %v867_v17  ;;  %v1105_v35 = vadd.f32 %v858_v54, %v857_v56  ;;  %v878_v12 = vmul.f32 %v11448_v55, %v11448_v55  ;;  %v879_v5 = vmul.f32 %v11449_v37, %v11449_v37  ;;  %v11451_v17 = vld [vmem:[#allocation49_spill] sm:$0xff]  ;;  %v11453_v32 = vld [vmem:[#allocation58_spill] sm:$0xff] }
  0xb0   : > { %v1091_v22 = vadd.f32 %v1090_v62, %v848_v20  ;;  %v1119_v30 = vsel %vm457_vm0, %v870_v40, 0.0  ;;  %v863_v7 = vmul.f32 %v7201_v28, %v7201_v28  ;;  %v880_v19 = vmul.f32 %v7189_v45, %v7189_v45 }
  0xb1   : > { %v1117_v27 = vadd.f32 %v1116_v38, %v868_v18  ;;  %v861_v10 = vmul.f32 %v11450_v25, %v11450_v25  ;;  %v862_v9 = vmul.f32 %v7237_v49, %v7237_v49  ;;  %v1106_v3 = vadd.f32 %v1105_v35, %v859_v48  ;;  %v11460_v35 = vld [vmem:[#allocation57_spill] sm:$0xff] }
  0xb2   : > { %1076 = vadd.xlane.f32.xlu0 %v1075_v1  ;;  %v1093_v2 = vadd.f32 %v1092_v36, %v1091_v22  ;;  %v881_v20 = vmul.f32 %v11451_v17, %v11451_v17  ;;  %v1132_v24 = vadd.f32 %v879_v5, %v878_v12  ;;  %v871_v28 = vmul.f32 %v11452_v34, %v11452_v34  ;;  %v11456_v1 = vld [vmem:[#allocation52_spill] sm:$0xff]  ;;  %v11461_v5 = vld [vmem:[#allocation61_spill] sm:$0xff]  ;;  %v11464_v17 = vld [vmem:[#allocation62_spill] sm:$0xff] }
  0xb3   : > { %1103 = vadd.xlane.f32.xlu1 %v1102_v13  ;;  %v1118_v56 = vadd.f32 %v1117_v27, %v869_v41  ;;  %v1107_v45 = vadd.f32 %v1106_v3, %v860_v21  ;;  %v884_v60 = vmul.f32 %v11453_v32, %v11453_v32  ;;  %v872_v40 = vmul.f32 %v11454_v59, %v11454_v59  ;;  %v11458_v13 = vld [vmem:[#allocation55_spill] sm:$0xff]  ;;  %v11459_v21 = vld [vmem:[#allocation56_spill] sm:$0xff] }
  0xb4   : > { %v1110_v49 = vsel %vm457_vm0, %v863_v7, 0.0  ;;  %v882_v36 = vmul.f32 %v11455_v14, %v11455_v14  ;;  %v1133_v54 = vadd.f32 %v1132_v24, %v880_v19  ;;  %v873_v8 = vmul.f32 %v11456_v1, %v11456_v1  ;;  %v11463_v27 = vld [vmem:[#allocation59_spill] sm:$0xff]  ;;  %v11466_v32 = vld [vmem:[#allocation64_spill] sm:$0xff] }
  0xb5   : > { %v1120_v18 = vadd.f32 %v1119_v30, %v1118_v56  ;;  %v1108_v47 = vadd.f32 %v1107_v45, %v861_v10  ;;  %v883_v48 = vmul.f32 %v11457_v0, %v11457_v0  ;;  %v874_v62 = vmul.f32 %v11458_v13, %v11458_v13  ;;  %v11462_v30 = vld [vmem:[#allocation60_spill] sm:$0xff]  ;;  %v11465_v24 = vld [vmem:[#allocation63_spill] sm:$0xff] }
  0xb6   : > { %1094 = vadd.xlane.f32.xlu0 %v1093_v2  ;;  %v1134_v41 = vadd.f32 %v1133_v54, %v881_v20  ;;  %v1123_v63 = vadd.f32 %v872_v40, %v871_v28  ;;  %v892_v38 = vmul.f32 %v11459_v21, %v11459_v21  ;;  %v893_v55 = vmul.f32 %v11460_v35, %v11460_v35  ;;  %v11469_v0 = vld [vmem:[#allocation67_spill] sm:$0xff]  ;;  %v11470_v13 = vld [vmem:[#allocation68_spill] sm:$0xff] }
  0xb7   : > { %1121 = vadd.xlane.f32.xlu1 %v1120_v18  ;;  %v1109_v12 = vadd.f32 %v1108_v47, %v862_v9  ;;  %v1137_v37 = vsel %vm457_vm0, %v884_v60, 0.0  ;;  %v877_v22 = vmul.f32 %v11461_v5, %v11461_v5  ;;  %v894_v7 = vmul.f32 %v11462_v30, %v11462_v30 }
  0xb8   : > { %v1135_v19 = vadd.f32 %v1134_v41, %v882_v36  ;;  %v875_v25 = vmul.f32 %v11463_v27, %v11463_v27  ;;  %v876_v10 = vmul.f32 %v7316_v11, %v7316_v11  ;;  %v1124_v3 = vadd.f32 %v1123_v63, %v873_v8  ;;  %v11468_v8 = vld [vmem:[#allocation66_spill] sm:$0xff]  ;;  %v11471_v63 = vld [vmem:[#allocation71_spill] sm:$0xff] }
  0xb9   : > { %v1111_v2 = vadd.f32 %v1110_v49, %v1109_v12  ;;  %v895_v9 = vmul.f32 %v11464_v17, %v11464_v17  ;;  %v1150_v20 = vadd.f32 %v893_v55, %v892_v38  ;;  %v885_v34 = vmul.f32 %v11465_v24, %v11465_v24  ;;  %v11467_v49 = vld [vmem:[#allocation65_spill] sm:$0xff]  ;;  %v11473_v55 = vld [vmem:[#allocation70_spill] sm:$0xff] }
  0xba   : > { %v1136_v28 = vadd.f32 %v1135_v19, %v883_v48  ;;  %v1125_v56 = vadd.f32 %v1124_v3, %v874_v62  ;;  %v898_v45 = vmul.f32 %v7342_v33, %v7342_v33  ;;  %v886_v60 = vmul.f32 %v11466_v32, %v11466_v32  ;;  %v11472_v38 = vld [vmem:[#allocation69_spill] sm:$0xff]  ;;  %v11480_v32 = vld [vmem:[#allocation78_spill] sm:$0xff] }
  0xbb   : > { %1112 = vadd.xlane.f32.xlu0 %v1111_v2  ;;  %v1128_v11 = vsel %vm457_vm0, %v877_v22, 0.0  ;;  %v896_v59 = vmul.f32 %v7337_v58, %v7337_v58  ;;  %v1151_v40 = vadd.f32 %v1150_v20, %v894_v7  ;;  %v887_v14 = vmul.f32 %v11467_v49, %v11467_v49  ;;  %v11475_v7 = vld [vmem:[#allocation73_spill] sm:$0xff]  ;;  %v11478_v20 = vld [vmem:[#allocation75_spill] sm:$0xff] }
  0xbc   : > { %v1138_v36 = vadd.f32 %v1137_v37, %v1136_v28  ;;  %v1126_v54 = vadd.f32 %v1125_v56, %v875_v25  ;;  %v897_v1 = vmul.f32 %v7375_v29, %v7375_v29  ;;  %v888_v33 = vmul.f32 %v11468_v8, %v11468_v8  ;;  %v11474_v37 = vld [vmem:[#allocation72_spill] sm:$0xff]  ;;  %v11476_v25 = vld [vmem:[#allocation74_spill] sm:$0xff]  ;;  %v11477_v17 = vld [vmem:[#allocation77_spill] sm:$0xff] }
  0xbd   : > { %v1152_v18 = vadd.f32 %v1151_v40, %v895_v9  ;;  %v1141_v47 = vadd.f32 %v886_v60, %v885_v34  ;;  %v906_v48 = vmul.f32 %v11469_v0, %v11469_v0  ;;  %v907_v58 = vmul.f32 %v11470_v13, %v11470_v13  ;;  %v11479_v28 = vld [vmem:[#allocation76_spill] sm:$0xff]  ;;  %v11481_v49 = vld [vmem:[#allocation79_spill] sm:$0xff] }
  0xbe   : > { %1139 = vadd.xlane.f32.xlu1 %v1138_v36  ;;  %v1127_v62 = vadd.f32 %v1126_v54, %v876_v10  ;;  %v1155_v41 = vsel %vm457_vm0, %v898_v45, 0.0  ;;  %v891_v21 = vmul.f32 %v11471_v63, %v11471_v63  ;;  %v908_v29 = vmul.f32 %v11472_v38, %v11472_v38 }
  0xbf   : > { %v1153_v35 = vadd.f32 %v1152_v18, %v896_v59  ;;  %v889_v12 = vmul.f32 %v11473_v55, %v11473_v55  ;;  %v890_v5 = vmul.f32 %v11474_v37, %v11474_v37  ;;  %v1142_v22 = vadd.f32 %v1141_v47, %v887_v14 }
  0xc0   : > { %v1129_v30 = vadd.f32 %v1128_v11, %v1127_v62  ;;  %v909_v19 = vmul.f32 %v11475_v7, %v11475_v7  ;;  %v1168_v27 = vadd.f32 %v907_v58, %v906_v48  ;;  %v899_v10 = vmul.f32 %v11476_v25, %v11476_v25  ;;  %v11484_v48 = vld [vmem:[#allocation81_spill] sm:$0xff]  ;;  %v11489_v7 = vld [vmem:[#allocation86_spill] sm:$0xff] }
  0xc1   : > { %v1154_v3 = vadd.f32 %v1153_v35, %v897_v1  ;;  %v1143_v2 = vadd.f32 %v1142_v22, %v888_v33  ;;  %v912_v9 = vmul.f32 %v11477_v17, %v11477_v17  ;;  %v900_v24 = vmul.f32 %v11478_v20, %v11478_v20  ;;  %v11482_v1 = vld [vmem:[#allocation80_spill] sm:$0xff]  ;;  %v11483_v33 = vld [vmem:[#allocation82_spill] sm:$0xff]  ;;  %v11492_v20 = vld [vmem:[#allocation93_spill] sm:$0xff] }
  0xc2   : > { %1130 = vadd.xlane.f32.xlu0 %v1129_v30  ;;  %v1146_v34 = vsel %vm457_vm0, %v891_v21, 0.0  ;;  %v910_v56 = vmul.f32 %v11479_v28, %v11479_v28  ;;  %v1169_v45 = vadd.f32 %v1168_v27, %v908_v29  ;;  %v901_v60 = vmul.f32 %v11480_v32, %v11480_v32  ;;  %v11486_v29 = vld [vmem:[#allocation83_spill] sm:$0xff]  ;;  %v11488_v30 = vld [vmem:[#allocation84_spill] sm:$0xff]  ;;  %v11490_v27 = vld [vmem:[#allocation89_spill] sm:$0xff] }
  0xc3   : > { %v1156_v11 = vadd.f32 %v1155_v41, %v1154_v3  ;;  %v1144_v59 = vadd.f32 %v1143_v2, %v889_v12  ;;  %v911_v40 = vmul.f32 %v7442_v15, %v7442_v15  ;;  %v902_v14 = vmul.f32 %v11481_v49, %v11481_v49  ;;  %v11485_v41 = vld [vmem:[#allocation88_spill] sm:$0xff]  ;;  %v11487_v12 = vld [vmem:[#allocation85_spill] sm:$0xff]  ;;  %v11491_v3 = vld [vmem:[#allocation87_spill] sm:$0xff] }
  0xc4   : > { %v1170_v36 = vadd.f32 %v1169_v45, %v909_v19  ;;  %v1159_v54 = vadd.f32 %v900_v24, %v899_v10  ;;  %v920_v8 = vmul.f32 %v11482_v1, %v11482_v1  ;;  %v921_v18 = vmul.f32 %v11483_v33, %v11483_v33  ;;  %v11494_v32 = vld [vmem:[#allocation91_spill] sm:$0xff]  ;;  %v11498_v33 = vld [vmem:[#allocation94_spill] sm:$0xff] }
  0xc5   : > { %1157 = vadd.xlane.f32.xlu1 %v1156_v11  ;;  %v1145_v47 = vadd.f32 %v1144_v59, %v890_v5  ;;  %v1173_v0 = vsel %vm457_vm0, %v912_v9, 0.0  ;;  %v905_v13 = vmul.f32 %v11484_v48, %v11484_v48  ;;  %v922_v15 = vmul.f32 %v7471_v23, %v7471_v23  ;;  %v11495_v11 = vld [vmem:[#allocation92_spill] sm:$0xff] }
  0xc6   : > { %v1171_v58 = vadd.f32 %v1170_v36, %v910_v56  ;;  %v903_v62 = vmul.f32 %v7481_v31, %v7481_v31  ;;  %v904_v63 = vmul.f32 %v11485_v41, %v11485_v41  ;;  %v1160_v21 = vadd.f32 %v1159_v54, %v901_v60  ;;  %v11497_v54 = vld [vmem:[#allocation95_spill] sm:$0xff] }
  0xc7   : > { %v1147_v38 = vadd.f32 %v1146_v34, %v1145_v47  ;;  %v923_v35 = vmul.f32 %v11486_v29, %v11486_v29  ;;  %v1186_v55 = vadd.f32 %v921_v18, %v920_v8  ;;  %v913_v37 = vmul.f32 %v11487_v12, %v11487_v12  ;;  %v11493_v34 = vld [vmem:[#allocation90_spill] sm:$0xff]  ;;  %v11501_v29 = vld [vmem:[#allocation99_spill] sm:$0xff] }
  0xc8   : > { %v1172_v5 = vadd.f32 %v1171_v58, %v911_v40  ;;  %v1161_v22 = vadd.f32 %v1160_v21, %v902_v14  ;;  %v926_v23 = vmul.f32 %v11488_v30, %v11488_v30  ;;  %v914_v31 = vmul.f32 %v11489_v7, %v11489_v7  ;;  %v11496_v14 = vld [vmem:[#allocation98_spill] sm:$0xff] }
  0xc9   : > { %1148 = vadd.xlane.f32.xlu0 %v1147_v38  ;;  %v1164_v19 = vsel %vm457_vm0, %v905_v13, 0.0  ;;  %v924_v25 = vmul.f32 %v11490_v27, %v11490_v27  ;;  %v1187_v10 = vadd.f32 %v1186_v55, %v922_v15  ;;  %v915_v2 = vmul.f32 %v11491_v3, %v11491_v3  ;;  %v11499_v13 = vld [vmem:[#allocation96_spill] sm:$0xff]  ;;  %v11502_v55 = vld [vmem:[#allocation101_spill] sm:$0xff] }
  0xca   : > { %v1174_v17 = vadd.f32 %v1173_v0, %v1172_v5  ;;  %v1162_v9 = vadd.f32 %v1161_v22, %v903_v62  ;;  %v925_v24 = vmul.f32 %v11492_v20, %v11492_v20  ;;  %v916_v28 = vmul.f32 %v11493_v34, %v11493_v34  ;;  %v11500_v62 = vld [vmem:[#allocation97_spill] sm:$0xff]  ;;  %v11503_v5 = vld [vmem:[#allocation100_spill] sm:$0xff]  ;;  %v11507_v20 = vld [vmem:[#allocation107_spill] sm:$0xff] }
  0xcb   : > { %v1188_v56 = vadd.f32 %v1187_v10, %v923_v35  ;;  %v1177_v45 = vadd.f32 %v914_v31, %v913_v37  ;;  %v934_v60 = vmul.f32 %v11494_v32, %v11494_v32  ;;  %v935_v59 = vmul.f32 %v11495_v11, %v11495_v11  ;;  %v11504_v31 = vld [vmem:[#allocation102_spill] sm:$0xff]  ;;  %v11506_v3 = vld [vmem:[#allocation104_spill] sm:$0xff]  ;;  %v11508_v34 = vld [vmem:[#allocation105_spill] sm:$0xff] }
  0xcc   : > { %1175 = vadd.xlane.f32.xlu1 %v1174_v17  ;;  %v1163_v40 = vadd.f32 %v1162_v9, %v904_v63  ;;  %v1191_v49 = vsel %vm457_vm0, %v926_v23, 0.0  ;;  %v919_v36 = vmul.f32 %v11496_v14, %v11496_v14  ;;  %v936_v1 = vmul.f32 %v11497_v54, %v11497_v54  ;;  %v11511_v14 = vld [vmem:[#allocation109_spill] sm:$0xff] }
  0xcd   : > { %v1189_v8 = vadd.f32 %v1188_v56, %v924_v25  ;;  %v917_v18 = vmul.f32 %v11498_v33, %v11498_v33  ;;  %v918_v47 = vmul.f32 %v7578_v43, %v7578_v43  ;;  %v1178_v0 = vadd.f32 %v1177_v45, %v915_v2  ;;  %v11505_v25 = vld [vmem:[#allocation103_spill] sm:$0xff]  ;;  %v11509_v56 = vld [vmem:[#allocation106_spill] sm:$0xff] }
  0xce   : > { %v1165_v48 = vadd.f32 %v1164_v19, %v1163_v40  ;;  %v937_v15 = vmul.f32 %v11499_v13, %v11499_v13  ;;  %v1204_v58 = vadd.f32 %v935_v59, %v934_v60  ;;  %v927_v41 = vmul.f32 %v11500_v62, %v11500_v62  ;;  %v11510_v59 = vld [vmem:[#allocation108_spill] sm:$0xff] }
  0xcf   : > { %v1190_v63 = vadd.f32 %v1189_v8, %v925_v24  ;;  %v1179_v21 = vadd.f32 %v1178_v0, %v916_v28  ;;  %v940_v38 = vmul.f32 %v7620_v53, %v7620_v53  ;;  %v928_v35 = vmul.f32 %v11501_v29, %v11501_v29  ;;  %v11512_v8 = vld [vmem:[#allocation112_spill] sm:$0xff]  ;;  %v11514_v0 = vld [vmem:[#allocation111_spill] sm:$0xff] }
  0xd0   : > { %1166 = vadd.xlane.f32.xlu0 %v1165_v48  ;;  %v1182_v43 = vsel %vm457_vm0, %v919_v36, 0.0  ;;  %v938_v12 = vmul.f32 %v11502_v55, %v11502_v55  ;;  %v1205_v37 = vadd.f32 %v1204_v58, %v936_v1  ;;  %v929_v22 = vmul.f32 %v11503_v5, %v11503_v5 }
  0xd1   : > { %v1192_v30 = vadd.f32 %v1191_v49, %v1190_v63  ;;  %v1180_v23 = vadd.f32 %v1179_v21, %v917_v18  ;;  %v939_v7 = vmul.f32 %v7656_v44, %v7656_v44  ;;  %v930_v53 = vmul.f32 %v11504_v31, %v11504_v31  ;;  %v11513_v18 = vld [vmem:[#allocation110_spill] sm:$0xff] }
  0xd2   : > { %v1206_v19 = vadd.f32 %v1205_v37, %v937_v15  ;;  %v1195_v27 = vadd.f32 %v928_v35, %v927_v41  ;;  %v948_v10 = vmul.f32 %v11505_v25, %v11505_v25  ;;  %v949_v2 = vmul.f32 %v11506_v3, %v11506_v3  ;;  %v11515_v15 = vld [vmem:[#allocation113_spill] sm:$0xff]  ;;  %v11516_v21 = vld [vmem:[#allocation114_spill] sm:$0xff]  ;;  %v11522_v3 = vld [vmem:[#allocation119_spill] sm:$0xff] }
  0xd3   : > { %1193 = vadd.xlane.f32.xlu1 %v1192_v30  ;;  %v1181_v17 = vadd.f32 %v1180_v23, %v918_v47  ;;  %v1209_v9 = vsel %vm457_vm0, %v940_v38, 0.0  ;;  %v933_v24 = vmul.f32 %v11507_v20, %v11507_v20  ;;  %v950_v44 = vmul.f32 %v11508_v34, %v11508_v34  ;;  %v11519_v30 = vld [vmem:[#allocation116_spill] sm:$0xff]  ;;  %v11520_v31 = vld [vmem:[#allocation118_spill] sm:$0xff] }
  0xd4   : > { %v1207_v28 = vadd.f32 %v1206_v19, %v938_v12  ;;  %v931_v45 = vmul.f32 %v11509_v56, %v11509_v56  ;;  %v932_v32 = vmul.f32 %v7678_v51, %v7678_v51  ;;  %v1196_v60 = vadd.f32 %v1195_v27, %v929_v22  ;;  %v11518_v12 = vld [vmem:[#allocation117_spill] sm:$0xff]  ;;  %v11521_v19 = vld [vmem:[#allocation124_spill] sm:$0xff] }
  0xd5   : > { %v1183_v11 = vadd.f32 %v1182_v43, %v1181_v17  ;;  %v951_v40 = vmul.f32 %v11510_v59, %v11510_v59  ;;  %v1222_v49 = vadd.f32 %v949_v2, %v948_v10  ;;  %v941_v36 = vmul.f32 %v11511_v14, %v11511_v14  ;;  %v11517_v43 = vld [vmem:[#allocation115_spill] sm:$0xff] }
  0xd6   : > { %v1208_v54 = vadd.f32 %v1207_v28, %v939_v7  ;;  %v1197_v1 = vadd.f32 %v1196_v60, %v930_v53  ;;  %v954_v33 = vmul.f32 %v11512_v8, %v11512_v8  ;;  %v942_v47 = vmul.f32 %v11513_v18, %v11513_v18  ;;  %v11525_v28 = vld [vmem:[#allocation122_spill] sm:$0xff]  ;;  %v11527_v59 = vld [vmem:[#allocation123_spill] sm:$0xff] }
  0xd7   : > { %1184 = vadd.xlane.f32.xlu0 %v1183_v11  ;;  %v1200_v51 = vsel %vm457_vm0, %v933_v24, 0.0  ;;  %v952_v48 = vmul.f32 %v11514_v0, %v11514_v0  ;;  %v1223_v13 = vadd.f32 %v1222_v49, %v950_v44  ;;  %v943_v58 = vmul.f32 %v11515_v15, %v11515_v15  ;;  %v11524_v44 = vld [vmem:[#allocation120_spill] sm:$0xff]  ;;  %v8357_v49 = vpop.xlane.xlu1 %478  ;;  %v11529_v8 = vld [vmem:[#allocation126_spill] sm:$0xff]  ;;  %v8367_v15 = vpop.xlane.xlu0 %460 }
  0xd8   : > { %v1210_v62 = vadd.f32 %v1209_v9, %v1208_v54  ;;  %v1198_v41 = vadd.f32 %v1197_v1, %v931_v45  ;;  %v953_v63 = vmul.f32 %v7721_v50, %v7721_v50  ;;  %v944_v38 = vmul.f32 %v11516_v21, %v11516_v21  ;;  %v11523_v9 = vld [vmem:[#allocation121_spill] sm:$0xff]  ;;  %v11533_v21 = vld [vmem:[#allocation131_spill] sm:$0xff] }
  0xd9   : > { %v1224_v29 = vadd.f32 %v1223_v13, %v951_v40  ;;  %v1213_v35 = vadd.f32 %v942_v47, %v941_v36  ;;  %v962_v55 = vmul.f32 %v11517_v43, %v11517_v43  ;;  %v963_v37 = vmul.f32 %v11518_v12, %v11518_v12  ;;  %v11528_v54 = vld [vmem:[#allocation129_spill] sm:$0xff] }
  0xda   : > { %1211 = vadd.xlane.f32.xlu1 %v1210_v62  ;;  %v1199_v5 = vadd.f32 %v1198_v41, %v932_v32  ;;  %v1227_v22 = vsel %vm457_vm0, %v954_v33, 0.0  ;;  %v947_v23 = vmul.f32 %v11519_v30, %v11519_v30  ;;  %v964_v50 = vmul.f32 %v7749_v26, %v7749_v26  ;;  %v11526_v32 = vld [vmem:[#allocation125_spill] sm:$0xff]  ;;  %v11532_v41 = vld [vmem:[#allocation132_spill] sm:$0xff] }
  0xdb   : > { %v1225_v7 = vadd.f32 %v1224_v29, %v952_v48  ;;  %v945_v53 = vmul.f32 %v11520_v31, %v11520_v31  ;;  %v946_v27 = vmul.f32 %v11521_v19, %v11521_v19  ;;  %v1214_v25 = vadd.f32 %v1213_v35, %v943_v58  ;;  %v11531_v48 = vld [vmem:[#allocation128_spill] sm:$0xff]  ;;  %v11534_v35 = vld [vmem:[#allocation130_spill] sm:$0xff] }
  0xdc   : > { %v1201_v10 = vadd.f32 %v1200_v51, %v1199_v5  ;;  %v965_v2 = vmul.f32 %v11522_v3, %v11522_v3  ;;  %v1240_v17 = vadd.f32 %v963_v37, %v962_v55  ;;  %v955_v20 = vmul.f32 %v11523_v9, %v11523_v9  ;;  %v11530_v51 = vld [vmem:[#allocation127_spill] sm:$0xff]  ;;  %v11535_v5 = vld [vmem:[#allocation133_spill] sm:$0xff] }
  0xdd   : > { %v1226_v24 = vadd.f32 %v1225_v7, %v953_v63  ;;  %v1215_v34 = vadd.f32 %v1214_v25, %v944_v38  ;;  %v968_v26 = vmul.f32 %v11524_v44, %v11524_v44  ;;  %v956_v56 = vmul.f32 %v11525_v28, %v11525_v28  ;;  %v8382_v7 = vpop.xlane.xlu1 %487 }
  0xde   : > { %1202 = vadd.xlane.f32.xlu0 %v1201_v10  ;;  %v1218_v45 = vsel %vm457_vm0, %v947_v23, 0.0  ;;  %v966_v60 = vmul.f32 %v11526_v32, %v11526_v32  ;;  %v1241_v11 = vadd.f32 %v1240_v17, %v964_v50  ;;  %v957_v40 = vmul.f32 %v11527_v59, %v11527_v59  ;;  %v11536_v23 = vld [vmem:[#allocation134_spill] sm:$0xff]  ;;  %v8393_v17 = vpop.xlane.xlu0 %469  ;;  %v11542_v59 = vld [vmem:[#allocation139_spill] sm:$0xff] }
  0xdf   : > { %v1228_v14 = vadd.f32 %v1227_v22, %v1226_v24  ;;  %v1216_v36 = vadd.f32 %v1215_v34, %v945_v53  ;;  %v967_v1 = vmul.f32 %v11528_v54, %v11528_v54  ;;  %v958_v33 = vmul.f32 %v11529_v8, %v11529_v8  ;;  %v11538_v24 = vld [vmem:[#allocation140_spill] sm:$0xff] }
  0xe0   : > { %v1242_v18 = vadd.f32 %v1241_v11, %v965_v2  ;;  %v1231_v47 = vadd.f32 %v956_v56, %v955_v20  ;;  %v976_v0 = vmul.f32 %v11530_v51, %v11530_v51  ;;  %v977_v13 = vmul.f32 %v11531_v48, %v11531_v48  ;;  %v11539_v34 = vld [vmem:[#allocation136_spill] sm:$0xff]  ;;  %v11540_v56 = vld [vmem:[#allocation137_spill] sm:$0xff] }
  0xe1   : > { %1229 = vadd.xlane.f32.xlu1 %v1228_v14  ;;  %v1217_v58 = vadd.f32 %v1216_v36, %v946_v27  ;;  %v1245_v62 = vsel %vm457_vm0, %v968_v26, 0.0  ;;  %v961_v63 = vmul.f32 %v11532_v41, %v11532_v41  ;;  %v978_v38 = vmul.f32 %v11533_v21, %v11533_v21  ;;  %v11537_v27 = vld [vmem:[#allocation135_spill] sm:$0xff] }
  0xe2   : > { %v1243_v29 = vadd.f32 %v1242_v18, %v966_v60  ;;  %v959_v43 = vmul.f32 %v11534_v35, %v11534_v35  ;;  %v960_v55 = vmul.f32 %v7871_v6, %v7871_v6  ;;  %v1232_v12 = vadd.f32 %v1231_v47, %v957_v40  ;;  %v8403_v60 = vpop.xlane.xlu1 %505  ;;  %v11543_v47 = vld [vmem:[#allocation141_spill] sm:$0xff] }
  0xe3   : > { %v1219_v37 = vadd.f32 %v1218_v45, %v1217_v58  ;;  %v979_v22 = vmul.f32 %v11535_v5, %v11535_v5  ;;  %v1258_v30 = vadd.f32 %v977_v13, %v976_v0  ;;  %v969_v50 = vmul.f32 %v11536_v23, %v11536_v23  ;;  %v8416_v0 = vpop.xlane.xlu0 %496  ;;  %v11544_v13 = vld [vmem:[#allocation145_spill] sm:$0xff] }
  0xe4   : > { %v1244_v31 = vadd.f32 %v1243_v29, %v967_v1  ;;  %v1233_v53 = vadd.f32 %v1232_v12, %v958_v33  ;;  %v982_v19 = vmul.f32 %v7895_v42, %v7895_v42  ;;  %v970_v25 = vmul.f32 %v11537_v27, %v11537_v27  ;;  %v11548_v12 = vld [vmem:[#allocation143_spill] sm:$0xff]  ;;  %v11550_v27 = vld [vmem:[#allocation149_spill] sm:$0xff] }
  0xe5   : > { %1220 = vadd.xlane.f32.xlu0 %v1219_v37  ;;  %v1236_v6 = vsel %vm457_vm0, %v961_v63, 0.0  ;;  %v980_v10 = vmul.f32 %v7890_v46, %v7890_v46  ;;  %v1259_v3 = vadd.f32 %v1258_v30, %v978_v38  ;;  %v971_v2 = vmul.f32 %v7883_v16, %v7883_v16  ;;  %v11541_v46 = vld [vmem:[#allocation138_spill] sm:$0xff]  ;;  %v11549_v30 = vld [vmem:[#allocation147_spill] sm:$0xff] }
  0xe6   : > { %v1246_v9 = vadd.f32 %v1245_v62, %v1244_v31  ;;  %v1234_v20 = vadd.f32 %v1233_v53, %v959_v43  ;;  %v981_v42 = vmul.f32 %v11538_v24, %v11538_v24  ;;  %v972_v44 = vmul.f32 %v11539_v34, %v11539_v34  ;;  %v8426_v29 = vpop.xlane.xlu1 %523 }
  0xe7   : > { %v1260_v26 = vadd.f32 %v1259_v3, %v979_v22  ;;  %v1249_v28 = vadd.f32 %v970_v25, %v969_v50  ;;  %v990_v45 = vmul.f32 %v11540_v56, %v11540_v56  ;;  %v991_v32 = vmul.f32 %v11541_v46, %v11541_v46  ;;  %v8435_v31 = vpop.xlane.xlu0 %514 }
  0xe8   : > { %1247 = vadd.xlane.f32.xlu1 %v1246_v9  ;;  %v1235_v16 = vadd.f32 %v1234_v20, %v960_v55  ;;  %v1263_v11 = vsel %vm457_vm0, %v982_v19, 0.0  ;;  %v992_v40 = vmul.f32 %v11542_v59, %v11542_v59  ;;  %v973_v36 = vmul.f32 %v7934_v4, %v7934_v4  ;;  %v11545_v4 = vld [vmem:[#allocation142_spill] sm:$0xff] }
  0xe9   : > { %v1261_v14 = vadd.f32 %v1260_v26, %v980_v10  ;;  %v975_v54 = vmul.f32 %v7963_v57, %v7963_v57  ;;  %v1250_v1 = vadd.f32 %v1249_v28, %v971_v2  ;;  %v993_v33 = vmul.f32 %v7948_v61, %v7948_v61  ;;  %v11546_v57 = vld [vmem:[#allocation146_spill] sm:$0xff]  ;;  %v11547_v61 = vld [vmem:[#allocation144_spill] sm:$0xff] }
  0xea   : > { %v1237_v8 = vadd.f32 %v1236_v6, %v1235_v16  ;;  %v1276_v18 = vadd.f32 %v991_v32, %v990_v45  ;;  %v983_v51 = vmul.f32 %v11543_v47, %v11543_v47  ;;  %v974_v58 = vmul.f32 %v11544_v13, %v11544_v13  ;;  %v11551_v2 = vld [vmem:[#allocation148_spill] sm:$0xff]  ;;  %v8442_v9 = vpop.xlane.xlu1 %541 }
  0xeb   : > { %v1262_v48 = vadd.f32 %v1261_v14, %v981_v42  ;;  %v1251_v62 = vadd.f32 %v1250_v1, %v972_v44  ;;  %v984_v41 = vmul.f32 %v11545_v4, %v11545_v4  ;;  %v994_v63 = vmul.f32 %v11546_v57, %v11546_v57  ;;  %v8446_v34 = vpop.xlane.xlu0 %532 }
  0xec   : > { %1238 = vadd.xlane.f32.xlu0 %v1237_v8  ;;  %v1277_v21 = vadd.f32 %v1276_v18, %v992_v40  ;;  %v985_v38 = vmul.f32 %v11547_v61, %v11547_v61  ;;  %v1254_v55 = vsel %vm457_vm0, %v975_v54, 0.0  ;;  %v996_v37 = vmul.f32 %v11548_v12, %v11548_v12 }
  0xed   : > { %v1264_v35 = vadd.f32 %v1263_v11, %v1262_v48  ;;  %v1252_v43 = vadd.f32 %v1251_v62, %v973_v36  ;;  %v995_v5 = vmul.f32 %v8013_v39, %v8013_v39  ;;  %v986_v23 = vmul.f32 %v11549_v30, %v11549_v30 }
  0xee   : > { %v1278_v22 = vadd.f32 %v1277_v21, %v993_v33  ;;  %v1267_v50 = vadd.f32 %v984_v41, %v983_v51  ;;  %v987_v25 = vmul.f32 %v11550_v27, %v11550_v27  ;;  %v1281_v3 = vsel %vm457_vm0, %v996_v37, 0.0  ;;  %v8449_v45 = vpop.xlane.xlu1 %559 }
  0xef   : > { %1265 = vadd.xlane.f32.xlu1 %v1264_v35  ;;  %v1253_v53 = vadd.f32 %v1252_v43, %v974_v58  ;;  %v989_v39 = vmul.f32 %v11551_v2, %v11551_v2  ;;  %v988_v24 = vmul.f32 %v8030_v52, %v8030_v52  ;;  %v6497_v28 = vmov 0   ;;  %v8451_v16 = vpop.xlane.xlu0 %550 }
  0xf0   : > { %v1279_v19 = vadd.f32 %v1278_v22, %v994_v63  ;;  %v1268_v6 = vadd.f32 %v1267_v50, %v985_v38  ;;  %5933 = vset.pattern.permute.xlu1 %v6497_v28  ;;  %5932 = vset.pattern.permute.xlu0 %v6497_v28  ;;  %v8492_v57 = vmul.f32 0.0012755102, %v8393_v17  ;;  %v8497_v21 = vmul.f32 0.0012755102, %v8367_v15 }
  0xf1   : > { %v1255_v10 = vadd.f32 %v1254_v55, %v1253_v53  ;;  %v1272_v56 = vsel %vm457_vm0, %v989_v39, 0.0  ;;  %v8500_v38 = vmul.f32 0.0012755102, %v8382_v7  ;;  %v8505_v55 = vmul.f32 0.0012755102, %v8357_v49 }
  0xf2   : > { %v1280_v20 = vadd.f32 %v1279_v19, %v995_v5  ;;  %v1269_v42 = vadd.f32 %v1268_v6, %v986_v23  ;;  %v8453_v52 = vpop.xlane.xlu1 %577  ;;  %v1318_v35 = vmul.f32 %v8492_v57, %v8492_v57  ;;  %v1317_v17 = vmul.f32 %v8497_v21, %v8497_v21 }
  0xf3   : > { %1256 = vadd.xlane.f32.xlu0 %v1255_v10  ;;  %v8455_v11 = vpop.xlane.xlu0 %568  ;;  %v1320_v15 = vmul.f32 %v8500_v38, %v8500_v38  ;;  %v1319_v50 = vmul.f32 %v8505_v55, %v8505_v55  ;;  %v8514_v53 = vmul.f32 0.0012755102, %v8403_v60  ;;  %v8517_v49 = vmul.f32 0.0012755102, %v8416_v0 }
  0xf4   : > { %v1282_v44 = vadd.f32 %v1281_v3, %v1280_v20  ;;  %v1270_v26 = vadd.f32 %v1269_v42, %v987_v25  ;;  %v8527_v28 = vmul.f32 0.0012755102, %v8442_v9 }
  0xf5   : > { %v1322_v39 = vmul.f32 %v8514_v53, %v8514_v53  ;;  %v1321_v60 = vmul.f32 %v8517_v49, %v8517_v49 }
  0xf6   : > { %1283 = vadd.xlane.f32.xlu1 %v1282_v44  ;;  %v1271_v46 = vadd.f32 %v1270_v26, %v988_v24  ;;  %v8457_v59 = vpop.xlane.xlu1 %595  ;;  %v8524_v44 = vmul.f32 0.0012755102, %v8435_v31  ;;  %v8535_v31 = vmul.f32 0.0012755102, %v8449_v45  ;;  %v1326_v9 = vmul.f32 %v8527_v28, %v8527_v28 }
  0xf7   : > { %v8459_v40 = vpop.xlane.xlu0 %586 }
  0xf8   : > { %v1273_v32 = vadd.f32 %v1272_v56, %v1271_v46 }
  0xfa   : > { %1274 = vadd.xlane.f32.xlu0 %v1273_v32  ;;  %v8461_v14 = vpop.xlane.xlu1 %613 }
  0xfc   : > { %v8463_v36 = vpop.xlane.xlu0 %604 }
  0xff   : > { %v8465_v54 = vpop.xlane.xlu1 %631 }
 0x102   : > { %v8467_v1 = vpop.xlane.xlu0 %622 }
 0x105   : > { %v8469_v8 = vpop.xlane.xlu1 %649 }
 0x108   : > { %v8471_v33 = vpop.xlane.xlu0 %640 }
 0x10a   : > { %v8473_v18 = vpop.xlane.xlu1 %667 }
 0x10e   : > { %v8475_v47 = vpop.xlane.xlu0 %658 }
 0x114   : > { %v8477_v51 = vpop.xlane.xlu1 %685 }
 0x116   : > { %v8479_v48 = vpop.xlane.xlu0 %676 }
 0x119   : > { %v8481_v13 = vpop.xlane.xlu1 %703 }
 0x11c   : > { %v8483_v58 = vpop.xlane.xlu0 %694 }
 0x11f   : > { %v8485_v62 = vpop.xlane.xlu1 %721 }
 0x122   : > { %v8487_v4 = vpop.xlane.xlu0 %712 }
 0x124   : > { %v8489_v41 = vpop.xlane.xlu1 %739 }
 0x127   : > { %v8494_v63 = vpop.xlane.xlu0 %730 }
 0x128   : > { %v1014_v61 = vpop.xlane.xlu1 %1013 }
 0x129   : > { %v1286_v43 = vmul.f32 0.0012755102, %v1014_v61 }
 0x12b   : > { %v1005_v12 = vpop.xlane.xlu0 %1004  ;;  %v1350_v37 = vsub.f32 %v1286_v43, %v1318_v35  ;;  %v8530_v43 = vmul.f32 0.0012755102, %v8426_v29  ;;  %v1446_v29 = vld [vmem:[%s11103_s1 + $0x8] sm:$0xff] }
 0x12c   : > { %v1285_v5 = vmul.f32 0.0012755102, %v1005_v12  ;;  %v1032_v22 = vpop.xlane.xlu1 %1031  ;;  %v1323_v12 = vmul.f32 %v8524_v44, %v8524_v44 }
 0x12d   : > { %v1382_v30 = vadd.f32 1e-05, %v1350_v37  ;;  %v1288_v23 = vmul.f32 0.0012755102, %v1032_v22  ;;  %v1324_v45 = vmul.f32 %v8530_v43, %v8530_v43 }
 0x12e   : > { %v1349_v7 = vsub.f32 %v1285_v5, %v1317_v17 }
 0x12f   : > { %v1023_v19 = vpop.xlane.xlu0 %1022  ;;  %5934 = vrsqrt.f32 %v1382_v30  ;;  %v1352_v25 = vsub.f32 %v1288_v23, %v1320_v15 }
 0x130   : > { %v1381_v27 = vadd.f32 1e-05, %v1349_v7  ;;  %v1287_v6 = vmul.f32 0.0012755102, %v1023_v19  ;;  %v1050_v10 = vpop.xlane.xlu1 %1049  ;;  %v1328_v19 = vmul.f32 %v8535_v31, %v8535_v31 }
 0x131   : > { %v1290_v2 = vmul.f32 0.0012755102, %v1050_v10  ;;  %v1384_v24 = vadd.f32 1e-05, %v1352_v25  ;;  %v1445_v25 = vld [vmem:[%s11103_s1] sm:$0xff] }
 0x132   : > { %5936 = vrsqrt.f32 %v1381_v27  ;;  %v1351_v3 = vsub.f32 %v1287_v6, %v1319_v50  ;;  %v8545_v50 = vmul.f32 0.0012755102, %v8446_v34  ;;  %v8553_v6 = vmul.f32 0.0012755102, %v8453_v52 }
 0x133   : > { %v1041_v20 = vpop.xlane.xlu0 %1040  ;;  %v1354_v56 = vsub.f32 %v1290_v2, %v1322_v39 }
 0x134   : > { %v1383_v42 = vadd.f32 1e-05, %v1351_v3  ;;  %v1289_v0 = vmul.f32 0.0012755102, %v1041_v20  ;;  %v1068_v26 = vpop.xlane.xlu1 %1067 }
 0x135   : > { %v1386_v37 = vadd.f32 1e-05, %v1354_v56  ;;  %v1292_v22 = vmul.f32 0.0012755102, %v1068_v26  ;;  %v1447_v56 = vld [vmem:[%s11103_s1 + $0x10] sm:$0xff] }
 0x136   : > { %5938 = vrsqrt.f32 %v1383_v42  ;;  %v1353_v46 = vsub.f32 %v1289_v0, %v1321_v60  ;;  %v1325_v0 = vmul.f32 %v8545_v50, %v8545_v50 }
 0x137   : > { %v1059_v32 = vpop.xlane.xlu0 %1058  ;;  %5940 = vrsqrt.f32 %v1384_v24  ;;  %v1356_v39 = vsub.f32 %v1292_v22, %v1324_v45 }
 0x138   : > { %v1385_v61 = vadd.f32 1e-05, %v1353_v46  ;;  %v1291_v35 = vmul.f32 0.0012755102, %v1059_v32  ;;  %v1086_v17 = vpop.xlane.xlu1 %1085  ;;  %v8566_v46 = vmul.f32 0.0012755102, %v8451_v16  ;;  %v1330_v32 = vmul.f32 %v8553_v6, %v8553_v6 }
 0x139   : > { %v1294_v5 = vmul.f32 0.0012755102, %v1086_v17  ;;  %v1388_v17 = vadd.f32 1e-05, %v1356_v39  ;;  %v8574_v16 = vmul.f32 0.0012755102, %v8455_v11 }
 0x13a   : > { %v1355_v15 = vsub.f32 %v1291_v35, %v1323_v12  ;;  %5942 = vrsqrt.f32 %v1385_v61 }
 0x13b   : > { %v1077_v30 = vpop.xlane.xlu0 %1076  ;;  %v1358_v7 = vsub.f32 %v1294_v5, %v1326_v9  ;;  %5944 = vrsqrt.f32 %v1386_v37 }
 0x13c   : > { %v5935_v23 = vpop.eup %5934  ;;  %v1104_v27 = vpop.xlane.xlu1 %1103  ;;  %v1387_v20 = vadd.f32 1e-05, %v1355_v15  ;;  %v1293_v60 = vmul.f32 0.0012755102, %v1077_v30  ;;  %v8577_v30 = vmul.f32 0.0012755102, %v8457_v59 }
 0x13d   : > { %v1390_v10 = vadd.f32 1e-05, %v1358_v7  ;;  %v1296_v3 = vmul.f32 0.0012755102, %v1104_v27  ;;  %v8555_v24 = vmul.f32 %v5935_v23, %v1446_v29  ;;  %v1448_v29 = vld [vmem:[%s11103_s1 + $0x18] sm:$0xff]  ;;  %v1327_v23 = vmul.f32 %v8566_v46, %v8566_v46 }
 0x13e   : > { %v1357_v9 = vsub.f32 %v1293_v60, %v1325_v0  ;;  %v8595_v60 = vmul.f32 0.0012755102, %v8459_v40 }
 0x13f   : > { %v5937_v2 = vpop.eup %5936  ;;  %v1095_v34 = vpop.xlane.xlu0 %1094  ;;  %5946 = vrsqrt.f32 %v1390_v10  ;;  %v1360_v42 = vsub.f32 %v1296_v3, %v1328_v19  ;;  %1612 = vperm.xlu1 %5933, %v8555_v24   ;;  %v1329_v3 = vmul.f32 %v8574_v16, %v8574_v16 }
 0x140   : > { %v8560_v26 = vmul.f32 %v5937_v2, %v1445_v25  ;;  %v1122_v52 = vpop.xlane.xlu1 %1121  ;;  %5948 = vrsqrt.f32 %v1387_v20  ;;  %v1295_v37 = vmul.f32 0.0012755102, %v1095_v34  ;;  %v1389_v27 = vadd.f32 1e-05, %v1357_v9  ;;  %v1449_v20 = vld [vmem:[%s11103_s1 + $0x20] sm:$0xff]  ;;  %v1450_v9 = vld [vmem:[%s11103_s1 + $0x28] sm:$0xff] }
 0x141   : > { %v1392_v61 = vadd.f32 1e-05, %v1360_v42  ;;  %v1298_v35 = vmul.f32 0.0012755102, %v1122_v52  ;;  %v1332_v2 = vmul.f32 %v8577_v30, %v8577_v30  ;;  %v8599_v42 = vmul.f32 0.0012755102, %v8461_v14 }
 0x142   : > { %1607 = vperm.xlu0 %5932, %v8560_v26   ;;  %v1359_v25 = vsub.f32 %v1295_v37, %v1327_v23  ;;  %v1331_v14 = vmul.f32 %v8595_v60, %v8595_v60  ;;  %v1456_v23 = vld [vmem:[%s11103_s1 + $0x58] sm:$0xff] }
 0x143   : > { %v5939_v12 = vpop.eup %5938  ;;  %5950 = vrsqrt.f32 %v1392_v61  ;;  %v1362_v5 = vsub.f32 %v1298_v35, %v1330_v32 }
 0x144   : > { %v8571_v22 = vmul.f32 %v5939_v12, %v1447_v56  ;;  %v5941_v15 = vpop.eup %5940  ;;  %v1113_v7 = vpop.xlane.xlu0 %1112  ;;  %5952 = vrsqrt.f32 %v1388_v17  ;;  %v1454_v56 = vld [vmem:[%s11103_s1 + $0x48] sm:$0xff]  ;;  %v1391_v32 = vadd.f32 1e-05, %v1359_v25 }
 0x145   : > { %v1394_v45 = vadd.f32 1e-05, %v1362_v5  ;;  %v1297_v19 = vmul.f32 0.0012755102, %v1113_v7  ;;  %v8585_v10 = vmul.f32 %v5941_v15, %v1448_v29  ;;  %v1334_v5 = vmul.f32 %v8599_v42, %v8599_v42 }
 0x146   : > { %1617 = vperm.xlu1 %5933, %v8571_v22   ;;  %v8617_v15 = vmul.f32 0.0012755102, %v8463_v36  ;;  %v1451_v36 = vld [vmem:[%s11103_s1 + $0x30] sm:$0xff] }
 0x147   : > { %5954 = vrsqrt.f32 %v1394_v45  ;;  %v1140_v11 = vpop.xlane.xlu1 %1139  ;;  %v5943_v59 = vpop.eup %5942  ;;  %v1361_v0 = vsub.f32 %v1297_v19, %v1329_v3 }
 0x148   : > { %v1300_v39 = vmul.f32 0.0012755102, %v1140_v11  ;;  %v5945_v34 = vpop.eup %5944  ;;  %5956 = vrsqrt.f32 %v1389_v27  ;;  %v8604_v35 = vmul.f32 %v5943_v59, %v1449_v20 }
 0x149   : > { %v1393_v7 = vadd.f32 1e-05, %v1361_v0  ;;  %v8623_v25 = vmul.f32 %v5945_v34, %v1450_v9  ;;  %v1458_v34 = vld [vmem:[%s11103_s1 + $0x68] sm:$0xff] }
 0x14a   : > { %1622 = vperm.xlu1 %5933, %v8585_v10   ;;  %v1364_v52 = vsub.f32 %v1300_v39, %v1332_v2  ;;  %v1333_v2 = vmul.f32 %v8617_v15, %v8617_v15  ;;  %v8634_v39 = vmul.f32 0.0012755102, %v8465_v54  ;;  %v1452_v54 = vld [vmem:[%s11103_s1 + $0x38] sm:$0xff] }
 0x14b   : > { %v1131_v61 = vpop.xlane.xlu0 %1130 }
 0x14c   : > { %v5947_v12 = vpop.eup %5946  ;;  %v1396_v40 = vadd.f32 1e-05, %v1364_v52  ;;  %v1299_v17 = vmul.f32 0.0012755102, %v1131_v61 }
 0x14d   : > { %v8612_v37 = vmul.f32 %v5947_v12, %v1454_v56  ;;  %v5949_v45 = vpop.eup %5948 }
 0x14e   : > { %1627 = vperm.xlu1 %5933, %v8604_v35   ;;  %5958 = vrsqrt.f32 %v1396_v40  ;;  %v1158_v29 = vpop.xlane.xlu1 %1157  ;;  %v1363_v19 = vsub.f32 %v1299_v17, %v1331_v14  ;;  %v8640_v61 = vmul.f32 %v5949_v45, %v1451_v36  ;;  %v1336_v14 = vmul.f32 %v8634_v39, %v8634_v39 }
 0x14f   : > { %5960 = vrsqrt.f32 %v1391_v32  ;;  %v1302_v27 = vmul.f32 0.0012755102, %v1158_v29  ;;  %1652 = vperm.xlu0 %5932, %v8612_v37  }
 0x150   : > { %v5951_v11 = vpop.eup %5950  ;;  %5962 = vrsqrt.f32 %v1393_v7  ;;  %v1395_v52 = vadd.f32 1e-05, %v1363_v19 }
 0x151   : > { %v1366_v59 = vsub.f32 %v1302_v27, %v1334_v5  ;;  %v8629_v3 = vmul.f32 %v5951_v11, %v1456_v23  ;;  %v5953_v0 = vpop.eup %5952  ;;  %v8651_v5 = vmul.f32 0.0012755102, %v8467_v1  ;;  %v1453_v27 = vld [vmem:[%s11103_s1 + $0x40] sm:$0xff]  ;;  %v8660_v11 = vmul.f32 0.0012755102, %v8469_v8  ;;  %v1460_v1 = vld [vmem:[%s11103_s1 + $0x78] sm:$0xff] }
 0x152   : > { %1632 = vperm.xlu1 %5933, %v8623_v25   ;;  %v1149_v20 = vpop.xlane.xlu0 %1148  ;;  %v8654_v23 = vmul.f32 %v5953_v0, %v1452_v54 }
 0x153   : > { %v1398_v56 = vadd.f32 1e-05, %v1366_v59  ;;  %v1301_v32 = vmul.f32 0.0012755102, %v1149_v20  ;;  %1662 = vperm.xlu0 %5932, %v8629_v3   ;;  %v1335_v59 = vmul.f32 %v8651_v5, %v8651_v5  ;;  %v1338_v54 = vmul.f32 %v8660_v11, %v8660_v11 }
 0x154   : > { %v5955_v12 = vpop.eup %5954 }
 0x155   : > { %5964 = vrsqrt.f32 %v1398_v56  ;;  %v1365_v40 = vsub.f32 %v1301_v32, %v1333_v2  ;;  %v1176_v17 = vpop.xlane.xlu1 %1175  ;;  %v8646_v9 = vmul.f32 %v5955_v12, %v1458_v34  ;;  %v5957_v45 = vpop.eup %5956  ;;  %v1455_v12 = vld [vmem:[%s11103_s1 + $0x50] sm:$0xff] }
 0x156   : > { %1637 = vperm.xlu1 %5933, %v8640_v61   ;;  %v1304_v7 = vmul.f32 0.0012755102, %v1176_v17  ;;  %5966 = vrsqrt.f32 %v1395_v52  ;;  %v8668_v0 = vmul.f32 %v5957_v45, %v1453_v27 }
 0x157   : > { %v1397_v29 = vadd.f32 1e-05, %v1365_v40  ;;  %1672 = vperm.xlu0 %5932, %v8646_v9   ;;  %v8678_v40 = vmul.f32 0.0012755102, %v8471_v33  ;;  %v1462_v33 = vld [vmem:[%s11103_s1 + $0x88] sm:$0xff] }
 0x158   : > { %v1368_v19 = vsub.f32 %v1304_v7, %v1336_v14 }
 0x159   : > { %v1167_v36 = vpop.xlane.xlu0 %1166  ;;  %5968 = vrsqrt.f32 %v1397_v29  ;;  %11552 = vst [vmem:[#allocation6_spill] sm:$0xff] %v8678_v40 }
 0x15a   : > { %1642 = vperm.xlu1 %5933, %v8654_v23   ;;  %v1400_v2 = vadd.f32 1e-05, %v1368_v19  ;;  %v1303_v20 = vmul.f32 0.0012755102, %v1167_v36  ;;  %v8685_v19 = vmul.f32 0.0012755102, %v8473_v18 }
 0x15b   : > { %v5959_v34 = vpop.eup %5958  ;;  %v1457_v36 = vld [vmem:[%s11103_s1 + $0x60] sm:$0xff] }
 0x15c   : > { %v5961_v52 = vpop.eup %5960  ;;  %5970 = vrsqrt.f32 %v1400_v2  ;;  %v1367_v8 = vsub.f32 %v1303_v20, %v1335_v59  ;;  %v1194_v56 = vpop.xlane.xlu1 %1193  ;;  %v8670_v32 = vmul.f32 %v5959_v34, %v1460_v1  ;;  %v1337_v1 = vmul.f32 %v8678_v40, %v8678_v40 }
 0x15d   : > { %v1306_v17 = vmul.f32 0.0012755102, %v1194_v56  ;;  %v5963_v7 = vpop.eup %5962  ;;  %v8682_v45 = vmul.f32 %v5961_v52, %v1455_v12  ;;  %v1340_v12 = vmul.f32 %v8685_v19, %v8685_v19 }
 0x15e   : > { %1647 = vperm.xlu1 %5933, %v8668_v0   ;;  %v1399_v14 = vadd.f32 1e-05, %v1367_v8  ;;  %1682 = vperm.xlu0 %5932, %v8670_v32   ;;  %v8698_v8 = vmul.f32 %v5963_v7, %v1457_v36  ;;  %v8711_v7 = vmul.f32 0.0012755102, %v8477_v51 }
 0x15f   : > { %v1370_v29 = vsub.f32 %v1306_v17, %v1338_v54  ;;  %v8703_v54 = vmul.f32 0.0012755102, %v8475_v47  ;;  %v1464_v47 = vld [vmem:[%s11103_s1 + $0x98] sm:$0xff] }
 0x160   : > { %5972 = vrsqrt.f32 %v1399_v14  ;;  %v1185_v27 = vpop.xlane.xlu0 %1184  ;;  %v1459_v14 = vld [vmem:[%s11103_s1 + $0x70] sm:$0xff]  ;;  %11554 = vst [vmem:[#allocation7_spill] sm:$0xff] %v8711_v7 }
 0x161   : > { %v1402_v59 = vadd.f32 1e-05, %v1370_v29  ;;  %v1305_v2 = vmul.f32 0.0012755102, %v1185_v27  ;;  %11553 = vst [vmem:[#allocation8_spill] sm:$0xff] %v8703_v54 }
 0x162   : > { %1657 = vperm.xlu1 %5933, %v8682_v45   ;;  %v5965_v20 = vpop.eup %5964 }
 0x163   : > { %5974 = vrsqrt.f32 %v1402_v59  ;;  %v1369_v18 = vsub.f32 %v1305_v2, %v1337_v1  ;;  %v1212_v34 = vpop.xlane.xlu1 %1211  ;;  %v8696_v52 = vmul.f32 %v5965_v20, %v1462_v33  ;;  %v5967_v56 = vpop.eup %5966  ;;  %v1339_v59 = vmul.f32 %v8703_v54, %v8703_v54 }
 0x164   : > { %v1308_v17 = vmul.f32 0.0012755102, %v1212_v34  ;;  %v8716_v36 = vmul.f32 %v5967_v56, %v1459_v14  ;;  %v1342_v56 = vmul.f32 %v8711_v7, %v8711_v7  ;;  %v8729_v14 = vmul.f32 0.0012755102, %v8479_v48 }
 0x165   : > { %v1401_v29 = vadd.f32 1e-05, %v1369_v18  ;;  %1692 = vperm.xlu0 %5932, %v8696_v52   ;;  %v1461_v18 = vld [vmem:[%s11103_s1 + $0x80] sm:$0xff] }
 0x166   : > { %1667 = vperm.xlu1 %5933, %v8698_v8   ;;  %v1372_v27 = vsub.f32 %v1308_v17, %v1340_v12  ;;  %v5969_v1 = vpop.eup %5968  ;;  %11555 = vst [vmem:[#allocation9_spill] sm:$0xff] %v8729_v14 }
 0x167   : > { %5976 = vrsqrt.f32 %v1401_v29  ;;  %v1203_v33 = vpop.xlane.xlu0 %1202 }
 0x168   : > { %v1404_v2 = vadd.f32 1e-05, %v1372_v27  ;;  %v1307_v20 = vmul.f32 0.0012755102, %v1203_v33  ;;  %v8731_v27 = vmul.f32 %v5969_v1, %v1461_v18  ;;  %v1466_v1 = vld [vmem:[%s11103_s1 + $0xa8] sm:$0xff]  ;;  %v1341_v18 = vmul.f32 %v8729_v14, %v8729_v14 }
 0x169   : > { %v5971_v51 = vpop.eup %5970  ;;  %v8776_v14 = vmul.f32 0.0012755102, %v8487_v4  ;;  %v1470_v4 = vld [vmem:[%s11103_s1 + $0xc8] sm:$0xff] }
 0x16a   : > { %1677 = vperm.xlu1 %5933, %v8716_v36   ;;  %5978 = vrsqrt.f32 %v1404_v2  ;;  %v1371_v34 = vsub.f32 %v1307_v20, %v1339_v59  ;;  %v1230_v12 = vpop.xlane.xlu1 %1229  ;;  %v8724_v17 = vmul.f32 %v5971_v51, %v1464_v47  ;;  %v1463_v2 = vld [vmem:[%s11103_s1 + $0x90] sm:$0xff]  ;;  %v8739_v47 = vmul.f32 0.0012755102, %v8481_v13 }
 0x16b   : > { %v1310_v29 = vmul.f32 0.0012755102, %v1230_v12  ;;  %11558 = vst [vmem:[#allocation12_spill] sm:$0xff] %v8776_v14 }
 0x16c   : > { %v1403_v33 = vadd.f32 1e-05, %v1371_v34  ;;  %1702 = vperm.xlu0 %5932, %v8724_v17   ;;  %v1344_v13 = vmul.f32 %v8739_v47, %v8739_v47 }
 0x16d   : > { %v5973_v59 = vpop.eup %5972  ;;  %v1374_v20 = vsub.f32 %v1310_v29, %v1342_v56 }
 0x16e   : > { %1687 = vperm.xlu1 %5933, %v8731_v27   ;;  %5980 = vrsqrt.f32 %v1403_v33  ;;  %v1221_v48 = vpop.xlane.xlu0 %1220  ;;  %v8746_v12 = vmul.f32 %v5973_v59, %v1463_v2  ;;  %v8754_v33 = vmul.f32 0.0012755102, %v8483_v58  ;;  %v1465_v2 = vld [vmem:[%s11103_s1 + $0xa0] sm:$0xff]  ;;  %v1468_v58 = vld [vmem:[%s11103_s1 + $0xb8] sm:$0xff] }
 0x16f   : > { %v1406_v51 = vadd.f32 1e-05, %v1374_v20  ;;  %v1309_v34 = vmul.f32 0.0012755102, %v1221_v48 }
 0x170   : > { %v5975_v54 = vpop.eup %5974  ;;  %11556 = vst [vmem:[#allocation10_spill] sm:$0xff] %v8754_v33 }
 0x171   : > { %5982 = vrsqrt.f32 %v1406_v51  ;;  %v1373_v56 = vsub.f32 %v1309_v34, %v1341_v18  ;;  %v1248_v29 = vpop.xlane.xlu1 %1247  ;;  %v8748_v7 = vmul.f32 %v5975_v54, %v1466_v1  ;;  %v8761_v54 = vmul.f32 0.0012755102, %v8485_v62 }
 0x172   : > { %1697 = vperm.xlu1 %5933, %v8746_v12   ;;  %v1312_v40 = vmul.f32 0.0012755102, %v1248_v29  ;;  %v1343_v51 = vmul.f32 %v8754_v33, %v8754_v33 }
 0x173   : > { %v1405_v59 = vadd.f32 1e-05, %v1373_v56  ;;  %1712 = vperm.xlu0 %5932, %v8748_v7   ;;  %11557 = vst [vmem:[#allocation11_spill] sm:$0xff] %v8761_v54 }
 0x174   : > { %v5977_v20 = vpop.eup %5976  ;;  %v1376_v48 = vsub.f32 %v1312_v40, %v1344_v13 }
 0x175   : > { %5984 = vrsqrt.f32 %v1405_v59  ;;  %v1239_v1 = vpop.xlane.xlu0 %1238  ;;  %v8766_v18 = vmul.f32 %v5977_v20, %v1465_v2  ;;  %v1346_v59 = vmul.f32 %v8761_v54, %v8761_v54  ;;  %v1467_v20 = vld [vmem:[%s11103_s1 + $0xb0] sm:$0xff]  ;;  %v8798_v54 = vmul.f32 0.0012755102, %v8494_v63 }
 0x176   : > { %v1408_v34 = vadd.f32 1e-05, %v1376_v48  ;;  %v1311_v56 = vmul.f32 0.0012755102, %v1239_v1 }
 0x177   : > { %v5979_v29 = vpop.eup %5978  ;;  %1707 = vperm.xlu1 %5933, %v8766_v18   ;;  %v1347_v63 = vmul.f32 %v8798_v54, %v8798_v54 }
 0x178   : > { %5986 = vrsqrt.f32 %v1408_v34  ;;  %v1375_v40 = vsub.f32 %v1311_v56, %v1343_v51  ;;  %v1266_v62 = vpop.xlane.xlu1 %1265  ;;  %v8771_v13 = vmul.f32 %v5979_v29, %v1468_v58  ;;  %v8783_v51 = vmul.f32 0.0012755102, %v8489_v41 }
 0x179   : > { %v1314_v2 = vmul.f32 0.0012755102, %v1266_v62  ;;  %v1345_v29 = vmul.f32 %v8776_v14, %v8776_v14 }
 0x17a   : > { %v1407_v48 = vadd.f32 1e-05, %v1375_v40  ;;  %1722 = vperm.xlu0 %5932, %v8771_v13   ;;  %11559 = vst [vmem:[#allocation13_spill] sm:$0xff] %v8783_v51 }
 0x17b   : > { %v5981_v1 = vpop.eup %5980  ;;  %v1378_v34 = vsub.f32 %v1314_v2, %v1346_v59 }
 0x17c   : > { %5988 = vrsqrt.f32 %v1407_v48  ;;  %v1257_v58 = vpop.xlane.xlu0 %1256  ;;  %v8788_v56 = vmul.f32 %v5981_v1, %v1467_v20  ;;  %v1348_v48 = vmul.f32 %v8783_v51, %v8783_v51  ;;  %v1469_v1 = vld [vmem:[%s11103_s1 + $0xc0] sm:$0xff] }
 0x17d   : > { %v1410_v62 = vadd.f32 1e-05, %v1378_v34  ;;  %v1313_v40 = vmul.f32 0.0012755102, %v1257_v58 }
 0x17e   : > { %v5983_v33 = vpop.eup %5982  ;;  %1717 = vperm.xlu1 %5933, %v8788_v56  }
 0x17f   : > { %5990 = vrsqrt.f32 %v1410_v62  ;;  %v1377_v59 = vsub.f32 %v1313_v40, %v1345_v29  ;;  %v1284_v41 = vpop.xlane.xlu1 %1283  ;;  %v8793_v2 = vmul.f32 %v5983_v33, %v1470_v4  ;;  %v1472_v33 = vld [vmem:[%s11103_s1 + $0xd8] sm:$0xff] }
 0x180   : > { %v1316_v20 = vmul.f32 0.0012755102, %v1284_v41 }
 0x181   : > { %v1409_v34 = vadd.f32 1e-05, %v1377_v59  ;;  %1732 = vperm.xlu0 %5932, %v8793_v2  }
 0x182   : > { %v5985_v58 = vpop.eup %5984  ;;  %v1380_v62 = vsub.f32 %v1316_v20, %v1348_v48  ;;  %v1471_v48 = vld [vmem:[%s11103_s1 + $0xd0] sm:$0xff] }
 0x183   : > { %5992 = vrsqrt.f32 %v1409_v34  ;;  %v1275_v29 = vpop.xlane.xlu0 %1274  ;;  %v8807_v4 = vmul.f32 %v5985_v58, %v1469_v1  ;;  %v1474_v34 = vld [vmem:[%s11103_s1 + $0xe8] sm:$0xff] }
 0x184   : > { %v1412_v40 = vadd.f32 1e-05, %v1380_v62  ;;  %v1315_v41 = vmul.f32 0.0012755102, %v1275_v29  ;;  %v1473_v29 = vld [vmem:[%s11103_s1 + $0xe0] sm:$0xff] }
 0x185   : > { %v5987_v14 = vpop.eup %5986  ;;  %1727 = vperm.xlu1 %5933, %v8807_v4  }
 0x186   : > { %5994 = vrsqrt.f32 %v1412_v40  ;;  %v1379_v59 = vsub.f32 %v1315_v41, %v1347_v63  ;;  %v8812_v51 = vmul.f32 %v5987_v14, %v1472_v33  ;;  %v1476_v63 = vld [vmem:[%s11103_s1 + $0xf8] sm:$0xff] }
 0x188   : > { %v1411_v20 = vadd.f32 1e-05, %v1379_v59  ;;  %1742 = vperm.xlu0 %5932, %v8812_v51  }
 0x189   : > { %v5989_v1 = vpop.eup %5988 }
 0x18a   : > { %5996 = vrsqrt.f32 %v1411_v20  ;;  %v8821_v58 = vmul.f32 %v5989_v1, %v1471_v48  ;;  %v1542_v48 = vmul.f32 %v8555_v24, %v8492_v57  ;;  %v1510_v20 = vld [vmem:[%s11104_s2 + $0x8] sm:$0xff]  ;;  %v1475_v1 = vld [vmem:[%s11103_s1 + $0xf0] sm:$0xff]  ;;  %v1512_v57 = vld [vmem:[%s11104_s2 + $0x18] sm:$0xff] }
 0x18b   : > { %v1509_v24 = vld [vmem:[%s11104_s2] sm:$0xff] }
 0x18c   : > { %v5991_v62 = vpop.eup %5990  ;;  %1737 = vperm.xlu1 %5933, %v8821_v58  }
 0x18d   : > { %v8824_v14 = vmul.f32 %v5991_v62, %v1474_v34  ;;  %v1541_v62 = vmul.f32 %v8560_v26, %v8497_v21  ;;  %v1543_v21 = vmul.f32 %v8571_v22, %v8505_v55  ;;  %v1548_v55 = vmul.f32 %v8654_v23, %v8530_v43  ;;  %v1518_v43 = vld [vmem:[%s11104_s2 + $0x48] sm:$0xff]  ;;  %v1515_v23 = vld [vmem:[%s11104_s2 + $0x30] sm:$0xff] }
 0x18f   : > { %1752 = vperm.xlu0 %5932, %v8824_v14  }
 0x190   : > { %v5993_v33 = vpop.eup %5992 }
 0x191   : > { %v8833_v40 = vmul.f32 %v5993_v33, %v1473_v29  ;;  %v1574_v29 = vsub.f32 %v1510_v20, %v1542_v48  ;;  %v1544_v33 = vmul.f32 %v8585_v10, %v8500_v38  ;;  %v1546_v38 = vmul.f32 %v8623_v25, %v8514_v53  ;;  %v1511_v48 = vld [vmem:[%s11104_s2 + $0x10] sm:$0xff]  ;;  %v1516_v53 = vld [vmem:[%s11104_s2 + $0x38] sm:$0xff]  ;;  %v1513_v25 = vld [vmem:[%s11104_s2 + $0x20] sm:$0xff] }
 0x192   : > { %v1573_v10 = vsub.f32 %v1509_v24, %v1541_v62  ;;  %v1545_v20 = vmul.f32 %v8604_v35, %v8517_v49  ;;  %v1575_v22 = vsub.f32 %v1511_v48, %v1543_v21  ;;  %v1547_v49 = vmul.f32 %v8640_v61, %v8524_v44  ;;  %v1520_v61 = vld [vmem:[%s11104_s2 + $0x58] sm:$0xff]  ;;  %v1519_v24 = vld [vmem:[%s11104_s2 + $0x50] sm:$0xff]  ;;  %v1525_v48 = vld [vmem:[%s11104_s2 + $0x80] sm:$0xff] }
 0x193   : > { %v5995_v41 = vpop.eup %5994  ;;  %1747 = vperm.xlu1 %5933, %v8833_v40   ;;  %v1576_v26 = vsub.f32 %v1512_v57, %v1544_v33  ;;  %v1580_v35 = vsub.f32 %v1516_v53, %v1548_v55  ;;  %v1517_v33 = vld [vmem:[%s11104_s2 + $0x40] sm:$0xff]  ;;  %v1554_v57 = vmul.f32 %v8646_v9, %v8553_v6  ;;  %v1556_v21 = vmul.f32 %v8670_v32, %v8577_v30  ;;  %v1527_v55 = vld [vmem:[%s11104_s2 + $0x90] sm:$0xff] }
 0x194   : > { %v8836_v59 = vmul.f32 %v5995_v41, %v1476_v63  ;;  %v1514_v41 = vld [vmem:[%s11104_s2 + $0x28] sm:$0xff]  ;;  %v1577_v62 = vsub.f32 %v1513_v25, %v1545_v20  ;;  %v1579_v44 = vsub.f32 %v1515_v23, %v1547_v49  ;;  %v1553_v6 = vmul.f32 %v8698_v8, %v8574_v16  ;;  %v11560_v53 = vld [vmem:[#allocation6_spill] sm:$0xff]  ;;  %v1532_v25 = vld [vmem:[%s11104_s2 + $0xb8] sm:$0xff] }
 0x195   : > { %v1555_v30 = vmul.f32 %v8716_v36, %v8595_v60  ;;  %v1526_v8 = vld [vmem:[%s11104_s2 + $0x88] sm:$0xff]  ;;  %v1528_v36 = vld [vmem:[%s11104_s2 + $0x98] sm:$0xff] }
 0x196   : > { %1762 = vperm.xlu0 %5932, %v8836_v59   ;;  %v11561_v49 = vld [vmem:[#allocation7_spill] sm:$0xff] }
 0x197   : > { %v5997_v34 = vpop.eup %5996  ;;  %v1534_v23 = vld [vmem:[%s11104_s2 + $0xc8] sm:$0xff] }
 0x198   : > { %v8851_v63 = vmul.f32 %v5997_v34, %v1475_v1  ;;  %v1578_v1 = vsub.f32 %v1514_v41, %v1546_v38  ;;  %v1550_v34 = vmul.f32 %v8612_v37, %v8527_v28  ;;  %v1549_v28 = vmul.f32 %v8668_v0, %v8545_v50  ;;  %v1522_v0 = vld [vmem:[%s11104_s2 + $0x68] sm:$0xff] }
 0x199   : > { %v1586_v9 = vsub.f32 %v1522_v0, %v1554_v57  ;;  %v1558_v38 = vmul.f32 %v8696_v52, %v8599_v42  ;;  %v1560_v41 = vmul.f32 %v8724_v17, %v8634_v39  ;;  %v1557_v42 = vmul.f32 %v8731_v27, %v8617_v15  ;;  %v1533_v57 = vld [vmem:[%s11104_s2 + $0xc0] sm:$0xff] }
 0x19a   : > { %1996 = vperm.xlu0 %5932, %v1574_v29   ;;  %1757 = vperm.xlu1 %5933, %v8851_v63   ;;  %v1552_v29 = vmul.f32 %v8629_v3, %v8535_v31  ;;  %v1582_v37 = vsub.f32 %v1518_v43, %v1550_v34  ;;  %v1551_v31 = vmul.f32 %v8682_v45, %v8566_v46  ;;  %v1524_v45 = vld [vmem:[%s11104_s2 + $0x78] sm:$0xff]  ;;  %v1529_v34 = vld [vmem:[%s11104_s2 + $0xa0] sm:$0xff] }
 0x19b   : > { %v1581_v50 = vsub.f32 %v1517_v33, %v1549_v28  ;;  %v1588_v32 = vsub.f32 %v1524_v45, %v1556_v21  ;;  %v1590_v52 = vsub.f32 %v1526_v8, %v1558_v38  ;;  %v1562_v39 = vmul.f32 %v8748_v7, %v8660_v11  ;;  %v11563_v28 = vld [vmem:[#allocation9_spill] sm:$0xff]  ;;  %v1538_v21 = vld [vmem:[%s11104_s2 + $0xe8] sm:$0xff] }
 0x19c   : > { %v1584_v3 = vsub.f32 %v1520_v61, %v1552_v29  ;;  %v1583_v46 = vsub.f32 %v1519_v24, %v1551_v31  ;;  %v1559_v15 = vmul.f32 %v8746_v12, %v8651_v5  ;;  %v1592_v17 = vsub.f32 %v1528_v36, %v1560_v41  ;;  %v1531_v29 = vld [vmem:[%s11104_s2 + $0xb0] sm:$0xff]  ;;  %v1536_v33 = vld [vmem:[%s11104_s2 + $0xd8] sm:$0xff] }
 0x19d   : > { %v1589_v27 = vsub.f32 %v1525_v48, %v1557_v42  ;;  %v1561_v11 = vmul.f32 %v8766_v18, %v11560_v53 }
 0x19e   : > { %2006 = vperm.xlu0 %5932, %v1576_v26   ;;  %1991 = vperm.xlu1 %5933, %v1573_v10   ;;  %v1521_v26 = vld [vmem:[%s11104_s2 + $0x60] sm:$0xff]  ;;  %v1523_v10 = vld [vmem:[%s11104_s2 + $0x70] sm:$0xff]  ;;  %v1591_v5 = vsub.f32 %v1527_v55, %v1559_v15 }
 0x19f   : > { %v1585_v16 = vsub.f32 %v1521_v26, %v1553_v6  ;;  %v1587_v60 = vsub.f32 %v1523_v10, %v1555_v30  ;;  %v1535_v6 = vld [vmem:[%s11104_s2 + $0xd0] sm:$0xff] }
 0x1a0   : > { %v11567_v26 = vld [vmem:[#allocation12_spill] sm:$0xff] }
 0x1a1   : > { %v1569_v38 = vmul.f32 %v8833_v40, %v11567_v26  ;;  %v1539_v40 = vld [vmem:[%s11104_s2 + $0xf0] sm:$0xff]  ;;  %v6019_v26 = vld [vmem:[%s11102_s0 + $0xa8] sm:$0xff] }
 0x1a2   : > { %2016 = vperm.xlu0 %5932, %v1578_v1   ;;  %2001 = vperm.xlu1 %5933, %v1575_v22   ;;  %v1530_v1 = vld [vmem:[%s11104_s2 + $0xa8] sm:$0xff]  ;;  %v1564_v22 = vmul.f32 %v8771_v13, %v8685_v19  ;;  %v1566_v19 = vmul.f32 %v8793_v2, %v11561_v49  ;;  %v11562_v13 = vld [vmem:[#allocation8_spill] sm:$0xff]  ;;  %v1568_v2 = vmul.f32 %v8812_v51, %v8739_v47  ;;  %v11565_v51 = vld [vmem:[#allocation10_spill] sm:$0xff] }
 0x1a3   : > { %v1594_v7 = vsub.f32 %v1530_v1, %v1562_v39  ;;  %v1563_v18 = vmul.f32 %v8788_v56, %v11562_v13  ;;  %v1565_v56 = vmul.f32 %v8807_v4, %v11563_v28  ;;  %v1567_v4 = vmul.f32 %v8821_v58, %v11565_v51  ;;  %v5999_v39 = vld [vmem:[%s11102_s0 + $0x40] sm:$0xff]  ;;  %v6001_v1 = vld [vmem:[%s11102_s0 + $0x50] sm:$0xff]  ;;  %v6006_v13 = vld [vmem:[%s11102_s0 + $0x8] sm:$0xff] }
 0x1a4   : > { %v6005_v49 = vld [vmem:[%s11102_s0] sm:$0xff] }
 0x1a5   : > { %v1597_v0 = vsub.f32 %v1533_v57, %v1565_v56  ;;  %v1599_v45 = vsub.f32 %v1535_v6, %v1567_v4  ;;  %v6010_v56 = vld [vmem:[%s11102_s0 + $0x28] sm:$0xff]  ;;  %v6012_v57 = vld [vmem:[%s11102_s0 + $0x70] sm:$0xff]  ;;  %v6014_v4 = vld [vmem:[%s11102_s0 + $0x80] sm:$0xff] }
 0x1a6   : > { %2026 = vperm.xlu0 %5932, %v1580_v35   ;;  %2011 = vperm.xlu1 %5933, %v1577_v62   ;;  %v1596_v35 = vsub.f32 %v1532_v25, %v1564_v22  ;;  %v1593_v62 = vsub.f32 %v1529_v34, %v1561_v11  ;;  %v6002_v22 = vld [vmem:[%s11102_s0 + $0x58] sm:$0xff]  ;;  %v6004_v25 = vld [vmem:[%s11102_s0 + $0x68] sm:$0xff] }
 0x1aa   : > { %2036 = vperm.xlu0 %5932, %v1582_v37   ;;  %2021 = vperm.xlu1 %5933, %v1579_v44   ;;  %v1598_v37 = vsub.f32 %v1534_v23, %v1566_v19  ;;  %v1595_v44 = vsub.f32 %v1531_v29, %v1563_v18  ;;  %v6008_v23 = vld [vmem:[%s11102_s0 + $0x18] sm:$0xff] }
 0x1ae   : > { %2046 = vperm.xlu0 %5932, %v1584_v3   ;;  %2031 = vperm.xlu1 %5933, %v1581_v50   ;;  %v11564_v3 = vld [vmem:[#allocation11_spill] sm:$0xff]  ;;  %v1600_v50 = vsub.f32 %v1536_v33, %v1568_v2  ;;  %v6009_v2 = vld [vmem:[%s11102_s0 + $0x20] sm:$0xff] }
 0x1af   : > { %v1570_v47 = vmul.f32 %v8824_v14, %v11564_v3  ;;  %v11566_v14 = vld [vmem:[#allocation13_spill] sm:$0xff] }
 0x1b1   : > { %v1602_v58 = vsub.f32 %v1538_v21, %v1570_v47  ;;  %v6013_v47 = vld [vmem:[%s11102_s0 + $0x78] sm:$0xff]  ;;  %v6016_v21 = vld [vmem:[%s11102_s0 + $0x90] sm:$0xff] }
 0x1b2   : > { %2056 = vperm.xlu0 %5932, %v1586_v9   ;;  %2041 = vperm.xlu1 %5933, %v1583_v46   ;;  %v1572_v46 = vmul.f32 %v8836_v59, %v11566_v14  ;;  %v1571_v59 = vmul.f32 %v8851_v63, %v8798_v54  ;;  %v5998_v54 = vld [vmem:[%s11102_s0 + $0x38] sm:$0xff] }
 0x1b3   : > { %v6017_v14 = vld [vmem:[%s11102_s0 + $0x98] sm:$0xff] }
 0x1b6   : > { %2066 = vperm.xlu0 %5932, %v1588_v32   ;;  %2051 = vperm.xlu1 %5933, %v1585_v16   ;;  %v1540_v32 = vld [vmem:[%s11104_s2 + $0xf8] sm:$0xff]  ;;  %v1537_v16 = vld [vmem:[%s11104_s2 + $0xe0] sm:$0xff] }
 0x1b7   : > { %v1604_v8 = vsub.f32 %v1540_v32, %v1572_v46  ;;  %v1601_v10 = vsub.f32 %v1537_v16, %v1569_v38  ;;  %v6020_v32 = vld [vmem:[%s11102_s0 + $0xb0] sm:$0xff] }
 0x1ba   : > { %2076 = vperm.xlu0 %5932, %v1590_v52   ;;  %2061 = vperm.xlu1 %5933, %v1587_v60   ;;  %v8940_v20 = vpop.permute.xlu1 %1612  ;;  %v1603_v52 = vsub.f32 %v1539_v40, %v1571_v59 }
 0x1bb   : > { %v9033_v63 = vmul.f32 %v5998_v54, %v8940_v20  ;;  %v9039_v15 = vmul.f32 %v5999_v39, %v8940_v20  ;;  %v9051_v55 = vmul.f32 %v6001_v1, %v8940_v20  ;;  %v9057_v53 = vmul.f32 %v6002_v22, %v8940_v20  ;;  %v6024_v39 = vld [vmem:[%s11102_s0 + $0xd0] sm:$0xff]  ;;  %v6025_v1 = vld [vmem:[%s11102_s0 + $0xd8] sm:$0xff] }
 0x1bc   : > { %v9071_v34 = vmul.f32 %v6004_v25, %v8940_v20 }
 0x1bd   : > { %v1608_v31 = vpop.permute.xlu0 %1607 }
 0x1be   : > { %2086 = vperm.xlu0 %5932, %v1592_v17   ;;  %2071 = vperm.xlu1 %5933, %v1589_v27   ;;  %v6000_v17 = vld [vmem:[%s11102_s0 + $0x48] sm:$0xff]  ;;  %v9076_v19 = vmul.f32 %v6005_v49, %v1608_v31  ;;  %v9081_v18 = vmul.f32 %v6006_v13, %v1608_v31  ;;  %v9093_v29 = vmul.f32 %v6008_v23, %v1608_v31  ;;  %v6029_v23 = vld [vmem:[%s11102_s0 + $0xf8] sm:$0xff] }
 0x1bf   : > { %v9045_v27 = vmul.f32 %v6000_v17, %v8940_v20  ;;  %v9098_v28 = vmul.f32 %v6009_v2, %v1608_v31  ;;  %v6027_v49 = vld [vmem:[%s11102_s0 + $0xe8] sm:$0xff] }
 0x1c1   : > { %v8956_v12 = vpop.permute.xlu1 %1617 }
 0x1c2   : > { %2096 = vperm.xlu0 %5932, %v1594_v7   ;;  %2081 = vperm.xlu1 %5933, %v1591_v5   ;;  %v6003_v7 = vld [vmem:[%s11102_s0 + $0x60] sm:$0xff]  ;;  %v9114_v3 = vmul.f32 %v6012_v57, %v8956_v12  ;;  %v9120_v51 = vmul.f32 %v6013_v47, %v8956_v12  ;;  %v9138_v6 = vmul.f32 %v6016_v21, %v8956_v12  ;;  %v6031_v47 = vld [vmem:[%s11102_s0 + $0x108] sm:$0xff] }
 0x1c3   : > { %v9065_v5 = vmul.f32 %v6003_v7, %v8940_v20  ;;  %v9144_v46 = vmul.f32 %v6017_v14, %v8956_v12  ;;  %v6026_v7 = vld [vmem:[%s11102_s0 + $0xe0] sm:$0xff]  ;;  %v6033_v14 = vld [vmem:[%s11102_s0 + $0x1f8] sm:$0xff] }
 0x1c5   : > { %v8968_v43 = vpop.permute.xlu1 %1622 }
 0x1c6   : > { %2106 = vperm.xlu0 %5932, %v1596_v35   ;;  %2091 = vperm.xlu1 %5933, %v1593_v62   ;;  %v6007_v62 = vld [vmem:[%s11102_s0 + $0x10] sm:$0xff]  ;;  %v9156_v38 = vmul.f32 %v6019_v26, %v8968_v43  ;;  %v9162_v16 = vmul.f32 %v6020_v32, %v8968_v43  ;;  %v9188_v17 = vmul.f32 %v6024_v39, %v8968_v43  ;;  %v6034_v26 = vld [vmem:[%s11102_s0 + $0x200] sm:$0xff]  ;;  %v6037_v39 = vld [vmem:[%s11102_s0 + $0x218] sm:$0xff] }
 0x1c7   : > { %v9088_v20 = vmul.f32 %v6007_v62, %v1608_v31  ;;  %v9194_v22 = vmul.f32 %v6025_v1, %v8968_v43  ;;  %v6028_v62 = vld [vmem:[%s11102_s0 + $0xf0] sm:$0xff] }
 0x1c9   : > { %v8980_v61 = vpop.permute.xlu1 %1627 }
 0x1ca   : > { %2116 = vperm.xlu0 %5932, %v1598_v37   ;;  %2101 = vperm.xlu1 %5933, %v1595_v44   ;;  %v9000_v9 = vpop.permute.xlu0 %1652  ;;  %v9103_v37 = vmul.f32 %v6010_v56, %v1608_v31  ;;  %v6011_v44 = vld [vmem:[%s11102_s0 + $0x30] sm:$0xff]  ;;  %v9200_v25 = vmul.f32 %v6026_v7, %v8980_v61  ;;  %v9206_v13 = vmul.f32 %v6027_v49, %v8980_v61  ;;  %v6030_v56 = vld [vmem:[%s11102_s0 + $0x100] sm:$0xff] }
 0x1cb   : > { %v9108_v33 = vmul.f32 %v6011_v44, %v1608_v31  ;;  %v9126_v31 = vmul.f32 %v6014_v4, %v8956_v12  ;;  %v9218_v2 = vmul.f32 %v6029_v23, %v8980_v61  ;;  %v9224_v44 = vmul.f32 %v6030_v56, %v8980_v61  ;;  %v6038_v7 = vld [vmem:[%s11102_s0 + $0x220] sm:$0xff] }
 0x1cc   : > { %11568 = vst [vmem:[#allocation14_spill] sm:$0xff] %v9200_v25  ;;  %11569 = vst [vmem:[#allocation15_spill] sm:$0xff] %v9206_v13  ;;  %v9232_v4 = vmul.f32 %v6031_v47, %v8980_v61  ;;  %v9250_v32 = vmul.f32 %v6034_v26, %v9000_v9  ;;  %v9268_v1 = vmul.f32 %v6037_v39, %v9000_v9  ;;  %v6040_v56 = vld [vmem:[%s11102_s0 + $0x120] sm:$0xff]  ;;  %v6042_v26 = vld [vmem:[%s11102_s0 + $0x228] sm:$0xff] }
 0x1cd   : > { %v8992_v24 = vpop.permute.xlu1 %1632  ;;  %11571 = vst [vmem:[#allocation20_spill] sm:$0xff] %v9218_v2  ;;  %11572 = vst [vmem:[#allocation17_spill] sm:$0xff] %v9224_v44  ;;  %v9274_v49 = vmul.f32 %v6038_v7, %v9000_v9  ;;  %v6044_v7 = vld [vmem:[%s11102_s0 + $0x138] sm:$0xff]  ;;  %v6050_v44 = vld [vmem:[%s11102_s0 + $0x280] sm:$0xff] }
 0x1ce   : > { %2126 = vperm.xlu0 %5932, %v1600_v50   ;;  %2111 = vperm.xlu1 %5933, %v1597_v0   ;;  %v9021_v42 = vpop.permute.xlu0 %1662  ;;  %v6015_v50 = vld [vmem:[%s11102_s0 + $0x88] sm:$0xff]  ;;  %11573 = vst [vmem:[#allocation19_spill] sm:$0xff] %v9232_v4  ;;  %v9286_v47 = vmul.f32 %v6040_v56, %v8992_v24  ;;  %v6045_v56 = vld [vmem:[%s11102_s0 + $0x140] sm:$0xff] }
 0x1cf   : > { %v9132_v0 = vmul.f32 %v6015_v50, %v8956_v12  ;;  %v6032_v50 = vld [vmem:[%s11102_s0 + $0x110] sm:$0xff]  ;;  %11575 = vst [vmem:[#allocation21_spill] sm:$0xff] %v9274_v49  ;;  %v6075_v13 = vld [vmem:[%s11102_s0 + $0x1c0] sm:$0xff]  ;;  %v6076_v25 = vld [vmem:[%s11102_s0 + $0x1c8] sm:$0xff] }
 0x1d0   : > { %v9238_v21 = vmul.f32 %v6032_v50, %v8980_v61  ;;  %v6041_v50 = vld [vmem:[%s11102_s0 + $0x128] sm:$0xff] }
 0x1d1   : > { %v9006_v30 = vpop.permute.xlu1 %1637  ;;  %v6082_v49 = vld [vmem:[%s11102_s0 + $0x348] sm:$0xff] }
 0x1d2   : > { %2136 = vperm.xlu0 %5932, %v1602_v58   ;;  %2121 = vperm.xlu1 %5933, %v1599_v45   ;;  %v9025_v36 = vpop.permute.xlu0 %1672  ;;  %v6018_v58 = vld [vmem:[%s11102_s0 + $0xa0] sm:$0xff]  ;;  %11574 = vst [vmem:[#allocation18_spill] sm:$0xff] %v9238_v21 }
 0x1d3   : > { %v9150_v45 = vmul.f32 %v6018_v58, %v8956_v12  ;;  %v9244_v58 = vmul.f32 %v6033_v14, %v9000_v9  ;;  %v9292_v14 = vmul.f32 %v6041_v50, %v8992_v24  ;;  %v6046_v50 = vld [vmem:[%s11102_s0 + $0x148] sm:$0xff] }
 0x1d5   : > { %v9016_v41 = vpop.permute.xlu1 %1642 }
 0x1d6   : > { %2146 = vperm.xlu0 %5932, %v1604_v8   ;;  %2131 = vperm.xlu1 %5933, %v1601_v10   ;;  %v6021_v8 = vld [vmem:[%s11102_s0 + $0xb8] sm:$0xff]  ;;  %v6022_v10 = vld [vmem:[%s11102_s0 + $0xc0] sm:$0xff] }
 0x1d7   : > { %v9168_v12 = vmul.f32 %v6021_v8, %v8968_v43  ;;  %v9174_v59 = vmul.f32 %v6022_v10, %v8968_v43  ;;  %v6035_v8 = vld [vmem:[%s11102_s0 + $0x208] sm:$0xff]  ;;  %v6036_v10 = vld [vmem:[%s11102_s0 + $0x210] sm:$0xff] }
 0x1d9   : > { %v9023_v60 = vpop.permute.xlu1 %1647  ;;  %v9083_v35 = vpop.permute.xlu0 %1682 }
 0x1da   : > { %2141 = vperm.xlu1 %5933, %v1603_v52   ;;  %v6023_v52 = vld [vmem:[%s11102_s0 + $0xc8] sm:$0xff] }
 0x1db   : > { %v9182_v54 = vmul.f32 %v6023_v52, %v8968_v43  ;;  %v9212_v43 = vmul.f32 %v6028_v62, %v8980_v61  ;;  %v9256_v61 = vmul.f32 %v6035_v8, %v9000_v9  ;;  %v9262_v52 = vmul.f32 %v6036_v10, %v9000_v9  ;;  %v6039_v62 = vld [vmem:[%s11102_s0 + $0x118] sm:$0xff]  ;;  %v6043_v10 = vld [vmem:[%s11102_s0 + $0x130] sm:$0xff] }
 0x1dc   : > { %v9280_v23 = vmul.f32 %v6039_v62, %v8992_v24  ;;  %v9298_v8 = vmul.f32 %v6042_v26, %v9000_v9  ;;  %v9304_v39 = vmul.f32 %v6043_v10, %v8992_v24  ;;  %v9310_v62 = vmul.f32 %v6044_v7, %v8992_v24  ;;  %v6047_v7 = vld [vmem:[%s11102_s0 + $0x268] sm:$0xff] }
 0x1dd   : > { %v9027_v48 = vpop.permute.xlu1 %1657  ;;  %11570 = vst [vmem:[#allocation16_spill] sm:$0xff] %v9212_v43  ;;  %v9316_v9 = vmul.f32 %v6045_v56, %v8992_v24  ;;  %v9322_v26 = vmul.f32 %v6046_v50, %v8992_v24  ;;  %v9330_v21 = vmul.f32 %v6047_v7, %v9021_v42  ;;  %v6048_v56 = vld [vmem:[%s11102_s0 + $0x270] sm:$0xff]  ;;  %v6049_v24 = vld [vmem:[%s11102_s0 + $0x278] sm:$0xff]  ;;  %v9348_v7 = vmul.f32 %v6050_v44, %v9021_v42 }
 0x1de   : > { %11576 = vst [vmem:[#allocation24_spill] sm:$0xff] %v9298_v8  ;;  %v9336_v4 = vmul.f32 %v6048_v56, %v9021_v42  ;;  %v9342_v50 = vmul.f32 %v6049_v24, %v9021_v42  ;;  %v6077_v8 = vld [vmem:[%s11102_s0 + $0x1d0] sm:$0xff] }
 0x1df   : > { %11577 = vst [vmem:[#allocation22_spill] sm:$0xff] %v9330_v21  ;;  %11580 = vst [vmem:[#allocation26_spill] sm:$0xff] %v9348_v7  ;;  %v6051_v21 = vld [vmem:[%s11102_s0 + $0x150] sm:$0xff]  ;;  %v6054_v7 = vld [vmem:[%s11102_s0 + $0x298] sm:$0xff] }
 0x1e0   : > { %v9226_v57 = vpop.permute.xlu0 %1692  ;;  %11578 = vst [vmem:[#allocation23_spill] sm:$0xff] %v9336_v4  ;;  %11579 = vst [vmem:[#allocation25_spill] sm:$0xff] %v9342_v50  ;;  %v9354_v56 = vmul.f32 %v6051_v21, %v9006_v30  ;;  %v6052_v4 = vld [vmem:[%s11102_s0 + $0x288] sm:$0xff]  ;;  %v6053_v50 = vld [vmem:[%s11102_s0 + $0x290] sm:$0xff]  ;;  %v9372_v21 = vmul.f32 %v6054_v7, %v9021_v42 }
 0x1e1   : > { %v9059_v11 = vpop.permute.xlu1 %1667  ;;  %v9360_v24 = vmul.f32 %v6052_v4, %v9021_v42  ;;  %v9366_v44 = vmul.f32 %v6053_v50, %v9021_v42  ;;  %v6055_v4 = vld [vmem:[%s11102_s0 + $0x158] sm:$0xff]  ;;  %v6056_v50 = vld [vmem:[%s11102_s0 + $0x160] sm:$0xff]  ;;  %v6057_v42 = vld [vmem:[%s11102_s0 + $0x168] sm:$0xff] }
 0x1e2   : > { %11581 = vst [vmem:[#allocation27_spill] sm:$0xff] %v9354_v56  ;;  %11584 = vst [vmem:[#allocation29_spill] sm:$0xff] %v9372_v21  ;;  %v9392_v7 = vmul.f32 %v6057_v42, %v9006_v30  ;;  %v6058_v21 = vld [vmem:[%s11102_s0 + $0x170] sm:$0xff] }
 0x1e3   : > { %11582 = vst [vmem:[#allocation31_spill] sm:$0xff] %v9360_v24  ;;  %11583 = vst [vmem:[#allocation28_spill] sm:$0xff] %v9366_v44  ;;  %v9380_v24 = vmul.f32 %v6055_v4, %v9006_v30  ;;  %v9386_v44 = vmul.f32 %v6056_v50, %v9006_v30  ;;  %v9398_v4 = vmul.f32 %v6058_v21, %v9006_v30 }
 0x1e4   : > { %11587 = vst [vmem:[#allocation32_spill] sm:$0xff] %v9392_v7  ;;  %v6061_v7 = vld [vmem:[%s11102_s0 + $0x2d8] sm:$0xff] }
 0x1e5   : > { %v9176_v40 = vpop.permute.xlu1 %1677  ;;  %11585 = vst [vmem:[#allocation37_spill] sm:$0xff] %v9380_v24  ;;  %11586 = vst [vmem:[#allocation30_spill] sm:$0xff] %v9386_v44  ;;  %v6059_v24 = vld [vmem:[%s11102_s0 + $0x178] sm:$0xff]  ;;  %v6060_v44 = vld [vmem:[%s11102_s0 + $0x180] sm:$0xff]  ;;  %v9416_v21 = vmul.f32 %v6061_v7, %v9025_v36 }
 0x1e6   : > { %11588 = vst [vmem:[#allocation33_spill] sm:$0xff] %v9398_v4  ;;  %v9404_v50 = vmul.f32 %v6059_v24, %v9006_v30  ;;  %v9410_v42 = vmul.f32 %v6060_v44, %v9006_v30  ;;  %v6062_v4 = vld [vmem:[%s11102_s0 + $0x2e0] sm:$0xff]  ;;  %v6064_v44 = vld [vmem:[%s11102_s0 + $0x2f0] sm:$0xff] }
 0x1e7   : > { %v9374_v56 = vpop.permute.xlu0 %1702  ;;  %11591 = vst [vmem:[#allocation38_spill] sm:$0xff] %v9416_v21  ;;  %v9422_v24 = vmul.f32 %v6062_v4, %v9025_v36  ;;  %v9434_v7 = vmul.f32 %v6064_v44, %v9025_v36  ;;  %v6065_v21 = vld [vmem:[%s11102_s0 + $0x2f8] sm:$0xff] }
 0x1e8   : > { %11589 = vst [vmem:[#allocation34_spill] sm:$0xff] %v9404_v50  ;;  %11590 = vst [vmem:[#allocation35_spill] sm:$0xff] %v9410_v42  ;;  %v6063_v50 = vld [vmem:[%s11102_s0 + $0x2e8] sm:$0xff]  ;;  %v9440_v4 = vmul.f32 %v6065_v21, %v9025_v36 }
 0x1e9   : > { %v9324_v10 = vpop.permute.xlu1 %1687  ;;  %11592 = vst [vmem:[#allocation36_spill] sm:$0xff] %v9422_v24  ;;  %v9428_v30 = vmul.f32 %v6063_v50, %v9025_v36  ;;  %11594 = vst [vmem:[#allocation40_spill] sm:$0xff] %v9434_v7  ;;  %v6066_v24 = vld [vmem:[%s11102_s0 + $0x300] sm:$0xff]  ;;  %v6068_v7 = vld [vmem:[%s11102_s0 + $0x190] sm:$0xff] }
 0x1ea   : > { %11595 = vst [vmem:[#allocation44_spill] sm:$0xff] %v9440_v4  ;;  %v9446_v50 = vmul.f32 %v6066_v24, %v9025_v36  ;;  %v9458_v21 = vmul.f32 %v6068_v7, %v9016_v41  ;;  %v6069_v4 = vld [vmem:[%s11102_s0 + $0x198] sm:$0xff]  ;;  %v6071_v7 = vld [vmem:[%s11102_s0 + $0x1a0] sm:$0xff] }
 0x1eb   : > { %11593 = vst [vmem:[#allocation39_spill] sm:$0xff] %v9428_v30  ;;  %v6067_v30 = vld [vmem:[%s11102_s0 + $0x188] sm:$0xff]  ;;  %v9464_v24 = vmul.f32 %v6069_v4, %v9016_v41  ;;  %v9478_v2 = vmul.f32 %v6071_v7, %v9016_v41 }
 0x1ec   : > { %11596 = vst [vmem:[#allocation41_spill] sm:$0xff] %v9446_v50  ;;  %v9452_v44 = vmul.f32 %v6067_v30, %v9016_v41  ;;  %v6070_v50 = vld [vmem:[%s11102_s0 + $0x308] sm:$0xff] }
 0x1ed   : > { %v9470_v30 = vmul.f32 %v6070_v50, %v9025_v36  ;;  %v9472_v42 = vpop.permute.xlu1 %1697  ;;  %v6072_v4 = vld [vmem:[%s11102_s0 + $0x1a8] sm:$0xff]  ;;  %v6073_v36 = vld [vmem:[%s11102_s0 + $0x1b0] sm:$0xff] }
 0x1ee   : > { %v9484_v43 = vmul.f32 %v6072_v4, %v9016_v41  ;;  %v9490_v50 = vmul.f32 %v6073_v36, %v9016_v41  ;;  %v9502_v4 = vmul.f32 %v6075_v13, %v9023_v60  ;;  %v9508_v36 = vmul.f32 %v6076_v25, %v9023_v60  ;;  %v6079_v25 = vld [vmem:[%s11102_s0 + $0x1e0] sm:$0xff] }
 0x1ef   : > { %11597 = vst [vmem:[#allocation42_spill] sm:$0xff] %v9470_v30  ;;  %v6074_v30 = vld [vmem:[%s11102_s0 + $0x1b8] sm:$0xff] }
 0x1f0   : > { %v9496_v7 = vmul.f32 %v6074_v30, %v9016_v41  ;;  %11598 = vst [vmem:[#allocation43_spill] sm:$0xff] %v9502_v4  ;;  %11599 = vst [vmem:[#allocation45_spill] sm:$0xff] %v9508_v36  ;;  %v9514_v41 = vmul.f32 %v6077_v8, %v9023_v60  ;;  %v6078_v30 = vld [vmem:[%s11102_s0 + $0x1d8] sm:$0xff]  ;;  %v9522_v4 = vpop.permute.xlu0 %1712  ;;  %v9528_v36 = vmul.f32 %v6079_v25, %v9023_v60  ;;  %v6080_v8 = vld [vmem:[%s11102_s0 + $0x1e8] sm:$0xff] }
 0x1f1   : > { %v9520_v13 = vmul.f32 %v6078_v30, %v9023_v60  ;;  %v6081_v30 = vld [vmem:[%s11102_s0 + $0x1f0] sm:$0xff]  ;;  %v9546_v25 = vmul.f32 %v6082_v49, %v9083_v35 }
 0x1f2   : > { %11600 = vst [vmem:[#allocation46_spill] sm:$0xff] %v9514_v41  ;;  %11602 = vst [vmem:[#allocation48_spill] sm:$0xff] %v9528_v36  ;;  %v9534_v41 = vmul.f32 %v6080_v8, %v9023_v60  ;;  %v6083_v36 = vld [vmem:[%s11102_s0 + $0x350] sm:$0xff] }
 0x1f3   : > { %11601 = vst [vmem:[#allocation47_spill] sm:$0xff] %v9520_v13  ;;  %v9540_v13 = vmul.f32 %v6081_v30, %v9023_v60  ;;  %11604 = vst [vmem:[#allocation50_spill] sm:$0xff] %v9546_v25  ;;  %v9552_v8 = vmul.f32 %v6083_v36, %v9083_v35  ;;  %v6085_v30 = vld [vmem:[%s11102_s0 + $0x360] sm:$0xff]  ;;  %v6086_v25 = vld [vmem:[%s11102_s0 + $0x368] sm:$0xff] }
 0x1f4   : > { %11603 = vst [vmem:[#allocation49_spill] sm:$0xff] %v9534_v41  ;;  %v6084_v41 = vld [vmem:[%s11102_s0 + $0x358] sm:$0xff]  ;;  %v9564_v49 = vmul.f32 %v6085_v30, %v9083_v35  ;;  %v9570_v36 = vmul.f32 %v6086_v25, %v9083_v35 }
 0x1f5   : > { %11605 = vst [vmem:[#allocation58_spill] sm:$0xff] %v9552_v8  ;;  %v9558_v60 = vmul.f32 %v6084_v41, %v9083_v35  ;;  %v6087_v8 = vld [vmem:[%s11102_s0 + $0x370] sm:$0xff] }
 0x1f6   : > { %11607 = vst [vmem:[#allocation53_spill] sm:$0xff] %v9564_v49  ;;  %11608 = vst [vmem:[#allocation52_spill] sm:$0xff] %v9570_v36  ;;  %v9576_v41 = vmul.f32 %v6087_v8, %v9083_v35  ;;  %v6089_v49 = vld [vmem:[%s11102_s0 + $0x230] sm:$0xff]  ;;  %v6090_v36 = vld [vmem:[%s11102_s0 + $0x238] sm:$0xff] }
 0x1f7   : > { %11606 = vst [vmem:[#allocation51_spill] sm:$0xff] %v9558_v60  ;;  %v6088_v60 = vld [vmem:[%s11102_s0 + $0x378] sm:$0xff]  ;;  %v9588_v25 = vmul.f32 %v6089_v49, %v9027_v48  ;;  %v9594_v8 = vmul.f32 %v6090_v36, %v9027_v48 }
 0x1f8   : > { %11609 = vst [vmem:[#allocation54_spill] sm:$0xff] %v9576_v41  ;;  %v9582_v30 = vmul.f32 %v6088_v60, %v9083_v35  ;;  %v6091_v41 = vld [vmem:[%s11102_s0 + $0x240] sm:$0xff]  ;;  %v6092_v60 = vld [vmem:[%s11102_s0 + $0x248] sm:$0xff] }
 0x1f9   : > { %11611 = vst [vmem:[#allocation56_spill] sm:$0xff] %v9588_v25  ;;  %11612 = vst [vmem:[#allocation57_spill] sm:$0xff] %v9594_v8  ;;  %v9600_v35 = vmul.f32 %v6091_v41, %v9027_v48  ;;  %v9606_v49 = vmul.f32 %v6092_v60, %v9027_v48  ;;  %v6093_v25 = vld [vmem:[%s11102_s0 + $0x250] sm:$0xff]  ;;  %v6094_v8 = vld [vmem:[%s11102_s0 + $0x258] sm:$0xff] }
 0x1fa   : > { %11610 = vst [vmem:[#allocation55_spill] sm:$0xff] %v9582_v30  ;;  %v9612_v36 = vmul.f32 %v6093_v25, %v9027_v48  ;;  %v9618_v41 = vmul.f32 %v6094_v8, %v9027_v48  ;;  %v6095_v60 = vld [vmem:[%s11102_s0 + $0x260] sm:$0xff]  ;;  %v6096_v25 = vld [vmem:[%s11102_s0 + $0x3b8] sm:$0xff]  ;;  %v6098_v30 = vld [vmem:[%s11102_s0 + $0x3c8] sm:$0xff] }
 0x1fb   : > { %11613 = vst [vmem:[#allocation61_spill] sm:$0xff] %v9600_v35  ;;  %11614 = vst [vmem:[#allocation60_spill] sm:$0xff] %v9606_v49  ;;  %v9620_v35 = vpop.permute.xlu1 %1707  ;;  %v9626_v49 = vmul.f32 %v6095_v60, %v9027_v48  ;;  %v6097_v8 = vld [vmem:[%s11102_s0 + $0x3c0] sm:$0xff]  ;;  %v9644_v48 = vmul.f32 %v6098_v30, %v9226_v57  ;;  %v6099_v60 = vld [vmem:[%s11102_s0 + $0x3d0] sm:$0xff] }
 0x1fc   : > { %11615 = vst [vmem:[#allocation59_spill] sm:$0xff] %v9612_v36  ;;  %11616 = vst [vmem:[#allocation62_spill] sm:$0xff] %v9618_v41  ;;  %v9632_v36 = vmul.f32 %v6096_v25, %v9226_v57  ;;  %v9638_v41 = vmul.f32 %v6097_v8, %v9226_v57  ;;  %v9650_v25 = vmul.f32 %v6099_v60, %v9226_v57 }
 0x1fd   : > { %11619 = vst [vmem:[#allocation65_spill] sm:$0xff] %v9644_v48  ;;  %v6102_v48 = vld [vmem:[%s11102_s0 + $0x3e8] sm:$0xff] }
 0x1fe   : > { %11617 = vst [vmem:[#allocation63_spill] sm:$0xff] %v9632_v36  ;;  %11618 = vst [vmem:[#allocation64_spill] sm:$0xff] %v9638_v41  ;;  %v6100_v36 = vld [vmem:[%s11102_s0 + $0x3d8] sm:$0xff]  ;;  %v6101_v41 = vld [vmem:[%s11102_s0 + $0x3e0] sm:$0xff]  ;;  %v9668_v60 = vmul.f32 %v6102_v48, %v9226_v57 }
 0x1ff   : > { %11620 = vst [vmem:[#allocation66_spill] sm:$0xff] %v9650_v25  ;;  %v9656_v8 = vmul.f32 %v6100_v36, %v9226_v57  ;;  %v9662_v30 = vmul.f32 %v6101_v41, %v9226_v57  ;;  %v9670_v25 = vpop.permute.xlu0 %1722  ;;  %v6103_v36 = vld [vmem:[%s11102_s0 + $0x2a0] sm:$0xff]  ;;  %v6104_v41 = vld [vmem:[%s11102_s0 + $0x2a8] sm:$0xff]  ;;  %v6105_v57 = vld [vmem:[%s11102_s0 + $0x2b0] sm:$0xff] }
 0x200   : > { %11623 = vst [vmem:[#allocation71_spill] sm:$0xff] %v9668_v60  ;;  %v9688_v48 = vmul.f32 %v6105_v57, %v9059_v11  ;;  %v6106_v60 = vld [vmem:[%s11102_s0 + $0x2b8] sm:$0xff] }
 0x201   : > { %11621 = vst [vmem:[#allocation67_spill] sm:$0xff] %v9656_v8  ;;  %11622 = vst [vmem:[#allocation68_spill] sm:$0xff] %v9662_v30  ;;  %v9676_v8 = vmul.f32 %v6103_v36, %v9059_v11  ;;  %v9682_v30 = vmul.f32 %v6104_v41, %v9059_v11  ;;  %v9694_v36 = vmul.f32 %v6106_v60, %v9059_v11 }
 0x202   : > { %11626 = vst [vmem:[#allocation72_spill] sm:$0xff] %v9688_v48  ;;  %v6109_v48 = vld [vmem:[%s11102_s0 + $0x2d0] sm:$0xff] }
 0x203   : > { %11624 = vst [vmem:[#allocation69_spill] sm:$0xff] %v9676_v8  ;;  %11625 = vst [vmem:[#allocation70_spill] sm:$0xff] %v9682_v30  ;;  %v6107_v8 = vld [vmem:[%s11102_s0 + $0x2c0] sm:$0xff]  ;;  %v6108_v30 = vld [vmem:[%s11102_s0 + $0x2c8] sm:$0xff]  ;;  %v9712_v60 = vmul.f32 %v6109_v48, %v9059_v11 }
 0x204   : > { %11627 = vst [vmem:[#allocation73_spill] sm:$0xff] %v9694_v36  ;;  %v9700_v41 = vmul.f32 %v6107_v8, %v9059_v11  ;;  %v9706_v57 = vmul.f32 %v6108_v30, %v9059_v11  ;;  %v6110_v36 = vld [vmem:[%s11102_s0 + $0x310] sm:$0xff]  ;;  %v6113_v48 = vld [vmem:[%s11102_s0 + $0x328] sm:$0xff] }
 0x205   : > { %11630 = vst [vmem:[#allocation75_spill] sm:$0xff] %v9712_v60  ;;  %v9718_v8 = vmul.f32 %v6110_v36, %v9176_v40  ;;  %v9736_v36 = vmul.f32 %v6113_v48, %v9176_v40 }
 0x206   : > { %11628 = vst [vmem:[#allocation74_spill] sm:$0xff] %v9700_v41  ;;  %11629 = vst [vmem:[#allocation77_spill] sm:$0xff] %v9706_v57  ;;  %v6111_v41 = vld [vmem:[%s11102_s0 + $0x318] sm:$0xff]  ;;  %v6112_v57 = vld [vmem:[%s11102_s0 + $0x320] sm:$0xff] }
 0x207   : > { %11631 = vst [vmem:[#allocation76_spill] sm:$0xff] %v9718_v8  ;;  %v9724_v30 = vmul.f32 %v6111_v41, %v9176_v40  ;;  %v9730_v11 = vmul.f32 %v6112_v57, %v9176_v40  ;;  %11634 = vst [vmem:[#allocation80_spill] sm:$0xff] %v9736_v36  ;;  %v6114_v8 = vld [vmem:[%s11102_s0 + $0x330] sm:$0xff]  ;;  %v6117_v36 = vld [vmem:[%s11102_s0 + $0x338] sm:$0xff] }
 0x208   : > { %v9742_v41 = vmul.f32 %v6114_v8, %v9176_v40  ;;  %v9760_v8 = vmul.f32 %v6117_v36, %v9176_v40  ;;  %v6120_v36 = vld [vmem:[%s11102_s0 + $0x440] sm:$0xff] }
 0x209   : > { %11632 = vst [vmem:[#allocation78_spill] sm:$0xff] %v9724_v30  ;;  %11633 = vst [vmem:[#allocation79_spill] sm:$0xff] %v9730_v11  ;;  %v6115_v30 = vld [vmem:[%s11102_s0 + $0x428] sm:$0xff]  ;;  %v6116_v11 = vld [vmem:[%s11102_s0 + $0x430] sm:$0xff] }
 0x20a   : > { %11635 = vst [vmem:[#allocation82_spill] sm:$0xff] %v9742_v41  ;;  %v9748_v57 = vmul.f32 %v6115_v30, %v9374_v56  ;;  %v9754_v48 = vmul.f32 %v6116_v11, %v9374_v56  ;;  %11638 = vst [vmem:[#allocation83_spill] sm:$0xff] %v9760_v8  ;;  %v6118_v41 = vld [vmem:[%s11102_s0 + $0x340] sm:$0xff]  ;;  %v6119_v11 = vld [vmem:[%s11102_s0 + $0x438] sm:$0xff]  ;;  %v9780_v8 = vmul.f32 %v6120_v36, %v9374_v56 }
 0x20b   : > { %v9766_v30 = vmul.f32 %v6118_v41, %v9176_v40  ;;  %v6121_v40 = vld [vmem:[%s11102_s0 + $0x448] sm:$0xff] }
 0x20c   : > { %11636 = vst [vmem:[#allocation81_spill] sm:$0xff] %v9748_v57  ;;  %11637 = vst [vmem:[#allocation88_spill] sm:$0xff] %v9754_v48  ;;  %v9768_v57 = vpop.permute.xlu1 %1717  ;;  %v9774_v48 = vmul.f32 %v6119_v11, %v9374_v56  ;;  %v9786_v41 = vmul.f32 %v6121_v40, %v9374_v56 }
 0x20d   : > { %11639 = vst [vmem:[#allocation85_spill] sm:$0xff] %v9766_v30  ;;  %11641 = vst [vmem:[#allocation86_spill] sm:$0xff] %v9780_v8  ;;  %v6122_v30 = vld [vmem:[%s11102_s0 + $0x450] sm:$0xff]  ;;  %v6124_v8 = vld [vmem:[%s11102_s0 + $0x380] sm:$0xff] }
 0x20e   : > { %11640 = vst [vmem:[#allocation84_spill] sm:$0xff] %v9774_v48  ;;  %11642 = vst [vmem:[#allocation89_spill] sm:$0xff] %v9786_v41  ;;  %v9792_v11 = vmul.f32 %v6122_v30, %v9374_v56  ;;  %v6123_v48 = vld [vmem:[%s11102_s0 + $0x458] sm:$0xff]  ;;  %v9804_v40 = vmul.f32 %v6124_v8, %v9324_v10  ;;  %v6125_v41 = vld [vmem:[%s11102_s0 + $0x388] sm:$0xff] }
 0x20f   : > { %v9798_v36 = vmul.f32 %v6123_v48, %v9374_v56  ;;  %v9810_v30 = vmul.f32 %v6125_v41, %v9324_v10  ;;  %v9818_v48 = vpop.permute.xlu0 %1732  ;;  %v6127_v8 = vld [vmem:[%s11102_s0 + $0x398] sm:$0xff]  ;;  %v6128_v41 = vld [vmem:[%s11102_s0 + $0x3a0] sm:$0xff] }
 0x210   : > { %11643 = vst [vmem:[#allocation87_spill] sm:$0xff] %v9792_v11  ;;  %11645 = vst [vmem:[#allocation90_spill] sm:$0xff] %v9804_v40  ;;  %v6126_v11 = vld [vmem:[%s11102_s0 + $0x390] sm:$0xff]  ;;  %v9824_v40 = vmul.f32 %v6127_v8, %v9324_v10 }
 0x211   : > { %11644 = vst [vmem:[#allocation93_spill] sm:$0xff] %v9798_v36  ;;  %11646 = vst [vmem:[#allocation91_spill] sm:$0xff] %v9810_v30  ;;  %v9816_v56 = vmul.f32 %v6126_v11, %v9324_v10  ;;  %v9830_v30 = vmul.f32 %v6128_v41, %v9324_v10  ;;  %v6129_v11 = vld [vmem:[%s11102_s0 + $0x3a8] sm:$0xff]  ;;  %v6130_v36 = vld [vmem:[%s11102_s0 + $0x3b0] sm:$0xff] }
 0x212   : > { %11648 = vst [vmem:[#allocation98_spill] sm:$0xff] %v9824_v40  ;;  %v9842_v8 = vmul.f32 %v6130_v36, %v9324_v10  ;;  %v6131_v40 = vld [vmem:[%s11102_s0 + $0x3f0] sm:$0xff]  ;;  %v6134_v36 = vld [vmem:[%s11102_s0 + $0x408] sm:$0xff] }
 0x213   : > { %11647 = vst [vmem:[#allocation92_spill] sm:$0xff] %v9816_v56  ;;  %11649 = vst [vmem:[#allocation95_spill] sm:$0xff] %v9830_v30  ;;  %v9836_v56 = vmul.f32 %v6129_v11, %v9324_v10  ;;  %v9848_v41 = vmul.f32 %v6131_v40, %v9472_v42  ;;  %v6132_v30 = vld [vmem:[%s11102_s0 + $0x3f8] sm:$0xff]  ;;  %v9866_v40 = vmul.f32 %v6134_v36, %v9472_v42 }
 0x214   : > { %11651 = vst [vmem:[#allocation96_spill] sm:$0xff] %v9842_v8  ;;  %v9854_v11 = vmul.f32 %v6132_v30, %v9472_v42  ;;  %v6139_v8 = vld [vmem:[%s11102_s0 + $0x4a0] sm:$0xff] }
 0x215   : > { %11650 = vst [vmem:[#allocation94_spill] sm:$0xff] %v9836_v56  ;;  %11652 = vst [vmem:[#allocation97_spill] sm:$0xff] %v9848_v41  ;;  %v6133_v56 = vld [vmem:[%s11102_s0 + $0x400] sm:$0xff]  ;;  %v6135_v41 = vld [vmem:[%s11102_s0 + $0x498] sm:$0xff] }
 0x216   : > { %11653 = vst [vmem:[#allocation99_spill] sm:$0xff] %v9854_v11  ;;  %v9860_v10 = vmul.f32 %v6133_v56, %v9472_v42  ;;  %11655 = vst [vmem:[#allocation100_spill] sm:$0xff] %v9866_v40  ;;  %v9872_v30 = vmul.f32 %v6135_v41, %v9522_v4  ;;  %v6136_v11 = vld [vmem:[%s11102_s0 + $0x410] sm:$0xff]  ;;  %v6138_v40 = vld [vmem:[%s11102_s0 + $0x420] sm:$0xff] }
 0x217   : > { %v9878_v56 = vmul.f32 %v6136_v11, %v9472_v42  ;;  %v9890_v41 = vmul.f32 %v6138_v40, %v9472_v42  ;;  %v9896_v11 = vmul.f32 %v6139_v8, %v9522_v4  ;;  %v6142_v40 = vld [vmem:[%s11102_s0 + $0x4b8] sm:$0xff] }
 0x218   : > { %11654 = vst [vmem:[#allocation101_spill] sm:$0xff] %v9860_v10  ;;  %11656 = vst [vmem:[#allocation102_spill] sm:$0xff] %v9872_v30  ;;  %v6137_v10 = vld [vmem:[%s11102_s0 + $0x418] sm:$0xff]  ;;  %v9914_v8 = vmul.f32 %v6142_v40, %v9522_v4  ;;  %v6145_v40 = vld [vmem:[%s11102_s0 + $0x460] sm:$0xff] }
 0x219   : > { %11657 = vst [vmem:[#allocation103_spill] sm:$0xff] %v9878_v56  ;;  %v9884_v36 = vmul.f32 %v6137_v10, %v9472_v42  ;;  %11659 = vst [vmem:[#allocation107_spill] sm:$0xff] %v9890_v41  ;;  %v6140_v56 = vld [vmem:[%s11102_s0 + $0x4a8] sm:$0xff]  ;;  %v9916_v41 = vpop.permute.xlu1 %1727 }
 0x21a   : > { %11660 = vst [vmem:[#allocation105_spill] sm:$0xff] %v9896_v11  ;;  %v9902_v10 = vmul.f32 %v6140_v56, %v9522_v4  ;;  %11663 = vst [vmem:[#allocation109_spill] sm:$0xff] %v9914_v8  ;;  %v6143_v56 = vld [vmem:[%s11102_s0 + $0x4c0] sm:$0xff]  ;;  %v9934_v8 = vmul.f32 %v6145_v40, %v9620_v35  ;;  %v6146_v11 = vld [vmem:[%s11102_s0 + $0x468] sm:$0xff] }
 0x21b   : > { %11658 = vst [vmem:[#allocation104_spill] sm:$0xff] %v9884_v36  ;;  %v6141_v36 = vld [vmem:[%s11102_s0 + $0x4b0] sm:$0xff] }
 0x21c   : > { %11661 = vst [vmem:[#allocation106_spill] sm:$0xff] %v9902_v10  ;;  %v9908_v42 = vmul.f32 %v6141_v36, %v9522_v4  ;;  %v9922_v10 = vmul.f32 %v6143_v56, %v9522_v4  ;;  %v6144_v36 = vld [vmem:[%s11102_s0 + $0x4c8] sm:$0xff]  ;;  %11666 = vst [vmem:[#allocation111_spill] sm:$0xff] %v9934_v8  ;;  %v9940_v56 = vmul.f32 %v6146_v11, %v9620_v35  ;;  %v6149_v8 = vld [vmem:[%s11102_s0 + $0x480] sm:$0xff] }
 0x21d   : > { %v9958_v11 = vmul.f32 %v6149_v8, %v9620_v35  ;;  %v6152_v8 = vld [vmem:[%s11102_s0 + $0x510] sm:$0xff] }
 0x21e   : > { %11662 = vst [vmem:[#allocation108_spill] sm:$0xff] %v9908_v42  ;;  %11664 = vst [vmem:[#allocation112_spill] sm:$0xff] %v9922_v10  ;;  %v9928_v42 = vmul.f32 %v6144_v36, %v9522_v4  ;;  %v6147_v10 = vld [vmem:[%s11102_s0 + $0x470] sm:$0xff]  ;;  %v6148_v36 = vld [vmem:[%s11102_s0 + $0x478] sm:$0xff] }
 0x21f   : > { %11667 = vst [vmem:[#allocation113_spill] sm:$0xff] %v9940_v56  ;;  %v9946_v4 = vmul.f32 %v6147_v10, %v9620_v35  ;;  %v9952_v40 = vmul.f32 %v6148_v36, %v9620_v35  ;;  %11670 = vst [vmem:[#allocation117_spill] sm:$0xff] %v9958_v11  ;;  %v6150_v56 = vld [vmem:[%s11102_s0 + $0x488] sm:$0xff]  ;;  %v9978_v11 = vmul.f32 %v6152_v8, %v9670_v25 }
 0x220   : > { %11665 = vst [vmem:[#allocation110_spill] sm:$0xff] %v9928_v42  ;;  %v9964_v10 = vmul.f32 %v6150_v56, %v9620_v35  ;;  %v6151_v36 = vld [vmem:[%s11102_s0 + $0x508] sm:$0xff]  ;;  %v6153_v56 = vld [vmem:[%s11102_s0 + $0x518] sm:$0xff]  ;;  %v6154_v42 = vld [vmem:[%s11102_s0 + $0x490] sm:$0xff] }
 0x221   : > { %11668 = vst [vmem:[#allocation114_spill] sm:$0xff] %v9946_v4  ;;  %11669 = vst [vmem:[#allocation115_spill] sm:$0xff] %v9952_v40  ;;  %v9966_v4 = vpop.permute.xlu0 %1742  ;;  %v9972_v40 = vmul.f32 %v6151_v36, %v9670_v25  ;;  %v9990_v36 = vmul.f32 %v6154_v42, %v9620_v35  ;;  %v6158_v42 = vld [vmem:[%s11102_s0 + $0x538] sm:$0xff] }
 0x222   : > { %11671 = vst [vmem:[#allocation116_spill] sm:$0xff] %v9964_v10  ;;  %11673 = vst [vmem:[#allocation124_spill] sm:$0xff] %v9978_v11  ;;  %v9984_v10 = vmul.f32 %v6153_v56, %v9670_v25  ;;  %v6156_v11 = vld [vmem:[%s11102_s0 + $0x528] sm:$0xff] }
 0x223   : > { %11672 = vst [vmem:[#allocation118_spill] sm:$0xff] %v9972_v40  ;;  %11675 = vst [vmem:[#allocation121_spill] sm:$0xff] %v9990_v36  ;;  %v6155_v40 = vld [vmem:[%s11102_s0 + $0x520] sm:$0xff]  ;;  %v10002_v56 = vmul.f32 %v6156_v11, %v9670_v25  ;;  %v6159_v36 = vld [vmem:[%s11102_s0 + $0x4d0] sm:$0xff] }
 0x224   : > { %11674 = vst [vmem:[#allocation119_spill] sm:$0xff] %v9984_v10  ;;  %v9996_v8 = vmul.f32 %v6155_v40, %v9670_v25  ;;  %v6157_v10 = vld [vmem:[%s11102_s0 + $0x530] sm:$0xff]  ;;  %v10014_v40 = vmul.f32 %v6158_v42, %v9670_v25  ;;  %v10020_v11 = vmul.f32 %v6159_v36, %v9768_v57  ;;  %v6162_v42 = vld [vmem:[%s11102_s0 + $0x4e8] sm:$0xff] }
 0x225   : > { %11677 = vst [vmem:[#allocation122_spill] sm:$0xff] %v10002_v56  ;;  %v10008_v35 = vmul.f32 %v6157_v10, %v9670_v25  ;;  %v6160_v56 = vld [vmem:[%s11102_s0 + $0x4d8] sm:$0xff]  ;;  %v10038_v36 = vmul.f32 %v6162_v42, %v9768_v57 }
 0x226   : > { %11676 = vst [vmem:[#allocation120_spill] sm:$0xff] %v9996_v8  ;;  %11679 = vst [vmem:[#allocation123_spill] sm:$0xff] %v10014_v40  ;;  %v10026_v10 = vmul.f32 %v6160_v56, %v9768_v57 }
 0x227   : > { %11678 = vst [vmem:[#allocation125_spill] sm:$0xff] %v10008_v35  ;;  %11680 = vst [vmem:[#allocation129_spill] sm:$0xff] %v10020_v11  ;;  %v6161_v35 = vld [vmem:[%s11102_s0 + $0x4e0] sm:$0xff]  ;;  %v6163_v11 = vld [vmem:[%s11102_s0 + $0x578] sm:$0xff] }
 0x228   : > { %11681 = vst [vmem:[#allocation126_spill] sm:$0xff] %v10026_v10  ;;  %v10032_v25 = vmul.f32 %v6161_v35, %v9768_v57  ;;  %11683 = vst [vmem:[#allocation128_spill] sm:$0xff] %v10038_v36  ;;  %v10044_v56 = vmul.f32 %v6163_v11, %v9818_v48  ;;  %v6164_v10 = vld [vmem:[%s11102_s0 + $0x4f0] sm:$0xff]  ;;  %v6166_v36 = vld [vmem:[%s11102_s0 + $0x500] sm:$0xff] }
 0x229   : > { %v10050_v35 = vmul.f32 %v6164_v10, %v9768_v57  ;;  %v10062_v11 = vmul.f32 %v6166_v36, %v9768_v57  ;;  %v6167_v10 = vld [vmem:[%s11102_s0 + $0x580] sm:$0xff] }
 0x22a   : > { %11682 = vst [vmem:[#allocation127_spill] sm:$0xff] %v10032_v25  ;;  %11684 = vst [vmem:[#allocation132_spill] sm:$0xff] %v10044_v56  ;;  %v6165_v25 = vld [vmem:[%s11102_s0 + $0x4f8] sm:$0xff]  ;;  %v1738_v56 = vpop.permute.xlu1 %1737 }
 0x22b   : > { %11685 = vst [vmem:[#allocation131_spill] sm:$0xff] %v10050_v35  ;;  %v10056_v42 = vmul.f32 %v6165_v25, %v9768_v57  ;;  %11687 = vst [vmem:[#allocation133_spill] sm:$0xff] %v10062_v11  ;;  %v10068_v35 = vmul.f32 %v6167_v10, %v9818_v48  ;;  %v6168_v25 = vld [vmem:[%s11102_s0 + $0x588] sm:$0xff]  ;;  %v6169_v57 = vld [vmem:[%s11102_s0 + $0x590] sm:$0xff] }
 0x22c   : > { %v10080_v36 = vmul.f32 %v6169_v57, %v9818_v48  ;;  %v6170_v11 = vld [vmem:[%s11102_s0 + $0x598] sm:$0xff] }
 0x22d   : > { %11686 = vst [vmem:[#allocation130_spill] sm:$0xff] %v10056_v42  ;;  %11688 = vst [vmem:[#allocation134_spill] sm:$0xff] %v10068_v35  ;;  %v10074_v42 = vmul.f32 %v6168_v25, %v9818_v48  ;;  %v10086_v10 = vmul.f32 %v6170_v11, %v9818_v48  ;;  %v6171_v35 = vld [vmem:[%s11102_s0 + $0x5a0] sm:$0xff] }
 0x22e   : > { %11690 = vst [vmem:[#allocation140_spill] sm:$0xff] %v10080_v36  ;;  %v10092_v25 = vmul.f32 %v6171_v35, %v9818_v48  ;;  %v1753_v36 = vpop.permute.xlu0 %1752  ;;  %v6173_v11 = vld [vmem:[%s11102_s0 + $0x540] sm:$0xff]  ;;  %v6174_v35 = vld [vmem:[%s11102_s0 + $0x548] sm:$0xff] }
 0x22f   : > { %11689 = vst [vmem:[#allocation135_spill] sm:$0xff] %v10074_v42  ;;  %11691 = vst [vmem:[#allocation136_spill] sm:$0xff] %v10086_v10  ;;  %v6172_v42 = vld [vmem:[%s11102_s0 + $0x5a8] sm:$0xff]  ;;  %v10104_v10 = vmul.f32 %v6173_v11, %v9916_v41 }
 0x230   : > { %11692 = vst [vmem:[#allocation137_spill] sm:$0xff] %v10092_v25  ;;  %v10098_v57 = vmul.f32 %v6172_v42, %v9818_v48  ;;  %v10110_v25 = vmul.f32 %v6174_v35, %v9916_v41  ;;  %v6175_v48 = vld [vmem:[%s11102_s0 + $0x550] sm:$0xff] }
 0x231   : > { %11694 = vst [vmem:[#allocation139_spill] sm:$0xff] %v10104_v10  ;;  %v10116_v42 = vmul.f32 %v6175_v48, %v9916_v41  ;;  %v6177_v10 = vld [vmem:[%s11102_s0 + $0x560] sm:$0xff] }
 0x232   : > { %11693 = vst [vmem:[#allocation138_spill] sm:$0xff] %v10098_v57  ;;  %11695 = vst [vmem:[#allocation141_spill] sm:$0xff] %v10110_v25  ;;  %v6176_v57 = vld [vmem:[%s11102_s0 + $0x558] sm:$0xff]  ;;  %v10128_v35 = vmul.f32 %v6177_v10, %v9916_v41  ;;  %v6178_v25 = vld [vmem:[%s11102_s0 + $0x568] sm:$0xff] }
 0x233   : > { %11696 = vst [vmem:[#allocation145_spill] sm:$0xff] %v10116_v42  ;;  %v10122_v11 = vmul.f32 %v6176_v57, %v9916_v41  ;;  %v10134_v48 = vmul.f32 %v6178_v25, %v9916_v41  ;;  %v6179_v42 = vld [vmem:[%s11102_s0 + $0x5e8] sm:$0xff] }
 0x234   : > { %11698 = vst [vmem:[#allocation146_spill] sm:$0xff] %v10128_v35  ;;  %v10140_v57 = vmul.f32 %v6179_v42, %v9966_v4  ;;  %v6181_v35 = vld [vmem:[%s11102_s0 + $0x5f8] sm:$0xff] }
 0x235   : > { %11697 = vst [vmem:[#allocation142_spill] sm:$0xff] %v10122_v11  ;;  %11699 = vst [vmem:[#allocation144_spill] sm:$0xff] %v10134_v48  ;;  %v6180_v11 = vld [vmem:[%s11102_s0 + $0x5f0] sm:$0xff]  ;;  %v10152_v25 = vmul.f32 %v6181_v35, %v9966_v4 }
 0x236   : > { %11700 = vst [vmem:[#allocation143_spill] sm:$0xff] %v10140_v57  ;;  %v10146_v10 = vmul.f32 %v6180_v11, %v9966_v4  ;;  %v6182_v48 = vld [vmem:[%s11102_s0 + $0x570] sm:$0xff]  ;;  %v6183_v57 = vld [vmem:[%s11102_s0 + $0x600] sm:$0xff] }
 0x237   : > { %11702 = vst [vmem:[#allocation149_spill] sm:$0xff] %v10152_v25  ;;  %v10158_v42 = vmul.f32 %v6182_v48, %v9916_v41  ;;  %v10164_v11 = vmul.f32 %v6183_v57, %v9966_v4  ;;  %v6185_v25 = vld [vmem:[%s11102_s0 + $0x610] sm:$0xff]  ;;  %v6186_v48 = vld [vmem:[%s11102_s0 + $0x618] sm:$0xff] }
 0x238   : > { %11701 = vst [vmem:[#allocation147_spill] sm:$0xff] %v10146_v10  ;;  %v6184_v10 = vld [vmem:[%s11102_s0 + $0x608] sm:$0xff]  ;;  %v10176_v41 = vmul.f32 %v6185_v25, %v9966_v4  ;;  %v10182_v57 = vmul.f32 %v6186_v48, %v9966_v4  ;;  %v6189_v25 = vld [vmem:[%s11102_s0 + $0x5c0] sm:$0xff] }
 0x239   : > { %11703 = vst [vmem:[#allocation148_spill] sm:$0xff] %v10158_v42  ;;  %11704 = vst [vmem:[#allocation6_spill] sm:$0xff] %v10164_v11  ;;  %v10170_v35 = vmul.f32 %v6184_v10, %v9966_v4  ;;  %v6187_v42 = vld [vmem:[%s11102_s0 + $0x5b0] sm:$0xff]  ;;  %v6190_v4 = vld [vmem:[%s11102_s0 + $0x5c8] sm:$0xff] }
 0x23a   : > { %11706 = vst [vmem:[#allocation8_spill] sm:$0xff] %v10176_v41  ;;  %11707 = vst [vmem:[#allocation9_spill] sm:$0xff] %v10182_v57  ;;  %v10187_v10 = vmul.f32 %v6187_v42, %v1738_v56  ;;  %v10197_v41 = vmul.f32 %v6189_v25, %v1738_v56  ;;  %v10202_v48 = vmul.f32 %v6190_v4, %v1738_v56  ;;  %v1748_v42 = vpop.permute.xlu1 %1747  ;;  %v6193_v25 = vld [vmem:[%s11102_s0 + $0x5d8] sm:$0xff]  ;;  %v6194_v4 = vld [vmem:[%s11102_s0 + $0x5e0] sm:$0xff] }
 0x23b   : > { %11705 = vst [vmem:[#allocation7_spill] sm:$0xff] %v10170_v35  ;;  %v6188_v35 = vld [vmem:[%s11102_s0 + $0x5b8] sm:$0xff] }
 0x23c   : > { %11708 = vst [vmem:[#allocation11_spill] sm:$0xff] %v10187_v10  ;;  %v10192_v11 = vmul.f32 %v6188_v35, %v1738_v56  ;;  %11710 = vst [vmem:[#allocation13_spill] sm:$0xff] %v10197_v41  ;;  %v6191_v10 = vld [vmem:[%s11102_s0 + $0x658] sm:$0xff]  ;;  %v6192_v35 = vld [vmem:[%s11102_s0 + $0x5d0] sm:$0xff]  ;;  %v10217_v41 = vmul.f32 %v6193_v25, %v1738_v56 }
 0x23d   : > { %11711 = vst [vmem:[#allocation12_spill] sm:$0xff] %v10202_v48  ;;  %v10207_v57 = vmul.f32 %v6191_v10, %v1753_v36  ;;  %v10222_v48 = vmul.f32 %v6194_v4, %v1738_v56  ;;  %v6195_v10 = vld [vmem:[%s11102_s0 + $0x660] sm:$0xff]  ;;  %v6197_v25 = vld [vmem:[%s11102_s0 + $0x670] sm:$0xff] }
 0x23e   : > { %11709 = vst [vmem:[#allocation10_spill] sm:$0xff] %v10192_v11  ;;  %v10212_v11 = vmul.f32 %v6192_v35, %v1738_v56  ;;  %11714 = vst [vmem:[#allocation152_spill] sm:$0xff] %v10217_v41  ;;  %v6196_v35 = vld [vmem:[%s11102_s0 + $0x668] sm:$0xff]  ;;  %v10237_v41 = vmul.f32 %v6197_v25, %v1753_v36  ;;  %v6198_v56 = vld [vmem:[%s11102_s0 + $0x678] sm:$0xff] }
 0x23f   : > { %11712 = vst [vmem:[#allocation150_spill] sm:$0xff] %v10207_v57  ;;  %11715 = vst [vmem:[#allocation153_spill] sm:$0xff] %v10222_v48  ;;  %v10227_v57 = vmul.f32 %v6195_v10, %v1753_v36  ;;  %v10242_v4 = vmul.f32 %v6198_v56, %v1753_v36  ;;  %v1763_v10 = vpop.permute.xlu0 %1762  ;;  %v6199_v48 = vld [vmem:[%s11102_s0 + $0x680] sm:$0xff] }
 0x240   : > { %11713 = vst [vmem:[#allocation151_spill] sm:$0xff] %v10212_v11  ;;  %v10232_v11 = vmul.f32 %v6196_v35, %v1753_v36  ;;  %11718 = vst [vmem:[#allocation156_spill] sm:$0xff] %v10237_v41  ;;  %v6200_v35 = vld [vmem:[%s11102_s0 + $0x688] sm:$0xff]  ;;  %v6201_v25 = vld [vmem:[%s11102_s0 + $0x620] sm:$0xff] }
 0x241   : > { %11716 = vst [vmem:[#allocation154_spill] sm:$0xff] %v10227_v57  ;;  %11719 = vst [vmem:[#allocation157_spill] sm:$0xff] %v10242_v4  ;;  %v10247_v57 = vmul.f32 %v6199_v48, %v1753_v36  ;;  %v10257_v56 = vmul.f32 %v6201_v25, %v1748_v42  ;;  %v6202_v4 = vld [vmem:[%s11102_s0 + $0x628] sm:$0xff]  ;;  %v6203_v48 = vld [vmem:[%s11102_s0 + $0x630] sm:$0xff] }
 0x242   : > { %11717 = vst [vmem:[#allocation155_spill] sm:$0xff] %v10232_v11  ;;  %v10252_v11 = vmul.f32 %v6200_v35, %v1753_v36  ;;  %v10262_v41 = vmul.f32 %v6202_v4, %v1748_v42  ;;  %v6204_v36 = vld [vmem:[%s11102_s0 + $0x638] sm:$0xff]  ;;  %v6205_v25 = vld [vmem:[%s11102_s0 + $0x640] sm:$0xff]  ;;  %v6206_v4 = vld [vmem:[%s11102_s0 + $0x648] sm:$0xff] }
 0x243   : > { %11720 = vst [vmem:[#allocation158_spill] sm:$0xff] %v10247_v57  ;;  %11722 = vst [vmem:[#allocation160_spill] sm:$0xff] %v10257_v56  ;;  %v10267_v57 = vmul.f32 %v6203_v48, %v1748_v42  ;;  %v10272_v35 = vmul.f32 %v6204_v36, %v1748_v42  ;;  %v10277_v56 = vmul.f32 %v6205_v25, %v1748_v42  ;;  %v6207_v48 = vld [vmem:[%s11102_s0 + $0x650] sm:$0xff]  ;;  %v6208_v36 = vld [vmem:[%s11102_s0 + $0x6c8] sm:$0xff] }
 0x244   : > { %11721 = vst [vmem:[#allocation159_spill] sm:$0xff] %v10252_v11  ;;  %11723 = vst [vmem:[#allocation161_spill] sm:$0xff] %v10262_v41  ;;  %v10282_v41 = vmul.f32 %v6206_v4, %v1748_v42  ;;  %v6209_v25 = vld [vmem:[%s11102_s0 + $0x6d0] sm:$0xff]  ;;  %v6210_v4 = vld [vmem:[%s11102_s0 + $0x6d8] sm:$0xff] }
 0x245   : > { %11724 = vst [vmem:[#allocation162_spill] sm:$0xff] %v10267_v57  ;;  %11725 = vst [vmem:[#allocation163_spill] sm:$0xff] %v10272_v35  ;;  %v10287_v57 = vmul.f32 %v6207_v48, %v1748_v42  ;;  %v10292_v35 = vmul.f32 %v6208_v36, %v1763_v10  ;;  %v1997_v42 = vpop.permute.xlu0 %1996  ;;  %v10304_v48 = vpop.permute.xlu1 %1757  ;;  %v6211_v36 = vld [vmem:[%s11102_s0 + $0x6e0] sm:$0xff] }
 0x246   : > { %11726 = vst [vmem:[#allocation164_spill] sm:$0xff] %v10277_v56  ;;  %11727 = vst [vmem:[#allocation165_spill] sm:$0xff] %v10282_v41  ;;  %v10297_v56 = vmul.f32 %v6209_v25, %v1763_v10  ;;  %v10302_v41 = vmul.f32 %v6210_v4, %v1763_v10  ;;  %v6212_v25 = vld [vmem:[%s11102_s0 + $0x6e8] sm:$0xff]  ;;  %v6213_v4 = vld [vmem:[%s11102_s0 + $0x6f0] sm:$0xff]  ;;  %v2158_v40 = vadd.f32 %v1997_v42, %v9045_v27 }
 0x247   : > { %11728 = vst [vmem:[#allocation166_spill] sm:$0xff] %v10287_v57  ;;  %11729 = vst [vmem:[#allocation167_spill] sm:$0xff] %v10292_v35  ;;  %v10309_v57 = vmul.f32 %v6211_v36, %v1763_v10  ;;  %v6214_v35 = vld [vmem:[%s11102_s0 + $0x6f8] sm:$0xff]  ;;  %v2156_v36 = vadd.f32 %v1997_v42, %v9033_v63  ;;  %v2161_v8 = vadd.f32 %v1997_v42, %v9065_v5 }
 0x248   : > { %11730 = vst [vmem:[#allocation168_spill] sm:$0xff] %v10297_v56  ;;  %11731 = vst [vmem:[#allocation169_spill] sm:$0xff] %v10302_v41  ;;  %v10314_v56 = vmul.f32 %v6212_v25, %v1763_v10  ;;  %v10319_v41 = vmul.f32 %v6213_v4, %v1763_v10  ;;  %v10324_v11 = vmul.f32 %v6214_v35, %v1763_v10 }
 0x249   : > { %11732 = vst [vmem:[#allocation170_spill] sm:$0xff] %v10309_v57  ;;  %v2157_v57 = vadd.f32 %v1997_v42, %v9039_v15  ;;  %v2159_v25 = vadd.f32 %v1997_v42, %v9051_v55  ;;  %v2162_v4 = vadd.f32 %v1997_v42, %v9071_v34  ;;  %v2380_v63 = vmax.f32 %v2156_v36, 0.0  ;;  %v2007_v60 = vpop.permute.xlu0 %2006 }
 0x24a   : > { %11733 = vst [vmem:[#allocation171_spill] sm:$0xff] %v10314_v56  ;;  %11734 = vst [vmem:[#allocation172_spill] sm:$0xff] %v10319_v41  ;;  %v2160_v56 = vadd.f32 %v1997_v42, %v9057_v53  ;;  %v6215_v41 = vld [vmem:[%s11102_s0 + $0x690] sm:$0xff]  ;;  %v2382_v15 = vmax.f32 %v2158_v40, 0.0  ;;  %v2385_v30 = vmax.f32 %v2161_v8, 0.0  ;;  %v6216_v53 = vld [vmem:[%s11102_s0 + $0x698] sm:$0xff]  ;;  %v2171_v36 = vadd.f32 %v2007_v60, %v9162_v16 }
 0x24b   : > { %11735 = vst [vmem:[#allocation173_spill] sm:$0xff] %v10324_v11  ;;  %v10337_v10 = vmul.f32 %v6215_v41, %v10304_v48  ;;  %v2381_v35 = vmax.f32 %v2157_v57, 0.0  ;;  %v2383_v11 = vmax.f32 %v2159_v25, 0.0  ;;  %v2386_v55 = vmax.f32 %v2162_v4, 0.0  ;;  %v1992_v57 = vpop.permute.xlu1 %1991 }
 0x24c   : > { %v2384_v27 = vmax.f32 %v2160_v56, 0.0  ;;  %v10343_v5 = vmul.f32 %v6216_v53, %v10304_v48  ;;  %v2170_v41 = vadd.f32 %v2007_v60, %v9156_v38  ;;  %v2172_v8 = vadd.f32 %v2007_v60, %v9168_v12 }
 0x24d   : > { %v5653_v34 = vpack.c.bf16 %v2381_v35, %v2380_v63  ;;  %v5654_v42 = vpack.c.bf16 %v2383_v11, %v2382_v15  ;;  %v5656_v25 = vpack.c.bf16 %v2386_v55, %v2386_v55  ;;  %v2173_v56 = vadd.f32 %v2007_v60, %v9174_v59  ;;  %v2017_v35 = vpop.permute.xlu0 %2016 }
 0x24e   : > { %v5655_v40 = vpack.c.bf16 %v2385_v30, %v2384_v27  ;;  %v2174_v4 = vadd.f32 %v2007_v60, %v9182_v54  ;;  %v2175_v53 = vadd.f32 %v2007_v60, %v9188_v17  ;;  %v2176_v63 = vadd.f32 %v2007_v60, %v9194_v22 }
 0x24f   : > { %3306 = vst [vmem:[#allocation2 + $0x1c] sm:$0xff] %v5653_v34  ;;  %3307 = vst [vmem:[#allocation2 + $0x24] sm:$0xff] %v5654_v42  ;;  %v2394_v11 = vmax.f32 %v2170_v41, 0.0  ;;  %v2395_v38 = vmax.f32 %v2171_v36, 0.0  ;;  %v2396_v16 = vmax.f32 %v2172_v8, 0.0  ;;  %v2397_v30 = vmax.f32 %v2173_v56, 0.0 }
 0x250   : > { %3308 = vst [vmem:[#allocation2 + $0x2c] sm:$0xff] %v5655_v40  ;;  %3309 = vst.msk [vmem:[#allocation2 + $0x34] sm:$0xf] %vm3304_vm1, %v5656_v25  ;;  %v2149_v12 = vadd.f32 %v1992_v57, %v9076_v19  ;;  %v2398_v15 = vmax.f32 %v2174_v4, 0.0  ;;  %v2399_v59 = vmax.f32 %v2175_v53, 0.0  ;;  %v2400_v27 = vmax.f32 %v2176_v63, 0.0 }
 0x251   : > { %v2184_v55 = vadd.f32 %v2017_v35, %v9280_v23  ;;  %v5661_v54 = vpack.c.bf16 %v2395_v38, %v2394_v11  ;;  %v5662_v34 = vpack.c.bf16 %v2397_v30, %v2396_v16  ;;  %v2185_v17 = vadd.f32 %v2017_v35, %v9286_v47  ;;  %v2027_v38 = vpop.permute.xlu0 %2026 }
 0x252   : > { %v2186_v22 = vadd.f32 %v2017_v35, %v9292_v14  ;;  %v5663_v60 = vpack.c.bf16 %v2399_v59, %v2398_v15  ;;  %v5664_v42 = vpack.c.bf16 %v2400_v27, %v2400_v27  ;;  %v2187_v41 = vadd.f32 %v2017_v35, %v9304_v39 }
 0x253   : > { %v2188_v36 = vadd.f32 %v2017_v35, %v9310_v62  ;;  %3314 = vst [vmem:[#allocation2 + $0x54] sm:$0xff] %v5661_v54  ;;  %3315 = vst [vmem:[#allocation2 + $0x5c] sm:$0xff] %v5662_v34  ;;  %v2189_v19 = vadd.f32 %v2017_v35, %v9316_v9  ;;  %v2190_v40 = vadd.f32 %v2017_v35, %v9322_v26  ;;  %v2408_v25 = vmax.f32 %v2184_v55, 0.0 }
 0x254   : > { %v2409_v23 = vmax.f32 %v2185_v17, 0.0  ;;  %3316 = vst [vmem:[#allocation2 + $0x64] sm:$0xff] %v5663_v60  ;;  %3317 = vst.msk [vmem:[#allocation2 + $0x6c] sm:$0xf] %vm3304_vm1, %v5664_v42  ;;  %v2410_v47 = vmax.f32 %v2186_v22, 0.0  ;;  %v2411_v8 = vmax.f32 %v2187_v41, 0.0  ;;  %v2150_v56 = vadd.f32 %v1992_v57, %v9081_v18 }
 0x255   : > { %v2412_v14 = vmax.f32 %v2188_v36, 0.0  ;;  %v2413_v4 = vmax.f32 %v2189_v19, 0.0  ;;  %v2414_v39 = vmax.f32 %v2190_v40, 0.0  ;;  %v2151_v62 = vadd.f32 %v1992_v57, %v9088_v20 }
 0x256   : > { %v5669_v53 = vpack.c.bf16 %v2409_v23, %v2408_v25  ;;  %v5670_v63 = vpack.c.bf16 %v2411_v8, %v2410_v47  ;;  %v2152_v9 = vadd.f32 %v1992_v57, %v9093_v29  ;;  %v2153_v26 = vadd.f32 %v1992_v57, %v9098_v28 }
 0x257   : > { %v2154_v11 = vadd.f32 %v1992_v57, %v9103_v37  ;;  %v5671_v16 = vpack.c.bf16 %v2413_v4, %v2412_v14  ;;  %v5672_v30 = vpack.c.bf16 %v2414_v39, %v2414_v39  ;;  %v2155_v35 = vadd.f32 %v1992_v57, %v9108_v33  ;;  %v2002_v57 = vpop.permute.xlu1 %2001 }
 0x258   : > { %3322 = vst [vmem:[#allocation2 + $0x8c] sm:$0xff] %v5669_v53  ;;  %v2373_v15 = vmax.f32 %v2149_v12, 0.0  ;;  %3323 = vst [vmem:[#allocation2 + $0x94] sm:$0xff] %v5670_v63  ;;  %v2374_v18 = vmax.f32 %v2150_v56, 0.0  ;;  %v2375_v59 = vmax.f32 %v2151_v62, 0.0  ;;  %v2376_v27 = vmax.f32 %v2152_v9, 0.0  ;;  %v2037_v56 = vpop.permute.xlu0 %2036 }
 0x259   : > { %v2377_v55 = vmax.f32 %v2153_v26, 0.0  ;;  %3324 = vst [vmem:[#allocation2 + $0x9c] sm:$0xff] %v5671_v16  ;;  %3325 = vst.msk [vmem:[#allocation2 + $0xa4] sm:$0xf] %vm3304_vm1, %v5672_v30  ;;  %v2378_v20 = vmax.f32 %v2154_v11, 0.0  ;;  %v2379_v29 = vmax.f32 %v2155_v35, 0.0  ;;  %v2198_v28 = vadd.f32 %v2027_v38, %v9452_v44 }
 0x25a   : > { %v2199_v37 = vadd.f32 %v2027_v38, %v9458_v21  ;;  %v5649_v54 = vpack.c.bf16 %v2374_v18, %v2373_v15  ;;  %v5650_v34 = vpack.c.bf16 %v2376_v27, %v2375_v59  ;;  %v2200_v17 = vadd.f32 %v2027_v38, %v9464_v24  ;;  %v11736_v18 = vld [vmem:[#allocation21_spill] sm:$0xff]  ;;  %v11737_v27 = vld [vmem:[#allocation24_spill] sm:$0xff] }
 0x25b   : > { %v2201_v33 = vadd.f32 %v2027_v38, %v9478_v2  ;;  %v5651_v12 = vpack.c.bf16 %v2378_v20, %v2377_v55  ;;  %v5652_v22 = vpack.c.bf16 %v2379_v29, %v2379_v29  ;;  %v2202_v60 = vadd.f32 %v2027_v38, %v9484_v43  ;;  %v2012_v16 = vpop.permute.xlu1 %2011 }
 0x25c   : > { %v2203_v42 = vadd.f32 %v2027_v38, %v9490_v50  ;;  %3301 = vst [vmem:[#allocation2] sm:$0xff] %v5649_v54  ;;  %3302 = vst [vmem:[#allocation2 + $0x8] sm:$0xff] %v5650_v34  ;;  %v2204_v41 = vadd.f32 %v2027_v38, %v9496_v7  ;;  %v2422_v44 = vmax.f32 %v2198_v28, 0.0  ;;  %v2423_v36 = vmax.f32 %v2199_v37, 0.0  ;;  %v11738_v28 = vld [vmem:[#allocation14_spill] sm:$0xff] }
 0x25d   : > { %v2424_v21 = vmax.f32 %v2200_v17, 0.0  ;;  %3303 = vst [vmem:[#allocation2 + $0x10] sm:$0xff] %v5651_v12  ;;  %3305 = vst.msk [vmem:[#allocation2 + $0x18] sm:$0xf] %vm3304_vm1, %v5652_v22  ;;  %v2425_v24 = vmax.f32 %v2201_v33, 0.0  ;;  %v2426_v19 = vmax.f32 %v2202_v60, 0.0  ;;  %v2163_v40 = vadd.f32 %v2002_v57, %v9114_v3 }
 0x25e   : > { %v2427_v2 = vmax.f32 %v2203_v42, 0.0  ;;  %v2428_v25 = vmax.f32 %v2204_v41, 0.0  ;;  %v5677_v23 = vpack.c.bf16 %v2423_v36, %v2422_v44  ;;  %v2164_v43 = vadd.f32 %v2002_v57, %v9120_v51  ;;  %v11740_v33 = vld [vmem:[#allocation16_spill] sm:$0xff]  ;;  %v11742_v41 = vld [vmem:[#allocation17_spill] sm:$0xff]  ;;  %v2047_v36 = vpop.permute.xlu0 %2046 }
 0x25f   : > { %v2165_v50 = vadd.f32 %v2002_v57, %v9126_v31  ;;  %v5678_v47 = vpack.c.bf16 %v2425_v24, %v2424_v21  ;;  %v2166_v7 = vadd.f32 %v2002_v57, %v9132_v0  ;;  %v2167_v14 = vadd.f32 %v2002_v57, %v9138_v6  ;;  %v11741_v60 = vld [vmem:[#allocation20_spill] sm:$0xff]  ;;  %v11743_v24 = vld [vmem:[#allocation19_spill] sm:$0xff] }
 0x260   : > { %v5679_v8 = vpack.c.bf16 %v2427_v2, %v2426_v19  ;;  %v5680_v4 = vpack.c.bf16 %v2428_v25, %v2428_v25  ;;  %3330 = vst [vmem:[#allocation2 + $0xc4] sm:$0xff] %v5677_v23  ;;  %v2168_v39 = vadd.f32 %v2002_v57, %v9144_v46  ;;  %v2169_v53 = vadd.f32 %v2002_v57, %v9150_v45  ;;  %v11744_v2 = vld [vmem:[#allocation18_spill] sm:$0xff] }
 0x261   : > { %v2387_v3 = vmax.f32 %v2163_v40, 0.0  ;;  %3331 = vst [vmem:[#allocation2 + $0xcc] sm:$0xff] %v5678_v47  ;;  %v2388_v62 = vmax.f32 %v2164_v43, 0.0  ;;  %v2389_v51 = vmax.f32 %v2165_v50, 0.0  ;;  %v2390_v63 = vmax.f32 %v2166_v7, 0.0 }
 0x262   : > { %3332 = vst [vmem:[#allocation2 + $0xd4] sm:$0xff] %v5679_v8  ;;  %v2391_v31 = vmax.f32 %v2167_v14, 0.0  ;;  %3333 = vst.msk [vmem:[#allocation2 + $0xdc] sm:$0xf] %vm3304_vm1, %v5680_v4  ;;  %v2392_v9 = vmax.f32 %v2168_v39, 0.0  ;;  %v2393_v0 = vmax.f32 %v2169_v53, 0.0  ;;  %v2212_v6 = vadd.f32 %v2037_v56, %v9244_v58 }
 0x263   : > { %v2213_v26 = vadd.f32 %v2037_v56, %v9250_v32  ;;  %v5657_v11 = vpack.c.bf16 %v2388_v62, %v2387_v3  ;;  %v5658_v38 = vpack.c.bf16 %v2390_v63, %v2389_v51  ;;  %v2214_v46 = vadd.f32 %v2037_v56, %v9256_v61  ;;  %v11745_v14 = vld [vmem:[#allocation22_spill] sm:$0xff]  ;;  %v11746_v4 = vld [vmem:[#allocation23_spill] sm:$0xff]  ;;  %v11747_v62 = vld [vmem:[#allocation25_spill] sm:$0xff] }
 0x264   : > { %v2215_v45 = vadd.f32 %v2037_v56, %v9262_v52  ;;  %v5659_v30 = vpack.c.bf16 %v2392_v9, %v2391_v31  ;;  %v5660_v35 = vpack.c.bf16 %v2393_v0, %v2393_v0  ;;  %v2216_v15 = vadd.f32 %v2037_v56, %v9268_v1  ;;  %v11739_v1 = vld [vmem:[#allocation15_spill] sm:$0xff]  ;;  %v11748_v63 = vld [vmem:[#allocation26_spill] sm:$0xff]  ;;  %v2022_v9 = vpop.permute.xlu1 %2021 }
 0x265   : > { %v2217_v59 = vadd.f32 %v2037_v56, %v11736_v18  ;;  %3310 = vst [vmem:[#allocation2 + $0x38] sm:$0xff] %v5657_v11  ;;  %3311 = vst [vmem:[#allocation2 + $0x40] sm:$0xff] %v5658_v38  ;;  %v2218_v55 = vadd.f32 %v2037_v56, %v11737_v27  ;;  %v2436_v58 = vmax.f32 %v2212_v6, 0.0  ;;  %v2437_v20 = vmax.f32 %v2213_v26, 0.0  ;;  %v11749_v26 = vld [vmem:[#allocation31_spill] sm:$0xff]  ;;  %v11750_v38 = vld [vmem:[#allocation28_spill] sm:$0xff] }
 0x266   : > { %v2438_v32 = vmax.f32 %v2214_v46, 0.0  ;;  %3312 = vst [vmem:[#allocation2 + $0x48] sm:$0xff] %v5659_v30  ;;  %3313 = vst.msk [vmem:[#allocation2 + $0x50] sm:$0xf] %vm3304_vm1, %v5660_v35  ;;  %v2439_v61 = vmax.f32 %v2215_v45, 0.0  ;;  %v2440_v29 = vmax.f32 %v2216_v15, 0.0  ;;  %v2177_v37 = vadd.f32 %v2012_v16, %v11738_v28 }
 0x267   : > { %v2441_v52 = vmax.f32 %v2217_v59, 0.0  ;;  %v2442_v54 = vmax.f32 %v2218_v55, 0.0  ;;  %v5685_v34 = vpack.c.bf16 %v2437_v20, %v2436_v58  ;;  %v2178_v17 = vadd.f32 %v2012_v16, %v11739_v1  ;;  %v11751_v45 = vld [vmem:[#allocation29_spill] sm:$0xff]  ;;  %v11752_v55 = vld [vmem:[#allocation27_spill] sm:$0xff] }
 0x268   : > { %v2179_v57 = vadd.f32 %v2012_v16, %v11740_v33  ;;  %v5686_v12 = vpack.c.bf16 %v2439_v61, %v2438_v32  ;;  %v2180_v42 = vadd.f32 %v2012_v16, %v11741_v60  ;;  %v2181_v44 = vadd.f32 %v2012_v16, %v11742_v41  ;;  %v11753_v61 = vld [vmem:[#allocation37_spill] sm:$0xff] }
 0x269   : > { %v5687_v22 = vpack.c.bf16 %v2441_v52, %v2440_v29  ;;  %v5688_v21 = vpack.c.bf16 %v2442_v54, %v2442_v54  ;;  %3338 = vst [vmem:[#allocation2 + $0xfc] sm:$0xff] %v5685_v34  ;;  %v2182_v19 = vadd.f32 %v2012_v16, %v11743_v24  ;;  %v2183_v40 = vadd.f32 %v2012_v16, %v11744_v2  ;;  %v11754_v52 = vld [vmem:[#allocation30_spill] sm:$0xff]  ;;  %v11755_v34 = vld [vmem:[#allocation32_spill] sm:$0xff] }
 0x26a   : > { %v2401_v25 = vmax.f32 %v2177_v37, 0.0  ;;  %3339 = vst [vmem:[#allocation2 + $0x104] sm:$0xff] %v5686_v12  ;;  %v2402_v23 = vmax.f32 %v2178_v17, 0.0  ;;  %v2403_v43 = vmax.f32 %v2179_v57, 0.0  ;;  %v2404_v50 = vmax.f32 %v2180_v42, 0.0  ;;  %v11756_v17 = vld [vmem:[#allocation33_spill] sm:$0xff]  ;;  %v2057_v57 = vpop.permute.xlu0 %2056 }
 0x26b   : > { %3340 = vst [vmem:[#allocation2 + $0x10c] sm:$0xff] %v5687_v22  ;;  %v2405_v47 = vmax.f32 %v2181_v44, 0.0  ;;  %3341 = vst.msk [vmem:[#allocation2 + $0x114] sm:$0xf] %vm3304_vm1, %v5688_v21  ;;  %v2406_v8 = vmax.f32 %v2182_v19, 0.0  ;;  %v2407_v7 = vmax.f32 %v2183_v40, 0.0  ;;  %v2226_v56 = vadd.f32 %v2047_v36, %v11745_v14 }
 0x26c   : > { %v2227_v39 = vadd.f32 %v2047_v36, %v11746_v4  ;;  %v5665_v53 = vpack.c.bf16 %v2402_v23, %v2401_v25  ;;  %v5666_v3 = vpack.c.bf16 %v2404_v50, %v2403_v43  ;;  %v2228_v51 = vadd.f32 %v2047_v36, %v11747_v62  ;;  %v11757_v22 = vld [vmem:[#allocation34_spill] sm:$0xff]  ;;  %v11758_v42 = vld [vmem:[#allocation35_spill] sm:$0xff]  ;;  %v11760_v43 = vld [vmem:[#allocation36_spill] sm:$0xff] }
 0x26d   : > { %v2229_v31 = vadd.f32 %v2047_v36, %v11748_v63  ;;  %v5667_v0 = vpack.c.bf16 %v2406_v8, %v2405_v47  ;;  %v5668_v6 = vpack.c.bf16 %v2407_v7, %v2407_v7  ;;  %v2230_v11 = vadd.f32 %v2047_v36, %v11749_v26  ;;  %v11759_v25 = vld [vmem:[#allocation38_spill] sm:$0xff]  ;;  %v11761_v7 = vld [vmem:[#allocation39_spill] sm:$0xff]  ;;  %v11763_v62 = vld [vmem:[#allocation44_spill] sm:$0xff] }
 0x26e   : > { %v2231_v46 = vadd.f32 %v2047_v36, %v11750_v38  ;;  %3318 = vst [vmem:[#allocation2 + $0x70] sm:$0xff] %v5665_v53  ;;  %3319 = vst [vmem:[#allocation2 + $0x78] sm:$0xff] %v5666_v3  ;;  %v2232_v16 = vadd.f32 %v2047_v36, %v11751_v45  ;;  %v2450_v30 = vmax.f32 %v2226_v56, 0.0  ;;  %v2451_v35 = vmax.f32 %v2227_v39, 0.0  ;;  %v11762_v56 = vld [vmem:[#allocation40_spill] sm:$0xff]  ;;  %v2032_v39 = vpop.permute.xlu1 %2031  ;;  %v11764_v63 = vld [vmem:[#allocation41_spill] sm:$0xff] }
 0x26f   : > { %v2452_v15 = vmax.f32 %v2228_v51, 0.0  ;;  %3320 = vst [vmem:[#allocation2 + $0x80] sm:$0xff] %v5667_v0  ;;  %3321 = vst.msk [vmem:[#allocation2 + $0x88] sm:$0xf] %vm3304_vm1, %v5668_v6  ;;  %v2453_v18 = vmax.f32 %v2229_v31, 0.0  ;;  %v2454_v59 = vmax.f32 %v2230_v11, 0.0  ;;  %v2191_v58 = vadd.f32 %v2022_v9, %v11752_v55 }
 0x270   : > { %v2455_v27 = vmax.f32 %v2231_v46, 0.0  ;;  %v2456_v20 = vmax.f32 %v2232_v16, 0.0  ;;  %v5693_v32 = vpack.c.bf16 %v2451_v35, %v2450_v30  ;;  %v2192_v29 = vadd.f32 %v2022_v9, %v11753_v61  ;;  %v11766_v16 = vld [vmem:[#allocation43_spill] sm:$0xff] }
 0x271   : > { %v2193_v28 = vadd.f32 %v2022_v9, %v11754_v52  ;;  %v5694_v37 = vpack.c.bf16 %v2453_v18, %v2452_v15  ;;  %v2194_v1 = vadd.f32 %v2022_v9, %v11755_v34  ;;  %v2195_v33 = vadd.f32 %v2022_v9, %v11756_v17  ;;  %v11767_v18 = vld [vmem:[#allocation45_spill] sm:$0xff] }
 0x272   : > { %v5695_v54 = vpack.c.bf16 %v2455_v27, %v2454_v59  ;;  %v5696_v12 = vpack.c.bf16 %v2456_v20, %v2456_v20  ;;  %3346 = vst [vmem:[#allocation2 + $0x134] sm:$0xff] %v5693_v32  ;;  %v2196_v60 = vadd.f32 %v2022_v9, %v11757_v22  ;;  %v2197_v41 = vadd.f32 %v2022_v9, %v11758_v42  ;;  %v11765_v9 = vld [vmem:[#allocation42_spill] sm:$0xff]  ;;  %v11769_v32 = vld [vmem:[#allocation47_spill] sm:$0xff] }
 0x273   : > { %v2415_v44 = vmax.f32 %v2191_v58, 0.0  ;;  %3347 = vst [vmem:[#allocation2 + $0x13c] sm:$0xff] %v5694_v37  ;;  %v2416_v36 = vmax.f32 %v2192_v29, 0.0  ;;  %v2417_v21 = vmax.f32 %v2193_v28, 0.0  ;;  %v2418_v24 = vmax.f32 %v2194_v1, 0.0  ;;  %v11768_v27 = vld [vmem:[#allocation46_spill] sm:$0xff]  ;;  %v2067_v28 = vpop.permute.xlu0 %2066 }
 0x274   : > { %3348 = vst [vmem:[#allocation2 + $0x144] sm:$0xff] %v5695_v54  ;;  %v2419_v19 = vmax.f32 %v2195_v33, 0.0  ;;  %3349 = vst.msk [vmem:[#allocation2 + $0x14c] sm:$0xf] %vm3304_vm1, %v5696_v12  ;;  %v2420_v2 = vmax.f32 %v2196_v60, 0.0  ;;  %v2421_v40 = vmax.f32 %v2197_v41, 0.0  ;;  %v2240_v23 = vadd.f32 %v2057_v57, %v11759_v25 }
 0x275   : > { %v2241_v50 = vadd.f32 %v2057_v57, %v11760_v43  ;;  %v5673_v47 = vpack.c.bf16 %v2416_v36, %v2415_v44  ;;  %v5674_v8 = vpack.c.bf16 %v2418_v24, %v2417_v21  ;;  %v2242_v14 = vadd.f32 %v2057_v57, %v11761_v7  ;;  %v11770_v29 = vld [vmem:[#allocation48_spill] sm:$0xff]  ;;  %v11771_v54 = vld [vmem:[#allocation49_spill] sm:$0xff]  ;;  %v11772_v41 = vld [vmem:[#allocation50_spill] sm:$0xff] }
 0x276   : > { %v2243_v4 = vadd.f32 %v2057_v57, %v11762_v56  ;;  %v5675_v53 = vpack.c.bf16 %v2420_v2, %v2419_v19  ;;  %v5676_v3 = vpack.c.bf16 %v2421_v40, %v2421_v40  ;;  %v2244_v51 = vadd.f32 %v2057_v57, %v11763_v62  ;;  %v11773_v36 = vld [vmem:[#allocation58_spill] sm:$0xff]  ;;  %v11774_v2 = vld [vmem:[#allocation51_spill] sm:$0xff] }
 0x277   : > { %v2245_v31 = vadd.f32 %v2057_v57, %v11764_v63  ;;  %3326 = vst [vmem:[#allocation2 + $0xa8] sm:$0xff] %v5673_v47  ;;  %3327 = vst [vmem:[#allocation2 + $0xb0] sm:$0xff] %v5674_v8  ;;  %v2246_v0 = vadd.f32 %v2057_v57, %v11765_v9  ;;  %v2464_v6 = vmax.f32 %v2240_v23, 0.0  ;;  %v2465_v26 = vmax.f32 %v2241_v50, 0.0  ;;  %v2042_v23 = vpop.permute.xlu1 %2041  ;;  %v11776_v47 = vld [vmem:[#allocation52_spill] sm:$0xff]  ;;  %v11777_v7 = vld [vmem:[#allocation54_spill] sm:$0xff] }
 0x278   : > { %v2466_v11 = vmax.f32 %v2242_v14, 0.0  ;;  %3328 = vst [vmem:[#allocation2 + $0xb8] sm:$0xff] %v5675_v53  ;;  %3329 = vst.msk [vmem:[#allocation2 + $0xc0] sm:$0xf] %vm3304_vm1, %v5676_v3  ;;  %v2467_v38 = vmax.f32 %v2243_v4, 0.0  ;;  %v2468_v46 = vmax.f32 %v2244_v51, 0.0  ;;  %v2205_v30 = vadd.f32 %v2032_v39, %v11766_v16 }
 0x279   : > { %v2469_v45 = vmax.f32 %v2245_v31, 0.0  ;;  %v2470_v35 = vmax.f32 %v2246_v0, 0.0  ;;  %v5701_v15 = vpack.c.bf16 %v2465_v26, %v2464_v6  ;;  %v2206_v59 = vadd.f32 %v2032_v39, %v11767_v18  ;;  %v11778_v56 = vld [vmem:[#allocation55_spill] sm:$0xff]  ;;  %v11779_v31 = vld [vmem:[#allocation56_spill] sm:$0xff]  ;;  %v11780_v26 = vld [vmem:[#allocation57_spill] sm:$0xff] }
 0x27a   : > { %v2207_v55 = vadd.f32 %v2032_v39, %v11768_v27  ;;  %v5702_v58 = vpack.c.bf16 %v2467_v38, %v2466_v11  ;;  %v2208_v61 = vadd.f32 %v2032_v39, %v11769_v32  ;;  %v2209_v52 = vadd.f32 %v2032_v39, %v11770_v29  ;;  %v11781_v38 = vld [vmem:[#allocation61_spill] sm:$0xff] }
 0x27b   : > { %v5703_v20 = vpack.c.bf16 %v2469_v45, %v2468_v46  ;;  %v5704_v37 = vpack.c.bf16 %v2470_v35, %v2470_v35  ;;  %3354 = vst [vmem:[#allocation2 + $0x16c] sm:$0xff] %v5701_v15  ;;  %v2210_v34 = vadd.f32 %v2032_v39, %v11771_v54  ;;  %v2211_v1 = vadd.f32 %v2032_v39, %v9540_v13  ;;  %v11775_v13 = vld [vmem:[#allocation53_spill] sm:$0xff]  ;;  %v11783_v15 = vld [vmem:[#allocation59_spill] sm:$0xff] }
 0x27c   : > { %v2429_v17 = vmax.f32 %v2205_v30, 0.0  ;;  %3355 = vst [vmem:[#allocation2 + $0x174] sm:$0xff] %v5702_v58  ;;  %v2430_v33 = vmax.f32 %v2206_v59, 0.0  ;;  %v2431_v57 = vmax.f32 %v2207_v55, 0.0  ;;  %v2432_v12 = vmax.f32 %v2208_v61, 0.0  ;;  %v11782_v30 = vld [vmem:[#allocation60_spill] sm:$0xff]  ;;  %v2077_v59 = vpop.permute.xlu0 %2076 }
 0x27d   : > { %3356 = vst [vmem:[#allocation2 + $0x17c] sm:$0xff] %v5703_v20  ;;  %v2433_v22 = vmax.f32 %v2209_v52, 0.0  ;;  %3357 = vst.msk [vmem:[#allocation2 + $0x184] sm:$0xf] %vm3304_vm1, %v5704_v37  ;;  %v2434_v60 = vmax.f32 %v2210_v34, 0.0  ;;  %v2435_v42 = vmax.f32 %v2211_v1, 0.0  ;;  %v2254_v44 = vadd.f32 %v2067_v28, %v11772_v41  ;;  %v2052_v41 = vpop.permute.xlu1 %2051 }
 0x27e   : > { %v2255_v21 = vadd.f32 %v2067_v28, %v11773_v36  ;;  %v5681_v24 = vpack.c.bf16 %v2430_v33, %v2429_v17  ;;  %v5682_v19 = vpack.c.bf16 %v2432_v12, %v2431_v57  ;;  %v2256_v40 = vadd.f32 %v2067_v28, %v11774_v2  ;;  %v11784_v55 = vld [vmem:[#allocation62_spill] sm:$0xff]  ;;  %v11785_v34 = vld [vmem:[#allocation63_spill] sm:$0xff]  ;;  %v11786_v17 = vld [vmem:[#allocation64_spill] sm:$0xff] }
 0x27f   : > { %v2257_v25 = vadd.f32 %v2067_v28, %v11775_v13  ;;  %v5683_v43 = vpack.c.bf16 %v2434_v60, %v2433_v22  ;;  %v5684_v50 = vpack.c.bf16 %v2435_v42, %v2435_v42  ;;  %v2258_v8 = vadd.f32 %v2067_v28, %v11776_v47  ;;  %v11787_v22 = vld [vmem:[#allocation65_spill] sm:$0xff] }
 0x280   : > { %v2259_v14 = vadd.f32 %v2067_v28, %v11777_v7  ;;  %3334 = vst [vmem:[#allocation2 + $0xe0] sm:$0xff] %v5681_v24  ;;  %3335 = vst [vmem:[#allocation2 + $0xe8] sm:$0xff] %v5682_v19  ;;  %v2260_v4 = vadd.f32 %v2067_v28, %v11778_v56  ;;  %v2478_v39 = vmax.f32 %v2254_v44, 0.0  ;;  %v2479_v53 = vmax.f32 %v2255_v21, 0.0  ;;  %v11789_v21 = vld [vmem:[#allocation67_spill] sm:$0xff]  ;;  %v11790_v19 = vld [vmem:[#allocation68_spill] sm:$0xff] }
 0x281   : > { %v2480_v3 = vmax.f32 %v2256_v40, 0.0  ;;  %3336 = vst [vmem:[#allocation2 + $0xf0] sm:$0xff] %v5683_v43  ;;  %3337 = vst.msk [vmem:[#allocation2 + $0xf8] sm:$0xf] %vm3304_vm1, %v5684_v50  ;;  %v2481_v62 = vmax.f32 %v2257_v25, 0.0  ;;  %v2482_v51 = vmax.f32 %v2258_v8, 0.0  ;;  %v2219_v9 = vadd.f32 %v2042_v23, %v11779_v31 }
 0x282   : > { %v2483_v63 = vmax.f32 %v2259_v14, 0.0  ;;  %v2484_v0 = vmax.f32 %v2260_v4, 0.0  ;;  %v5709_v6 = vpack.c.bf16 %v2479_v53, %v2478_v39  ;;  %v2220_v11 = vadd.f32 %v2042_v23, %v11780_v26  ;;  %v11791_v40 = vld [vmem:[#allocation71_spill] sm:$0xff]  ;;  %v11792_v7 = vld [vmem:[#allocation69_spill] sm:$0xff]  ;;  %v11793_v39 = vld [vmem:[#allocation70_spill] sm:$0xff]  ;;  %v2087_v26 = vpop.permute.xlu0 %2086 }
 0x283   : > { %v2221_v46 = vadd.f32 %v2042_v23, %v11781_v38  ;;  %v5710_v45 = vpack.c.bf16 %v2481_v62, %v2480_v3  ;;  %v2222_v35 = vadd.f32 %v2042_v23, %v11782_v30  ;;  %v2223_v18 = vadd.f32 %v2042_v23, %v11783_v15  ;;  %v11794_v3 = vld [vmem:[#allocation72_spill] sm:$0xff]  ;;  %v11795_v31 = vld [vmem:[#allocation73_spill] sm:$0xff] }
 0x284   : > { %v5711_v16 = vpack.c.bf16 %v2483_v63, %v2482_v51  ;;  %v5712_v27 = vpack.c.bf16 %v2484_v0, %v2484_v0  ;;  %3362 = vst [vmem:[#allocation2 + $0x1a4] sm:$0xff] %v5709_v6  ;;  %v2224_v58 = vadd.f32 %v2042_v23, %v11784_v55  ;;  %v2225_v20 = vadd.f32 %v2042_v23, %v9626_v49  ;;  %v11788_v49 = vld [vmem:[#allocation66_spill] sm:$0xff]  ;;  %v11797_v38 = vld [vmem:[#allocation77_spill] sm:$0xff] }
 0x285   : > { %v2443_v32 = vmax.f32 %v2219_v9, 0.0  ;;  %3363 = vst [vmem:[#allocation2 + $0x1ac] sm:$0xff] %v5710_v45  ;;  %v2444_v61 = vmax.f32 %v2220_v11, 0.0  ;;  %v2445_v29 = vmax.f32 %v2221_v46, 0.0  ;;  %v2446_v52 = vmax.f32 %v2222_v35, 0.0  ;;  %v11796_v0 = vld [vmem:[#allocation74_spill] sm:$0xff] }
 0x286   : > { %3364 = vst [vmem:[#allocation2 + $0x1b4] sm:$0xff] %v5711_v16  ;;  %v2447_v28 = vmax.f32 %v2223_v18, 0.0  ;;  %3365 = vst.msk [vmem:[#allocation2 + $0x1bc] sm:$0xf] %vm3304_vm1, %v5712_v27  ;;  %v2448_v37 = vmax.f32 %v2224_v58, 0.0  ;;  %v2449_v54 = vmax.f32 %v2225_v20, 0.0  ;;  %v2268_v1 = vadd.f32 %v2077_v59, %v11785_v34 }
 0x287   : > { %v2269_v33 = vadd.f32 %v2077_v59, %v11786_v17  ;;  %v5689_v57 = vpack.c.bf16 %v2444_v61, %v2443_v32  ;;  %v5690_v12 = vpack.c.bf16 %v2446_v52, %v2445_v29  ;;  %v2270_v60 = vadd.f32 %v2077_v59, %v11787_v22  ;;  %v11798_v45 = vld [vmem:[#allocation75_spill] sm:$0xff]  ;;  %v11799_v58 = vld [vmem:[#allocation81_spill] sm:$0xff]  ;;  %v11800_v32 = vld [vmem:[#allocation88_spill] sm:$0xff] }
 0x288   : > { %v2271_v42 = vadd.f32 %v2077_v59, %v11788_v49  ;;  %v5691_v44 = vpack.c.bf16 %v2448_v37, %v2447_v28  ;;  %v5692_v36 = vpack.c.bf16 %v2449_v54, %v2449_v54  ;;  %v2272_v24 = vadd.f32 %v2077_v59, %v11789_v21  ;;  %v11801_v28 = vld [vmem:[#allocation84_spill] sm:$0xff]  ;;  %v11802_v54 = vld [vmem:[#allocation86_spill] sm:$0xff]  ;;  %v11804_v22 = vld [vmem:[#allocation87_spill] sm:$0xff] }
 0x289   : > { %v2273_v2 = vadd.f32 %v2077_v59, %v11790_v19  ;;  %3342 = vst [vmem:[#allocation2 + $0x118] sm:$0xff] %v5689_v57  ;;  %3343 = vst [vmem:[#allocation2 + $0x120] sm:$0xff] %v5690_v12  ;;  %v2274_v13 = vadd.f32 %v2077_v59, %v11791_v40  ;;  %v2492_v25 = vmax.f32 %v2268_v1, 0.0  ;;  %v2493_v23 = vmax.f32 %v2269_v33, 0.0  ;;  %v2062_v1 = vpop.permute.xlu1 %2061  ;;  %v11803_v57 = vld [vmem:[#allocation89_spill] sm:$0xff] }
 0x28a   : > { %v2494_v43 = vmax.f32 %v2270_v60, 0.0  ;;  %3344 = vst [vmem:[#allocation2 + $0x128] sm:$0xff] %v5691_v44  ;;  %3345 = vst.msk [vmem:[#allocation2 + $0x130] sm:$0xf] %vm3304_vm1, %v5692_v36  ;;  %v2495_v50 = vmax.f32 %v2271_v42, 0.0  ;;  %v2496_v47 = vmax.f32 %v2272_v24, 0.0  ;;  %v2233_v14 = vadd.f32 %v2052_v41, %v11792_v7 }
 0x28b   : > { %v2497_v8 = vmax.f32 %v2273_v2, 0.0  ;;  %v2498_v56 = vmax.f32 %v2274_v13, 0.0  ;;  %v5717_v4 = vpack.c.bf16 %v2493_v23, %v2492_v25  ;;  %v2234_v53 = vadd.f32 %v2052_v41, %v11793_v39  ;;  %v11805_v49 = vld [vmem:[#allocation93_spill] sm:$0xff]  ;;  %v11806_v2 = vld [vmem:[#allocation76_spill] sm:$0xff]  ;;  %v11807_v23 = vld [vmem:[#allocation78_spill] sm:$0xff] }
 0x28c   : > { %v2235_v62 = vadd.f32 %v2052_v41, %v11794_v3  ;;  %v5718_v51 = vpack.c.bf16 %v2495_v50, %v2494_v43  ;;  %v2236_v9 = vadd.f32 %v2052_v41, %v11795_v31  ;;  %v2237_v6 = vadd.f32 %v2052_v41, %v11796_v0  ;;  %v11808_v50 = vld [vmem:[#allocation79_spill] sm:$0xff] }
 0x28d   : > { %v5719_v63 = vpack.c.bf16 %v2497_v8, %v2496_v47  ;;  %v5720_v11 = vpack.c.bf16 %v2498_v56, %v2498_v56  ;;  %3370 = vst [vmem:[#allocation2 + $0x1dc] sm:$0xff] %v5717_v4  ;;  %v2238_v46 = vadd.f32 %v2052_v41, %v11797_v38  ;;  %v2239_v16 = vadd.f32 %v2052_v41, %v11798_v45  ;;  %v11810_v4 = vld [vmem:[#allocation82_spill] sm:$0xff] }
 0x28e   : > { %v2457_v30 = vmax.f32 %v2233_v14, 0.0  ;;  %3371 = vst [vmem:[#allocation2 + $0x1e4] sm:$0xff] %v5718_v51  ;;  %v2458_v35 = vmax.f32 %v2234_v53, 0.0  ;;  %v2459_v15 = vmax.f32 %v2235_v62, 0.0  ;;  %v2460_v18 = vmax.f32 %v2236_v9, 0.0  ;;  %v11809_v14 = vld [vmem:[#allocation80_spill] sm:$0xff]  ;;  %v2097_v53 = vpop.permute.xlu0 %2096 }
 0x28f   : > { %3372 = vst [vmem:[#allocation2 + $0x1ec] sm:$0xff] %v5719_v63  ;;  %v2461_v59 = vmax.f32 %v2237_v6, 0.0  ;;  %3373 = vst.msk [vmem:[#allocation2 + $0x1f4] sm:$0xf] %vm3304_vm1, %v5720_v11  ;;  %v2462_v27 = vmax.f32 %v2238_v46, 0.0  ;;  %v2463_v55 = vmax.f32 %v2239_v16, 0.0  ;;  %v2282_v20 = vadd.f32 %v2087_v26, %v11799_v58 }
 0x290   : > { %v2283_v61 = vadd.f32 %v2087_v26, %v11800_v32  ;;  %v5697_v29 = vpack.c.bf16 %v2458_v35, %v2457_v30  ;;  %v5698_v52 = vpack.c.bf16 %v2460_v18, %v2459_v15  ;;  %v2284_v37 = vadd.f32 %v2087_v26, %v11801_v28  ;;  %v11811_v62 = vld [vmem:[#allocation83_spill] sm:$0xff]  ;;  %v11812_v63 = vld [vmem:[#allocation85_spill] sm:$0xff]  ;;  %v11813_v45 = vld [vmem:[#allocation102_spill] sm:$0xff] }
 0x291   : > { %v2285_v34 = vadd.f32 %v2087_v26, %v11802_v54  ;;  %v5699_v17 = vpack.c.bf16 %v2462_v27, %v2461_v59  ;;  %v5700_v33 = vpack.c.bf16 %v2463_v55, %v2463_v55  ;;  %v2286_v12 = vadd.f32 %v2087_v26, %v11803_v57  ;;  %v11814_v30 = vld [vmem:[#allocation105_spill] sm:$0xff]  ;;  %v11815_v59 = vld [vmem:[#allocation106_spill] sm:$0xff]  ;;  %v11816_v55 = vld [vmem:[#allocation108_spill] sm:$0xff] }
 0x292   : > { %v2287_v60 = vadd.f32 %v2087_v26, %v11804_v22  ;;  %3350 = vst [vmem:[#allocation2 + $0x150] sm:$0xff] %v5697_v29  ;;  %3351 = vst [vmem:[#allocation2 + $0x158] sm:$0xff] %v5698_v52  ;;  %v2288_v42 = vadd.f32 %v2087_v26, %v11805_v49  ;;  %v2506_v41 = vmax.f32 %v2282_v20, 0.0  ;;  %v2507_v44 = vmax.f32 %v2283_v61, 0.0  ;;  %v2072_v20 = vpop.permute.xlu1 %2071  ;;  %v11817_v29 = vld [vmem:[#allocation109_spill] sm:$0xff]  ;;  %v11818_v28 = vld [vmem:[#allocation112_spill] sm:$0xff] }
 0x293   : > { %v2508_v36 = vmax.f32 %v2284_v37, 0.0  ;;  %3352 = vst [vmem:[#allocation2 + $0x160] sm:$0xff] %v5699_v17  ;;  %3353 = vst.msk [vmem:[#allocation2 + $0x168] sm:$0xf] %vm3304_vm1, %v5700_v33  ;;  %v2509_v21 = vmax.f32 %v2285_v34, 0.0  ;;  %v2510_v24 = vmax.f32 %v2286_v12, 0.0  ;;  %v2247_v40 = vadd.f32 %v2062_v1, %v11806_v2 }
 0x294   : > { %v2511_v19 = vmax.f32 %v2287_v60, 0.0  ;;  %v2512_v13 = vmax.f32 %v2288_v42, 0.0  ;;  %v5725_v25 = vpack.c.bf16 %v2507_v44, %v2506_v41  ;;  %v2248_v43 = vadd.f32 %v2062_v1, %v11807_v23  ;;  %v11819_v54 = vld [vmem:[#allocation110_spill] sm:$0xff]  ;;  %v11821_v44 = vld [vmem:[#allocation91_spill] sm:$0xff] }
 0x295   : > { %v2249_v47 = vadd.f32 %v2062_v1, %v11808_v50  ;;  %v5726_v8 = vpack.c.bf16 %v2509_v21, %v2508_v36  ;;  %v2250_v56 = vadd.f32 %v2062_v1, %v11809_v14  ;;  %v2251_v39 = vadd.f32 %v2062_v1, %v11810_v4  ;;  %v11820_v60 = vld [vmem:[#allocation90_spill] sm:$0xff]  ;;  %v11822_v21 = vld [vmem:[#allocation92_spill] sm:$0xff] }
 0x296   : > { %v5727_v7 = vpack.c.bf16 %v2511_v19, %v2510_v24  ;;  %v5728_v3 = vpack.c.bf16 %v2512_v13, %v2512_v13  ;;  %3378 = vst [vmem:[#allocation2 + $0x214] sm:$0xff] %v5725_v25  ;;  %v2252_v51 = vadd.f32 %v2062_v1, %v11811_v62  ;;  %v2253_v31 = vadd.f32 %v2062_v1, %v11812_v63  ;;  %v11824_v25 = vld [vmem:[#allocation95_spill] sm:$0xff]  ;;  %v11827_v63 = vld [vmem:[#allocation118_spill] sm:$0xff] }
 0x297   : > { %v2471_v9 = vmax.f32 %v2247_v40, 0.0  ;;  %3379 = vst [vmem:[#allocation2 + $0x21c] sm:$0xff] %v5726_v8  ;;  %v2472_v0 = vmax.f32 %v2248_v43, 0.0  ;;  %v2473_v6 = vmax.f32 %v2249_v47, 0.0  ;;  %v2474_v26 = vmax.f32 %v2250_v56, 0.0  ;;  %v11823_v40 = vld [vmem:[#allocation98_spill] sm:$0xff]  ;;  %v2107_v43 = vpop.permute.xlu0 %2106 }
 0x298   : > { %3380 = vst [vmem:[#allocation2 + $0x224] sm:$0xff] %v5727_v7  ;;  %v2475_v11 = vmax.f32 %v2251_v39, 0.0  ;;  %3381 = vst.msk [vmem:[#allocation2 + $0x22c] sm:$0xf] %vm3304_vm1, %v5728_v3  ;;  %v2476_v38 = vmax.f32 %v2252_v51, 0.0  ;;  %v2477_v46 = vmax.f32 %v2253_v31, 0.0  ;;  %v2296_v16 = vadd.f32 %v2097_v53, %v11813_v45 }
 0x299   : > { %v2297_v35 = vadd.f32 %v2097_v53, %v11814_v30  ;;  %v5705_v15 = vpack.c.bf16 %v2472_v0, %v2471_v9  ;;  %v5706_v18 = vpack.c.bf16 %v2474_v26, %v2473_v6  ;;  %v2298_v27 = vadd.f32 %v2097_v53, %v11815_v59  ;;  %v11825_v47 = vld [vmem:[#allocation94_spill] sm:$0xff]  ;;  %v11826_v7 = vld [vmem:[#allocation96_spill] sm:$0xff]  ;;  %v11832_v59 = vld [vmem:[#allocation125_spill] sm:$0xff] }
 0x29a   : > { %v2299_v58 = vadd.f32 %v2097_v53, %v11816_v55  ;;  %v5707_v32 = vpack.c.bf16 %v2476_v38, %v2475_v11  ;;  %v5708_v61 = vpack.c.bf16 %v2477_v46, %v2477_v46  ;;  %v2300_v52 = vadd.f32 %v2097_v53, %v11817_v29  ;;  %v11828_v9 = vld [vmem:[#allocation124_spill] sm:$0xff]  ;;  %v11829_v11 = vld [vmem:[#allocation119_spill] sm:$0xff] }
 0x29b   : > { %v2301_v37 = vadd.f32 %v2097_v53, %v11818_v28  ;;  %3358 = vst [vmem:[#allocation2 + $0x188] sm:$0xff] %v5705_v15  ;;  %3359 = vst [vmem:[#allocation2 + $0x190] sm:$0xff] %v5706_v18  ;;  %v2302_v34 = vadd.f32 %v2097_v53, %v11819_v54  ;;  %v2520_v1 = vmax.f32 %v2296_v16, 0.0  ;;  %v2521_v17 = vmax.f32 %v2297_v35, 0.0  ;;  %v11830_v46 = vld [vmem:[#allocation120_spill] sm:$0xff]  ;;  %v2082_v16 = vpop.permute.xlu1 %2081  ;;  %v11831_v15 = vld [vmem:[#allocation122_spill] sm:$0xff] }
 0x29c   : > { %v2522_v33 = vmax.f32 %v2298_v27, 0.0  ;;  %3360 = vst [vmem:[#allocation2 + $0x198] sm:$0xff] %v5707_v32  ;;  %3361 = vst.msk [vmem:[#allocation2 + $0x1a0] sm:$0xf] %vm3304_vm1, %v5708_v61  ;;  %v2523_v57 = vmax.f32 %v2299_v58, 0.0  ;;  %v2524_v12 = vmax.f32 %v2300_v52, 0.0  ;;  %v2261_v49 = vadd.f32 %v2072_v20, %v11820_v60 }
 0x29d   : > { %v2525_v22 = vmax.f32 %v2301_v37, 0.0  ;;  %v2526_v42 = vmax.f32 %v2302_v34, 0.0  ;;  %v5733_v41 = vpack.c.bf16 %v2521_v17, %v2520_v1  ;;  %v2262_v36 = vadd.f32 %v2072_v20, %v11821_v44  ;;  %v11833_v55 = vld [vmem:[#allocation123_spill] sm:$0xff]  ;;  %v11834_v37 = vld [vmem:[#allocation97_spill] sm:$0xff] }
 0x29e   : > { %v2263_v24 = vadd.f32 %v2072_v20, %v11822_v21  ;;  %v5734_v19 = vpack.c.bf16 %v2523_v57, %v2522_v33  ;;  %v2264_v13 = vadd.f32 %v2072_v20, %v11823_v40  ;;  %v2265_v23 = vadd.f32 %v2072_v20, %v11824_v25  ;;  %v11835_v17 = vld [vmem:[#allocation99_spill] sm:$0xff]  ;;  %v11836_v57 = vld [vmem:[#allocation101_spill] sm:$0xff] }
 0x29f   : > { %v5735_v2 = vpack.c.bf16 %v2525_v22, %v2524_v12  ;;  %v5736_v50 = vpack.c.bf16 %v2526_v42, %v2526_v42  ;;  %3386 = vst [vmem:[#allocation2 + $0x24c] sm:$0xff] %v5733_v41  ;;  %v2266_v8 = vadd.f32 %v2072_v20, %v11825_v47  ;;  %v2267_v14 = vadd.f32 %v2072_v20, %v11826_v7  ;;  %v11838_v41 = vld [vmem:[#allocation103_spill] sm:$0xff]  ;;  %v11841_v7 = vld [vmem:[#allocation132_spill] sm:$0xff] }
 0x2a0   : > { %v2485_v56 = vmax.f32 %v2261_v49, 0.0  ;;  %3387 = vst [vmem:[#allocation2 + $0x254] sm:$0xff] %v5734_v19  ;;  %v2486_v4 = vmax.f32 %v2262_v36, 0.0  ;;  %v2487_v39 = vmax.f32 %v2263_v24, 0.0  ;;  %v2488_v53 = vmax.f32 %v2264_v13, 0.0  ;;  %v11837_v49 = vld [vmem:[#allocation100_spill] sm:$0xff]  ;;  %v2117_v36 = vpop.permute.xlu0 %2116 }
 0x2a1   : > { %3388 = vst [vmem:[#allocation2 + $0x25c] sm:$0xff] %v5735_v2  ;;  %v2489_v3 = vmax.f32 %v2265_v23, 0.0  ;;  %3389 = vst.msk [vmem:[#allocation2 + $0x264] sm:$0xf] %vm3304_vm1, %v5736_v50  ;;  %v2490_v62 = vmax.f32 %v2266_v8, 0.0  ;;  %v2491_v51 = vmax.f32 %v2267_v14, 0.0  ;;  %v2310_v31 = vadd.f32 %v2107_v43, %v11827_v63 }
 0x2a2   : > { %v2311_v0 = vadd.f32 %v2107_v43, %v11828_v9  ;;  %v5713_v6 = vpack.c.bf16 %v2486_v4, %v2485_v56  ;;  %v5714_v26 = vpack.c.bf16 %v2488_v53, %v2487_v39  ;;  %v2312_v38 = vadd.f32 %v2107_v43, %v11829_v11  ;;  %v11839_v24 = vld [vmem:[#allocation104_spill] sm:$0xff]  ;;  %v11840_v2 = vld [vmem:[#allocation107_spill] sm:$0xff]  ;;  %v11842_v56 = vld [vmem:[#allocation134_spill] sm:$0xff] }
 0x2a3   : > { %v2313_v45 = vadd.f32 %v2107_v43, %v11830_v46  ;;  %v5715_v30 = vpack.c.bf16 %v2490_v62, %v2489_v3  ;;  %v5716_v35 = vpack.c.bf16 %v2491_v51, %v2491_v51  ;;  %v2314_v18 = vadd.f32 %v2107_v43, %v11831_v15  ;;  %v11843_v3 = vld [vmem:[#allocation135_spill] sm:$0xff]  ;;  %v11844_v51 = vld [vmem:[#allocation140_spill] sm:$0xff]  ;;  %v11846_v11 = vld [vmem:[#allocation137_spill] sm:$0xff] }
 0x2a4   : > { %v2315_v27 = vadd.f32 %v2107_v43, %v11832_v59  ;;  %3366 = vst [vmem:[#allocation2 + $0x1c0] sm:$0xff] %v5713_v6  ;;  %3367 = vst [vmem:[#allocation2 + $0x1c8] sm:$0xff] %v5714_v26  ;;  %v2316_v58 = vadd.f32 %v2107_v43, %v11833_v55  ;;  %v2534_v20 = vmax.f32 %v2310_v31, 0.0  ;;  %v2535_v32 = vmax.f32 %v2311_v0, 0.0  ;;  %v2092_v31 = vpop.permute.xlu1 %2091  ;;  %v11845_v6 = vld [vmem:[#allocation136_spill] sm:$0xff]  ;;  %v11847_v46 = vld [vmem:[#allocation138_spill] sm:$0xff] }
 0x2a5   : > { %v2536_v61 = vmax.f32 %v2312_v38, 0.0  ;;  %3368 = vst [vmem:[#allocation2 + $0x1d0] sm:$0xff] %v5715_v30  ;;  %3369 = vst.msk [vmem:[#allocation2 + $0x1d8] sm:$0xf] %vm3304_vm1, %v5716_v35  ;;  %v2537_v29 = vmax.f32 %v2313_v45, 0.0  ;;  %v2538_v52 = vmax.f32 %v2314_v18, 0.0  ;;  %v2275_v54 = vadd.f32 %v2082_v16, %v11834_v37 }
 0x2a6   : > { %v2539_v28 = vmax.f32 %v2315_v27, 0.0  ;;  %v2540_v34 = vmax.f32 %v2316_v58, 0.0  ;;  %v5741_v1 = vpack.c.bf16 %v2535_v32, %v2534_v20  ;;  %v2276_v33 = vadd.f32 %v2082_v16, %v11835_v17  ;;  %v11848_v27 = vld [vmem:[#allocation111_spill] sm:$0xff]  ;;  %v11849_v32 = vld [vmem:[#allocation113_spill] sm:$0xff] }
 0x2a7   : > { %v2277_v12 = vadd.f32 %v2082_v16, %v11836_v57  ;;  %v5742_v22 = vpack.c.bf16 %v2537_v29, %v2536_v61  ;;  %v2278_v42 = vadd.f32 %v2082_v16, %v11837_v49  ;;  %v2279_v44 = vadd.f32 %v2082_v16, %v11838_v41  ;;  %v11850_v29 = vld [vmem:[#allocation114_spill] sm:$0xff] }
 0x2a8   : > { %v5743_v60 = vpack.c.bf16 %v2539_v28, %v2538_v52  ;;  %v5744_v21 = vpack.c.bf16 %v2540_v34, %v2540_v34  ;;  %3394 = vst [vmem:[#allocation2 + $0x284] sm:$0xff] %v5741_v1  ;;  %v2280_v19 = vadd.f32 %v2082_v16, %v11839_v24  ;;  %v2281_v40 = vadd.f32 %v2082_v16, %v11840_v2  ;;  %v11852_v1 = vld [vmem:[#allocation117_spill] sm:$0xff]  ;;  %v11855_v2 = vld [vmem:[#allocation143_spill] sm:$0xff] }
 0x2a9   : > { %v2499_v13 = vmax.f32 %v2275_v54, 0.0  ;;  %3395 = vst [vmem:[#allocation2 + $0x28c] sm:$0xff] %v5742_v22  ;;  %v2500_v25 = vmax.f32 %v2276_v33, 0.0  ;;  %v2501_v23 = vmax.f32 %v2277_v12, 0.0  ;;  %v2502_v43 = vmax.f32 %v2278_v42, 0.0  ;;  %v11851_v54 = vld [vmem:[#allocation115_spill] sm:$0xff]  ;;  %v2127_v33 = vpop.permute.xlu0 %2126 }
 0x2aa   : > { %3396 = vst [vmem:[#allocation2 + $0x294] sm:$0xff] %v5743_v60  ;;  %v2503_v50 = vmax.f32 %v2279_v44, 0.0  ;;  %3397 = vst.msk [vmem:[#allocation2 + $0x29c] sm:$0xf] %vm3304_vm1, %v5744_v21  ;;  %v2504_v47 = vmax.f32 %v2280_v19, 0.0  ;;  %v2505_v8 = vmax.f32 %v2281_v40, 0.0  ;;  %v2324_v14 = vadd.f32 %v2117_v36, %v11841_v7 }
 0x2ab   : > { %v2325_v4 = vadd.f32 %v2117_v36, %v11842_v56  ;;  %v5721_v39 = vpack.c.bf16 %v2500_v25, %v2499_v13  ;;  %v5722_v53 = vpack.c.bf16 %v2502_v43, %v2501_v23  ;;  %v2326_v62 = vadd.f32 %v2117_v36, %v11843_v3  ;;  %v11853_v12 = vld [vmem:[#allocation116_spill] sm:$0xff]  ;;  %v11854_v60 = vld [vmem:[#allocation121_spill] sm:$0xff]  ;;  %v11856_v13 = vld [vmem:[#allocation147_spill] sm:$0xff] }
 0x2ac   : > { %v2327_v63 = vadd.f32 %v2117_v36, %v11844_v51  ;;  %v5723_v9 = vpack.c.bf16 %v2504_v47, %v2503_v50  ;;  %v5724_v0 = vpack.c.bf16 %v2505_v8, %v2505_v8  ;;  %v2328_v26 = vadd.f32 %v2117_v36, %v11845_v6  ;;  %v11857_v50 = vld [vmem:[#allocation149_spill] sm:$0xff]  ;;  %v11858_v8 = vld [vmem:[#allocation6_spill] sm:$0xff]  ;;  %v11860_v3 = vld [vmem:[#allocation8_spill] sm:$0xff] }
 0x2ad   : > { %v2329_v38 = vadd.f32 %v2117_v36, %v11846_v11  ;;  %3374 = vst [vmem:[#allocation2 + $0x1f8] sm:$0xff] %v5721_v39  ;;  %3375 = vst [vmem:[#allocation2 + $0x200] sm:$0xff] %v5722_v53  ;;  %v2330_v45 = vadd.f32 %v2117_v36, %v11847_v46  ;;  %v2548_v16 = vmax.f32 %v2324_v14, 0.0  ;;  %v2549_v30 = vmax.f32 %v2325_v4, 0.0  ;;  %v2102_v14 = vpop.permute.xlu1 %2101  ;;  %v11859_v39 = vld [vmem:[#allocation7_spill] sm:$0xff]  ;;  %v11861_v51 = vld [vmem:[#allocation9_spill] sm:$0xff] }
 0x2ae   : > { %v2550_v35 = vmax.f32 %v2326_v62, 0.0  ;;  %3376 = vst [vmem:[#allocation2 + $0x208] sm:$0xff] %v5723_v9  ;;  %3377 = vst.msk [vmem:[#allocation2 + $0x210] sm:$0xf] %vm3304_vm1, %v5724_v0  ;;  %v2551_v15 = vmax.f32 %v2327_v63, 0.0  ;;  %v2552_v18 = vmax.f32 %v2328_v26, 0.0  ;;  %v2289_v55 = vadd.f32 %v2092_v31, %v11848_v27 }
 0x2af   : > { %v2553_v59 = vmax.f32 %v2329_v38, 0.0  ;;  %v2554_v58 = vmax.f32 %v2330_v45, 0.0  ;;  %v5749_v20 = vpack.c.bf16 %v2549_v30, %v2548_v16  ;;  %v2290_v61 = vadd.f32 %v2092_v31, %v11849_v32  ;;  %v11862_v38 = vld [vmem:[#allocation129_spill] sm:$0xff]  ;;  %v11863_v30 = vld [vmem:[#allocation126_spill] sm:$0xff] }
 0x2b0   : > { %v2291_v52 = vadd.f32 %v2092_v31, %v11850_v29  ;;  %v5750_v28 = vpack.c.bf16 %v2551_v15, %v2550_v35  ;;  %v2292_v34 = vadd.f32 %v2092_v31, %v11851_v54  ;;  %v2293_v17 = vadd.f32 %v2092_v31, %v11852_v1  ;;  %v11864_v15 = vld [vmem:[#allocation127_spill] sm:$0xff] }
 0x2b1   : > { %v5751_v37 = vpack.c.bf16 %v2553_v59, %v2552_v18  ;;  %v5752_v57 = vpack.c.bf16 %v2554_v58, %v2554_v58  ;;  %3402 = vst [vmem:[#allocation2 + $0x2bc] sm:$0xff] %v5749_v20  ;;  %v2294_v22 = vadd.f32 %v2092_v31, %v11853_v12  ;;  %v2295_v49 = vadd.f32 %v2092_v31, %v11854_v60  ;;  %v11866_v20 = vld [vmem:[#allocation131_spill] sm:$0xff]  ;;  %v11869_v60 = vld [vmem:[#allocation150_spill] sm:$0xff] }
 0x2b2   : > { %v2513_v42 = vmax.f32 %v2289_v55, 0.0  ;;  %3403 = vst [vmem:[#allocation2 + $0x2c4] sm:$0xff] %v5750_v28  ;;  %v2514_v41 = vmax.f32 %v2290_v61, 0.0  ;;  %v2515_v44 = vmax.f32 %v2291_v52, 0.0  ;;  %v2516_v36 = vmax.f32 %v2292_v34, 0.0  ;;  %v11865_v55 = vld [vmem:[#allocation128_spill] sm:$0xff]  ;;  %v2137_v61 = vpop.permute.xlu0 %2136 }
 0x2b3   : > { %3404 = vst [vmem:[#allocation2 + $0x2cc] sm:$0xff] %v5751_v37  ;;  %v2517_v21 = vmax.f32 %v2293_v17, 0.0  ;;  %3405 = vst.msk [vmem:[#allocation2 + $0x2d4] sm:$0xf] %vm3304_vm1, %v5752_v57  ;;  %v2518_v24 = vmax.f32 %v2294_v22, 0.0  ;;  %v2519_v19 = vmax.f32 %v2295_v49, 0.0  ;;  %v2338_v40 = vadd.f32 %v2127_v33, %v11855_v2 }
 0x2b4   : > { %v2339_v25 = vadd.f32 %v2127_v33, %v11856_v13  ;;  %v5729_v23 = vpack.c.bf16 %v2514_v41, %v2513_v42  ;;  %v5730_v43 = vpack.c.bf16 %v2516_v36, %v2515_v44  ;;  %v2340_v47 = vadd.f32 %v2127_v33, %v11857_v50  ;;  %v11867_v52 = vld [vmem:[#allocation130_spill] sm:$0xff]  ;;  %v11868_v37 = vld [vmem:[#allocation133_spill] sm:$0xff] }
 0x2b5   : > { %v2341_v7 = vadd.f32 %v2127_v33, %v11858_v8  ;;  %v5731_v56 = vpack.c.bf16 %v2518_v24, %v2517_v21  ;;  %v5732_v4 = vpack.c.bf16 %v2519_v19, %v2519_v19  ;;  %v2342_v53 = vadd.f32 %v2127_v33, %v11859_v39  ;;  %v11870_v42 = vld [vmem:[#allocation154_spill] sm:$0xff]  ;;  %v11871_v21 = vld [vmem:[#allocation155_spill] sm:$0xff]  ;;  %v11872_v19 = vld [vmem:[#allocation156_spill] sm:$0xff] }
 0x2b6   : > { %v2343_v62 = vadd.f32 %v2127_v33, %v11860_v3  ;;  %3382 = vst [vmem:[#allocation2 + $0x230] sm:$0xff] %v5729_v23  ;;  %3383 = vst [vmem:[#allocation2 + $0x238] sm:$0xff] %v5730_v43  ;;  %v2344_v63 = vadd.f32 %v2127_v33, %v11861_v51  ;;  %v2562_v31 = vmax.f32 %v2338_v40, 0.0  ;;  %v2563_v9 = vmax.f32 %v2339_v25, 0.0  ;;  %v2112_v40 = vpop.permute.xlu1 %2111  ;;  %v11873_v23 = vld [vmem:[#allocation157_spill] sm:$0xff]  ;;  %v11874_v50 = vld [vmem:[#allocation158_spill] sm:$0xff] }
 0x2b7   : > { %v2564_v0 = vmax.f32 %v2340_v47, 0.0  ;;  %3384 = vst [vmem:[#allocation2 + $0x240] sm:$0xff] %v5731_v56  ;;  %3385 = vst.msk [vmem:[#allocation2 + $0x248] sm:$0xf] %vm3304_vm1, %v5732_v4  ;;  %v2565_v6 = vmax.f32 %v2341_v7, 0.0  ;;  %v2566_v26 = vmax.f32 %v2342_v53, 0.0  ;;  %v2303_v46 = vadd.f32 %v2102_v14, %v11862_v38 }
 0x2b8   : > { %v2567_v11 = vmax.f32 %v2343_v62, 0.0  ;;  %v2568_v45 = vmax.f32 %v2344_v63, 0.0  ;;  %v5757_v16 = vpack.c.bf16 %v2563_v9, %v2562_v31  ;;  %v2304_v35 = vadd.f32 %v2102_v14, %v11863_v30  ;;  %v11875_v8 = vld [vmem:[#allocation159_spill] sm:$0xff]  ;;  %v11877_v9 = vld [vmem:[#allocation141_spill] sm:$0xff] }
 0x2b9   : > { %v2305_v18 = vadd.f32 %v2102_v14, %v11864_v15  ;;  %v5758_v59 = vpack.c.bf16 %v2565_v6, %v2564_v0  ;;  %v2306_v58 = vadd.f32 %v2102_v14, %v11865_v55  ;;  %v2307_v32 = vadd.f32 %v2102_v14, %v11866_v20  ;;  %v11876_v62 = vld [vmem:[#allocation139_spill] sm:$0xff]  ;;  %v11878_v6 = vld [vmem:[#allocation145_spill] sm:$0xff] }
 0x2ba   : > { %v5759_v27 = vpack.c.bf16 %v2567_v11, %v2566_v26  ;;  %v5760_v29 = vpack.c.bf16 %v2568_v45, %v2568_v45  ;;  %3410 = vst [vmem:[#allocation2 + $0x2f4] sm:$0xff] %v5757_v16  ;;  %v2308_v28 = vadd.f32 %v2102_v14, %v11867_v52  ;;  %v2309_v54 = vadd.f32 %v2102_v14, %v11868_v37  ;;  %v11880_v16 = vld [vmem:[#allocation146_spill] sm:$0xff]  ;;  %v11883_v37 = vld [vmem:[#allocation167_spill] sm:$0xff] }
 0x2bb   : > { %v2527_v34 = vmax.f32 %v2303_v46, 0.0  ;;  %3411 = vst [vmem:[#allocation2 + $0x2fc] sm:$0xff] %v5758_v59  ;;  %v2528_v1 = vmax.f32 %v2304_v35, 0.0  ;;  %v2529_v17 = vmax.f32 %v2305_v18, 0.0  ;;  %v2530_v33 = vmax.f32 %v2306_v58, 0.0  ;;  %v11879_v46 = vld [vmem:[#allocation142_spill] sm:$0xff]  ;;  %v2147_v35 = vpop.permute.xlu0 %2146 }
 0x2bc   : > { %3412 = vst [vmem:[#allocation2 + $0x304] sm:$0xff] %v5759_v27  ;;  %v2531_v57 = vmax.f32 %v2307_v32, 0.0  ;;  %3413 = vst.msk [vmem:[#allocation2 + $0x30c] sm:$0xf] %vm3304_vm1, %v5760_v29  ;;  %v2532_v12 = vmax.f32 %v2308_v28, 0.0  ;;  %v2533_v22 = vmax.f32 %v2309_v54, 0.0  ;;  %v2352_v49 = vadd.f32 %v2137_v61, %v11869_v60 }
 0x2bd   : > { %v2353_v41 = vadd.f32 %v2137_v61, %v11870_v42  ;;  %v5737_v44 = vpack.c.bf16 %v2528_v1, %v2527_v34  ;;  %v5738_v36 = vpack.c.bf16 %v2530_v33, %v2529_v17  ;;  %v2354_v24 = vadd.f32 %v2137_v61, %v11871_v21  ;;  %v11881_v18 = vld [vmem:[#allocation144_spill] sm:$0xff]  ;;  %v2122_v17 = vpop.permute.xlu1 %2121  ;;  %v11886_v60 = vld [vmem:[#allocation170_spill] sm:$0xff] }
 0x2be   : > { %v2355_v2 = vadd.f32 %v2137_v61, %v11872_v19  ;;  %v5739_v13 = vpack.c.bf16 %v2532_v12, %v2531_v57  ;;  %v5740_v25 = vpack.c.bf16 %v2533_v22, %v2533_v22  ;;  %v2356_v43 = vadd.f32 %v2137_v61, %v11873_v23  ;;  %v11882_v27 = vld [vmem:[#allocation148_spill] sm:$0xff]  ;;  %v11885_v12 = vld [vmem:[#allocation169_spill] sm:$0xff] }
 0x2bf   : > { %v2357_v47 = vadd.f32 %v2137_v61, %v11874_v50  ;;  %3390 = vst [vmem:[#allocation2 + $0x268] sm:$0xff] %v5737_v44  ;;  %3391 = vst [vmem:[#allocation2 + $0x270] sm:$0xff] %v5738_v36  ;;  %v2358_v7 = vadd.f32 %v2137_v61, %v11875_v8  ;;  %v2576_v14 = vmax.f32 %v2352_v49, 0.0  ;;  %v2577_v56 = vmax.f32 %v2353_v41, 0.0  ;;  %v11884_v34 = vld [vmem:[#allocation168_spill] sm:$0xff]  ;;  %v11887_v44 = vld [vmem:[#allocation171_spill] sm:$0xff] }
 0x2c0   : > { %v2578_v4 = vmax.f32 %v2354_v24, 0.0  ;;  %3392 = vst [vmem:[#allocation2 + $0x278] sm:$0xff] %v5739_v13  ;;  %3393 = vst.msk [vmem:[#allocation2 + $0x280] sm:$0xf] %vm3304_vm1, %v5740_v25  ;;  %v2579_v39 = vmax.f32 %v2355_v2, 0.0  ;;  %v2580_v53 = vmax.f32 %v2356_v43, 0.0  ;;  %v2317_v51 = vadd.f32 %v2112_v40, %v11876_v62 }
 0x2c1   : > { %v2581_v3 = vmax.f32 %v2357_v47, 0.0  ;;  %v2582_v63 = vmax.f32 %v2358_v7, 0.0  ;;  %v5765_v31 = vpack.c.bf16 %v2577_v56, %v2576_v14  ;;  %v2318_v0 = vadd.f32 %v2112_v40, %v11877_v9  ;;  %v11888_v21 = vld [vmem:[#allocation172_spill] sm:$0xff]  ;;  %v11889_v19 = vld [vmem:[#allocation173_spill] sm:$0xff]  ;;  %v11890_v47 = vld [vmem:[#allocation11_spill] sm:$0xff] }
 0x2c2   : > { %v2319_v26 = vadd.f32 %v2112_v40, %v11878_v6  ;;  %v5766_v11 = vpack.c.bf16 %v2579_v39, %v2578_v4  ;;  %v2320_v45 = vadd.f32 %v2112_v40, %v11879_v46  ;;  %v2321_v30 = vadd.f32 %v2112_v40, %v11880_v16  ;;  %v11891_v56 = vld [vmem:[#allocation10_spill] sm:$0xff]  ;;  %v11892_v39 = vld [vmem:[#allocation13_spill] sm:$0xff] }
 0x2c3   : > { %v5767_v38 = vpack.c.bf16 %v2581_v3, %v2580_v53  ;;  %v5768_v15 = vpack.c.bf16 %v2582_v63, %v2582_v63  ;;  %3418 = vst [vmem:[#allocation2 + $0x32c] sm:$0xff] %v5765_v31  ;;  %v2322_v59 = vadd.f32 %v2112_v40, %v11881_v18  ;;  %v2323_v55 = vadd.f32 %v2112_v40, %v11882_v27  ;;  %v11894_v31 = vld [vmem:[#allocation151_spill] sm:$0xff]  ;;  %v11897_v27 = vld [vmem:[#allocation160_spill] sm:$0xff] }
 0x2c4   : > { %v2541_v58 = vmax.f32 %v2317_v51, 0.0  ;;  %3419 = vst [vmem:[#allocation2 + $0x334] sm:$0xff] %v5766_v11  ;;  %v2542_v20 = vmax.f32 %v2318_v0, 0.0  ;;  %v2543_v32 = vmax.f32 %v2319_v26, 0.0  ;;  %v2544_v61 = vmax.f32 %v2320_v45, 0.0  ;;  %v11893_v51 = vld [vmem:[#allocation12_spill] sm:$0xff]  ;;  %v2132_v0 = vpop.permute.xlu1 %2131 }
 0x2c5   : > { %3420 = vst [vmem:[#allocation2 + $0x33c] sm:$0xff] %v5767_v38  ;;  %v2545_v29 = vmax.f32 %v2321_v30, 0.0  ;;  %3421 = vst.msk [vmem:[#allocation2 + $0x344] sm:$0xf] %vm3304_vm1, %v5768_v15  ;;  %v2546_v52 = vmax.f32 %v2322_v59, 0.0  ;;  %v2547_v28 = vmax.f32 %v2323_v55, 0.0  ;;  %v2366_v54 = vadd.f32 %v2147_v35, %v11883_v37 }
 0x2c6   : > { %v2367_v1 = vadd.f32 %v2147_v35, %v11884_v34  ;;  %v5745_v33 = vpack.c.bf16 %v2542_v20, %v2541_v58  ;;  %v5746_v57 = vpack.c.bf16 %v2544_v61, %v2543_v32  ;;  %v2368_v22 = vadd.f32 %v2147_v35, %v11885_v12  ;;  %v11895_v26 = vld [vmem:[#allocation152_spill] sm:$0xff]  ;;  %v11896_v38 = vld [vmem:[#allocation153_spill] sm:$0xff]  ;;  %v11903_v12 = vld [vmem:[#allocation166_spill] sm:$0xff] }
 0x2c7   : > { %v2369_v49 = vadd.f32 %v2147_v35, %v11886_v60  ;;  %v5747_v42 = vpack.c.bf16 %v2546_v52, %v2545_v29  ;;  %v5748_v41 = vpack.c.bf16 %v2547_v28, %v2547_v28  ;;  %v2370_v36 = vadd.f32 %v2147_v35, %v11887_v44  ;;  %v11898_v58 = vld [vmem:[#allocation161_spill] sm:$0xff]  ;;  %v11899_v29 = vld [vmem:[#allocation162_spill] sm:$0xff]  ;;  %v11900_v28 = vld [vmem:[#allocation163_spill] sm:$0xff] }
 0x2c8   : > { %v2371_v24 = vadd.f32 %v2147_v35, %v11888_v21  ;;  %3398 = vst [vmem:[#allocation2 + $0x2a0] sm:$0xff] %v5745_v33  ;;  %3399 = vst [vmem:[#allocation2 + $0x2a8] sm:$0xff] %v5746_v57  ;;  %v2372_v2 = vadd.f32 %v2147_v35, %v11889_v19  ;;  %v2590_v40 = vmax.f32 %v2366_v54, 0.0  ;;  %v2591_v13 = vmax.f32 %v2367_v1, 0.0  ;;  %v11901_v1 = vld [vmem:[#allocation164_spill] sm:$0xff]  ;;  %v11902_v33 = vld [vmem:[#allocation165_spill] sm:$0xff]  ;;  %v2142_v19 = vpop.permute.xlu1 %2141 }
 0x2c9   : > { %v2592_v25 = vmax.f32 %v2368_v22, 0.0  ;;  %3400 = vst [vmem:[#allocation2 + $0x2b0] sm:$0xff] %v5747_v42  ;;  %3401 = vst.msk [vmem:[#allocation2 + $0x2b8] sm:$0xf] %vm3304_vm1, %v5748_v41  ;;  %v2593_v23 = vmax.f32 %v2369_v49, 0.0  ;;  %v2594_v43 = vmax.f32 %v2370_v36, 0.0  ;;  %v2331_v8 = vadd.f32 %v2122_v17, %v11890_v47 }
 0x2ca   : > { %v2595_v50 = vmax.f32 %v2371_v24, 0.0  ;;  %v2596_v7 = vmax.f32 %v2372_v2, 0.0  ;;  %v5773_v14 = vpack.c.bf16 %v2591_v13, %v2590_v40  ;;  %v2332_v4 = vadd.f32 %v2122_v17, %v11891_v56  ;;  %v6217_v21 = vld [vmem:[%s11102_s0 + $0x6a0] sm:$0xff]  ;;  %v6218_v13 = vld [vmem:[%s11102_s0 + $0x6a8] sm:$0xff] }
 0x2cb   : > { %v2333_v53 = vadd.f32 %v2122_v17, %v11892_v39  ;;  %v5774_v3 = vpack.c.bf16 %v2593_v23, %v2592_v25  ;;  %v2334_v63 = vadd.f32 %v2122_v17, %v11893_v51  ;;  %v2335_v9 = vadd.f32 %v2122_v17, %v11894_v31  ;;  %v6219_v23 = vld [vmem:[%s11102_s0 + $0x6b0] sm:$0xff] }
 0x2cc   : > { %v5775_v62 = vpack.c.bf16 %v2595_v50, %v2594_v43  ;;  %v5776_v6 = vpack.c.bf16 %v2596_v7, %v2596_v7  ;;  %3426 = vst [vmem:[#allocation2 + $0x364] sm:$0xff] %v5773_v14  ;;  %v2336_v11 = vadd.f32 %v2122_v17, %v11895_v26  ;;  %v2337_v46 = vadd.f32 %v2122_v17, %v11896_v38  ;;  %v6221_v14 = vld [vmem:[%s11102_s0 + $0x6c0] sm:$0xff] }
 0x2cd   : > { %v2555_v45 = vmax.f32 %v2331_v8, 0.0  ;;  %3427 = vst [vmem:[#allocation2 + $0x36c] sm:$0xff] %v5774_v3  ;;  %v2556_v16 = vmax.f32 %v2332_v4, 0.0  ;;  %v2557_v30 = vmax.f32 %v2333_v53, 0.0  ;;  %v2558_v35 = vmax.f32 %v2334_v63, 0.0  ;;  %v6220_v8 = vld [vmem:[%s11102_s0 + $0x6b8] sm:$0xff] }
 0x2ce   : > { %3428 = vst [vmem:[#allocation2 + $0x374] sm:$0xff] %v5775_v62  ;;  %v2559_v15 = vmax.f32 %v2335_v9, 0.0  ;;  %3429 = vst.msk [vmem:[#allocation2 + $0x37c] sm:$0xf] %vm3304_vm1, %v5776_v6  ;;  %v2560_v18 = vmax.f32 %v2336_v11, 0.0  ;;  %v2561_v59 = vmax.f32 %v2337_v46, 0.0  ;;  %v2345_v55 = vadd.f32 %v2132_v0, %v11897_v27 }
 0x2cf   : > { %v2346_v20 = vadd.f32 %v2132_v0, %v11898_v58  ;;  %v5753_v32 = vpack.c.bf16 %v2556_v16, %v2555_v45  ;;  %v5754_v61 = vpack.c.bf16 %v2558_v35, %v2557_v30  ;;  %v2347_v52 = vadd.f32 %v2132_v0, %v11899_v29 }
 0x2d0   : > { %v2348_v37 = vadd.f32 %v2132_v0, %v11900_v28  ;;  %v5755_v54 = vpack.c.bf16 %v2560_v18, %v2559_v15  ;;  %v5756_v34 = vpack.c.bf16 %v2561_v59, %v2561_v59  ;;  %v2349_v17 = vadd.f32 %v2132_v0, %v11901_v1 }
 0x2d1   : > { %v2350_v57 = vadd.f32 %v2132_v0, %v11902_v33  ;;  %3406 = vst [vmem:[#allocation2 + $0x2d8] sm:$0xff] %v5753_v32  ;;  %3407 = vst [vmem:[#allocation2 + $0x2e0] sm:$0xff] %v5754_v61  ;;  %v2351_v22 = vadd.f32 %v2132_v0, %v11903_v12  ;;  %v2569_v60 = vmax.f32 %v2345_v55, 0.0  ;;  %v2570_v49 = vmax.f32 %v2346_v20, 0.0 }
 0x2d2   : > { %v2571_v42 = vmax.f32 %v2347_v52, 0.0  ;;  %3408 = vst [vmem:[#allocation2 + $0x2e8] sm:$0xff] %v5755_v54  ;;  %3409 = vst.msk [vmem:[#allocation2 + $0x2f0] sm:$0xf] %vm3304_vm1, %v5756_v34  ;;  %v2572_v41 = vmax.f32 %v2348_v37, 0.0  ;;  %v2573_v44 = vmax.f32 %v2349_v17, 0.0  ;;  %v1977_v24 = vmul.f32 %v6217_v21, %v10304_v48 }
 0x2d3   : > { %v2574_v36 = vmax.f32 %v2350_v57, 0.0  ;;  %v2575_v2 = vmax.f32 %v2351_v22, 0.0  ;;  %v5761_v40 = vpack.c.bf16 %v2570_v49, %v2569_v60  ;;  %v1978_v25 = vmul.f32 %v6218_v13, %v10304_v48 }
 0x2d4   : > { %v1979_v43 = vmul.f32 %v6219_v23, %v10304_v48  ;;  %v5762_v50 = vpack.c.bf16 %v2572_v41, %v2571_v42  ;;  %v1980_v7 = vmul.f32 %v6220_v8, %v10304_v48  ;;  %v1981_v56 = vmul.f32 %v6221_v14, %v10304_v48 }
 0x2d5   : > { %v5763_v47 = vpack.c.bf16 %v2574_v36, %v2573_v44  ;;  %v5764_v4 = vpack.c.bf16 %v2575_v2, %v2575_v2  ;;  %3414 = vst [vmem:[#allocation2 + $0x310] sm:$0xff] %v5761_v40  ;;  %v2359_v39 = vadd.f32 %v2142_v19, %v10337_v10  ;;  %v2360_v53 = vadd.f32 %v2142_v19, %v10343_v5 }
 0x2d6   : > { %v2361_v3 = vadd.f32 %v2142_v19, %v1977_v24  ;;  %3415 = vst [vmem:[#allocation2 + $0x318] sm:$0xff] %v5762_v50  ;;  %v2362_v62 = vadd.f32 %v2142_v19, %v1978_v25  ;;  %v2363_v51 = vadd.f32 %v2142_v19, %v1979_v43  ;;  %v2364_v63 = vadd.f32 %v2142_v19, %v1980_v7 }
 0x2d7   : > { %3416 = vst [vmem:[#allocation2 + $0x320] sm:$0xff] %v5763_v47  ;;  %v2365_v31 = vadd.f32 %v2142_v19, %v1981_v56  ;;  %3417 = vst.msk [vmem:[#allocation2 + $0x328] sm:$0xf] %vm3304_vm1, %v5764_v4  ;;  %v2583_v9 = vmax.f32 %v2359_v39, 0.0  ;;  %v2584_v0 = vmax.f32 %v2360_v53, 0.0 }
 0x2d8   : > { %v2585_v6 = vmax.f32 %v2361_v3, 0.0  ;;  %v2586_v26 = vmax.f32 %v2362_v62, 0.0  ;;  %v2587_v48 = vmax.f32 %v2363_v51, 0.0  ;;  %v2588_v11 = vmax.f32 %v2364_v63, 0.0 }
 0x2d9   : > { %v2589_v38 = vmax.f32 %v2365_v31, 0.0  ;;  %v5769_v46 = vpack.c.bf16 %v2584_v0, %v2583_v9 }
 0x2da   : > { %v5770_v10 = vpack.c.bf16 %v2586_v26, %v2585_v6  ;;  %v5771_v45 = vpack.c.bf16 %v2588_v11, %v2587_v48 }
 0x2db   : > { %v5772_v5 = vpack.c.bf16 %v2589_v38, %v2589_v38  ;;  %3422 = vst [vmem:[#allocation2 + $0x348] sm:$0xff] %v5769_v46 }
 0x2dc   : > { %3423 = vst [vmem:[#allocation2 + $0x350] sm:$0xff] %v5770_v10  ;;  %3424 = vst [vmem:[#allocation2 + $0x358] sm:$0xff] %v5771_v45 }
 0x2dd   : > { %3425 = vst.msk [vmem:[#allocation2 + $0x360] sm:$0xf] %vm3304_vm1, %v5772_v5 }
 0x2de PF: > { %v6222_v16 = vld [vmem:[#allocation2 + $0x18c] ss:$28 sps:$4 sm:$0xff]   ;;  %v6224_v30 = vld [vmem:[#allocation2 + $0x194] ss:$28 sps:$4 sm:$0xff]   ;;  %v6230_v59 = vld [vmem:[#allocation2 + $0x15c] ss:$28 sps:$4 sm:$0xff]  }
 0x2df   : > { %4326 = vmatprep.subr.bf16.mxu0 %v6222_v16  ;;  %v6226_v35 = vld [vmem:[#allocation2 + $0x188] ss:$28 sps:$4 sm:$0xff]   ;;  %v6227_v15 = vld [vmem:[#allocation2 + $0x190] ss:$28 sps:$4 sm:$0xff]   ;;  %4519 = vmatprep.subr.bf16.mxu1 %v6224_v30  ;;  %v6233_v55 = vld [vmem:[#allocation2 + $0x158] ss:$28 sps:$4 sm:$0xff]  }
 0x2e0   : > { %v6228_v18 = vld [vmem:[#allocation2 + $0x154] ss:$28 sps:$4 sm:$0xff]   ;;  %4327 = vmatpush1.bf16.msra.mxu0 %v6226_v35  ;;  %4520 = vmatpush1.bf16.msra.mxu1 %v6227_v15  ;;  %v6234_v58 = vld [vmem:[#allocation2 + $0x11c] ss:$28 sps:$4 sm:$0xff]   ;;  %v6236_v20 = vld [vmem:[#allocation2 + $0x124] ss:$28 sps:$4 sm:$0xff]  }
 0x2e1   : > { %v6232_v27 = vld [vmem:[#allocation2 + $0x150] ss:$28 sps:$4 sm:$0xff]   ;;  %4328 = vmatprep.subr.bf16.mxu0 %v6228_v18  ;;  %4521 = vmatprep.subr.bf16.mxu1 %v6230_v59  ;;  %v6238_v32 = vld [vmem:[#allocation2 + $0x118] ss:$28 sps:$4 sm:$0xff]   ;;  %v6239_v61 = vld [vmem:[#allocation2 + $0x120] ss:$28 sps:$4 sm:$0xff]  }
 0x2e2   : > { %v6240_v29 = vld [vmem:[#allocation2 + $0xe4] ss:$28 sps:$4 sm:$0xff]   ;;  %v6242_v52 = vld [vmem:[#allocation2 + $0xec] ss:$28 sps:$4 sm:$0xff]   ;;  %v6248_v34 = vld [vmem:[#allocation2 + $0xb4] ss:$28 sps:$4 sm:$0xff]  }
 0x2e3   : > { %v6244_v28 = vld [vmem:[#allocation2 + $0xe0] ss:$28 sps:$4 sm:$0xff]   ;;  %v6245_v37 = vld [vmem:[#allocation2 + $0xe8] ss:$28 sps:$4 sm:$0xff]   ;;  %v6251_v17 = vld [vmem:[#allocation2 + $0xb0] ss:$28 sps:$4 sm:$0xff]  }
 0x2e4   : > { %4329 = vmatpush1.bf16.msra.mxu0 %v6232_v27  ;;  %4522 = vmatpush1.bf16.msra.mxu1 %v6233_v55  ;;  %v6246_v54 = vld [vmem:[#allocation2 + $0xac] ss:$28 sps:$4 sm:$0xff]   ;;  %v6252_v33 = vld [vmem:[#allocation2 + $0x74] ss:$28 sps:$4 sm:$0xff]   ;;  %v6254_v57 = vld [vmem:[#allocation2 + $0x7c] ss:$28 sps:$4 sm:$0xff]  }
 0x2e5   : > { %4330 = vmatprep.subr.bf16.mxu0 %v6234_v58  ;;  %4523 = vmatprep.subr.bf16.mxu1 %v6236_v20  ;;  %v6250_v1 = vld [vmem:[#allocation2 + $0xa8] ss:$28 sps:$4 sm:$0xff]   ;;  %v6256_v12 = vld [vmem:[#allocation2 + $0x70] ss:$28 sps:$4 sm:$0xff]   ;;  %v6257_v22 = vld [vmem:[#allocation2 + $0x78] ss:$28 sps:$4 sm:$0xff]  }
 0x2e6   : > { %v6258_v60 = vld [vmem:[#allocation2 + $0x3c] ss:$28 sps:$4 sm:$0xff]   ;;  %v6260_v49 = vld [vmem:[#allocation2 + $0x44] ss:$28 sps:$4 sm:$0xff]   ;;  %v6266_v36 = vld [vmem:[#allocation2 + $0xc] ss:$28 sps:$4 sm:$0xff]  }
 0x2e7   : > { %v6262_v42 = vld [vmem:[#allocation2 + $0x38] ss:$28 sps:$4 sm:$0xff]   ;;  %v6263_v41 = vld [vmem:[#allocation2 + $0x40] ss:$28 sps:$4 sm:$0xff]   ;;  %v6269_v24 = vld [vmem:[#allocation2 + $0x8] ss:$28 sps:$4 sm:$0xff]  }
 0x2e8   : > { %4331 = vmatpush1.bf16.msra.mxu0 %v6238_v32  ;;  %4524 = vmatpush1.bf16.msra.mxu1 %v6239_v61  ;;  %v6264_v44 = vld [vmem:[#allocation2 + $0x4] ss:$28 sps:$4 sm:$0xff]   ;;  %v6270_v19 = vld [vmem:[#allocation2 + $0x34c] ss:$28 sps:$4 sm:$0xff]   ;;  %v6272_v2 = vld [vmem:[#allocation2 + $0x354] ss:$28 sps:$4 sm:$0xff]  }
 0x2e9   : > { %4332 = vmatprep.subr.bf16.mxu0 %v6240_v29  ;;  %4525 = vmatprep.subr.bf16.mxu1 %v6242_v52  ;;  %v6268_v21 = vld [vmem:[#allocation2] ss:$28 sps:$4 sm:$0xff]   ;;  %v6274_v40 = vld [vmem:[#allocation2 + $0x348] ss:$28 sps:$4 sm:$0xff]   ;;  %v6275_v13 = vld [vmem:[#allocation2 + $0x350] ss:$28 sps:$4 sm:$0xff]  }
 0x2ea   : > { %v6276_v25 = vld [vmem:[#allocation2 + $0x314] ss:$28 sps:$4 sm:$0xff]   ;;  %v6278_v23 = vld [vmem:[#allocation2 + $0x31c] ss:$28 sps:$4 sm:$0xff]   ;;  %v6284_v8 = vld [vmem:[#allocation2 + $0x2e4] ss:$28 sps:$4 sm:$0xff]  }
 0x2eb   : > { %v6280_v43 = vld [vmem:[#allocation2 + $0x310] ss:$28 sps:$4 sm:$0xff]   ;;  %v6281_v50 = vld [vmem:[#allocation2 + $0x318] ss:$28 sps:$4 sm:$0xff]   ;;  %v6287_v14 = vld [vmem:[#allocation2 + $0x2e0] ss:$28 sps:$4 sm:$0xff]  }
 0x2ec   : > { %4333 = vmatpush1.bf16.msra.mxu0 %v6244_v28  ;;  %4526 = vmatpush1.bf16.msra.mxu1 %v6245_v37  ;;  %v6282_v47 = vld [vmem:[#allocation2 + $0x2dc] ss:$28 sps:$4 sm:$0xff]   ;;  %v6288_v56 = vld [vmem:[#allocation2 + $0x2a4] ss:$28 sps:$4 sm:$0xff]   ;;  %v6290_v4 = vld [vmem:[#allocation2 + $0x2ac] ss:$28 sps:$4 sm:$0xff]  }
 0x2ed   : > { %4334 = vmatprep.subr.bf16.mxu0 %v6246_v54  ;;  %4527 = vmatprep.subr.bf16.mxu1 %v6248_v34  ;;  %v6286_v7 = vld [vmem:[#allocation2 + $0x2d8] ss:$28 sps:$4 sm:$0xff]   ;;  %v6292_v39 = vld [vmem:[#allocation2 + $0x2a0] ss:$28 sps:$4 sm:$0xff]   ;;  %v6293_v53 = vld [vmem:[#allocation2 + $0x2a8] ss:$28 sps:$4 sm:$0xff]  }
 0x2ee   : > { %v10610_v3 = vld [vmem:[%s6602_s9 + $0x4] ss:$8 sps:$4 sm:$0xff]   ;;  %v6296_v51 = vld [vmem:[#allocation2 + $0x274] ss:$28 sps:$4 sm:$0xff]   ;;  %v6302_v0 = vld [vmem:[#allocation2 + $0x23c] ss:$28 sps:$4 sm:$0xff]  }
 0x2ef   : > { %v6294_v62 = vld [vmem:[#allocation2 + $0x26c] ss:$28 sps:$4 sm:$0xff]   ;;  %4358 = vmatprep.mubr.bf16.mxu0 %v10610_v3  ;;  %4551 = vmatprep.mubr.bf16.mxu1 %v10610_v3  ;;  %v6300_v9 = vld [vmem:[#allocation2 + $0x234] ss:$28 sps:$4 sm:$0xff]   ;;  %v6306_v48 = vld [vmem:[#allocation2 + $0x1fc] ss:$28 sps:$4 sm:$0xff]  }
 0x2f0   : > { %4335 = vmatpush1.bf16.msra.mxu0 %v6250_v1  ;;  %4528 = vmatpush1.bf16.msra.mxu1 %v6251_v17  ;;  %v6298_v63 = vld [vmem:[#allocation2 + $0x268] ss:$28 sps:$4 sm:$0xff]   ;;  %v6299_v31 = vld [vmem:[#allocation2 + $0x270] ss:$28 sps:$4 sm:$0xff]   ;;  %v6305_v26 = vld [vmem:[#allocation2 + $0x238] ss:$28 sps:$4 sm:$0xff]  }
 0x2f1   : > { %4336 = vmatprep.subr.bf16.mxu0 %v6252_v33  ;;  %4529 = vmatprep.subr.bf16.mxu1 %v6254_v57  ;;  %v6304_v6 = vld [vmem:[#allocation2 + $0x230] ss:$28 sps:$4 sm:$0xff]   ;;  %v6308_v11 = vld [vmem:[#allocation2 + $0x204] ss:$28 sps:$4 sm:$0xff]   ;;  %v6310_v38 = vld [vmem:[#allocation2 + $0x1f8] ss:$28 sps:$4 sm:$0xff]  }
 0x2f2   : > { %v6311_v46 = vld [vmem:[#allocation2 + $0x200] ss:$28 sps:$4 sm:$0xff]   ;;  %v6314_v45 = vld [vmem:[#allocation2 + $0x1cc] ss:$28 sps:$4 sm:$0xff]   ;;  %v6323_v59 = vld [vmem:[#allocation2 + $0x198] ss:$28 sps:$4 sm:$0xff]  }
 0x2f3   : > { %v6312_v10 = vld [vmem:[#allocation2 + $0x1c4] ss:$28 sps:$4 sm:$0xff]   ;;  %v6325_v35 = vld [vmem:[#allocation2 + $0x19c] ss:$28 sps:$4 sm:$0xff]   ;;  %v6339_v61 = vld [vmem:[#allocation2 + $0x12c] ss:$28 sps:$4 sm:$0xff]  }
 0x2f4   : > { %4337 = vmatpush1.bf16.msra.mxu0 %v6256_v12  ;;  %4530 = vmatpush1.bf16.msra.mxu1 %v6257_v22  ;;  %v6316_v5 = vld [vmem:[#allocation2 + $0x1c0] ss:$28 sps:$4 sm:$0xff]   ;;  %v6317_v16 = vld [vmem:[#allocation2 + $0x1c8] ss:$28 sps:$4 sm:$0xff]   ;;  %v6349_v29 = vld [vmem:[#allocation2 + $0x2f0] ss:$28 sps:$4 sm:$0xff]  }
 0x2f5   : > { %4338 = vmatprep.subr.bf16.mxu0 %v6258_v60  ;;  %4531 = vmatprep.subr.bf16.mxu1 %v6260_v49  ;;  %v6321_v30 = vld [vmem:[#allocation2 + $0x360] ss:$28 sps:$4 sm:$0xff]   ;;  %v6335_v20 = vld [vmem:[#allocation2 + $0x328] ss:$28 sps:$4 sm:$0xff]   ;;  %v10625_v52 = vld [vmem:[%s6602_s9 + $0x10] ss:$8 sps:$4 sm:$0xff]  }
 0x2f6   : > { %v10615_v15 = vld [vmem:[%s6602_s9] ss:$8 sps:$4 sm:$0xff]   ;;  %v10618_v27 = vld [vmem:[%s6602_s9 + $0x14] ss:$8 sps:$4 sm:$0xff]   ;;  %v10628_v28 = vld [vmem:[%s6602_s9 + $0x24] ss:$8 sps:$4 sm:$0xff]  }
 0x2f7   : > { %v6322_v18 = vld [vmem:[#allocation2 + $0x1a0] ss:$28 sps:$4 sm:$0xff]   ;;  %v6336_v32 = vld [vmem:[#allocation2 + $0x168] ss:$28 sps:$4 sm:$0xff]   ;;  %v6345_v54 = vld [vmem:[#allocation2 + $0xf4] ss:$28 sps:$4 sm:$0xff]  }
 0x2f8   : > { %4339 = vmatpush1.bf16.msra.mxu0 %v6262_v42  ;;  %4532 = vmatpush1.bf16.msra.mxu1 %v6263_v41  ;;  %v6331_v55 = vld [vmem:[#allocation2 + $0x164] ss:$28 sps:$4 sm:$0xff]   ;;  %v6350_v34 = vld [vmem:[#allocation2 + $0x130] ss:$28 sps:$4 sm:$0xff]   ;;  %v6363_v1 = vld [vmem:[#allocation2 + $0x2b8] ss:$28 sps:$4 sm:$0xff]  }
 0x2f9   : > { %4340 = vmatprep.subr.bf16.mxu0 %v6264_v44  ;;  %4533 = vmatprep.subr.bf16.mxu1 %v6266_v36  ;;  %v6329_v58 = vld [vmem:[#allocation2 + $0x160] ss:$28 sps:$4 sm:$0xff]   ;;  %v6337_v37 = vld [vmem:[#allocation2 + $0x128] ss:$28 sps:$4 sm:$0xff]   ;;  %v6343_v17 = vld [vmem:[#allocation2 + $0xf0] ss:$28 sps:$4 sm:$0xff]  }
 0x2fa   : > { %v10635_v33 = vld [vmem:[%s6602_s9 + $0x20] ss:$8 sps:$4 sm:$0xff]   ;;  %v6353_v57 = vld [vmem:[#allocation2 + $0xbc] ss:$28 sps:$4 sm:$0xff]   ;;  %vm5072_vm2 = vcmask 130048  }
 0x2fb   : > { %v6364_v12 = vld [vmem:[#allocation2 + $0xf8] ss:$28 sps:$4 sm:$0xff]   ;;  %v6377_v22 = vld [vmem:[#allocation2 + $0x280] ss:$28 sps:$4 sm:$0xff]   ;;  %v6391_v44 = vld [vmem:[#allocation2 + $0x248] ss:$28 sps:$4 sm:$0xff]  }
 0x2fc   : > { %4341 = vmatpush1.bf16.msra.mxu0 %v6268_v21  ;;  %4534 = vmatpush1.bf16.msra.mxu1 %v6269_v24  ;;  %v10638_v60 = vld [vmem:[%s6602_s9 + $0x34] ss:$8 sps:$4 sm:$0xff]   ;;  %v6359_v42 = vld [vmem:[#allocation2 + $0x84] ss:$28 sps:$4 sm:$0xff]   ;;  %v10645_v24 = vld [vmem:[%s6602_s9 + $0x30] ss:$8 sps:$4 sm:$0xff]  }
 0x2fd   : > { %4342 = vmatprep.subr.bf16.mxu0 %v6270_v19  ;;  %4535 = vmatprep.subr.bf16.mxu1 %v6272_v2  ;;  %v6351_v49 = vld [vmem:[#allocation2 + $0xb8] ss:$28 sps:$4 sm:$0xff]   ;;  %v6378_v41 = vld [vmem:[#allocation2 + $0xc0] ss:$28 sps:$4 sm:$0xff]   ;;  %v6392_v21 = vld [vmem:[#allocation2 + $0x88] ss:$28 sps:$4 sm:$0xff]  }
 0x2fe   : > { %v6357_v36 = vld [vmem:[#allocation2 + $0x80] ss:$28 sps:$4 sm:$0xff]   ;;  %v6367_v19 = vld [vmem:[#allocation2 + $0x4c] ss:$28 sps:$4 sm:$0xff]  }
 0x2ff   : > { %v10648_v2 = vld [vmem:[%s6602_s9 + $0x44] ss:$8 sps:$4 sm:$0xff]  }
 0x300   : > { %4343 = vmatpush2.bf16.msra.mxu0 %v6274_v40  ;;  %4536 = vmatpush2.bf16.msra.mxu1 %v6275_v13  ;;  %v6365_v40 = vld [vmem:[#allocation2 + $0x48] ss:$28 sps:$4 sm:$0xff]   ;;  %v6405_v13 = vld [vmem:[#allocation2 + $0x210] ss:$28 sps:$4 sm:$0xff]  }
 0x301   : > { %4344 = vmatprep.subr.bf16.mxu0 %v6276_v25  ;;  %4537 = vmatprep.subr.bf16.mxu1 %v6278_v23  ;;  %v6406_v25 = vld [vmem:[#allocation2 + $0x50] ss:$28 sps:$4 sm:$0xff]  }
 0x302   : > { %v6373_v23 = vld [vmem:[#allocation2 + $0x14] ss:$28 sps:$4 sm:$0xff]  }
 0x304   : > { %4345 = vmatpush2.bf16.msra.mxu0 %v6280_v43  ;;  %4538 = vmatpush2.bf16.msra.mxu1 %v6281_v50  ;;  %v10655_v43 = vld [vmem:[%s6602_s9 + $0x40] ss:$8 sps:$4 sm:$0xff]   ;;  %v6371_v50 = vld [vmem:[#allocation2 + $0x10] ss:$28 sps:$4 sm:$0xff]  }
 0x305   : > { %4346 = vmatprep.subr.bf16.mxu0 %v6282_v47  ;;  %4539 = vmatprep.subr.bf16.mxu1 %v6284_v8  ;;  %v10658_v47 = vld [vmem:[%s6602_s9 + $0x54] ss:$8 sps:$4 sm:$0xff]  }
 0x306   : > { %v6381_v8 = vld [vmem:[#allocation2 + $0x35c] ss:$28 sps:$4 sm:$0xff]  }
 0x308   : > { %4347 = vmatpush2.bf16.msra.mxu0 %v6286_v7  ;;  %4540 = vmatpush2.bf16.msra.mxu1 %v6287_v14  ;;  %v6379_v7 = vld [vmem:[#allocation2 + $0x358] ss:$28 sps:$4 sm:$0xff]  }
 0x309   : > { %4348 = vmatprep.subr.bf16.mxu0 %v6288_v56  ;;  %4541 = vmatprep.subr.bf16.mxu1 %v6290_v4  ;;  %v6419_v14 = vld [vmem:[#allocation2 + $0x1d8] ss:$28 sps:$4 sm:$0xff]   ;;  %v6387_v4 = vld [vmem:[#allocation2 + $0x324] ss:$28 sps:$4 sm:$0xff]  }
 0x30a   : > { %v6420_v56 = vld [vmem:[#allocation2 + $0x18] ss:$28 sps:$4 sm:$0xff]  }
 0x30c   : > { %4349 = vmatpush2.bf16.msra.mxu0 %v6292_v39  ;;  %4542 = vmatpush2.bf16.msra.mxu1 %v6293_v53  ;;  %v6385_v39 = vld [vmem:[#allocation2 + $0x320] ss:$28 sps:$4 sm:$0xff]   ;;  %v6395_v53 = vld [vmem:[#allocation2 + $0x2ec] ss:$28 sps:$4 sm:$0xff]  }
 0x30d   : > { %4350 = vmatprep.subr.bf16.mxu0 %v6294_v62  ;;  %4543 = vmatprep.subr.bf16.mxu1 %v6296_v51  ;;  %v10665_v62 = vld [vmem:[%s6602_s9 + $0x50] ss:$8 sps:$4 sm:$0xff]   ;;  %v10668_v51 = vld [vmem:[%s6602_s9 + $0x64] ss:$8 sps:$4 sm:$0xff]  }
 0x310   : > { %4351 = vmatpush2.bf16.msra.mxu0 %v6298_v63  ;;  %4544 = vmatpush2.bf16.msra.mxu1 %v6299_v31  ;;  %v6393_v63 = vld [vmem:[#allocation2 + $0x2e8] ss:$28 sps:$4 sm:$0xff]   ;;  %v6401_v31 = vld [vmem:[#allocation2 + $0x2b4] ss:$28 sps:$4 sm:$0xff]  }
 0x311   : > { %4352 = vmatprep.subr.bf16.mxu0 %v6300_v9  ;;  %4545 = vmatprep.subr.bf16.mxu1 %v6302_v0  ;;  %v6399_v9 = vld [vmem:[#allocation2 + $0x2b0] ss:$28 sps:$4 sm:$0xff]   ;;  %v6409_v0 = vld [vmem:[#allocation2 + $0x27c] ss:$28 sps:$4 sm:$0xff]  }
 0x314   : > { %4353 = vmatpush2.bf16.msra.mxu0 %v6304_v6  ;;  %4546 = vmatpush2.bf16.msra.mxu1 %v6305_v26  ;;  %v10675_v6 = vld [vmem:[%s6602_s9 + $0x60] ss:$8 sps:$4 sm:$0xff]   ;;  %v10678_v26 = vld [vmem:[%s6602_s9 + $0x74] ss:$8 sps:$4 sm:$0xff]  }
 0x315   : > { %4354 = vmatprep.subr.bf16.mxu0 %v6306_v48  ;;  %4547 = vmatprep.subr.bf16.mxu1 %v6308_v11  ;;  %v6407_v48 = vld [vmem:[#allocation2 + $0x278] ss:$28 sps:$4 sm:$0xff]   ;;  %v6415_v11 = vld [vmem:[#allocation2 + $0x244] ss:$28 sps:$4 sm:$0xff]  }
 0x318   : > { %4355 = vmatpush2.bf16.msra.mxu0 %v6310_v38  ;;  %4548 = vmatpush2.bf16.msra.mxu1 %v6311_v46  ;;  %v6413_v38 = vld [vmem:[#allocation2 + $0x240] ss:$28 sps:$4 sm:$0xff]   ;;  %v6423_v46 = vld [vmem:[#allocation2 + $0x20c] ss:$28 sps:$4 sm:$0xff]  }
 0x319   : > { %4356 = vmatprep.subr.bf16.mxu0 %v6312_v10  ;;  %4549 = vmatprep.subr.bf16.mxu1 %v6314_v45  ;;  %v10685_v10 = vld [vmem:[%s6602_s9 + $0x70] ss:$8 sps:$4 sm:$0xff]   ;;  %v10688_v45 = vld [vmem:[%s6602_s9 + $0x84] ss:$8 sps:$4 sm:$0xff]  }
 0x31c   : > { %4357 = vmatpush2.bf16.msra.mxu0 %v6316_v5  ;;  %4550 = vmatpush2.bf16.msra.mxu1 %v6317_v16  ;;  %v6421_v5 = vld [vmem:[#allocation2 + $0x208] ss:$28 sps:$4 sm:$0xff]   ;;  %v6429_v16 = vld [vmem:[#allocation2 + $0x1d4] ss:$28 sps:$4 sm:$0xff]  }
 0x31d   : > { %5777 = vmatprep.subr.bf16.mxu1 %v6321_v30  ;;  %4712 = vmatprep.subr.bf16.mxu0 %v6325_v35  ;;  %v6427_v30 = vld [vmem:[#allocation2 + $0x1d0] ss:$28 sps:$4 sm:$0xff]   ;;  %v10695_v35 = vld [vmem:[%s6602_s9 + $0x80] ss:$8 sps:$4 sm:$0xff]  }
 0x31f   : > { %4359 = vmatmul.mubr.bf16.vlgmr.msra.gmra.mxu0 %v10615_v15  ;;  %4552 = vmatmul.mubr.bf16.vlgmr.msra.gmra.mxu1 %v10615_v15 }
 0x320   : > { %5778 = vmatpush3.bf16.msra.mxu1 %v6322_v18  ;;  %4713 = vmatpush1.bf16.msra.mxu0 %v6323_v59  ;;  %v10698_v18 = vld [vmem:[%s6602_s9 + $0x94] ss:$8 sps:$4 sm:$0xff]   ;;  %v10705_v59 = vld [vmem:[%s6602_s9 + $0x90] ss:$8 sps:$4 sm:$0xff]  }
 0x321   : > { %4368 = vmatprep.mubr.bf16.mxu0 %v10618_v27  ;;  %4561 = vmatprep.mubr.bf16.mxu1 %v10618_v27 }
 0x322   : > { %4714 = vmatprep.subr.bf16.mxu0 %v6331_v55  ;;  %5779 = vmatprep.subr.bf16.mxu1 %v6335_v20  ;;  %v10708_v55 = vld [vmem:[%s6602_s9 + $0xa4] ss:$8 sps:$4 sm:$0xff]   ;;  %v10718_v20 = vld [vmem:[%s6602_s9 + $0xb4] ss:$8 sps:$4 sm:$0xff]  }
 0x324   : > { %4715 = vmatpush1.bf16.msra.mxu0 %v6329_v58  ;;  %5780 = vmatpush3.bf16.msra.mxu1 %v6336_v32  ;;  %v10715_v58 = vld [vmem:[%s6602_s9 + $0xa0] ss:$8 sps:$4 sm:$0xff]   ;;  %v10725_v32 = vld [vmem:[%s6602_s9 + $0xb0] ss:$8 sps:$4 sm:$0xff]  }
 0x325   : > { %4716 = vmatprep.subr.bf16.mxu0 %v6339_v61  ;;  %5781 = vmatprep.subr.bf16.mxu1 %v6349_v29  ;;  %v10728_v61 = vld [vmem:[%s6602_s9 + $0xc4] ss:$8 sps:$4 sm:$0xff]   ;;  %v10735_v29 = vld [vmem:[%s6602_s9 + $0xc0] ss:$8 sps:$4 sm:$0xff]  }
 0x327   : > { %4369 = vmatmul.mubr.bf16.gmra.mxu0 %v10625_v52  ;;  %4562 = vmatmul.mubr.bf16.gmra.mxu1 %v10625_v52 }
 0x328   : > { %4378 = vmatprep.mubr.bf16.mxu0 %v10628_v28  ;;  %4571 = vmatprep.mubr.bf16.mxu1 %v10628_v28 }
 0x329   : > { %4717 = vmatpush1.bf16.msra.mxu0 %v6337_v37  ;;  %5782 = vmatpush3.bf16.msra.mxu1 %v6350_v34  ;;  %v10738_v37 = vld [vmem:[%s6602_s9 + $0xd4] ss:$8 sps:$4 sm:$0xff]   ;;  %v10748_v34 = vld [vmem:[%s6602_s9 + $0xe4] ss:$8 sps:$4 sm:$0xff]  }
 0x32a   : > { %4718 = vmatprep.subr.bf16.mxu0 %v6345_v54  ;;  %5783 = vmatprep.subr.bf16.mxu1 %v6363_v1  ;;  %v10745_v54 = vld [vmem:[%s6602_s9 + $0xd0] ss:$8 sps:$4 sm:$0xff]   ;;  %v10755_v1 = vld [vmem:[%s6602_s9 + $0xe0] ss:$8 sps:$4 sm:$0xff]  }
 0x32d   : > { %4719 = vmatpush1.bf16.msra.mxu0 %v6343_v17  ;;  %5784 = vmatpush3.bf16.msra.mxu1 %v6364_v12  ;;  %v10758_v17 = vld [vmem:[%s6602_s9 + $0xf4] ss:$8 sps:$4 sm:$0xff]  }
 0x32e   : > { %4720 = vmatprep.subr.bf16.mxu0 %v6353_v57  ;;  %5785 = vmatprep.subr.bf16.mxu1 %v6377_v22  ;;  %v10765_v57 = vld [vmem:[%s6602_s9 + $0xf0] ss:$8 sps:$4 sm:$0xff]  }
 0x32f   : > { %4379 = vmatmul.mubr.bf16.gmra.mxu0 %v10635_v33  ;;  %4572 = vmatmul.mubr.bf16.gmra.mxu1 %v10635_v33 }
 0x330   : > { %4388 = vmatprep.mubr.bf16.mxu0 %v10638_v60  ;;  %4581 = vmatprep.mubr.bf16.mxu1 %v10638_v60 }
 0x331   : > { %4721 = vmatpush1.bf16.msra.mxu0 %v6351_v49  ;;  %5786 = vmatpush3.bf16.msra.mxu1 %v6378_v41 }
 0x332   : > { %4722 = vmatprep.subr.bf16.mxu0 %v6359_v42  ;;  %5787 = vmatprep.subr.bf16.mxu1 %v6391_v44 }
 0x335   : > { %4723 = vmatpush1.bf16.msra.mxu0 %v6357_v36  ;;  %5788 = vmatpush3.bf16.msra.mxu1 %v6392_v21 }
 0x336   : > { %4724 = vmatprep.subr.bf16.mxu0 %v6367_v19  ;;  %5789 = vmatprep.subr.bf16.mxu1 %v6405_v13 }
 0x337   : > { %4389 = vmatmul.mubr.bf16.gmra.mxu0 %v10645_v24  ;;  %4582 = vmatmul.mubr.bf16.gmra.mxu1 %v10645_v24 }
 0x338   : > { %4398 = vmatprep.mubr.bf16.mxu0 %v10648_v2  ;;  %4591 = vmatprep.mubr.bf16.mxu1 %v10648_v2 }
 0x339   : > { %4725 = vmatpush1.bf16.msra.mxu0 %v6365_v40  ;;  %5790 = vmatpush3.bf16.msra.mxu1 %v6406_v25 }
 0x33a   : > { %4726 = vmatprep.subr.bf16.mxu0 %v6373_v23  ;;  %5791 = vmatprep.subr.bf16.mxu1 %v6419_v14 }
 0x33d   : > { %4727 = vmatpush1.bf16.msra.mxu0 %v6371_v50  ;;  %5792 = vmatpush3.bf16.msra.mxu1 %v6420_v56 }
 0x33e   : > { %4728 = vmatprep.subr.bf16.mxu0 %v6381_v8 }
 0x33f   : > { %4399 = vmatmul.mubr.bf16.gmra.mxu0 %v10655_v43  ;;  %4592 = vmatmul.mubr.bf16.gmra.mxu1 %v10655_v43 }
 0x340   : > { %4408 = vmatprep.mubr.bf16.mxu0 %v10658_v47  ;;  %4601 = vmatprep.mubr.bf16.mxu1 %v10658_v47 }
 0x341   : > { %4729 = vmatpush2.bf16.msra.mxu0 %v6379_v7 }
 0x342   : > { %4730 = vmatprep.subr.bf16.mxu0 %v6387_v4 }
 0x345   : > { %4731 = vmatpush2.bf16.msra.mxu0 %v6385_v39 }
 0x346   : > { %4732 = vmatprep.subr.bf16.mxu0 %v6395_v53 }
 0x347   : > { %4409 = vmatmul.mubr.bf16.gmra.mxu0 %v10665_v62  ;;  %4602 = vmatmul.mubr.bf16.gmra.mxu1 %v10665_v62 }
 0x348   : > { %4418 = vmatprep.mubr.bf16.mxu0 %v10668_v51  ;;  %4611 = vmatprep.mubr.bf16.mxu1 %v10668_v51 }
 0x349   : > { %4733 = vmatpush2.bf16.msra.mxu0 %v6393_v63 }
 0x34a   : > { %4734 = vmatprep.subr.bf16.mxu0 %v6401_v31 }
 0x34d   : > { %4735 = vmatpush2.bf16.msra.mxu0 %v6399_v9 }
 0x34e   : > { %4736 = vmatprep.subr.bf16.mxu0 %v6409_v0 }
 0x34f   : > { %4419 = vmatmul.mubr.bf16.gmra.mxu0 %v10675_v6  ;;  %4612 = vmatmul.mubr.bf16.gmra.mxu1 %v10675_v6 }
 0x350   : > { %4428 = vmatprep.mubr.bf16.mxu0 %v10678_v26  ;;  %4621 = vmatprep.mubr.bf16.mxu1 %v10678_v26 }
 0x351   : > { %4737 = vmatpush2.bf16.msra.mxu0 %v6407_v48 }
 0x352   : > { %4738 = vmatprep.subr.bf16.mxu0 %v6415_v11 }
 0x355   : > { %4739 = vmatpush2.bf16.msra.mxu0 %v6413_v38 }
 0x356   : > { %4740 = vmatprep.subr.bf16.mxu0 %v6423_v46 }
 0x357   : > { %4429 = vmatmul.mubr.bf16.gmra.mxu0 %v10685_v10  ;;  %4622 = vmatmul.mubr.bf16.gmra.mxu1 %v10685_v10 }
 0x358   : > { %4438 = vmatprep.mubr.bf16.mxu0 %v10688_v45  ;;  %4631 = vmatprep.mubr.bf16.mxu1 %v10688_v45 }
 0x359   : > { %4741 = vmatpush2.bf16.msra.mxu0 %v6421_v5 }
 0x35a   : > { %4742 = vmatprep.subr.bf16.mxu0 %v6429_v16 }
 0x35d   : > { %4743 = vmatpush2.bf16.msra.mxu0 %v6427_v30 }
 0x35f   : > { %4439 = vmatmul.mubr.bf16.gmra.mxu0 %v10695_v35  ;;  %4632 = vmatmul.mubr.bf16.gmra.mxu1 %v10695_v35 }
 0x360   : > { %4448 = vmatprep.mubr.bf16.mxu0 %v10698_v18  ;;  %4641 = vmatprep.mubr.bf16.mxu1 %v10698_v18 }
 0x367   : > { %4449 = vmatmul.mubr.bf16.gmra.mxu0 %v10705_v59  ;;  %4642 = vmatmul.mubr.bf16.gmra.mxu1 %v10705_v59 }
 0x368   : > { %4458 = vmatprep.mubr.bf16.mxu0 %v10708_v55  ;;  %4651 = vmatprep.mubr.bf16.mxu1 %v10708_v55 }
 0x36f   : > { %4459 = vmatmul.mubr.bf16.gmra.mxu0 %v10715_v58  ;;  %4652 = vmatmul.mubr.bf16.gmra.mxu1 %v10715_v58 }
 0x370   : > { %4468 = vmatprep.mubr.bf16.mxu0 %v10718_v20  ;;  %4661 = vmatprep.mubr.bf16.mxu1 %v10718_v20 }
 0x377   : > { %4469 = vmatmul.mubr.bf16.gmra.mxu0 %v10725_v32  ;;  %4662 = vmatmul.mubr.bf16.gmra.mxu1 %v10725_v32 }
 0x378   : > { %4478 = vmatprep.mubr.bf16.mxu0 %v10728_v61  ;;  %4671 = vmatprep.mubr.bf16.mxu1 %v10728_v61 }
 0x37f   : > { %4479 = vmatmul.mubr.bf16.gmra.mxu0 %v10735_v29  ;;  %4672 = vmatmul.mubr.bf16.gmra.mxu1 %v10735_v29 }
 0x380   : > { %4488 = vmatprep.mubr.bf16.mxu0 %v10738_v37  ;;  %4681 = vmatprep.mubr.bf16.mxu1 %v10738_v37 }
 0x387   : > { %4489 = vmatmul.mubr.bf16.gmra.mxu0 %v10745_v54  ;;  %4682 = vmatmul.mubr.bf16.gmra.mxu1 %v10745_v54 }
 0x388   : > { %4498 = vmatprep.mubr.bf16.mxu0 %v10748_v34  ;;  %4691 = vmatprep.mubr.bf16.mxu1 %v10748_v34 }
 0x38f   : > { %4499 = vmatmul.mubr.bf16.gmra.mxu0 %v10755_v1  ;;  %4692 = vmatmul.mubr.bf16.gmra.mxu1 %v10755_v1 }
 0x390   : > { %4508 = vmatprep.mubr.bf16.mxu0 %v10758_v17  ;;  %4701 = vmatprep.mubr.bf16.mxu1 %v10758_v17 }
 0x397   : > { %4509 = vmatmul.mubr.bf16.gmra.mxu0 %v10765_v57  ;;  %4702 = vmatmul.mubr.bf16.gmra.mxu1 %v10765_v57 }
 0x398   : > { %4744 = vmatprep.mubr.bf16.mxu0 %v10610_v3  ;;  %4937 = vmatprep.mubr.bf16.mxu1 %v10610_v3 }
 0x39f   : > { %4745 = vmatmul.mubr.bf16.vlgmr.msra.gmra.mxu0 %v10615_v15  ;;  %4938 = vmatmul.mubr.bf16.vlgmr.msra.gmra.mxu1 %v10615_v15 }
 0x3a0   : > { %4754 = vmatprep.mubr.bf16.mxu0 %v10618_v27  ;;  %4945 = vmatprep.mubr.bf16.mxu1 %v10618_v27 }
 0x3a7   : > { %4755 = vmatmul.mubr.bf16.gmra.mxu0 %v10625_v52  ;;  %4946 = vmatmul.mubr.bf16.gmra.mxu1 %v10625_v52 }
 0x3a8   : > { %4764 = vmatprep.mubr.bf16.mxu0 %v10628_v28  ;;  %4953 = vmatprep.mubr.bf16.mxu1 %v10628_v28 }
 0x3af   : > { %4765 = vmatmul.mubr.bf16.gmra.mxu0 %v10635_v33  ;;  %4954 = vmatmul.mubr.bf16.gmra.mxu1 %v10635_v33 }
 0x3b0   : > { %4774 = vmatprep.mubr.bf16.mxu0 %v10638_v60  ;;  %4961 = vmatprep.mubr.bf16.mxu1 %v10638_v60 }
 0x3b7   : > { %4775 = vmatmul.mubr.bf16.gmra.mxu0 %v10645_v24  ;;  %4962 = vmatmul.mubr.bf16.gmra.mxu1 %v10645_v24 }
 0x3b8   : > { %4784 = vmatprep.mubr.bf16.mxu0 %v10648_v2  ;;  %4969 = vmatprep.mubr.bf16.mxu1 %v10648_v2 }
 0x3bf   : > { %4785 = vmatmul.mubr.bf16.gmra.mxu0 %v10655_v43  ;;  %4970 = vmatmul.mubr.bf16.gmra.mxu1 %v10655_v43 }
 0x3c0   : > { %4794 = vmatprep.mubr.bf16.mxu0 %v10658_v47  ;;  %4977 = vmatprep.mubr.bf16.mxu1 %v10658_v47 }
 0x3c7   : > { %4795 = vmatmul.mubr.bf16.gmra.mxu0 %v10665_v62  ;;  %4978 = vmatmul.mubr.bf16.gmra.mxu1 %v10665_v62 }
 0x3c8   : > { %4804 = vmatprep.mubr.bf16.mxu0 %v10668_v51  ;;  %4985 = vmatprep.mubr.bf16.mxu1 %v10668_v51 }
 0x3cf   : > { %4805 = vmatmul.mubr.bf16.gmra.mxu0 %v10675_v6  ;;  %4986 = vmatmul.mubr.bf16.gmra.mxu1 %v10675_v6 }
 0x3d0   : > { %4814 = vmatprep.mubr.bf16.mxu0 %v10678_v26  ;;  %4993 = vmatprep.mubr.bf16.mxu1 %v10678_v26 }
 0x3d7   : > { %4815 = vmatmul.mubr.bf16.gmra.mxu0 %v10685_v10  ;;  %4994 = vmatmul.mubr.bf16.gmra.mxu1 %v10685_v10 }
 0x3d8   : > { %4824 = vmatprep.mubr.bf16.mxu0 %v10688_v45  ;;  %5001 = vmatprep.mubr.bf16.mxu1 %v10688_v45 }
 0x3df   : > { %v4360_v3 = vpop.f32.mrf.mxu0  ;;  %v4553_v15 = vpop.f32.mrf.mxu1  ;;  %4825 = vmatmul.mubr.bf16.gmra.mxu0 %v10695_v35  ;;  %5002 = vmatmul.mubr.bf16.gmra.mxu1 %v10695_v35 }
 0x3e0   : > { %5066 = vst [vmem:[%s6612_s7] sm:$0xff] %v4360_v3  ;;  %5068 = vst [vmem:[%s6612_s7 + $0x10] sm:$0xff] %v4553_v15  ;;  %4834 = vmatprep.mubr.bf16.mxu0 %v10698_v18  ;;  %5009 = vmatprep.mubr.bf16.mxu1 %v10698_v18 }
 0x3e1   : > { %v4362_v27 = vpop.f32.mrf.mxu0  ;;  %v4555_v52 = vpop.f32.mrf.mxu1 }
 0x3e2   : > { %5067 = vst [vmem:[%s6612_s7 + $0x8] sm:$0xff] %v4362_v27  ;;  %5069 = vst [vmem:[%s6612_s7 + $0x18] sm:$0xff] %v4555_v52 }
 0x3e3   : > { %v4364_v28 = vpop.f32.mrf.mxu0  ;;  %v4557_v33 = vpop.f32.mrf.mxu1 }
 0x3e4   : > { %5074 = vst [vmem:[%s6612_s7 + $0x38] sm:$0xff] %v4364_v28  ;;  %5076 = vst [vmem:[%s6612_s7 + $0x48] sm:$0xff] %v4557_v33 }
 0x3e5   : > { %v4366_v12 = vpop.f32.mrf.mxu0  ;;  %v4559_v22 = vpop.f32.mrf.mxu1 }
 0x3e6   : > { %5075 = vst [vmem:[%s6612_s7 + $0x40] sm:$0xff] %v4366_v12  ;;  %5077 = vst [vmem:[%s6612_s7 + $0x50] sm:$0xff] %v4559_v22 }
 0x3e7   : > { %v4370_v60 = vpop.f32.mrf.mxu0  ;;  %v4563_v49 = vpop.f32.mrf.mxu1  ;;  %4835 = vmatmul.mubr.bf16.gmra.mxu0 %v10705_v59  ;;  %5010 = vmatmul.mubr.bf16.gmra.mxu1 %v10705_v59 }
 0x3e8   : > { %5081 = vst [vmem:[%s6612_s7 + $0x70] sm:$0xff] %v4370_v60  ;;  %5083 = vst [vmem:[%s6612_s7 + $0x80] sm:$0xff] %v4563_v49  ;;  %4844 = vmatprep.mubr.bf16.mxu0 %v10708_v55  ;;  %5017 = vmatprep.mubr.bf16.mxu1 %v10708_v55 }
 0x3e9   : > { %v4372_v42 = vpop.f32.mrf.mxu0  ;;  %v4565_v41 = vpop.f32.mrf.mxu1 }
 0x3ea   : > { %5082 = vst [vmem:[%s6612_s7 + $0x78] sm:$0xff] %v4372_v42  ;;  %5084 = vst [vmem:[%s6612_s7 + $0x88] sm:$0xff] %v4565_v41 }
 0x3eb   : > { %v4374_v44 = vpop.f32.mrf.mxu0  ;;  %v4567_v36 = vpop.f32.mrf.mxu1 }
 0x3ec   : > { %5088 = vst [vmem:[%s6612_s7 + $0xa8] sm:$0xff] %v4374_v44  ;;  %5090 = vst [vmem:[%s6612_s7 + $0xb8] sm:$0xff] %v4567_v36 }
 0x3ed   : > { %v4376_v21 = vpop.f32.mrf.mxu0  ;;  %v4569_v24 = vpop.f32.mrf.mxu1 }
 0x3ee   : > { %5089 = vst [vmem:[%s6612_s7 + $0xb0] sm:$0xff] %v4376_v21  ;;  %5091 = vst [vmem:[%s6612_s7 + $0xc0] sm:$0xff] %v4569_v24 }
 0x3ef   : > { %v4380_v19 = vpop.f32.mrf.mxu0  ;;  %v4573_v2 = vpop.f32.mrf.mxu1  ;;  %4845 = vmatmul.mubr.bf16.gmra.mxu0 %v10715_v58  ;;  %5018 = vmatmul.mubr.bf16.gmra.mxu1 %v10715_v58 }
 0x3f0   : > { %5095 = vst [vmem:[%s6612_s7 + $0xe0] sm:$0xff] %v4380_v19  ;;  %5097 = vst [vmem:[%s6612_s7 + $0xf0] sm:$0xff] %v4573_v2  ;;  %4854 = vmatprep.mubr.bf16.mxu0 %v10718_v20  ;;  %5025 = vmatprep.mubr.bf16.mxu1 %v10718_v20 }
 0x3f1   : > { %v4382_v40 = vpop.f32.mrf.mxu0  ;;  %v4575_v13 = vpop.f32.mrf.mxu1 }
 0x3f2   : > { %5096 = vst [vmem:[%s6612_s7 + $0xe8] sm:$0xff] %v4382_v40  ;;  %5098 = vst [vmem:[%s6612_s7 + $0xf8] sm:$0xff] %v4575_v13 }
 0x3f3   : > { %v4384_v25 = vpop.f32.mrf.mxu0  ;;  %v4577_v23 = vpop.f32.mrf.mxu1 }
 0x3f4   : > { %5102 = vst [vmem:[%s6612_s7 + $0x118] sm:$0xff] %v4384_v25  ;;  %5104 = vst [vmem:[%s6612_s7 + $0x128] sm:$0xff] %v4577_v23 }
 0x3f5   : > { %v4386_v43 = vpop.f32.mrf.mxu0  ;;  %v4579_v50 = vpop.f32.mrf.mxu1 }
 0x3f6   : > { %5103 = vst [vmem:[%s6612_s7 + $0x120] sm:$0xff] %v4386_v43  ;;  %5105 = vst [vmem:[%s6612_s7 + $0x130] sm:$0xff] %v4579_v50 }
 0x3f7   : > { %v4390_v47 = vpop.f32.mrf.mxu0  ;;  %v4583_v8 = vpop.f32.mrf.mxu1  ;;  %4855 = vmatmul.mubr.bf16.gmra.mxu0 %v10725_v32  ;;  %5026 = vmatmul.mubr.bf16.gmra.mxu1 %v10725_v32 }
 0x3f8   : > { %5109 = vst [vmem:[%s6612_s7 + $0x150] sm:$0xff] %v4390_v47  ;;  %5111 = vst [vmem:[%s6612_s7 + $0x160] sm:$0xff] %v4583_v8  ;;  %4864 = vmatprep.mubr.bf16.mxu0 %v10728_v61  ;;  %5033 = vmatprep.mubr.bf16.mxu1 %v10728_v61 }
 0x3f9   : > { %v4392_v7 = vpop.f32.mrf.mxu0  ;;  %v4585_v14 = vpop.f32.mrf.mxu1 }
 0x3fa   : > { %5110 = vst [vmem:[%s6612_s7 + $0x158] sm:$0xff] %v4392_v7  ;;  %5112 = vst [vmem:[%s6612_s7 + $0x168] sm:$0xff] %v4585_v14 }
 0x3fb   : > { %v4394_v56 = vpop.f32.mrf.mxu0  ;;  %v4587_v4 = vpop.f32.mrf.mxu1 }
 0x3fc   : > { %5116 = vst [vmem:[%s6612_s7 + $0x188] sm:$0xff] %v4394_v56  ;;  %5118 = vst [vmem:[%s6612_s7 + $0x198] sm:$0xff] %v4587_v4 }
 0x3fd   : > { %v4396_v39 = vpop.f32.mrf.mxu0  ;;  %v4589_v53 = vpop.f32.mrf.mxu1 }
 0x3fe   : > { %5117 = vst [vmem:[%s6612_s7 + $0x190] sm:$0xff] %v4396_v39  ;;  %5119 = vst [vmem:[%s6612_s7 + $0x1a0] sm:$0xff] %v4589_v53 }
 0x3ff   : > { %v4400_v62 = vpop.f32.mrf.mxu0  ;;  %v4593_v51 = vpop.f32.mrf.mxu1  ;;  %4865 = vmatmul.mubr.bf16.gmra.mxu0 %v10735_v29  ;;  %5034 = vmatmul.mubr.bf16.gmra.mxu1 %v10735_v29 }
 0x400   : > { %5123 = vst [vmem:[%s6612_s7 + $0x1c0] sm:$0xff] %v4400_v62  ;;  %5125 = vst [vmem:[%s6612_s7 + $0x1d0] sm:$0xff] %v4593_v51  ;;  %4874 = vmatprep.mubr.bf16.mxu0 %v10738_v37  ;;  %5041 = vmatprep.mubr.bf16.mxu1 %v10738_v37 }
 0x401   : > { %v4402_v63 = vpop.f32.mrf.mxu0  ;;  %v4595_v31 = vpop.f32.mrf.mxu1 }
 0x402   : > { %5124 = vst [vmem:[%s6612_s7 + $0x1c8] sm:$0xff] %v4402_v63  ;;  %5126 = vst [vmem:[%s6612_s7 + $0x1d8] sm:$0xff] %v4595_v31 }
 0x403   : > { %v4404_v9 = vpop.f32.mrf.mxu0  ;;  %v4597_v0 = vpop.f32.mrf.mxu1 }
 0x404   : > { %5130 = vst [vmem:[%s6612_s7 + $0x1f8] sm:$0xff] %v4404_v9  ;;  %5132 = vst [vmem:[%s6612_s7 + $0x208] sm:$0xff] %v4597_v0 }
 0x405   : > { %v4406_v6 = vpop.f32.mrf.mxu0  ;;  %v4599_v26 = vpop.f32.mrf.mxu1 }
 0x406   : > { %5131 = vst [vmem:[%s6612_s7 + $0x200] sm:$0xff] %v4406_v6  ;;  %5133 = vst [vmem:[%s6612_s7 + $0x210] sm:$0xff] %v4599_v26 }
 0x407   : > { %v4410_v48 = vpop.f32.mrf.mxu0  ;;  %v4603_v11 = vpop.f32.mrf.mxu1  ;;  %4875 = vmatmul.mubr.bf16.gmra.mxu0 %v10745_v54  ;;  %5042 = vmatmul.mubr.bf16.gmra.mxu1 %v10745_v54 }
 0x408   : > { %5137 = vst [vmem:[%s6612_s7 + $0x230] sm:$0xff] %v4410_v48  ;;  %5139 = vst [vmem:[%s6612_s7 + $0x240] sm:$0xff] %v4603_v11  ;;  %4884 = vmatprep.mubr.bf16.mxu0 %v10748_v34  ;;  %5049 = vmatprep.mubr.bf16.mxu1 %v10748_v34 }
 0x409   : > { %v4412_v38 = vpop.f32.mrf.mxu0  ;;  %v4605_v46 = vpop.f32.mrf.mxu1 }
 0x40a   : > { %5138 = vst [vmem:[%s6612_s7 + $0x238] sm:$0xff] %v4412_v38  ;;  %5140 = vst [vmem:[%s6612_s7 + $0x248] sm:$0xff] %v4605_v46 }
 0x40b   : > { %v4414_v10 = vpop.f32.mrf.mxu0  ;;  %v4607_v45 = vpop.f32.mrf.mxu1 }
 0x40c   : > { %5144 = vst [vmem:[%s6612_s7 + $0x268] sm:$0xff] %v4414_v10  ;;  %5146 = vst [vmem:[%s6612_s7 + $0x278] sm:$0xff] %v4607_v45 }
 0x40d   : > { %v4416_v5 = vpop.f32.mrf.mxu0  ;;  %v4609_v16 = vpop.f32.mrf.mxu1 }
 0x40e   : > { %5145 = vst [vmem:[%s6612_s7 + $0x270] sm:$0xff] %v4416_v5  ;;  %5147 = vst [vmem:[%s6612_s7 + $0x280] sm:$0xff] %v4609_v16 }
 0x40f   : > { %v4420_v30 = vpop.f32.mrf.mxu0  ;;  %v4613_v35 = vpop.f32.mrf.mxu1  ;;  %4885 = vmatmul.mubr.bf16.gmra.mxu0 %v10755_v1  ;;  %5050 = vmatmul.mubr.bf16.gmra.mxu1 %v10755_v1 }
 0x410   : > { %5151 = vst [vmem:[%s6612_s7 + $0x2a0] sm:$0xff] %v4420_v30  ;;  %5153 = vst [vmem:[%s6612_s7 + $0x2b0] sm:$0xff] %v4613_v35  ;;  %4894 = vmatprep.mubr.bf16.mxu0 %v10758_v17  ;;  %5057 = vmatprep.mubr.bf16.mxu1 %v10758_v17 }
 0x411   : > { %v4422_v18 = vpop.f32.mrf.mxu0  ;;  %v4615_v59 = vpop.f32.mrf.mxu1 }
 0x412   : > { %5152 = vst [vmem:[%s6612_s7 + $0x2a8] sm:$0xff] %v4422_v18  ;;  %5154 = vst [vmem:[%s6612_s7 + $0x2b8] sm:$0xff] %v4615_v59 }
 0x413   : > { %v4424_v55 = vpop.f32.mrf.mxu0  ;;  %v4617_v58 = vpop.f32.mrf.mxu1 }
 0x414   : > { %5158 = vst [vmem:[%s6612_s7 + $0x2d8] sm:$0xff] %v4424_v55  ;;  %5160 = vst [vmem:[%s6612_s7 + $0x2e8] sm:$0xff] %v4617_v58 }
 0x415   : > { %v4426_v20 = vpop.f32.mrf.mxu0  ;;  %v4619_v32 = vpop.f32.mrf.mxu1 }
 0x416   : > { %5159 = vst [vmem:[%s6612_s7 + $0x2e0] sm:$0xff] %v4426_v20  ;;  %5161 = vst [vmem:[%s6612_s7 + $0x2f0] sm:$0xff] %v4619_v32 }
 0x417   : > { %v4430_v61 = vpop.f32.mrf.mxu0  ;;  %v4623_v29 = vpop.f32.mrf.mxu1  ;;  %4895 = vmatmul.mubr.bf16.gmra.mxu0 %v10765_v57  ;;  %5058 = vmatmul.mubr.bf16.gmra.mxu1 %v10765_v57 }
 0x418   : > { %5165 = vst [vmem:[%s6612_s7 + $0x310] sm:$0xff] %v4430_v61  ;;  %5167 = vst [vmem:[%s6612_s7 + $0x320] sm:$0xff] %v4623_v29 }
 0x419   : > { %v4432_v37 = vpop.f32.mrf.mxu0  ;;  %v4625_v54 = vpop.f32.mrf.mxu1 }
 0x41a   : > { %5166 = vst [vmem:[%s6612_s7 + $0x318] sm:$0xff] %v4432_v37  ;;  %5168 = vst [vmem:[%s6612_s7 + $0x328] sm:$0xff] %v4625_v54 }
 0x41b   : > { %v4434_v34 = vpop.f32.mrf.mxu0  ;;  %v4627_v1 = vpop.f32.mrf.mxu1 }
 0x41c   : > { %5172 = vst [vmem:[%s6612_s7 + $0x348] sm:$0xff] %v4434_v34  ;;  %5174 = vst [vmem:[%s6612_s7 + $0x358] sm:$0xff] %v4627_v1 }
 0x41d   : > { %v4436_v17 = vpop.f32.mrf.mxu0  ;;  %v4629_v3 = vpop.f32.mrf.mxu1 }
 0x41e   : > { %5173 = vst [vmem:[%s6612_s7 + $0x350] sm:$0xff] %v4436_v17  ;;  %5175 = vst [vmem:[%s6612_s7 + $0x360] sm:$0xff] %v4629_v3 }
 0x41f   : > { %v4440_v57 = vpop.f32.mrf.mxu0  ;;  %v4633_v15 = vpop.f32.mrf.mxu1 }
 0x420   : > { %5179 = vst [vmem:[%s6612_s7 + $0x380] sm:$0xff] %v4440_v57  ;;  %5181 = vst [vmem:[%s6612_s7 + $0x390] sm:$0xff] %v4633_v15 }
 0x421   : > { %v4442_v27 = vpop.f32.mrf.mxu0  ;;  %v4635_v52 = vpop.f32.mrf.mxu1 }
 0x422   : > { %5180 = vst [vmem:[%s6612_s7 + $0x388] sm:$0xff] %v4442_v27  ;;  %5182 = vst [vmem:[%s6612_s7 + $0x398] sm:$0xff] %v4635_v52 }
 0x423   : > { %v4444_v28 = vpop.f32.mrf.mxu0  ;;  %v4637_v33 = vpop.f32.mrf.mxu1 }
 0x424   : > { %5186 = vst [vmem:[%s6612_s7 + $0x3b8] sm:$0xff] %v4444_v28  ;;  %5188 = vst [vmem:[%s6612_s7 + $0x3c8] sm:$0xff] %v4637_v33 }
 0x425   : > { %v4446_v12 = vpop.f32.mrf.mxu0  ;;  %v4639_v22 = vpop.f32.mrf.mxu1 }
 0x426   : > { %5187 = vst [vmem:[%s6612_s7 + $0x3c0] sm:$0xff] %v4446_v12  ;;  %5189 = vst [vmem:[%s6612_s7 + $0x3d0] sm:$0xff] %v4639_v22 }
 0x427   : > { %v4450_v60 = vpop.f32.mrf.mxu0  ;;  %v4643_v49 = vpop.f32.mrf.mxu1 }
 0x428   : > { %5193 = vst [vmem:[%s6612_s7 + $0x3f0] sm:$0xff] %v4450_v60  ;;  %5195 = vst [vmem:[%s6612_s7 + $0x400] sm:$0xff] %v4643_v49 }
 0x429   : > { %v4452_v42 = vpop.f32.mrf.mxu0  ;;  %v4645_v41 = vpop.f32.mrf.mxu1 }
 0x42a   : > { %5194 = vst [vmem:[%s6612_s7 + $0x3f8] sm:$0xff] %v4452_v42  ;;  %5196 = vst [vmem:[%s6612_s7 + $0x408] sm:$0xff] %v4645_v41 }
 0x42b   : > { %v4454_v44 = vpop.f32.mrf.mxu0  ;;  %v4647_v36 = vpop.f32.mrf.mxu1 }
 0x42c   : > { %5200 = vst [vmem:[%s6612_s7 + $0x428] sm:$0xff] %v4454_v44  ;;  %5202 = vst [vmem:[%s6612_s7 + $0x438] sm:$0xff] %v4647_v36 }
 0x42d   : > { %v4456_v21 = vpop.f32.mrf.mxu0  ;;  %v4649_v24 = vpop.f32.mrf.mxu1 }
 0x42e   : > { %5201 = vst [vmem:[%s6612_s7 + $0x430] sm:$0xff] %v4456_v21  ;;  %5203 = vst [vmem:[%s6612_s7 + $0x440] sm:$0xff] %v4649_v24 }
 0x42f   : > { %v4460_v19 = vpop.f32.mrf.mxu0  ;;  %v4653_v2 = vpop.f32.mrf.mxu1 }
 0x430   : > { %5207 = vst [vmem:[%s6612_s7 + $0x460] sm:$0xff] %v4460_v19  ;;  %5209 = vst [vmem:[%s6612_s7 + $0x470] sm:$0xff] %v4653_v2 }
 0x431   : > { %v4462_v40 = vpop.f32.mrf.mxu0  ;;  %v4655_v13 = vpop.f32.mrf.mxu1 }
 0x432   : > { %5208 = vst [vmem:[%s6612_s7 + $0x468] sm:$0xff] %v4462_v40  ;;  %5210 = vst [vmem:[%s6612_s7 + $0x478] sm:$0xff] %v4655_v13 }
 0x433   : > { %v4464_v25 = vpop.f32.mrf.mxu0  ;;  %v4657_v23 = vpop.f32.mrf.mxu1 }
 0x434   : > { %5214 = vst [vmem:[%s6612_s7 + $0x498] sm:$0xff] %v4464_v25  ;;  %5216 = vst [vmem:[%s6612_s7 + $0x4a8] sm:$0xff] %v4657_v23 }
 0x435   : > { %v4466_v43 = vpop.f32.mrf.mxu0  ;;  %v4659_v50 = vpop.f32.mrf.mxu1 }
 0x436   : > { %5215 = vst [vmem:[%s6612_s7 + $0x4a0] sm:$0xff] %v4466_v43  ;;  %5217 = vst [vmem:[%s6612_s7 + $0x4b0] sm:$0xff] %v4659_v50 }
 0x437   : > { %v4470_v47 = vpop.f32.mrf.mxu0  ;;  %v4663_v8 = vpop.f32.mrf.mxu1 }
 0x438   : > { %5221 = vst [vmem:[%s6612_s7 + $0x4d0] sm:$0xff] %v4470_v47  ;;  %5223 = vst [vmem:[%s6612_s7 + $0x4e0] sm:$0xff] %v4663_v8 }
 0x439   : > { %v4472_v7 = vpop.f32.mrf.mxu0  ;;  %v4665_v14 = vpop.f32.mrf.mxu1 }
 0x43a   : > { %5222 = vst [vmem:[%s6612_s7 + $0x4d8] sm:$0xff] %v4472_v7  ;;  %5224 = vst [vmem:[%s6612_s7 + $0x4e8] sm:$0xff] %v4665_v14 }
 0x43b   : > { %v4474_v56 = vpop.f32.mrf.mxu0  ;;  %v4667_v4 = vpop.f32.mrf.mxu1 }
 0x43c   : > { %5228 = vst [vmem:[%s6612_s7 + $0x508] sm:$0xff] %v4474_v56  ;;  %5230 = vst [vmem:[%s6612_s7 + $0x518] sm:$0xff] %v4667_v4 }
 0x43d   : > { %v4476_v39 = vpop.f32.mrf.mxu0  ;;  %v4669_v53 = vpop.f32.mrf.mxu1 }
 0x43e   : > { %5229 = vst [vmem:[%s6612_s7 + $0x510] sm:$0xff] %v4476_v39  ;;  %5231 = vst [vmem:[%s6612_s7 + $0x520] sm:$0xff] %v4669_v53 }
 0x43f   : > { %v4480_v62 = vpop.f32.mrf.mxu0  ;;  %v4673_v51 = vpop.f32.mrf.mxu1 }
 0x440   : > { %5235 = vst [vmem:[%s6612_s7 + $0x540] sm:$0xff] %v4480_v62  ;;  %5237 = vst [vmem:[%s6612_s7 + $0x550] sm:$0xff] %v4673_v51 }
 0x441   : > { %v4482_v63 = vpop.f32.mrf.mxu0  ;;  %v4675_v31 = vpop.f32.mrf.mxu1 }
 0x442   : > { %5236 = vst [vmem:[%s6612_s7 + $0x548] sm:$0xff] %v4482_v63  ;;  %5238 = vst [vmem:[%s6612_s7 + $0x558] sm:$0xff] %v4675_v31 }
 0x443   : > { %v4484_v9 = vpop.f32.mrf.mxu0  ;;  %v4677_v0 = vpop.f32.mrf.mxu1 }
 0x444   : > { %5242 = vst [vmem:[%s6612_s7 + $0x578] sm:$0xff] %v4484_v9  ;;  %5244 = vst [vmem:[%s6612_s7 + $0x588] sm:$0xff] %v4677_v0 }
 0x445   : > { %v4486_v6 = vpop.f32.mrf.mxu0  ;;  %v4679_v26 = vpop.f32.mrf.mxu1 }
 0x446   : > { %5243 = vst [vmem:[%s6612_s7 + $0x580] sm:$0xff] %v4486_v6  ;;  %5245 = vst [vmem:[%s6612_s7 + $0x590] sm:$0xff] %v4679_v26 }
 0x447   : > { %v4490_v48 = vpop.f32.mrf.mxu0  ;;  %v4683_v11 = vpop.f32.mrf.mxu1 }
 0x448   : > { %5249 = vst [vmem:[%s6612_s7 + $0x5b0] sm:$0xff] %v4490_v48  ;;  %5251 = vst [vmem:[%s6612_s7 + $0x5c0] sm:$0xff] %v4683_v11 }
 0x449   : > { %v4492_v38 = vpop.f32.mrf.mxu0  ;;  %v4685_v46 = vpop.f32.mrf.mxu1 }
 0x44a   : > { %5250 = vst [vmem:[%s6612_s7 + $0x5b8] sm:$0xff] %v4492_v38  ;;  %5252 = vst [vmem:[%s6612_s7 + $0x5c8] sm:$0xff] %v4685_v46 }
 0x44b   : > { %v4494_v10 = vpop.f32.mrf.mxu0  ;;  %v4687_v45 = vpop.f32.mrf.mxu1 }
 0x44c   : > { %5256 = vst [vmem:[%s6612_s7 + $0x5e8] sm:$0xff] %v4494_v10  ;;  %5258 = vst [vmem:[%s6612_s7 + $0x5f8] sm:$0xff] %v4687_v45 }
 0x44d   : > { %v4496_v5 = vpop.f32.mrf.mxu0  ;;  %v4689_v16 = vpop.f32.mrf.mxu1 }
 0x44e   : > { %5257 = vst [vmem:[%s6612_s7 + $0x5f0] sm:$0xff] %v4496_v5  ;;  %5259 = vst [vmem:[%s6612_s7 + $0x600] sm:$0xff] %v4689_v16 }
 0x44f   : > { %v4500_v30 = vpop.f32.mrf.mxu0  ;;  %v4693_v35 = vpop.f32.mrf.mxu1 }
 0x450   : > { %5263 = vst [vmem:[%s6612_s7 + $0x620] sm:$0xff] %v4500_v30  ;;  %5265 = vst [vmem:[%s6612_s7 + $0x630] sm:$0xff] %v4693_v35 }
 0x451   : > { %v4502_v18 = vpop.f32.mrf.mxu0  ;;  %v4695_v59 = vpop.f32.mrf.mxu1 }
 0x452   : > { %5264 = vst [vmem:[%s6612_s7 + $0x628] sm:$0xff] %v4502_v18  ;;  %5266 = vst [vmem:[%s6612_s7 + $0x638] sm:$0xff] %v4695_v59 }
 0x453   : > { %v4504_v55 = vpop.f32.mrf.mxu0  ;;  %v4697_v58 = vpop.f32.mrf.mxu1 }
 0x454   : > { %5270 = vst [vmem:[%s6612_s7 + $0x658] sm:$0xff] %v4504_v55  ;;  %5272 = vst [vmem:[%s6612_s7 + $0x668] sm:$0xff] %v4697_v58 }
 0x455   : > { %v4506_v20 = vpop.f32.mrf.mxu0  ;;  %v4699_v32 = vpop.f32.mrf.mxu1 }
 0x456   : > { %5271 = vst [vmem:[%s6612_s7 + $0x660] sm:$0xff] %v4506_v20  ;;  %5273 = vst [vmem:[%s6612_s7 + $0x670] sm:$0xff] %v4699_v32 }
 0x457   : > { %v4510_v61 = vpop.f32.mrf.mxu0  ;;  %v4703_v29 = vpop.f32.mrf.mxu1 }
 0x458   : > { %5277 = vst [vmem:[%s6612_s7 + $0x690] sm:$0xff] %v4510_v61  ;;  %5279 = vst [vmem:[%s6612_s7 + $0x6a0] sm:$0xff] %v4703_v29 }
 0x459   : > { %v4512_v37 = vpop.f32.mrf.mxu0  ;;  %v4705_v54 = vpop.f32.mrf.mxu1 }
 0x45a   : > { %5278 = vst [vmem:[%s6612_s7 + $0x698] sm:$0xff] %v4512_v37  ;;  %5280 = vst [vmem:[%s6612_s7 + $0x6a8] sm:$0xff] %v4705_v54 }
 0x45b   : > { %v4514_v34 = vpop.f32.mrf.mxu0  ;;  %v4707_v1 = vpop.f32.mrf.mxu1 }
 0x45c   : > { %5284 = vst [vmem:[%s6612_s7 + $0x6c8] sm:$0xff] %v4514_v34  ;;  %5286 = vst [vmem:[%s6612_s7 + $0x6d8] sm:$0xff] %v4707_v1 }
 0x45d   : > { %v4516_v17 = vpop.f32.mrf.mxu0  ;;  %v4709_v3 = vpop.f32.mrf.mxu1 }
 0x45e   : > { %5285 = vst [vmem:[%s6612_s7 + $0x6d0] sm:$0xff] %v4516_v17  ;;  %5287 = vst [vmem:[%s6612_s7 + $0x6e0] sm:$0xff] %v4709_v3 }
 0x45f   : > { %v4746_v57 = vpop.f32.mrf.mxu0  ;;  %v5793_v15 = vpop.f32.mrf.mxu1 }
 0x460   : > { %5070 = vst [vmem:[%s6612_s7 + $0x20] sm:$0xff] %v4746_v57 }
 0x461   : > { %v4748_v27 = vpop.f32.mrf.mxu0  ;;  %v5794_v52 = vpop.f32.mrf.mxu1 }
 0x462   : > { %5071 = vst [vmem:[%s6612_s7 + $0x28] sm:$0xff] %v4748_v27  ;;  %v5795_v28 = vadd.f32 %v5794_v52, %v5793_v15 }
 0x463   : > { %v4750_v33 = vpop.f32.mrf.mxu0  ;;  %v5796_v12 = vpop.f32.mrf.mxu1 }
 0x464   : > { %5073 = vst.msk [vmem:[%s6612_s7 + $0x30] sm:$0xff] %vm5072_vm2, %v5795_v28  ;;  %5078 = vst [vmem:[%s6612_s7 + $0x58] sm:$0xff] %v4750_v33 }
 0x465   : > { %v4752_v22 = vpop.f32.mrf.mxu0  ;;  %v5797_v60 = vpop.f32.mrf.mxu1 }
 0x466   : > { %5079 = vst [vmem:[%s6612_s7 + $0x60] sm:$0xff] %v4752_v22  ;;  %v5798_v49 = vadd.f32 %v5797_v60, %v5796_v12 }
 0x467   : > { %v4756_v42 = vpop.f32.mrf.mxu0  ;;  %v5799_v41 = vpop.f32.mrf.mxu1 }
 0x468   : > { %5080 = vst.msk [vmem:[%s6612_s7 + $0x68] sm:$0xff] %vm5072_vm2, %v5798_v49  ;;  %5085 = vst [vmem:[%s6612_s7 + $0x90] sm:$0xff] %v4756_v42 }
 0x469   : > { %v4758_v44 = vpop.f32.mrf.mxu0  ;;  %v5800_v36 = vpop.f32.mrf.mxu1 }
 0x46a   : > { %5086 = vst [vmem:[%s6612_s7 + $0x98] sm:$0xff] %v4758_v44  ;;  %v5801_v21 = vadd.f32 %v5800_v36, %v5799_v41 }
 0x46b   : > { %v4760_v24 = vpop.f32.mrf.mxu0  ;;  %v5802_v19 = vpop.f32.mrf.mxu1 }
 0x46c   : > { %5087 = vst.msk [vmem:[%s6612_s7 + $0xa0] sm:$0xff] %vm5072_vm2, %v5801_v21  ;;  %5092 = vst [vmem:[%s6612_s7 + $0xc8] sm:$0xff] %v4760_v24 }
 0x46d   : > { %v4762_v2 = vpop.f32.mrf.mxu0  ;;  %v5803_v40 = vpop.f32.mrf.mxu1 }
 0x46e   : > { %5093 = vst [vmem:[%s6612_s7 + $0xd0] sm:$0xff] %v4762_v2  ;;  %v5804_v13 = vadd.f32 %v5803_v40, %v5802_v19 }
 0x46f   : > { %v4766_v25 = vpop.f32.mrf.mxu0  ;;  %v5805_v23 = vpop.f32.mrf.mxu1 }
 0x470   : > { %5094 = vst.msk [vmem:[%s6612_s7 + $0xd8] sm:$0xff] %vm5072_vm2, %v5804_v13  ;;  %5099 = vst [vmem:[%s6612_s7 + $0x100] sm:$0xff] %v4766_v25 }
 0x471   : > { %v4768_v43 = vpop.f32.mrf.mxu0  ;;  %v5806_v50 = vpop.f32.mrf.mxu1 }
 0x472   : > { %5100 = vst [vmem:[%s6612_s7 + $0x108] sm:$0xff] %v4768_v43  ;;  %v5807_v47 = vadd.f32 %v5806_v50, %v5805_v23 }
 0x473   : > { %v4770_v8 = vpop.f32.mrf.mxu0  ;;  %v5808_v7 = vpop.f32.mrf.mxu1 }
 0x474   : > { %5101 = vst.msk [vmem:[%s6612_s7 + $0x110] sm:$0xff] %vm5072_vm2, %v5807_v47  ;;  %5106 = vst [vmem:[%s6612_s7 + $0x138] sm:$0xff] %v4770_v8 }
 0x475   : > { %v4772_v14 = vpop.f32.mrf.mxu0  ;;  %v5809_v56 = vpop.f32.mrf.mxu1 }
 0x476   : > { %5107 = vst [vmem:[%s6612_s7 + $0x140] sm:$0xff] %v4772_v14  ;;  %v5810_v4 = vadd.f32 %v5809_v56, %v5808_v7 }
 0x477   : > { %v4776_v39 = vpop.f32.mrf.mxu0  ;;  %v5811_v53 = vpop.f32.mrf.mxu1 }
 0x478   : > { %5108 = vst.msk [vmem:[%s6612_s7 + $0x148] sm:$0xff] %vm5072_vm2, %v5810_v4  ;;  %5113 = vst [vmem:[%s6612_s7 + $0x170] sm:$0xff] %v4776_v39 }
 0x479   : > { %v4778_v62 = vpop.f32.mrf.mxu0  ;;  %v5812_v51 = vpop.f32.mrf.mxu1 }
 0x47a   : > { %5114 = vst [vmem:[%s6612_s7 + $0x178] sm:$0xff] %v4778_v62  ;;  %v5813_v63 = vadd.f32 %v5812_v51, %v5811_v53 }
 0x47b   : > { %v4780_v31 = vpop.f32.mrf.mxu0  ;;  %v5814_v9 = vpop.f32.mrf.mxu1 }
 0x47c   : > { %5115 = vst.msk [vmem:[%s6612_s7 + $0x180] sm:$0xff] %vm5072_vm2, %v5813_v63  ;;  %5120 = vst [vmem:[%s6612_s7 + $0x1a8] sm:$0xff] %v4780_v31 }
 0x47d   : > { %v4782_v0 = vpop.f32.mrf.mxu0  ;;  %v5815_v6 = vpop.f32.mrf.mxu1 }
 0x47e   : > { %5121 = vst [vmem:[%s6612_s7 + $0x1b0] sm:$0xff] %v4782_v0  ;;  %v5816_v26 = vadd.f32 %v5815_v6, %v5814_v9 }
 0x47f   : > { %v4786_v48 = vpop.f32.mrf.mxu0  ;;  %v5817_v11 = vpop.f32.mrf.mxu1 }
 0x480   : > { %5122 = vst.msk [vmem:[%s6612_s7 + $0x1b8] sm:$0xff] %vm5072_vm2, %v5816_v26  ;;  %5127 = vst [vmem:[%s6612_s7 + $0x1e0] sm:$0xff] %v4786_v48 }
 0x481   : > { %v4788_v38 = vpop.f32.mrf.mxu0  ;;  %v5818_v46 = vpop.f32.mrf.mxu1 }
 0x482   : > { %5128 = vst [vmem:[%s6612_s7 + $0x1e8] sm:$0xff] %v4788_v38  ;;  %v5819_v10 = vadd.f32 %v5818_v46, %v5817_v11 }
 0x483   : > { %v4790_v45 = vpop.f32.mrf.mxu0  ;;  %v5820_v5 = vpop.f32.mrf.mxu1 }
 0x484   : > { %5129 = vst.msk [vmem:[%s6612_s7 + $0x1f0] sm:$0xff] %vm5072_vm2, %v5819_v10  ;;  %5134 = vst [vmem:[%s6612_s7 + $0x218] sm:$0xff] %v4790_v45 }
 0x485   : > { %v4792_v16 = vpop.f32.mrf.mxu0  ;;  %v5821_v30 = vpop.f32.mrf.mxu1 }
 0x486   : > { %5135 = vst [vmem:[%s6612_s7 + $0x220] sm:$0xff] %v4792_v16  ;;  %v5822_v35 = vadd.f32 %v5821_v30, %v5820_v5 }
 0x487   : > { %v4796_v18 = vpop.f32.mrf.mxu0  ;;  %v5823_v59 = vpop.f32.mrf.mxu1 }
 0x488   : > { %5136 = vst.msk [vmem:[%s6612_s7 + $0x228] sm:$0xff] %vm5072_vm2, %v5822_v35  ;;  %5141 = vst [vmem:[%s6612_s7 + $0x250] sm:$0xff] %v4796_v18 }
 0x489   : > { %v4798_v55 = vpop.f32.mrf.mxu0  ;;  %v5824_v58 = vpop.f32.mrf.mxu1 }
 0x48a   : > { %5142 = vst [vmem:[%s6612_s7 + $0x258] sm:$0xff] %v4798_v55  ;;  %v5825_v20 = vadd.f32 %v5824_v58, %v5823_v59 }
 0x48b   : > { %v4800_v32 = vpop.f32.mrf.mxu0  ;;  %v5826_v61 = vpop.f32.mrf.mxu1 }
 0x48c   : > { %5143 = vst.msk [vmem:[%s6612_s7 + $0x260] sm:$0xff] %vm5072_vm2, %v5825_v20  ;;  %5148 = vst [vmem:[%s6612_s7 + $0x288] sm:$0xff] %v4800_v32 }
 0x48d   : > { %v4802_v29 = vpop.f32.mrf.mxu0  ;;  %v5827_v37 = vpop.f32.mrf.mxu1 }
 0x48e   : > { %5149 = vst [vmem:[%s6612_s7 + $0x290] sm:$0xff] %v4802_v29  ;;  %v5828_v54 = vadd.f32 %v5827_v37, %v5826_v61 }
 0x48f   : > { %v4806_v34 = vpop.f32.mrf.mxu0  ;;  %v5829_v1 = vpop.f32.mrf.mxu1 }
 0x490   : > { %5150 = vst.msk [vmem:[%s6612_s7 + $0x298] sm:$0xff] %vm5072_vm2, %v5828_v54  ;;  %5155 = vst [vmem:[%s6612_s7 + $0x2c0] sm:$0xff] %v4806_v34 }
 0x491   : > { %v4808_v17 = vpop.f32.mrf.mxu0  ;;  %v5830_v3 = vpop.f32.mrf.mxu1 }
 0x492   : > { %5156 = vst [vmem:[%s6612_s7 + $0x2c8] sm:$0xff] %v4808_v17  ;;  %v5831_v57 = vadd.f32 %v5830_v3, %v5829_v1 }
 0x493   : > { %v4810_v15 = vpop.f32.mrf.mxu0  ;;  %v5832_v27 = vpop.f32.mrf.mxu1 }
 0x494   : > { %5157 = vst.msk [vmem:[%s6612_s7 + $0x2d0] sm:$0xff] %vm5072_vm2, %v5831_v57  ;;  %5162 = vst [vmem:[%s6612_s7 + $0x2f8] sm:$0xff] %v4810_v15 }
 0x495   : > { %v4812_v52 = vpop.f32.mrf.mxu0  ;;  %v5833_v28 = vpop.f32.mrf.mxu1 }
 0x496   : > { %5163 = vst [vmem:[%s6612_s7 + $0x300] sm:$0xff] %v4812_v52  ;;  %v5834_v33 = vadd.f32 %v5833_v28, %v5832_v27 }
 0x497   : > { %v4816_v12 = vpop.f32.mrf.mxu0  ;;  %v5835_v22 = vpop.f32.mrf.mxu1 }
 0x498   : > { %5164 = vst.msk [vmem:[%s6612_s7 + $0x308] sm:$0xff] %vm5072_vm2, %v5834_v33  ;;  %5169 = vst [vmem:[%s6612_s7 + $0x330] sm:$0xff] %v4816_v12 }
 0x499   : > { %v4818_v60 = vpop.f32.mrf.mxu0  ;;  %v5836_v49 = vpop.f32.mrf.mxu1 }
 0x49a   : > { %5170 = vst [vmem:[%s6612_s7 + $0x338] sm:$0xff] %v4818_v60  ;;  %v5837_v42 = vadd.f32 %v5836_v49, %v5835_v22 }
 0x49b   : > { %v4820_v41 = vpop.f32.mrf.mxu0  ;;  %v5838_v44 = vpop.f32.mrf.mxu1 }
 0x49c   : > { %5171 = vst.msk [vmem:[%s6612_s7 + $0x340] sm:$0xff] %vm5072_vm2, %v5837_v42  ;;  %5176 = vst [vmem:[%s6612_s7 + $0x368] sm:$0xff] %v4820_v41 }
 0x49d   : > { %v4822_v36 = vpop.f32.mrf.mxu0  ;;  %v5839_v21 = vpop.f32.mrf.mxu1 }
 0x49e   : > { %5177 = vst [vmem:[%s6612_s7 + $0x370] sm:$0xff] %v4822_v36  ;;  %v5840_v24 = vadd.f32 %v5839_v21, %v5838_v44 }
 0x49f   : > { %v4826_v19 = vpop.f32.mrf.mxu0  ;;  %v5841_v2 = vpop.f32.mrf.mxu1 }
 0x4a0   : > { %5178 = vst.msk [vmem:[%s6612_s7 + $0x378] sm:$0xff] %vm5072_vm2, %v5840_v24  ;;  %5183 = vst [vmem:[%s6612_s7 + $0x3a0] sm:$0xff] %v4826_v19 }
 0x4a1   : > { %v4828_v40 = vpop.f32.mrf.mxu0  ;;  %v5842_v13 = vpop.f32.mrf.mxu1 }
 0x4a2   : > { %5184 = vst [vmem:[%s6612_s7 + $0x3a8] sm:$0xff] %v4828_v40  ;;  %v5843_v25 = vadd.f32 %v5842_v13, %v5841_v2 }
 0x4a3   : > { %v4830_v23 = vpop.f32.mrf.mxu0  ;;  %v5844_v43 = vpop.f32.mrf.mxu1 }
 0x4a4   : > { %5185 = vst.msk [vmem:[%s6612_s7 + $0x3b0] sm:$0xff] %vm5072_vm2, %v5843_v25  ;;  %5190 = vst [vmem:[%s6612_s7 + $0x3d8] sm:$0xff] %v4830_v23 }
 0x4a5   : > { %v4832_v50 = vpop.f32.mrf.mxu0  ;;  %v5845_v47 = vpop.f32.mrf.mxu1 }
 0x4a6   : > { %5191 = vst [vmem:[%s6612_s7 + $0x3e0] sm:$0xff] %v4832_v50  ;;  %v5846_v8 = vadd.f32 %v5845_v47, %v5844_v43 }
 0x4a7   : > { %v4836_v7 = vpop.f32.mrf.mxu0  ;;  %v5847_v14 = vpop.f32.mrf.mxu1 }
 0x4a8   : > { %5192 = vst.msk [vmem:[%s6612_s7 + $0x3e8] sm:$0xff] %vm5072_vm2, %v5846_v8  ;;  %5197 = vst [vmem:[%s6612_s7 + $0x410] sm:$0xff] %v4836_v7 }
 0x4a9   : > { %v4838_v56 = vpop.f32.mrf.mxu0  ;;  %v5848_v4 = vpop.f32.mrf.mxu1 }
 0x4aa   : > { %5198 = vst [vmem:[%s6612_s7 + $0x418] sm:$0xff] %v4838_v56  ;;  %v5849_v39 = vadd.f32 %v5848_v4, %v5847_v14 }
 0x4ab   : > { %v4840_v53 = vpop.f32.mrf.mxu0  ;;  %v5850_v62 = vpop.f32.mrf.mxu1 }
 0x4ac   : > { %5199 = vst.msk [vmem:[%s6612_s7 + $0x420] sm:$0xff] %vm5072_vm2, %v5849_v39  ;;  %5204 = vst [vmem:[%s6612_s7 + $0x448] sm:$0xff] %v4840_v53 }
 0x4ad   : > { %v4842_v51 = vpop.f32.mrf.mxu0  ;;  %v5851_v63 = vpop.f32.mrf.mxu1 }
 0x4ae   : > { %5205 = vst [vmem:[%s6612_s7 + $0x450] sm:$0xff] %v4842_v51  ;;  %v5852_v31 = vadd.f32 %v5851_v63, %v5850_v62 }
 0x4af   : > { %v4846_v9 = vpop.f32.mrf.mxu0  ;;  %v5853_v0 = vpop.f32.mrf.mxu1 }
 0x4b0   : > { %5206 = vst.msk [vmem:[%s6612_s7 + $0x458] sm:$0xff] %vm5072_vm2, %v5852_v31  ;;  %5211 = vst [vmem:[%s6612_s7 + $0x480] sm:$0xff] %v4846_v9 }
 0x4b1   : > { %v4848_v6 = vpop.f32.mrf.mxu0  ;;  %v5854_v26 = vpop.f32.mrf.mxu1 }
 0x4b2   : > { %5212 = vst [vmem:[%s6612_s7 + $0x488] sm:$0xff] %v4848_v6  ;;  %v5855_v48 = vadd.f32 %v5854_v26, %v5853_v0 }
 0x4b3   : > { %v4850_v11 = vpop.f32.mrf.mxu0  ;;  %v5856_v38 = vpop.f32.mrf.mxu1 }
 0x4b4   : > { %5213 = vst.msk [vmem:[%s6612_s7 + $0x490] sm:$0xff] %vm5072_vm2, %v5855_v48  ;;  %5218 = vst [vmem:[%s6612_s7 + $0x4b8] sm:$0xff] %v4850_v11 }
 0x4b5   : > { %v4852_v46 = vpop.f32.mrf.mxu0  ;;  %v5857_v10 = vpop.f32.mrf.mxu1 }
 0x4b6   : > { %5219 = vst [vmem:[%s6612_s7 + $0x4c0] sm:$0xff] %v4852_v46  ;;  %v5858_v45 = vadd.f32 %v5857_v10, %v5856_v38 }
 0x4b7   : > { %v4856_v5 = vpop.f32.mrf.mxu0  ;;  %v5859_v16 = vpop.f32.mrf.mxu1 }
 0x4b8   : > { %5220 = vst.msk [vmem:[%s6612_s7 + $0x4c8] sm:$0xff] %vm5072_vm2, %v5858_v45  ;;  %5225 = vst [vmem:[%s6612_s7 + $0x4f0] sm:$0xff] %v4856_v5 }
 0x4b9   : > { %v4858_v30 = vpop.f32.mrf.mxu0  ;;  %v5860_v35 = vpop.f32.mrf.mxu1 }
 0x4ba   : > { %5226 = vst [vmem:[%s6612_s7 + $0x4f8] sm:$0xff] %v4858_v30  ;;  %v5861_v18 = vadd.f32 %v5860_v35, %v5859_v16 }
 0x4bb   : > { %v4860_v59 = vpop.f32.mrf.mxu0  ;;  %v5862_v55 = vpop.f32.mrf.mxu1 }
 0x4bc   : > { %5227 = vst.msk [vmem:[%s6612_s7 + $0x500] sm:$0xff] %vm5072_vm2, %v5861_v18  ;;  %5232 = vst [vmem:[%s6612_s7 + $0x528] sm:$0xff] %v4860_v59 }
 0x4bd   : > { %v4862_v58 = vpop.f32.mrf.mxu0  ;;  %v5863_v20 = vpop.f32.mrf.mxu1 }
 0x4be   : > { %5233 = vst [vmem:[%s6612_s7 + $0x530] sm:$0xff] %v4862_v58  ;;  %v5864_v32 = vadd.f32 %v5863_v20, %v5862_v55 }
 0x4bf   : > { %v4866_v61 = vpop.f32.mrf.mxu0  ;;  %v5865_v29 = vpop.f32.mrf.mxu1 }
 0x4c0   : > { %5234 = vst.msk [vmem:[%s6612_s7 + $0x538] sm:$0xff] %vm5072_vm2, %v5864_v32  ;;  %5239 = vst [vmem:[%s6612_s7 + $0x560] sm:$0xff] %v4866_v61 }
 0x4c1   : > { %v4868_v37 = vpop.f32.mrf.mxu0  ;;  %v5866_v54 = vpop.f32.mrf.mxu1 }
 0x4c2   : > { %5240 = vst [vmem:[%s6612_s7 + $0x568] sm:$0xff] %v4868_v37  ;;  %v5867_v34 = vadd.f32 %v5866_v54, %v5865_v29 }
 0x4c3   : > { %v4870_v1 = vpop.f32.mrf.mxu0  ;;  %v5868_v17 = vpop.f32.mrf.mxu1 }
 0x4c4   : > { %5241 = vst.msk [vmem:[%s6612_s7 + $0x570] sm:$0xff] %vm5072_vm2, %v5867_v34  ;;  %5246 = vst [vmem:[%s6612_s7 + $0x598] sm:$0xff] %v4870_v1 }
 0x4c5   : > { %v4872_v3 = vpop.f32.mrf.mxu0  ;;  %v5869_v57 = vpop.f32.mrf.mxu1 }
 0x4c6   : > { %5247 = vst [vmem:[%s6612_s7 + $0x5a0] sm:$0xff] %v4872_v3  ;;  %v5870_v15 = vadd.f32 %v5869_v57, %v5868_v17 }
 0x4c7   : > { %v4876_v27 = vpop.f32.mrf.mxu0  ;;  %v5871_v52 = vpop.f32.mrf.mxu1 }
 0x4c8   : > { %5248 = vst.msk [vmem:[%s6612_s7 + $0x5a8] sm:$0xff] %vm5072_vm2, %v5870_v15  ;;  %5253 = vst [vmem:[%s6612_s7 + $0x5d0] sm:$0xff] %v4876_v27 }
 0x4c9   : > { %v4878_v28 = vpop.f32.mrf.mxu0  ;;  %v5872_v33 = vpop.f32.mrf.mxu1 }
 0x4ca   : > { %5254 = vst [vmem:[%s6612_s7 + $0x5d8] sm:$0xff] %v4878_v28  ;;  %v5873_v12 = vadd.f32 %v5872_v33, %v5871_v52 }
 0x4cb   : > { %v4880_v22 = vpop.f32.mrf.mxu0  ;;  %v5874_v60 = vpop.f32.mrf.mxu1 }
 0x4cc   : > { %5255 = vst.msk [vmem:[%s6612_s7 + $0x5e0] sm:$0xff] %vm5072_vm2, %v5873_v12  ;;  %5260 = vst [vmem:[%s6612_s7 + $0x608] sm:$0xff] %v4880_v22 }
 0x4cd   : > { %v4882_v49 = vpop.f32.mrf.mxu0  ;;  %v5875_v42 = vpop.f32.mrf.mxu1 }
 0x4ce   : > { %5261 = vst [vmem:[%s6612_s7 + $0x610] sm:$0xff] %v4882_v49  ;;  %v5876_v41 = vadd.f32 %v5875_v42, %v5874_v60 }
 0x4cf   : > { %v4886_v44 = vpop.f32.mrf.mxu0  ;;  %v5877_v36 = vpop.f32.mrf.mxu1 }
 0x4d0   : > { %5262 = vst.msk [vmem:[%s6612_s7 + $0x618] sm:$0xff] %vm5072_vm2, %v5876_v41  ;;  %5267 = vst [vmem:[%s6612_s7 + $0x640] sm:$0xff] %v4886_v44 }
 0x4d1   : > { %v4888_v21 = vpop.f32.mrf.mxu0  ;;  %v5878_v24 = vpop.f32.mrf.mxu1 }
 0x4d2   : > { %5268 = vst [vmem:[%s6612_s7 + $0x648] sm:$0xff] %v4888_v21  ;;  %v5879_v19 = vadd.f32 %v5878_v24, %v5877_v36 }
 0x4d3   : > { %v4890_v2 = vpop.f32.mrf.mxu0  ;;  %v5880_v40 = vpop.f32.mrf.mxu1 }
 0x4d4   : > { %5269 = vst.msk [vmem:[%s6612_s7 + $0x650] sm:$0xff] %vm5072_vm2, %v5879_v19  ;;  %5274 = vst [vmem:[%s6612_s7 + $0x678] sm:$0xff] %v4890_v2 }
 0x4d5   : > { %v4892_v13 = vpop.f32.mrf.mxu0  ;;  %v5881_v25 = vpop.f32.mrf.mxu1 }
 0x4d6   : > { %5275 = vst [vmem:[%s6612_s7 + $0x680] sm:$0xff] %v4892_v13  ;;  %v5882_v23 = vadd.f32 %v5881_v25, %v5880_v40 }
 0x4d7   : > { %v4896_v43 = vpop.f32.mrf.mxu0  ;;  %v5883_v50 = vpop.f32.mrf.mxu1 }
 0x4d8   : > { %5276 = vst.msk [vmem:[%s6612_s7 + $0x688] sm:$0xff] %vm5072_vm2, %v5882_v23  ;;  %5281 = vst [vmem:[%s6612_s7 + $0x6b0] sm:$0xff] %v4896_v43 }
 0x4d9   : > { %v4898_v47 = vpop.f32.mrf.mxu0  ;;  %v5884_v8 = vpop.f32.mrf.mxu1 }
 0x4da   : > { %5282 = vst [vmem:[%s6612_s7 + $0x6b8] sm:$0xff] %v4898_v47  ;;  %v5885_v7 = vadd.f32 %v5884_v8, %v5883_v50 }
 0x4db   : > { %v4900_v14 = vpop.f32.mrf.mxu0  ;;  %v5886_v56 = vpop.f32.mrf.mxu1 }
 0x4dc   : > { %5283 = vst.msk [vmem:[%s6612_s7 + $0x6c0] sm:$0xff] %vm5072_vm2, %v5885_v7  ;;  %5288 = vst [vmem:[%s6612_s7 + $0x6e8] sm:$0xff] %v4900_v14 }
 0x4dd   : > { %v4902_v4 = vpop.f32.mrf.mxu0  ;;  %v5887_v39 = vpop.f32.mrf.mxu1 }
 0x4de   : > { %5289 = vst [vmem:[%s6612_s7 + $0x6f0] sm:$0xff] %v4902_v4  ;;  %v5888_v53 = vadd.f32 %v5887_v39, %v5886_v56 }
 0x4e0   : > { %5290 = vst.msk [vmem:[%s6612_s7 + $0x6f8] sm:$0xff] %vm5072_vm2, %v5888_v53 }
 0x4e1 PF: > { %p14_p1 = scmp.ge.s32.totalorder %s6545_s20, 6   ;;  %s11904_s15 = smov %s6484_s16 }
 0x4e2   : > { %s11905_s16 = smov %s6488_s17  ;;  %s11906_s17 = smov %s6555_s23 }
 0x4e3   : > { %s11907_s18 = smov %s6545_s20  ;;  %16 = sbr.rel (!%p14_p1) target bundleno = 3 (0x3), region = 80 }
 0x4e8   :  { %5315 = vsyncpa [#allocation4], 1 }
 0x4e9   :  { %5317 = vsyncpa [#allocation4 + $0x1], 1 }

</bundles_post_ra>
